<compile_context>
chip_gen: v7x
topology: tpu7x:2x2x1
jax: 0.10.0
libtpu: 0.0.40
codegen_flags: <defaults>
</compile_context>

<pallas_src>
import jax
import jax.numpy as jnp
from jax.experimental import pallas as pl
from jax.experimental.pallas import tpu as pltpu


def _silu(x):
    return x * jax.nn.sigmoid(x)


def _make_kernel(P1, P1_OUT, C2, C2_OUT, MID, H, W, use_eq):
    """Build the fused per-sample kernel, specialized on the static config."""

    def kernel(*refs):
        if use_eq:
            (x1_ref, x2_ref, w1_ref, b1_ref, w2_ref, b2_ref,
             ew1_ref, eb1_ref, ew2_ref, eb2_ref,
             o_ref, x2p_scr, h1p_scr) = refs
        else:
            (x1_ref, x2_ref, w1_ref, b1_ref, w2_ref, b2_ref,
             o_ref, x2p_scr, h1p_scr) = refs

        # Stage part2 zero-padded in VMEM scratch (borders stay 0 == conv pad=1).
        x2p_scr[...] = jnp.zeros_like(x2p_scr)
        for c in range(C2):
            x2p_scr[c, 1:1 + H, 1:1 + W] = x2_ref[c]

        # ---- conv1 (3x3, pad=1, BN1 folded) + SiLU -> padded hidden scratch ----
        h1p_scr[...] = jnp.zeros_like(h1p_scr)
        acc1 = [jnp.zeros((H, W), jnp.float32) for _ in range(MID)]
        for c in range(C2):
            for ky in range(3):
                for kx in range(3):
                    win = x2p_scr[c, ky:ky + H, kx:kx + W]
                    for m in range(MID):
                        wv = w1_ref[((m * C2 + c) * 3 + ky) * 3 + kx]
                        acc1[m] = acc1[m] + wv * win
        for m in range(MID):
            h1p_scr[m, 1:1 + H, 1:1 + W] = _silu(acc1[m] + b1_ref[m])

        # ---- conv2 (3x3, 'same', BN2 folded) ----
        acc2 = [jnp.zeros((H, W), jnp.float32) for _ in range(C2_OUT)]
        for m in range(MID):
            for ky in range(3):
                for kx in range(3):
                    win = h1p_scr[m, ky:ky + H, kx:kx + W]
                    for co in range(C2_OUT):
                        wv = w2_ref[((co * MID + m) * 3 + ky) * 3 + kx]
                        acc2[co] = acc2[co] + wv * win

        # ---- residual + skip, SiLU -> second half of the channel-concat output ----
        for co in range(C2_OUT):
            if use_eq:
                skip = jnp.zeros((H, W), jnp.float32) + eb1_ref[co]
                for ci in range(C2):
                    skip = skip + ew1_ref[co * C2 + ci] * x2_ref[ci]
            else:
                skip = x2_ref[co]
            o_ref[P1_OUT + co] = _silu(acc2[co] + b2_ref[co] + skip).astype(o_ref.dtype)

        # ---- part1 passthrough / dim_equalizer2 -> first half of the output ----
        for po in range(P1_OUT):
            if use_eq:
                p = jnp.zeros((H, W), jnp.float32) + eb2_ref[po]
                for pi in range(P1):
                    p = p + ew2_ref[po * P1 + pi] * x1_ref[pi]
                o_ref[po] = p.astype(o_ref.dtype)
            else:
                o_ref[po] = x1_ref[po]

    return kernel


def csp_residual_block(x, params, *, out_dim, part_ratio=0.5, eps=1e-5):
    """Fused CSPResidualBlock forward (stride=1) on TPU via Pallas.

    x: (N, C_in, H, W) float32, NCHW (same layout as the PyTorch module).
    params: dict with
      'w1' (mid, part2, 3, 3), 'g1','b1','m1','v1' (mid,)            # conv1 + BN1
      'w2' (part2_out, mid, 3, 3), 'g2','b2','m2','v2' (part2_out,)  # conv2 + BN2
      and, iff part1_chnls != part1_out_chnls:
      'eq1_w' (part2_out, part2, 1, 1), 'eq1_b' (part2_out,),
      'eq2_w' (part1_out, part1, 1, 1), 'eq2_b' (part1_out,)
    """
    N, C_IN, H, W = x.shape
    P1 = int(C_IN * part_ratio)
    C2 = C_IN - P1
    P1_OUT = int(out_dim * part_ratio)
    C2_OUT = out_dim - P1_OUT
    MID = params["w1"].shape[0]
    use_eq = (P1 != P1_OUT)
    if not use_eq:
        assert C2 == C2_OUT, "skip add requires part2_chnls == part2_out_chnls"

    f32 = jnp.float32
    # Fold eval-mode BatchNorm into the (bias-free) conv weights.
    s1 = params["g1"] / jnp.sqrt(params["v1"] + eps)
    w1_eff = (params["w1"] * s1[:, None, None, None]).astype(f32)
    b1_eff = (params["b1"] - params["m1"] * s1).astype(f32)
    s2 = params["g2"] / jnp.sqrt(params["v2"] + eps)
    w2_eff = (params["w2"] * s2[:, None, None, None]).astype(f32)
    b2_eff = (params["b2"] - params["m2"] * s2).astype(f32)

    part1 = x[:, :P1]
    part2 = x[:, P1:]

    args = [part1, part2, w1_eff.reshape(-1), b1_eff, w2_eff.reshape(-1), b2_eff]
    smem = pl.BlockSpec(memory_space=pltpu.MemorySpace.SMEM)
    in_specs = [
        pl.BlockSpec((None, P1, H, W), lambda n: (n, 0, 0, 0)),
        pl.BlockSpec((None, C2, H, W), lambda n: (n, 0, 0, 0)),
        smem, smem, smem, smem,
    ]
    if use_eq:
        args += [params["eq1_w"].reshape(-1).astype(f32), params["eq1_b"].astype(f32),
                 params["eq2_w"].reshape(-1).astype(f32), params["eq2_b"].astype(f32)]
        in_specs += [smem, smem, smem, smem]

    kernel = _make_kernel(P1, P1_OUT, C2, C2_OUT, MID, H, W, use_eq)

    flops = 2 * N * H * W * 9 * (C2 * MID + MID * C2_OUT)
    if use_eq:
        flops += 2 * N * H * W * (C2 * C2_OUT + P1 * P1_OUT)
    cost = pl.CostEstimate(
        flops=flops,
        transcendentals=N * H * W * (MID + C2_OUT),
        bytes_accessed=4 * N * H * W * (C_IN + out_dim),
    )

    return pl.pallas_call(
        kernel,
        out_shape=jax.ShapeDtypeStruct((N, out_dim, H, W), x.dtype),
        grid_spec=pltpu.PrefetchScalarGridSpec(
            num_scalar_prefetch=0,
            grid=(N,),
            in_specs=in_specs,
            out_specs=pl.BlockSpec((None, out_dim, H, W), lambda n: (n, 0, 0, 0)),
            scratch_shapes=[
                pltpu.VMEM((C2, H + 2, W + 2), jnp.float32),   # padded part2
                pltpu.VMEM((MID, H + 2, W + 2), jnp.float32),  # padded hidden act
            ],
        ),
        compiler_params=pltpu.CompilerParams(
            dimension_semantics=("parallel",),
            vmem_limit_bytes=32 * 1024 * 1024,
        ),
        cost_estimate=cost,
    )(*args)


# --------------------------- pure-JAX reference ---------------------------

def _conv_nchw(x, w, padding):
    return jax.lax.conv_general_dilated(
        x, w, window_strides=(1, 1), padding=padding,
        dimension_numbers=("NCHW", "OIHW", "NCHW"),
        precision=jax.lax.Precision.HIGHEST)


def _bn_eval(x, g, b, m, v, eps=1e-5):
    s = g / jnp.sqrt(v + eps)
    return x * s[None, :, None, None] + (b - m * s)[None, :, None, None]


def csp_residual_block_reference(x, params, *, out_dim, part_ratio=0.5, eps=1e-5):
    C_IN = x.shape[1]
    P1 = int(C_IN * part_ratio)
    P1_OUT = int(out_dim * part_ratio)
    part1 = x[:, :P1]
    part2 = x[:, P1:]
    skip = part2
    if P1 != P1_OUT:
        skip = _conv_nchw(part2, params["eq1_w"], "VALID") + params["eq1_b"][None, :, None, None]
        part1 = _conv_nchw(part1, params["eq2_w"], "VALID") + params["eq2_b"][None, :, None, None]
    h = _conv_nchw(part2, params["w1"], "SAME")
    h = _bn_eval(h, params["g1"], params["b1"], params["m1"], params["v1"], eps)
    h = _silu(h)
    r = _conv_nchw(h, params["w2"], "SAME")
    r = _bn_eval(r, params["g2"], params["b2"], params["m2"], params["v2"], eps)
    r = _silu(r + skip)
    return jnp.concatenate([part1, r], axis=1)


def _make_params(key, p1, c2, p1_out, c2_out, mid, use_eq):
    ks = jax.random.split(key, 14)
    p = {
        "w1": jax.random.normal(ks[0], (mid, c2, 3, 3), jnp.float32) * 0.2,
        "g1": 1.0 + 0.1 * jax.random.normal(ks[1], (mid,), jnp.float32),
        "b1": 0.1 * jax.random.normal(ks[2], (mid,), jnp.float32),
        "m1": 0.1 * jax.random.normal(ks[3], (mid,), jnp.float32),
        "v1": 0.5 + jax.random.uniform(ks[4], (mid,), jnp.float32),
        "w2": jax.random.normal(ks[5], (c2_out, mid, 3, 3), jnp.float32) * 0.2,
        "g2": 1.0 + 0.1 * jax.random.normal(ks[6], (c2_out,), jnp.float32),
        "b2": 0.1 * jax.random.normal(ks[7], (c2_out,), jnp.float32),
        "m2": 0.1 * jax.random.normal(ks[8], (c2_out,), jnp.float32),
        "v2": 0.5 + jax.random.uniform(ks[9], (c2_out,), jnp.float32),
    }
    if use_eq:
        p["eq1_w"] = jax.random.normal(ks[10], (c2_out, c2, 1, 1), jnp.float32) * 0.2
        p["eq1_b"] = 0.1 * jax.random.normal(ks[11], (c2_out,), jnp.float32)
        p["eq2_w"] = jax.random.normal(ks[12], (p1_out, p1, 1, 1), jnp.float32) * 0.2
        p["eq2_b"] = 0.1 * jax.random.normal(ks[13], (p1_out,), jnp.float32)
    return p


if __name__ == "__main__":
    key = jax.random.PRNGKey(0)
    kx1, kp1, kx2, kp2 = jax.random.split(key, 4)

    # Config 1: CSPResidualBlock(in_dim=4, mid_dim=8, out_dim=4, stride=1) — identity split path.
    N, C_IN, H, W = 2, 4, 16, 16
    OUT, MID = 4, 8
    P1 = int(C_IN * 0.5); C2 = C_IN - P1
    P1_OUT = int(OUT * 0.5); C2_OUT = OUT - P1_OUT
    x = jax.random.normal(kx1, (N, C_IN, H, W), jnp.float32)
    params = _make_params(kp1, P1, C2, P1_OUT, C2_OUT, MID, use_eq=False)
    out = jax.block_until_ready(csp_residual_block(x, params, out_dim=OUT))
    ref = csp_residual_block_reference(x, params, out_dim=OUT)
    assert out.shape == (N, OUT, H, W)
    assert jnp.allclose(out, ref, atol=1e-4, rtol=1e-4), "config1 mismatch vs reference"

    # Config 2: in_dim=4 -> out_dim=6 (stride=1) — dim_equalizer path.
    OUT2 = 6
    P1_OUT2 = int(OUT2 * 0.5); C2_OUT2 = OUT2 - P1_OUT2
    x2 = jax.random.normal(kx2, (N, C_IN, H, W), jnp.float32)
    params2 = _make_params(kp2, P1, C2, P1_OUT2, C2_OUT2, MID, use_eq=True)
    out2 = jax.block_until_ready(csp_residual_block(x2, params2, out_dim=OUT2))
    ref2 = csp_residual_block_reference(x2, params2, out_dim=OUT2)
    assert out2.shape == (N, OUT2, H, W)
    assert jnp.allclose(out2, ref2, atol=1e-4, rtol=1e-4), "config2 mismatch vs reference"

    print("KERNEL_OK")
</pallas_src>

<mosaic_0001>
module attributes {stable_mosaic.version = 11 : i64} {
  func.func @kernel(%arg0: i32, %arg1: memref<1x2x16x16xf32, #tpu.memory_space<vmem>>, %arg2: memref<1x2x16x16xf32, #tpu.memory_space<vmem>>, %arg3: memref<144xf32, #tpu.memory_space<smem>>, %arg4: memref<8xf32, #tpu.memory_space<smem>>, %arg5: memref<144xf32, #tpu.memory_space<smem>>, %arg6: memref<2xf32, #tpu.memory_space<smem>>, %arg7: memref<1x4x16x16xf32, #tpu.memory_space<vmem>>, %arg8: memref<2x18x18xf32, #tpu.memory_space<vmem>>, %arg9: memref<8x18x18xf32, #tpu.memory_space<vmem>>) attributes {dimension_semantics = [#tpu.dimension_semantics<parallel>], iteration_bounds = array<i64: 2>, scalar_prefetch = 0 : i64, scratch_operands = 2 : i64, tpu.core_type = #tpu.core_type<tc>, window_params = [{transform_indices = @transform_0, window_bounds = array<i64: 1, 2, 16, 16>}, {transform_indices = @transform_1, window_bounds = array<i64: 1, 2, 16, 16>}, {transform_indices = @transform_2, window_bounds = array<i64: 144>}, {transform_indices = @transform_3, window_bounds = array<i64: 8>}, {transform_indices = @transform_4, window_bounds = array<i64: 144>}, {transform_indices = @transform_5, window_bounds = array<i64: 2>}, {transform_indices = @transform_6, window_bounds = array<i64: 1, 4, 16, 16>}]} {
    %cst = arith.constant 0.000000e+00 : f32
    %0 = vector.broadcast %cst : f32 to vector<2x18x18xf32>
    %c0 = arith.constant 0 : index
    %c0_0 = arith.constant 0 : index
    %c0_1 = arith.constant 0 : index
    %1 = vector.load %arg8[%c0, %c0_0, %c0_1] : memref<2x18x18xf32, #tpu.memory_space<vmem>>, vector<2x18x18xf32>
    tpu.vector_store %arg8[%c0, %c0_0, %c0_1], %0 {strides = array<i32>} : memref<2x18x18xf32, #tpu.memory_space<vmem>>, vector<2x18x18xf32>,
    %c0_2 = arith.constant 0 : index
    %c0_3 = arith.constant 0 : index
    %c0_4 = arith.constant 0 : index
    %c0_5 = arith.constant 0 : index
    %2 = vector.load %arg2[%c0_2, %c0_3, %c0_4, %c0_5] : memref<1x2x16x16xf32, #tpu.memory_space<vmem>>, vector<1x1x16x16xf32>
    %3 = vector.shape_cast %2 : vector<1x1x16x16xf32> to vector<16x16xf32>
    %c0_6 = arith.constant 0 : index
    %c1 = arith.constant 1 : index
    %c1_7 = arith.constant 1 : index
    %4 = vector.load %arg8[%c0_6, %c1, %c1_7] : memref<2x18x18xf32, #tpu.memory_space<vmem>>, vector<1x16x16xf32>
    %5 = vector.shape_cast %4 : vector<1x16x16xf32> to vector<16x16xf32>
    %6 = vector.shape_cast %3 : vector<16x16xf32> to vector<1x16x16xf32>
    tpu.vector_store %arg8[%c0_6, %c1, %c1_7], %6 {strides = array<i32>} : memref<2x18x18xf32, #tpu.memory_space<vmem>>, vector<1x16x16xf32>,
    %c0_8 = arith.constant 0 : index
    %c1_9 = arith.constant 1 : index
    %c0_10 = arith.constant 0 : index
    %c0_11 = arith.constant 0 : index
    %7 = vector.load %arg2[%c0_8, %c1_9, %c0_10, %c0_11] : memref<1x2x16x16xf32, #tpu.memory_space<vmem>>, vector<1x1x16x16xf32>
    %8 = vector.shape_cast %7 : vector<1x1x16x16xf32> to vector<16x16xf32>
    %c1_12 = arith.constant 1 : index
    %c1_13 = arith.constant 1 : index
    %c1_14 = arith.constant 1 : index
    %9 = vector.load %arg8[%c1_12, %c1_13, %c1_14] : memref<2x18x18xf32, #tpu.memory_space<vmem>>, vector<1x16x16xf32>
    %10 = vector.shape_cast %9 : vector<1x16x16xf32> to vector<16x16xf32>
    %11 = vector.shape_cast %8 : vector<16x16xf32> to vector<1x16x16xf32>
    tpu.vector_store %arg8[%c1_12, %c1_13, %c1_14], %11 {strides = array<i32>} : memref<2x18x18xf32, #tpu.memory_space<vmem>>, vector<1x16x16xf32>,
    %cst_15 = arith.constant 0.000000e+00 : f32
    %12 = vector.broadcast %cst_15 : f32 to vector<8x18x18xf32>
    %c0_16 = arith.constant 0 : index
    %c0_17 = arith.constant 0 : index
    %c0_18 = arith.constant 0 : index
    %13 = vector.load %arg9[%c0_16, %c0_17, %c0_18] : memref<8x18x18xf32, #tpu.memory_space<vmem>>, vector<8x18x18xf32>
    tpu.vector_store %arg9[%c0_16, %c0_17, %c0_18], %12 {strides = array<i32>} : memref<8x18x18xf32, #tpu.memory_space<vmem>>, vector<8x18x18xf32>,
    %cst_19 = arith.constant 0.000000e+00 : f32
    %14 = vector.broadcast %cst_19 : f32 to vector<16x16xf32>
    %cst_20 = arith.constant 0.000000e+00 : f32
    %15 = vector.broadcast %cst_20 : f32 to vector<16x16xf32>
    %cst_21 = arith.constant 0.000000e+00 : f32
    %16 = vector.broadcast %cst_21 : f32 to vector<16x16xf32>
    %cst_22 = arith.constant 0.000000e+00 : f32
    %17 = vector.broadcast %cst_22 : f32 to vector<16x16xf32>
    %cst_23 = arith.constant 0.000000e+00 : f32
    %18 = vector.broadcast %cst_23 : f32 to vector<16x16xf32>
    %cst_24 = arith.constant 0.000000e+00 : f32
    %19 = vector.broadcast %cst_24 : f32 to vector<16x16xf32>
    %cst_25 = arith.constant 0.000000e+00 : f32
    %20 = vector.broadcast %cst_25 : f32 to vector<16x16xf32>
    %cst_26 = arith.constant 0.000000e+00 : f32
    %21 = vector.broadcast %cst_26 : f32 to vector<16x16xf32>
    %c0_27 = arith.constant 0 : index
    %c0_28 = arith.constant 0 : index
    %c0_29 = arith.constant 0 : index
    %22 = vector.load %arg8[%c0_27, %c0_28, %c0_29] : memref<2x18x18xf32, #tpu.memory_space<vmem>>, vector<1x16x16xf32>
    %23 = vector.shape_cast %22 : vector<1x16x16xf32> to vector<16x16xf32>
    %c0_30 = arith.constant 0 : index
    %24 = memref.load %arg3[%c0_30] : memref<144xf32, #tpu.memory_space<smem>>
    %25 = vector.broadcast %24 : f32 to vector<16x16xf32>
    %26 = arith.mulf %25, %23 : vector<16x16xf32>
    %27 = arith.addf %14, %26 : vector<16x16xf32>
    %c18 = arith.constant 18 : index
    %28 = memref.load %arg3[%c18] : memref<144xf32, #tpu.memory_space<smem>>
    %29 = vector.broadcast %28 : f32 to vector<16x16xf32>
    %30 = arith.mulf %29, %23 : vector<16x16xf32>
    %31 = arith.addf %15, %30 : vector<16x16xf32>
    %c36 = arith.constant 36 : index
    %32 = memref.load %arg3[%c36] : memref<144xf32, #tpu.memory_space<smem>>
    %33 = vector.broadcast %32 : f32 to vector<16x16xf32>
    %34 = arith.mulf %33, %23 : vector<16x16xf32>
    %35 = arith.addf %16, %34 : vector<16x16xf32>
    %c54 = arith.constant 54 : index
    %36 = memref.load %arg3[%c54] : memref<144xf32, #tpu.memory_space<smem>>
    %37 = vector.broadcast %36 : f32 to vector<16x16xf32>
    %38 = arith.mulf %37, %23 : vector<16x16xf32>
    %39 = arith.addf %17, %38 : vector<16x16xf32>
    %c72 = arith.constant 72 : index
    %40 = memref.load %arg3[%c72] : memref<144xf32, #tpu.memory_space<smem>>
    %41 = vector.broadcast %40 : f32 to vector<16x16xf32>
    %42 = arith.mulf %41, %23 : vector<16x16xf32>
    %43 = arith.addf %18, %42 : vector<16x16xf32>
    %c90 = arith.constant 90 : index
    %44 = memref.load %arg3[%c90] : memref<144xf32, #tpu.memory_space<smem>>
    %45 = vector.broadcast %44 : f32 to vector<16x16xf32>
    %46 = arith.mulf %45, %23 : vector<16x16xf32>
    %47 = arith.addf %19, %46 : vector<16x16xf32>
    %c108 = arith.constant 108 : index
    %48 = memref.load %arg3[%c108] : memref<144xf32, #tpu.memory_space<smem>>
    %49 = vector.broadcast %48 : f32 to vector<16x16xf32>
    %50 = arith.mulf %49, %23 : vector<16x16xf32>
    %51 = arith.addf %20, %50 : vector<16x16xf32>
    %c126 = arith.constant 126 : index
    %52 = memref.load %arg3[%c126] : memref<144xf32, #tpu.memory_space<smem>>
    %53 = vector.broadcast %52 : f32 to vector<16x16xf32>
    %54 = arith.mulf %53, %23 : vector<16x16xf32>
    %55 = arith.addf %21, %54 : vector<16x16xf32>
    %c0_31 = arith.constant 0 : index
    %c0_32 = arith.constant 0 : index
    %c1_33 = arith.constant 1 : index
    %56 = vector.load %arg8[%c0_31, %c0_32, %c1_33] : memref<2x18x18xf32, #tpu.memory_space<vmem>>, vector<1x16x16xf32>
    %57 = vector.shape_cast %56 : vector<1x16x16xf32> to vector<16x16xf32>
    %c1_34 = arith.constant 1 : index
    %58 = memref.load %arg3[%c1_34] : memref<144xf32, #tpu.memory_space<smem>>
    %59 = vector.broadcast %58 : f32 to vector<16x16xf32>
    %60 = arith.mulf %59, %57 : vector<16x16xf32>
    %61 = arith.addf %27, %60 : vector<16x16xf32>
    %c19 = arith.constant 19 : index
    %62 = memref.load %arg3[%c19] : memref<144xf32, #tpu.memory_space<smem>>
    %63 = vector.broadcast %62 : f32 to vector<16x16xf32>
    %64 = arith.mulf %63, %57 : vector<16x16xf32>
    %65 = arith.addf %31, %64 : vector<16x16xf32>
    %c37 = arith.constant 37 : index
    %66 = memref.load %arg3[%c37] : memref<144xf32, #tpu.memory_space<smem>>
    %67 = vector.broadcast %66 : f32 to vector<16x16xf32>
    %68 = arith.mulf %67, %57 : vector<16x16xf32>
    %69 = arith.addf %35, %68 : vector<16x16xf32>
    %c55 = arith.constant 55 : index
    %70 = memref.load %arg3[%c55] : memref<144xf32, #tpu.memory_space<smem>>
    %71 = vector.broadcast %70 : f32 to vector<16x16xf32>
    %72 = arith.mulf %71, %57 : vector<16x16xf32>
    %73 = arith.addf %39, %72 : vector<16x16xf32>
    %c73 = arith.constant 73 : index
    %74 = memref.load %arg3[%c73] : memref<144xf32, #tpu.memory_space<smem>>
    %75 = vector.broadcast %74 : f32 to vector<16x16xf32>
    %76 = arith.mulf %75, %57 : vector<16x16xf32>
    %77 = arith.addf %43, %76 : vector<16x16xf32>
    %c91 = arith.constant 91 : index
    %78 = memref.load %arg3[%c91] : memref<144xf32, #tpu.memory_space<smem>>
    %79 = vector.broadcast %78 : f32 to vector<16x16xf32>
    %80 = arith.mulf %79, %57 : vector<16x16xf32>
    %81 = arith.addf %47, %80 : vector<16x16xf32>
    %c109 = arith.constant 109 : index
    %82 = memref.load %arg3[%c109] : memref<144xf32, #tpu.memory_space<smem>>
    %83 = vector.broadcast %82 : f32 to vector<16x16xf32>
    %84 = arith.mulf %83, %57 : vector<16x16xf32>
    %85 = arith.addf %51, %84 : vector<16x16xf32>
    %c127 = arith.constant 127 : index
    %86 = memref.load %arg3[%c127] : memref<144xf32, #tpu.memory_space<smem>>
    %87 = vector.broadcast %86 : f32 to vector<16x16xf32>
    %88 = arith.mulf %87, %57 : vector<16x16xf32>
    %89 = arith.addf %55, %88 : vector<16x16xf32>
    %c0_35 = arith.constant 0 : index
    %c0_36 = arith.constant 0 : index
    %c2 = arith.constant 2 : index
    %90 = vector.load %arg8[%c0_35, %c0_36, %c2] : memref<2x18x18xf32, #tpu.memory_space<vmem>>, vector<1x16x16xf32>
    %91 = vector.shape_cast %90 : vector<1x16x16xf32> to vector<16x16xf32>
    %c2_37 = arith.constant 2 : index
    %92 = memref.load %arg3[%c2_37] : memref<144xf32, #tpu.memory_space<smem>>
    %93 = vector.broadcast %92 : f32 to vector<16x16xf32>
    %94 = arith.mulf %93, %91 : vector<16x16xf32>
    %95 = arith.addf %61, %94 : vector<16x16xf32>
    %c20 = arith.constant 20 : index
    %96 = memref.load %arg3[%c20] : memref<144xf32, #tpu.memory_space<smem>>
    %97 = vector.broadcast %96 : f32 to vector<16x16xf32>
    %98 = arith.mulf %97, %91 : vector<16x16xf32>
    %99 = arith.addf %65, %98 : vector<16x16xf32>
    %c38 = arith.constant 38 : index
    %100 = memref.load %arg3[%c38] : memref<144xf32, #tpu.memory_space<smem>>
    %101 = vector.broadcast %100 : f32 to vector<16x16xf32>
    %102 = arith.mulf %101, %91 : vector<16x16xf32>
    %103 = arith.addf %69, %102 : vector<16x16xf32>
    %c56 = arith.constant 56 : index
    %104 = memref.load %arg3[%c56] : memref<144xf32, #tpu.memory_space<smem>>
    %105 = vector.broadcast %104 : f32 to vector<16x16xf32>
    %106 = arith.mulf %105, %91 : vector<16x16xf32>
    %107 = arith.addf %73, %106 : vector<16x16xf32>
    %c74 = arith.constant 74 : index
    %108 = memref.load %arg3[%c74] : memref<144xf32, #tpu.memory_space<smem>>
    %109 = vector.broadcast %108 : f32 to vector<16x16xf32>
    %110 = arith.mulf %109, %91 : vector<16x16xf32>
    %111 = arith.addf %77, %110 : vector<16x16xf32>
    %c92 = arith.constant 92 : index
    %112 = memref.load %arg3[%c92] : memref<144xf32, #tpu.memory_space<smem>>
    %113 = vector.broadcast %112 : f32 to vector<16x16xf32>
    %114 = arith.mulf %113, %91 : vector<16x16xf32>
    %115 = arith.addf %81, %114 : vector<16x16xf32>
    %c110 = arith.constant 110 : index
    %116 = memref.load %arg3[%c110] : memref<144xf32, #tpu.memory_space<smem>>
    %117 = vector.broadcast %116 : f32 to vector<16x16xf32>
    %118 = arith.mulf %117, %91 : vector<16x16xf32>
    %119 = arith.addf %85, %118 : vector<16x16xf32>
    %c128 = arith.constant 128 : index
    %120 = memref.load %arg3[%c128] : memref<144xf32, #tpu.memory_space<smem>>
    %121 = vector.broadcast %120 : f32 to vector<16x16xf32>
    %122 = arith.mulf %121, %91 : vector<16x16xf32>
    %123 = arith.addf %89, %122 : vector<16x16xf32>
    %c0_38 = arith.constant 0 : index
    %c1_39 = arith.constant 1 : index
    %c0_40 = arith.constant 0 : index
    %124 = vector.load %arg8[%c0_38, %c1_39, %c0_40] : memref<2x18x18xf32, #tpu.memory_space<vmem>>, vector<1x16x16xf32>
    %125 = vector.shape_cast %124 : vector<1x16x16xf32> to vector<16x16xf32>
    %c3 = arith.constant 3 : index
    %126 = memref.load %arg3[%c3] : memref<144xf32, #tpu.memory_space<smem>>
    %127 = vector.broadcast %126 : f32 to vector<16x16xf32>
    %128 = arith.mulf %127, %125 : vector<16x16xf32>
    %129 = arith.addf %95, %128 : vector<16x16xf32>
    %c21 = arith.constant 21 : index
    %130 = memref.load %arg3[%c21] : memref<144xf32, #tpu.memory_space<smem>>
    %131 = vector.broadcast %130 : f32 to vector<16x16xf32>
    %132 = arith.mulf %131, %125 : vector<16x16xf32>
    %133 = arith.addf %99, %132 : vector<16x16xf32>
    %c39 = arith.constant 39 : index
    %134 = memref.load %arg3[%c39] : memref<144xf32, #tpu.memory_space<smem>>
    %135 = vector.broadcast %134 : f32 to vector<16x16xf32>
    %136 = arith.mulf %135, %125 : vector<16x16xf32>
    %137 = arith.addf %103, %136 : vector<16x16xf32>
    %c57 = arith.constant 57 : index
    %138 = memref.load %arg3[%c57] : memref<144xf32, #tpu.memory_space<smem>>
    %139 = vector.broadcast %138 : f32 to vector<16x16xf32>
    %140 = arith.mulf %139, %125 : vector<16x16xf32>
    %141 = arith.addf %107, %140 : vector<16x16xf32>
    %c75 = arith.constant 75 : index
    %142 = memref.load %arg3[%c75] : memref<144xf32, #tpu.memory_space<smem>>
    %143 = vector.broadcast %142 : f32 to vector<16x16xf32>
    %144 = arith.mulf %143, %125 : vector<16x16xf32>
    %145 = arith.addf %111, %144 : vector<16x16xf32>
    %c93 = arith.constant 93 : index
    %146 = memref.load %arg3[%c93] : memref<144xf32, #tpu.memory_space<smem>>
    %147 = vector.broadcast %146 : f32 to vector<16x16xf32>
    %148 = arith.mulf %147, %125 : vector<16x16xf32>
    %149 = arith.addf %115, %148 : vector<16x16xf32>
    %c111 = arith.constant 111 : index
    %150 = memref.load %arg3[%c111] : memref<144xf32, #tpu.memory_space<smem>>
    %151 = vector.broadcast %150 : f32 to vector<16x16xf32>
    %152 = arith.mulf %151, %125 : vector<16x16xf32>
    %153 = arith.addf %119, %152 : vector<16x16xf32>
    %c129 = arith.constant 129 : index
    %154 = memref.load %arg3[%c129] : memref<144xf32, #tpu.memory_space<smem>>
    %155 = vector.broadcast %154 : f32 to vector<16x16xf32>
    %156 = arith.mulf %155, %125 : vector<16x16xf32>
    %157 = arith.addf %123, %156 : vector<16x16xf32>
    %c0_41 = arith.constant 0 : index
    %c1_42 = arith.constant 1 : index
    %c1_43 = arith.constant 1 : index
    %158 = vector.load %arg8[%c0_41, %c1_42, %c1_43] : memref<2x18x18xf32, #tpu.memory_space<vmem>>, vector<1x16x16xf32>
    %159 = vector.shape_cast %158 : vector<1x16x16xf32> to vector<16x16xf32>
    %c4 = arith.constant 4 : index
    %160 = memref.load %arg3[%c4] : memref<144xf32, #tpu.memory_space<smem>>
    %161 = vector.broadcast %160 : f32 to vector<16x16xf32>
    %162 = arith.mulf %161, %159 : vector<16x16xf32>
    %163 = arith.addf %129, %162 : vector<16x16xf32>
    %c22 = arith.constant 22 : index
    %164 = memref.load %arg3[%c22] : memref<144xf32, #tpu.memory_space<smem>>
    %165 = vector.broadcast %164 : f32 to vector<16x16xf32>
    %166 = arith.mulf %165, %159 : vector<16x16xf32>
    %167 = arith.addf %133, %166 : vector<16x16xf32>
    %c40 = arith.constant 40 : index
    %168 = memref.load %arg3[%c40] : memref<144xf32, #tpu.memory_space<smem>>
    %169 = vector.broadcast %168 : f32 to vector<16x16xf32>
    %170 = arith.mulf %169, %159 : vector<16x16xf32>
    %171 = arith.addf %137, %170 : vector<16x16xf32>
    %c58 = arith.constant 58 : index
    %172 = memref.load %arg3[%c58] : memref<144xf32, #tpu.memory_space<smem>>
    %173 = vector.broadcast %172 : f32 to vector<16x16xf32>
    %174 = arith.mulf %173, %159 : vector<16x16xf32>
    %175 = arith.addf %141, %174 : vector<16x16xf32>
    %c76 = arith.constant 76 : index
    %176 = memref.load %arg3[%c76] : memref<144xf32, #tpu.memory_space<smem>>
    %177 = vector.broadcast %176 : f32 to vector<16x16xf32>
    %178 = arith.mulf %177, %159 : vector<16x16xf32>
    %179 = arith.addf %145, %178 : vector<16x16xf32>
    %c94 = arith.constant 94 : index
    %180 = memref.load %arg3[%c94] : memref<144xf32, #tpu.memory_space<smem>>
    %181 = vector.broadcast %180 : f32 to vector<16x16xf32>
    %182 = arith.mulf %181, %159 : vector<16x16xf32>
    %183 = arith.addf %149, %182 : vector<16x16xf32>
    %c112 = arith.constant 112 : index
    %184 = memref.load %arg3[%c112] : memref<144xf32, #tpu.memory_space<smem>>
    %185 = vector.broadcast %184 : f32 to vector<16x16xf32>
    %186 = arith.mulf %185, %159 : vector<16x16xf32>
    %187 = arith.addf %153, %186 : vector<16x16xf32>
    %c130 = arith.constant 130 : index
    %188 = memref.load %arg3[%c130] : memref<144xf32, #tpu.memory_space<smem>>
    %189 = vector.broadcast %188 : f32 to vector<16x16xf32>
    %190 = arith.mulf %189, %159 : vector<16x16xf32>
    %191 = arith.addf %157, %190 : vector<16x16xf32>
    %c0_44 = arith.constant 0 : index
    %c1_45 = arith.constant 1 : index
    %c2_46 = arith.constant 2 : index
    %192 = vector.load %arg8[%c0_44, %c1_45, %c2_46] : memref<2x18x18xf32, #tpu.memory_space<vmem>>, vector<1x16x16xf32>
    %193 = vector.shape_cast %192 : vector<1x16x16xf32> to vector<16x16xf32>
    %c5 = arith.constant 5 : index
    %194 = memref.load %arg3[%c5] : memref<144xf32, #tpu.memory_space<smem>>
    %195 = vector.broadcast %194 : f32 to vector<16x16xf32>
    %196 = arith.mulf %195, %193 : vector<16x16xf32>
    %197 = arith.addf %163, %196 : vector<16x16xf32>
    %c23 = arith.constant 23 : index
    %198 = memref.load %arg3[%c23] : memref<144xf32, #tpu.memory_space<smem>>
    %199 = vector.broadcast %198 : f32 to vector<16x16xf32>
    %200 = arith.mulf %199, %193 : vector<16x16xf32>
    %201 = arith.addf %167, %200 : vector<16x16xf32>
    %c41 = arith.constant 41 : index
    %202 = memref.load %arg3[%c41] : memref<144xf32, #tpu.memory_space<smem>>
    %203 = vector.broadcast %202 : f32 to vector<16x16xf32>
    %204 = arith.mulf %203, %193 : vector<16x16xf32>
    %205 = arith.addf %171, %204 : vector<16x16xf32>
    %c59 = arith.constant 59 : index
    %206 = memref.load %arg3[%c59] : memref<144xf32, #tpu.memory_space<smem>>
    %207 = vector.broadcast %206 : f32 to vector<16x16xf32>
    %208 = arith.mulf %207, %193 : vector<16x16xf32>
    %209 = arith.addf %175, %208 : vector<16x16xf32>
    %c77 = arith.constant 77 : index
    %210 = memref.load %arg3[%c77] : memref<144xf32, #tpu.memory_space<smem>>
    %211 = vector.broadcast %210 : f32 to vector<16x16xf32>
    %212 = arith.mulf %211, %193 : vector<16x16xf32>
    %213 = arith.addf %179, %212 : vector<16x16xf32>
    %c95 = arith.constant 95 : index
    %214 = memref.load %arg3[%c95] : memref<144xf32, #tpu.memory_space<smem>>
    %215 = vector.broadcast %214 : f32 to vector<16x16xf32>
    %216 = arith.mulf %215, %193 : vector<16x16xf32>
    %217 = arith.addf %183, %216 : vector<16x16xf32>
    %c113 = arith.constant 113 : index
    %218 = memref.load %arg3[%c113] : memref<144xf32, #tpu.memory_space<smem>>
    %219 = vector.broadcast %218 : f32 to vector<16x16xf32>
    %220 = arith.mulf %219, %193 : vector<16x16xf32>
    %221 = arith.addf %187, %220 : vector<16x16xf32>
    %c131 = arith.constant 131 : index
    %222 = memref.load %arg3[%c131] : memref<144xf32, #tpu.memory_space<smem>>
    %223 = vector.broadcast %222 : f32 to vector<16x16xf32>
    %224 = arith.mulf %223, %193 : vector<16x16xf32>
    %225 = arith.addf %191, %224 : vector<16x16xf32>
    %c0_47 = arith.constant 0 : index
    %c2_48 = arith.constant 2 : index
    %c0_49 = arith.constant 0 : index
    %226 = vector.load %arg8[%c0_47, %c2_48, %c0_49] : memref<2x18x18xf32, #tpu.memory_space<vmem>>, vector<1x16x16xf32>
    %227 = vector.shape_cast %226 : vector<1x16x16xf32> to vector<16x16xf32>
    %c6 = arith.constant 6 : index
    %228 = memref.load %arg3[%c6] : memref<144xf32, #tpu.memory_space<smem>>
    %229 = vector.broadcast %228 : f32 to vector<16x16xf32>
    %230 = arith.mulf %229, %227 : vector<16x16xf32>
    %231 = arith.addf %197, %230 : vector<16x16xf32>
    %c24 = arith.constant 24 : index
    %232 = memref.load %arg3[%c24] : memref<144xf32, #tpu.memory_space<smem>>
    %233 = vector.broadcast %232 : f32 to vector<16x16xf32>
    %234 = arith.mulf %233, %227 : vector<16x16xf32>
    %235 = arith.addf %201, %234 : vector<16x16xf32>
    %c42 = arith.constant 42 : index
    %236 = memref.load %arg3[%c42] : memref<144xf32, #tpu.memory_space<smem>>
    %237 = vector.broadcast %236 : f32 to vector<16x16xf32>
    %238 = arith.mulf %237, %227 : vector<16x16xf32>
    %239 = arith.addf %205, %238 : vector<16x16xf32>
    %c60 = arith.constant 60 : index
    %240 = memref.load %arg3[%c60] : memref<144xf32, #tpu.memory_space<smem>>
    %241 = vector.broadcast %240 : f32 to vector<16x16xf32>
    %242 = arith.mulf %241, %227 : vector<16x16xf32>
    %243 = arith.addf %209, %242 : vector<16x16xf32>
    %c78 = arith.constant 78 : index
    %244 = memref.load %arg3[%c78] : memref<144xf32, #tpu.memory_space<smem>>
    %245 = vector.broadcast %244 : f32 to vector<16x16xf32>
    %246 = arith.mulf %245, %227 : vector<16x16xf32>
    %247 = arith.addf %213, %246 : vector<16x16xf32>
    %c96 = arith.constant 96 : index
    %248 = memref.load %arg3[%c96] : memref<144xf32, #tpu.memory_space<smem>>
    %249 = vector.broadcast %248 : f32 to vector<16x16xf32>
    %250 = arith.mulf %249, %227 : vector<16x16xf32>
    %251 = arith.addf %217, %250 : vector<16x16xf32>
    %c114 = arith.constant 114 : index
    %252 = memref.load %arg3[%c114] : memref<144xf32, #tpu.memory_space<smem>>
    %253 = vector.broadcast %252 : f32 to vector<16x16xf32>
    %254 = arith.mulf %253, %227 : vector<16x16xf32>
    %255 = arith.addf %221, %254 : vector<16x16xf32>
    %c132 = arith.constant 132 : index
    %256 = memref.load %arg3[%c132] : memref<144xf32, #tpu.memory_space<smem>>
    %257 = vector.broadcast %256 : f32 to vector<16x16xf32>
    %258 = arith.mulf %257, %227 : vector<16x16xf32>
    %259 = arith.addf %225, %258 : vector<16x16xf32>
    %c0_50 = arith.constant 0 : index
    %c2_51 = arith.constant 2 : index
    %c1_52 = arith.constant 1 : index
    %260 = vector.load %arg8[%c0_50, %c2_51, %c1_52] : memref<2x18x18xf32, #tpu.memory_space<vmem>>, vector<1x16x16xf32>
    %261 = vector.shape_cast %260 : vector<1x16x16xf32> to vector<16x16xf32>
    %c7 = arith.constant 7 : index
    %262 = memref.load %arg3[%c7] : memref<144xf32, #tpu.memory_space<smem>>
    %263 = vector.broadcast %262 : f32 to vector<16x16xf32>
    %264 = arith.mulf %263, %261 : vector<16x16xf32>
    %265 = arith.addf %231, %264 : vector<16x16xf32>
    %c25 = arith.constant 25 : index
    %266 = memref.load %arg3[%c25] : memref<144xf32, #tpu.memory_space<smem>>
    %267 = vector.broadcast %266 : f32 to vector<16x16xf32>
    %268 = arith.mulf %267, %261 : vector<16x16xf32>
    %269 = arith.addf %235, %268 : vector<16x16xf32>
    %c43 = arith.constant 43 : index
    %270 = memref.load %arg3[%c43] : memref<144xf32, #tpu.memory_space<smem>>
    %271 = vector.broadcast %270 : f32 to vector<16x16xf32>
    %272 = arith.mulf %271, %261 : vector<16x16xf32>
    %273 = arith.addf %239, %272 : vector<16x16xf32>
    %c61 = arith.constant 61 : index
    %274 = memref.load %arg3[%c61] : memref<144xf32, #tpu.memory_space<smem>>
    %275 = vector.broadcast %274 : f32 to vector<16x16xf32>
    %276 = arith.mulf %275, %261 : vector<16x16xf32>
    %277 = arith.addf %243, %276 : vector<16x16xf32>
    %c79 = arith.constant 79 : index
    %278 = memref.load %arg3[%c79] : memref<144xf32, #tpu.memory_space<smem>>
    %279 = vector.broadcast %278 : f32 to vector<16x16xf32>
    %280 = arith.mulf %279, %261 : vector<16x16xf32>
    %281 = arith.addf %247, %280 : vector<16x16xf32>
    %c97 = arith.constant 97 : index
    %282 = memref.load %arg3[%c97] : memref<144xf32, #tpu.memory_space<smem>>
    %283 = vector.broadcast %282 : f32 to vector<16x16xf32>
    %284 = arith.mulf %283, %261 : vector<16x16xf32>
    %285 = arith.addf %251, %284 : vector<16x16xf32>
    %c115 = arith.constant 115 : index
    %286 = memref.load %arg3[%c115] : memref<144xf32, #tpu.memory_space<smem>>
    %287 = vector.broadcast %286 : f32 to vector<16x16xf32>
    %288 = arith.mulf %287, %261 : vector<16x16xf32>
    %289 = arith.addf %255, %288 : vector<16x16xf32>
    %c133 = arith.constant 133 : index
    %290 = memref.load %arg3[%c133] : memref<144xf32, #tpu.memory_space<smem>>
    %291 = vector.broadcast %290 : f32 to vector<16x16xf32>
    %292 = arith.mulf %291, %261 : vector<16x16xf32>
    %293 = arith.addf %259, %292 : vector<16x16xf32>
    %c0_53 = arith.constant 0 : index
    %c2_54 = arith.constant 2 : index
    %c2_55 = arith.constant 2 : index
    %294 = vector.load %arg8[%c0_53, %c2_54, %c2_55] : memref<2x18x18xf32, #tpu.memory_space<vmem>>, vector<1x16x16xf32>
    %295 = vector.shape_cast %294 : vector<1x16x16xf32> to vector<16x16xf32>
    %c8 = arith.constant 8 : index
    %296 = memref.load %arg3[%c8] : memref<144xf32, #tpu.memory_space<smem>>
    %297 = vector.broadcast %296 : f32 to vector<16x16xf32>
    %298 = arith.mulf %297, %295 : vector<16x16xf32>
    %299 = arith.addf %265, %298 : vector<16x16xf32>
    %c26 = arith.constant 26 : index
    %300 = memref.load %arg3[%c26] : memref<144xf32, #tpu.memory_space<smem>>
    %301 = vector.broadcast %300 : f32 to vector<16x16xf32>
    %302 = arith.mulf %301, %295 : vector<16x16xf32>
    %303 = arith.addf %269, %302 : vector<16x16xf32>
    %c44 = arith.constant 44 : index
    %304 = memref.load %arg3[%c44] : memref<144xf32, #tpu.memory_space<smem>>
    %305 = vector.broadcast %304 : f32 to vector<16x16xf32>
    %306 = arith.mulf %305, %295 : vector<16x16xf32>
    %307 = arith.addf %273, %306 : vector<16x16xf32>
    %c62 = arith.constant 62 : index
    %308 = memref.load %arg3[%c62] : memref<144xf32, #tpu.memory_space<smem>>
    %309 = vector.broadcast %308 : f32 to vector<16x16xf32>
    %310 = arith.mulf %309, %295 : vector<16x16xf32>
    %311 = arith.addf %277, %310 : vector<16x16xf32>
    %c80 = arith.constant 80 : index
    %312 = memref.load %arg3[%c80] : memref<144xf32, #tpu.memory_space<smem>>
    %313 = vector.broadcast %312 : f32 to vector<16x16xf32>
    %314 = arith.mulf %313, %295 : vector<16x16xf32>
    %315 = arith.addf %281, %314 : vector<16x16xf32>
    %c98 = arith.constant 98 : index
    %316 = memref.load %arg3[%c98] : memref<144xf32, #tpu.memory_space<smem>>
    %317 = vector.broadcast %316 : f32 to vector<16x16xf32>
    %318 = arith.mulf %317, %295 : vector<16x16xf32>
    %319 = arith.addf %285, %318 : vector<16x16xf32>
    %c116 = arith.constant 116 : index
    %320 = memref.load %arg3[%c116] : memref<144xf32, #tpu.memory_space<smem>>
    %321 = vector.broadcast %320 : f32 to vector<16x16xf32>
    %322 = arith.mulf %321, %295 : vector<16x16xf32>
    %323 = arith.addf %289, %322 : vector<16x16xf32>
    %c134 = arith.constant 134 : index
    %324 = memref.load %arg3[%c134] : memref<144xf32, #tpu.memory_space<smem>>
    %325 = vector.broadcast %324 : f32 to vector<16x16xf32>
    %326 = arith.mulf %325, %295 : vector<16x16xf32>
    %327 = arith.addf %293, %326 : vector<16x16xf32>
    %c1_56 = arith.constant 1 : index
    %c0_57 = arith.constant 0 : index
    %c0_58 = arith.constant 0 : index
    %328 = vector.load %arg8[%c1_56, %c0_57, %c0_58] : memref<2x18x18xf32, #tpu.memory_space<vmem>>, vector<1x16x16xf32>
    %329 = vector.shape_cast %328 : vector<1x16x16xf32> to vector<16x16xf32>
    %c9 = arith.constant 9 : index
    %330 = memref.load %arg3[%c9] : memref<144xf32, #tpu.memory_space<smem>>
    %331 = vector.broadcast %330 : f32 to vector<16x16xf32>
    %332 = arith.mulf %331, %329 : vector<16x16xf32>
    %333 = arith.addf %299, %332 : vector<16x16xf32>
    %c27 = arith.constant 27 : index
    %334 = memref.load %arg3[%c27] : memref<144xf32, #tpu.memory_space<smem>>
    %335 = vector.broadcast %334 : f32 to vector<16x16xf32>
    %336 = arith.mulf %335, %329 : vector<16x16xf32>
    %337 = arith.addf %303, %336 : vector<16x16xf32>
    %c45 = arith.constant 45 : index
    %338 = memref.load %arg3[%c45] : memref<144xf32, #tpu.memory_space<smem>>
    %339 = vector.broadcast %338 : f32 to vector<16x16xf32>
    %340 = arith.mulf %339, %329 : vector<16x16xf32>
    %341 = arith.addf %307, %340 : vector<16x16xf32>
    %c63 = arith.constant 63 : index
    %342 = memref.load %arg3[%c63] : memref<144xf32, #tpu.memory_space<smem>>
    %343 = vector.broadcast %342 : f32 to vector<16x16xf32>
    %344 = arith.mulf %343, %329 : vector<16x16xf32>
    %345 = arith.addf %311, %344 : vector<16x16xf32>
    %c81 = arith.constant 81 : index
    %346 = memref.load %arg3[%c81] : memref<144xf32, #tpu.memory_space<smem>>
    %347 = vector.broadcast %346 : f32 to vector<16x16xf32>
    %348 = arith.mulf %347, %329 : vector<16x16xf32>
    %349 = arith.addf %315, %348 : vector<16x16xf32>
    %c99 = arith.constant 99 : index
    %350 = memref.load %arg3[%c99] : memref<144xf32, #tpu.memory_space<smem>>
    %351 = vector.broadcast %350 : f32 to vector<16x16xf32>
    %352 = arith.mulf %351, %329 : vector<16x16xf32>
    %353 = arith.addf %319, %352 : vector<16x16xf32>
    %c117 = arith.constant 117 : index
    %354 = memref.load %arg3[%c117] : memref<144xf32, #tpu.memory_space<smem>>
    %355 = vector.broadcast %354 : f32 to vector<16x16xf32>
    %356 = arith.mulf %355, %329 : vector<16x16xf32>
    %357 = arith.addf %323, %356 : vector<16x16xf32>
    %c135 = arith.constant 135 : index
    %358 = memref.load %arg3[%c135] : memref<144xf32, #tpu.memory_space<smem>>
    %359 = vector.broadcast %358 : f32 to vector<16x16xf32>
    %360 = arith.mulf %359, %329 : vector<16x16xf32>
    %361 = arith.addf %327, %360 : vector<16x16xf32>
    %c1_59 = arith.constant 1 : index
    %c0_60 = arith.constant 0 : index
    %c1_61 = arith.constant 1 : index
    %362 = vector.load %arg8[%c1_59, %c0_60, %c1_61] : memref<2x18x18xf32, #tpu.memory_space<vmem>>, vector<1x16x16xf32>
    %363 = vector.shape_cast %362 : vector<1x16x16xf32> to vector<16x16xf32>
    %c10 = arith.constant 10 : index
    %364 = memref.load %arg3[%c10] : memref<144xf32, #tpu.memory_space<smem>>
    %365 = vector.broadcast %364 : f32 to vector<16x16xf32>
    %366 = arith.mulf %365, %363 : vector<16x16xf32>
    %367 = arith.addf %333, %366 : vector<16x16xf32>
    %c28 = arith.constant 28 : index
    %368 = memref.load %arg3[%c28] : memref<144xf32, #tpu.memory_space<smem>>
    %369 = vector.broadcast %368 : f32 to vector<16x16xf32>
    %370 = arith.mulf %369, %363 : vector<16x16xf32>
    %371 = arith.addf %337, %370 : vector<16x16xf32>
    %c46 = arith.constant 46 : index
    %372 = memref.load %arg3[%c46] : memref<144xf32, #tpu.memory_space<smem>>
    %373 = vector.broadcast %372 : f32 to vector<16x16xf32>
    %374 = arith.mulf %373, %363 : vector<16x16xf32>
    %375 = arith.addf %341, %374 : vector<16x16xf32>
    %c64 = arith.constant 64 : index
    %376 = memref.load %arg3[%c64] : memref<144xf32, #tpu.memory_space<smem>>
    %377 = vector.broadcast %376 : f32 to vector<16x16xf32>
    %378 = arith.mulf %377, %363 : vector<16x16xf32>
    %379 = arith.addf %345, %378 : vector<16x16xf32>
    %c82 = arith.constant 82 : index
    %380 = memref.load %arg3[%c82] : memref<144xf32, #tpu.memory_space<smem>>
    %381 = vector.broadcast %380 : f32 to vector<16x16xf32>
    %382 = arith.mulf %381, %363 : vector<16x16xf32>
    %383 = arith.addf %349, %382 : vector<16x16xf32>
    %c100 = arith.constant 100 : index
    %384 = memref.load %arg3[%c100] : memref<144xf32, #tpu.memory_space<smem>>
    %385 = vector.broadcast %384 : f32 to vector<16x16xf32>
    %386 = arith.mulf %385, %363 : vector<16x16xf32>
    %387 = arith.addf %353, %386 : vector<16x16xf32>
    %c118 = arith.constant 118 : index
    %388 = memref.load %arg3[%c118] : memref<144xf32, #tpu.memory_space<smem>>
    %389 = vector.broadcast %388 : f32 to vector<16x16xf32>
    %390 = arith.mulf %389, %363 : vector<16x16xf32>
    %391 = arith.addf %357, %390 : vector<16x16xf32>
    %c136 = arith.constant 136 : index
    %392 = memref.load %arg3[%c136] : memref<144xf32, #tpu.memory_space<smem>>
    %393 = vector.broadcast %392 : f32 to vector<16x16xf32>
    %394 = arith.mulf %393, %363 : vector<16x16xf32>
    %395 = arith.addf %361, %394 : vector<16x16xf32>
    %c1_62 = arith.constant 1 : index
    %c0_63 = arith.constant 0 : index
    %c2_64 = arith.constant 2 : index
    %396 = vector.load %arg8[%c1_62, %c0_63, %c2_64] : memref<2x18x18xf32, #tpu.memory_space<vmem>>, vector<1x16x16xf32>
    %397 = vector.shape_cast %396 : vector<1x16x16xf32> to vector<16x16xf32>
    %c11 = arith.constant 11 : index
    %398 = memref.load %arg3[%c11] : memref<144xf32, #tpu.memory_space<smem>>
    %399 = vector.broadcast %398 : f32 to vector<16x16xf32>
    %400 = arith.mulf %399, %397 : vector<16x16xf32>
    %401 = arith.addf %367, %400 : vector<16x16xf32>
    %c29 = arith.constant 29 : index
    %402 = memref.load %arg3[%c29] : memref<144xf32, #tpu.memory_space<smem>>
    %403 = vector.broadcast %402 : f32 to vector<16x16xf32>
    %404 = arith.mulf %403, %397 : vector<16x16xf32>
    %405 = arith.addf %371, %404 : vector<16x16xf32>
    %c47 = arith.constant 47 : index
    %406 = memref.load %arg3[%c47] : memref<144xf32, #tpu.memory_space<smem>>
    %407 = vector.broadcast %406 : f32 to vector<16x16xf32>
    %408 = arith.mulf %407, %397 : vector<16x16xf32>
    %409 = arith.addf %375, %408 : vector<16x16xf32>
    %c65 = arith.constant 65 : index
    %410 = memref.load %arg3[%c65] : memref<144xf32, #tpu.memory_space<smem>>
    %411 = vector.broadcast %410 : f32 to vector<16x16xf32>
    %412 = arith.mulf %411, %397 : vector<16x16xf32>
    %413 = arith.addf %379, %412 : vector<16x16xf32>
    %c83 = arith.constant 83 : index
    %414 = memref.load %arg3[%c83] : memref<144xf32, #tpu.memory_space<smem>>
    %415 = vector.broadcast %414 : f32 to vector<16x16xf32>
    %416 = arith.mulf %415, %397 : vector<16x16xf32>
    %417 = arith.addf %383, %416 : vector<16x16xf32>
    %c101 = arith.constant 101 : index
    %418 = memref.load %arg3[%c101] : memref<144xf32, #tpu.memory_space<smem>>
    %419 = vector.broadcast %418 : f32 to vector<16x16xf32>
    %420 = arith.mulf %419, %397 : vector<16x16xf32>
    %421 = arith.addf %387, %420 : vector<16x16xf32>
    %c119 = arith.constant 119 : index
    %422 = memref.load %arg3[%c119] : memref<144xf32, #tpu.memory_space<smem>>
    %423 = vector.broadcast %422 : f32 to vector<16x16xf32>
    %424 = arith.mulf %423, %397 : vector<16x16xf32>
    %425 = arith.addf %391, %424 : vector<16x16xf32>
    %c137 = arith.constant 137 : index
    %426 = memref.load %arg3[%c137] : memref<144xf32, #tpu.memory_space<smem>>
    %427 = vector.broadcast %426 : f32 to vector<16x16xf32>
    %428 = arith.mulf %427, %397 : vector<16x16xf32>
    %429 = arith.addf %395, %428 : vector<16x16xf32>
    %c1_65 = arith.constant 1 : index
    %c1_66 = arith.constant 1 : index
    %c0_67 = arith.constant 0 : index
    %430 = vector.load %arg8[%c1_65, %c1_66, %c0_67] : memref<2x18x18xf32, #tpu.memory_space<vmem>>, vector<1x16x16xf32>
    %431 = vector.shape_cast %430 : vector<1x16x16xf32> to vector<16x16xf32>
    %c12 = arith.constant 12 : index
    %432 = memref.load %arg3[%c12] : memref<144xf32, #tpu.memory_space<smem>>
    %433 = vector.broadcast %432 : f32 to vector<16x16xf32>
    %434 = arith.mulf %433, %431 : vector<16x16xf32>
    %435 = arith.addf %401, %434 : vector<16x16xf32>
    %c30 = arith.constant 30 : index
    %436 = memref.load %arg3[%c30] : memref<144xf32, #tpu.memory_space<smem>>
    %437 = vector.broadcast %436 : f32 to vector<16x16xf32>
    %438 = arith.mulf %437, %431 : vector<16x16xf32>
    %439 = arith.addf %405, %438 : vector<16x16xf32>
    %c48 = arith.constant 48 : index
    %440 = memref.load %arg3[%c48] : memref<144xf32, #tpu.memory_space<smem>>
    %441 = vector.broadcast %440 : f32 to vector<16x16xf32>
    %442 = arith.mulf %441, %431 : vector<16x16xf32>
    %443 = arith.addf %409, %442 : vector<16x16xf32>
    %c66 = arith.constant 66 : index
    %444 = memref.load %arg3[%c66] : memref<144xf32, #tpu.memory_space<smem>>
    %445 = vector.broadcast %444 : f32 to vector<16x16xf32>
    %446 = arith.mulf %445, %431 : vector<16x16xf32>
    %447 = arith.addf %413, %446 : vector<16x16xf32>
    %c84 = arith.constant 84 : index
    %448 = memref.load %arg3[%c84] : memref<144xf32, #tpu.memory_space<smem>>
    %449 = vector.broadcast %448 : f32 to vector<16x16xf32>
    %450 = arith.mulf %449, %431 : vector<16x16xf32>
    %451 = arith.addf %417, %450 : vector<16x16xf32>
    %c102 = arith.constant 102 : index
    %452 = memref.load %arg3[%c102] : memref<144xf32, #tpu.memory_space<smem>>
    %453 = vector.broadcast %452 : f32 to vector<16x16xf32>
    %454 = arith.mulf %453, %431 : vector<16x16xf32>
    %455 = arith.addf %421, %454 : vector<16x16xf32>
    %c120 = arith.constant 120 : index
    %456 = memref.load %arg3[%c120] : memref<144xf32, #tpu.memory_space<smem>>
    %457 = vector.broadcast %456 : f32 to vector<16x16xf32>
    %458 = arith.mulf %457, %431 : vector<16x16xf32>
    %459 = arith.addf %425, %458 : vector<16x16xf32>
    %c138 = arith.constant 138 : index
    %460 = memref.load %arg3[%c138] : memref<144xf32, #tpu.memory_space<smem>>
    %461 = vector.broadcast %460 : f32 to vector<16x16xf32>
    %462 = arith.mulf %461, %431 : vector<16x16xf32>
    %463 = arith.addf %429, %462 : vector<16x16xf32>
    %c1_68 = arith.constant 1 : index
    %c1_69 = arith.constant 1 : index
    %c1_70 = arith.constant 1 : index
    %464 = vector.load %arg8[%c1_68, %c1_69, %c1_70] : memref<2x18x18xf32, #tpu.memory_space<vmem>>, vector<1x16x16xf32>
    %465 = vector.shape_cast %464 : vector<1x16x16xf32> to vector<16x16xf32>
    %c13 = arith.constant 13 : index
    %466 = memref.load %arg3[%c13] : memref<144xf32, #tpu.memory_space<smem>>
    %467 = vector.broadcast %466 : f32 to vector<16x16xf32>
    %468 = arith.mulf %467, %465 : vector<16x16xf32>
    %469 = arith.addf %435, %468 : vector<16x16xf32>
    %c31 = arith.constant 31 : index
    %470 = memref.load %arg3[%c31] : memref<144xf32, #tpu.memory_space<smem>>
    %471 = vector.broadcast %470 : f32 to vector<16x16xf32>
    %472 = arith.mulf %471, %465 : vector<16x16xf32>
    %473 = arith.addf %439, %472 : vector<16x16xf32>
    %c49 = arith.constant 49 : index
    %474 = memref.load %arg3[%c49] : memref<144xf32, #tpu.memory_space<smem>>
    %475 = vector.broadcast %474 : f32 to vector<16x16xf32>
    %476 = arith.mulf %475, %465 : vector<16x16xf32>
    %477 = arith.addf %443, %476 : vector<16x16xf32>
    %c67 = arith.constant 67 : index
    %478 = memref.load %arg3[%c67] : memref<144xf32, #tpu.memory_space<smem>>
    %479 = vector.broadcast %478 : f32 to vector<16x16xf32>
    %480 = arith.mulf %479, %465 : vector<16x16xf32>
    %481 = arith.addf %447, %480 : vector<16x16xf32>
    %c85 = arith.constant 85 : index
    %482 = memref.load %arg3[%c85] : memref<144xf32, #tpu.memory_space<smem>>
    %483 = vector.broadcast %482 : f32 to vector<16x16xf32>
    %484 = arith.mulf %483, %465 : vector<16x16xf32>
    %485 = arith.addf %451, %484 : vector<16x16xf32>
    %c103 = arith.constant 103 : index
    %486 = memref.load %arg3[%c103] : memref<144xf32, #tpu.memory_space<smem>>
    %487 = vector.broadcast %486 : f32 to vector<16x16xf32>
    %488 = arith.mulf %487, %465 : vector<16x16xf32>
    %489 = arith.addf %455, %488 : vector<16x16xf32>
    %c121 = arith.constant 121 : index
    %490 = memref.load %arg3[%c121] : memref<144xf32, #tpu.memory_space<smem>>
    %491 = vector.broadcast %490 : f32 to vector<16x16xf32>
    %492 = arith.mulf %491, %465 : vector<16x16xf32>
    %493 = arith.addf %459, %492 : vector<16x16xf32>
    %c139 = arith.constant 139 : index
    %494 = memref.load %arg3[%c139] : memref<144xf32, #tpu.memory_space<smem>>
    %495 = vector.broadcast %494 : f32 to vector<16x16xf32>
    %496 = arith.mulf %495, %465 : vector<16x16xf32>
    %497 = arith.addf %463, %496 : vector<16x16xf32>
    %c1_71 = arith.constant 1 : index
    %c1_72 = arith.constant 1 : index
    %c2_73 = arith.constant 2 : index
    %498 = vector.load %arg8[%c1_71, %c1_72, %c2_73] : memref<2x18x18xf32, #tpu.memory_space<vmem>>, vector<1x16x16xf32>
    %499 = vector.shape_cast %498 : vector<1x16x16xf32> to vector<16x16xf32>
    %c14 = arith.constant 14 : index
    %500 = memref.load %arg3[%c14] : memref<144xf32, #tpu.memory_space<smem>>
    %501 = vector.broadcast %500 : f32 to vector<16x16xf32>
    %502 = arith.mulf %501, %499 : vector<16x16xf32>
    %503 = arith.addf %469, %502 : vector<16x16xf32>
    %c32 = arith.constant 32 : index
    %504 = memref.load %arg3[%c32] : memref<144xf32, #tpu.memory_space<smem>>
    %505 = vector.broadcast %504 : f32 to vector<16x16xf32>
    %506 = arith.mulf %505, %499 : vector<16x16xf32>
    %507 = arith.addf %473, %506 : vector<16x16xf32>
    %c50 = arith.constant 50 : index
    %508 = memref.load %arg3[%c50] : memref<144xf32, #tpu.memory_space<smem>>
    %509 = vector.broadcast %508 : f32 to vector<16x16xf32>
    %510 = arith.mulf %509, %499 : vector<16x16xf32>
    %511 = arith.addf %477, %510 : vector<16x16xf32>
    %c68 = arith.constant 68 : index
    %512 = memref.load %arg3[%c68] : memref<144xf32, #tpu.memory_space<smem>>
    %513 = vector.broadcast %512 : f32 to vector<16x16xf32>
    %514 = arith.mulf %513, %499 : vector<16x16xf32>
    %515 = arith.addf %481, %514 : vector<16x16xf32>
    %c86 = arith.constant 86 : index
    %516 = memref.load %arg3[%c86] : memref<144xf32, #tpu.memory_space<smem>>
    %517 = vector.broadcast %516 : f32 to vector<16x16xf32>
    %518 = arith.mulf %517, %499 : vector<16x16xf32>
    %519 = arith.addf %485, %518 : vector<16x16xf32>
    %c104 = arith.constant 104 : index
    %520 = memref.load %arg3[%c104] : memref<144xf32, #tpu.memory_space<smem>>
    %521 = vector.broadcast %520 : f32 to vector<16x16xf32>
    %522 = arith.mulf %521, %499 : vector<16x16xf32>
    %523 = arith.addf %489, %522 : vector<16x16xf32>
    %c122 = arith.constant 122 : index
    %524 = memref.load %arg3[%c122] : memref<144xf32, #tpu.memory_space<smem>>
    %525 = vector.broadcast %524 : f32 to vector<16x16xf32>
    %526 = arith.mulf %525, %499 : vector<16x16xf32>
    %527 = arith.addf %493, %526 : vector<16x16xf32>
    %c140 = arith.constant 140 : index
    %528 = memref.load %arg3[%c140] : memref<144xf32, #tpu.memory_space<smem>>
    %529 = vector.broadcast %528 : f32 to vector<16x16xf32>
    %530 = arith.mulf %529, %499 : vector<16x16xf32>
    %531 = arith.addf %497, %530 : vector<16x16xf32>
    %c1_74 = arith.constant 1 : index
    %c2_75 = arith.constant 2 : index
    %c0_76 = arith.constant 0 : index
    %532 = vector.load %arg8[%c1_74, %c2_75, %c0_76] : memref<2x18x18xf32, #tpu.memory_space<vmem>>, vector<1x16x16xf32>
    %533 = vector.shape_cast %532 : vector<1x16x16xf32> to vector<16x16xf32>
    %c15 = arith.constant 15 : index
    %534 = memref.load %arg3[%c15] : memref<144xf32, #tpu.memory_space<smem>>
    %535 = vector.broadcast %534 : f32 to vector<16x16xf32>
    %536 = arith.mulf %535, %533 : vector<16x16xf32>
    %537 = arith.addf %503, %536 : vector<16x16xf32>
    %c33 = arith.constant 33 : index
    %538 = memref.load %arg3[%c33] : memref<144xf32, #tpu.memory_space<smem>>
    %539 = vector.broadcast %538 : f32 to vector<16x16xf32>
    %540 = arith.mulf %539, %533 : vector<16x16xf32>
    %541 = arith.addf %507, %540 : vector<16x16xf32>
    %c51 = arith.constant 51 : index
    %542 = memref.load %arg3[%c51] : memref<144xf32, #tpu.memory_space<smem>>
    %543 = vector.broadcast %542 : f32 to vector<16x16xf32>
    %544 = arith.mulf %543, %533 : vector<16x16xf32>
    %545 = arith.addf %511, %544 : vector<16x16xf32>
    %c69 = arith.constant 69 : index
    %546 = memref.load %arg3[%c69] : memref<144xf32, #tpu.memory_space<smem>>
    %547 = vector.broadcast %546 : f32 to vector<16x16xf32>
    %548 = arith.mulf %547, %533 : vector<16x16xf32>
    %549 = arith.addf %515, %548 : vector<16x16xf32>
    %c87 = arith.constant 87 : index
    %550 = memref.load %arg3[%c87] : memref<144xf32, #tpu.memory_space<smem>>
    %551 = vector.broadcast %550 : f32 to vector<16x16xf32>
    %552 = arith.mulf %551, %533 : vector<16x16xf32>
    %553 = arith.addf %519, %552 : vector<16x16xf32>
    %c105 = arith.constant 105 : index
    %554 = memref.load %arg3[%c105] : memref<144xf32, #tpu.memory_space<smem>>
    %555 = vector.broadcast %554 : f32 to vector<16x16xf32>
    %556 = arith.mulf %555, %533 : vector<16x16xf32>
    %557 = arith.addf %523, %556 : vector<16x16xf32>
    %c123 = arith.constant 123 : index
    %558 = memref.load %arg3[%c123] : memref<144xf32, #tpu.memory_space<smem>>
    %559 = vector.broadcast %558 : f32 to vector<16x16xf32>
    %560 = arith.mulf %559, %533 : vector<16x16xf32>
    %561 = arith.addf %527, %560 : vector<16x16xf32>
    %c141 = arith.constant 141 : index
    %562 = memref.load %arg3[%c141] : memref<144xf32, #tpu.memory_space<smem>>
    %563 = vector.broadcast %562 : f32 to vector<16x16xf32>
    %564 = arith.mulf %563, %533 : vector<16x16xf32>
    %565 = arith.addf %531, %564 : vector<16x16xf32>
    %c1_77 = arith.constant 1 : index
    %c2_78 = arith.constant 2 : index
    %c1_79 = arith.constant 1 : index
    %566 = vector.load %arg8[%c1_77, %c2_78, %c1_79] : memref<2x18x18xf32, #tpu.memory_space<vmem>>, vector<1x16x16xf32>
    %567 = vector.shape_cast %566 : vector<1x16x16xf32> to vector<16x16xf32>
    %c16 = arith.constant 16 : index
    %568 = memref.load %arg3[%c16] : memref<144xf32, #tpu.memory_space<smem>>
    %569 = vector.broadcast %568 : f32 to vector<16x16xf32>
    %570 = arith.mulf %569, %567 : vector<16x16xf32>
    %571 = arith.addf %537, %570 : vector<16x16xf32>
    %c34 = arith.constant 34 : index
    %572 = memref.load %arg3[%c34] : memref<144xf32, #tpu.memory_space<smem>>
    %573 = vector.broadcast %572 : f32 to vector<16x16xf32>
    %574 = arith.mulf %573, %567 : vector<16x16xf32>
    %575 = arith.addf %541, %574 : vector<16x16xf32>
    %c52 = arith.constant 52 : index
    %576 = memref.load %arg3[%c52] : memref<144xf32, #tpu.memory_space<smem>>
    %577 = vector.broadcast %576 : f32 to vector<16x16xf32>
    %578 = arith.mulf %577, %567 : vector<16x16xf32>
    %579 = arith.addf %545, %578 : vector<16x16xf32>
    %c70 = arith.constant 70 : index
    %580 = memref.load %arg3[%c70] : memref<144xf32, #tpu.memory_space<smem>>
    %581 = vector.broadcast %580 : f32 to vector<16x16xf32>
    %582 = arith.mulf %581, %567 : vector<16x16xf32>
    %583 = arith.addf %549, %582 : vector<16x16xf32>
    %c88 = arith.constant 88 : index
    %584 = memref.load %arg3[%c88] : memref<144xf32, #tpu.memory_space<smem>>
    %585 = vector.broadcast %584 : f32 to vector<16x16xf32>
    %586 = arith.mulf %585, %567 : vector<16x16xf32>
    %587 = arith.addf %553, %586 : vector<16x16xf32>
    %c106 = arith.constant 106 : index
    %588 = memref.load %arg3[%c106] : memref<144xf32, #tpu.memory_space<smem>>
    %589 = vector.broadcast %588 : f32 to vector<16x16xf32>
    %590 = arith.mulf %589, %567 : vector<16x16xf32>
    %591 = arith.addf %557, %590 : vector<16x16xf32>
    %c124 = arith.constant 124 : index
    %592 = memref.load %arg3[%c124] : memref<144xf32, #tpu.memory_space<smem>>
    %593 = vector.broadcast %592 : f32 to vector<16x16xf32>
    %594 = arith.mulf %593, %567 : vector<16x16xf32>
    %595 = arith.addf %561, %594 : vector<16x16xf32>
    %c142 = arith.constant 142 : index
    %596 = memref.load %arg3[%c142] : memref<144xf32, #tpu.memory_space<smem>>
    %597 = vector.broadcast %596 : f32 to vector<16x16xf32>
    %598 = arith.mulf %597, %567 : vector<16x16xf32>
    %599 = arith.addf %565, %598 : vector<16x16xf32>
    %c1_80 = arith.constant 1 : index
    %c2_81 = arith.constant 2 : index
    %c2_82 = arith.constant 2 : index
    %600 = vector.load %arg8[%c1_80, %c2_81, %c2_82] : memref<2x18x18xf32, #tpu.memory_space<vmem>>, vector<1x16x16xf32>
    %601 = vector.shape_cast %600 : vector<1x16x16xf32> to vector<16x16xf32>
    %c17 = arith.constant 17 : index
    %602 = memref.load %arg3[%c17] : memref<144xf32, #tpu.memory_space<smem>>
    %603 = vector.broadcast %602 : f32 to vector<16x16xf32>
    %604 = arith.mulf %603, %601 : vector<16x16xf32>
    %605 = arith.addf %571, %604 : vector<16x16xf32>
    %c35 = arith.constant 35 : index
    %606 = memref.load %arg3[%c35] : memref<144xf32, #tpu.memory_space<smem>>
    %607 = vector.broadcast %606 : f32 to vector<16x16xf32>
    %608 = arith.mulf %607, %601 : vector<16x16xf32>
    %609 = arith.addf %575, %608 : vector<16x16xf32>
    %c53 = arith.constant 53 : index
    %610 = memref.load %arg3[%c53] : memref<144xf32, #tpu.memory_space<smem>>
    %611 = vector.broadcast %610 : f32 to vector<16x16xf32>
    %612 = arith.mulf %611, %601 : vector<16x16xf32>
    %613 = arith.addf %579, %612 : vector<16x16xf32>
    %c71 = arith.constant 71 : index
    %614 = memref.load %arg3[%c71] : memref<144xf32, #tpu.memory_space<smem>>
    %615 = vector.broadcast %614 : f32 to vector<16x16xf32>
    %616 = arith.mulf %615, %601 : vector<16x16xf32>
    %617 = arith.addf %583, %616 : vector<16x16xf32>
    %c89 = arith.constant 89 : index
    %618 = memref.load %arg3[%c89] : memref<144xf32, #tpu.memory_space<smem>>
    %619 = vector.broadcast %618 : f32 to vector<16x16xf32>
    %620 = arith.mulf %619, %601 : vector<16x16xf32>
    %621 = arith.addf %587, %620 : vector<16x16xf32>
    %c107 = arith.constant 107 : index
    %622 = memref.load %arg3[%c107] : memref<144xf32, #tpu.memory_space<smem>>
    %623 = vector.broadcast %622 : f32 to vector<16x16xf32>
    %624 = arith.mulf %623, %601 : vector<16x16xf32>
    %625 = arith.addf %591, %624 : vector<16x16xf32>
    %c125 = arith.constant 125 : index
    %626 = memref.load %arg3[%c125] : memref<144xf32, #tpu.memory_space<smem>>
    %627 = vector.broadcast %626 : f32 to vector<16x16xf32>
    %628 = arith.mulf %627, %601 : vector<16x16xf32>
    %629 = arith.addf %595, %628 : vector<16x16xf32>
    %c143 = arith.constant 143 : index
    %630 = memref.load %arg3[%c143] : memref<144xf32, #tpu.memory_space<smem>>
    %631 = vector.broadcast %630 : f32 to vector<16x16xf32>
    %632 = arith.mulf %631, %601 : vector<16x16xf32>
    %633 = arith.addf %599, %632 : vector<16x16xf32>
    %c0_83 = arith.constant 0 : index
    %634 = memref.load %arg4[%c0_83] : memref<8xf32, #tpu.memory_space<smem>>
    %635 = vector.broadcast %634 : f32 to vector<16x16xf32>
    %636 = arith.addf %605, %635 : vector<16x16xf32>
    %637 = arith.negf %636 : vector<16x16xf32>
    %638 = math.exp %637 : vector<16x16xf32>
    %cst_84 = arith.constant 1.000000e+00 : f32
    %639 = vector.broadcast %cst_84 : f32 to vector<16x16xf32>
    %640 = arith.addf %639, %638 : vector<16x16xf32>
    %641 = arith.divf %639, %640 : vector<16x16xf32>
    %642 = arith.mulf %636, %641 : vector<16x16xf32>
    %c0_85 = arith.constant 0 : index
    %c1_86 = arith.constant 1 : index
    %c1_87 = arith.constant 1 : index
    %643 = vector.load %arg9[%c0_85, %c1_86, %c1_87] : memref<8x18x18xf32, #tpu.memory_space<vmem>>, vector<1x16x16xf32>
    %644 = vector.shape_cast %643 : vector<1x16x16xf32> to vector<16x16xf32>
    %645 = vector.shape_cast %642 : vector<16x16xf32> to vector<1x16x16xf32>
    tpu.vector_store %arg9[%c0_85, %c1_86, %c1_87], %645 {strides = array<i32>} : memref<8x18x18xf32, #tpu.memory_space<vmem>>, vector<1x16x16xf32>,
    %c1_88 = arith.constant 1 : index
    %646 = memref.load %arg4[%c1_88] : memref<8xf32, #tpu.memory_space<smem>>
    %647 = vector.broadcast %646 : f32 to vector<16x16xf32>
    %648 = arith.addf %609, %647 : vector<16x16xf32>
    %649 = arith.negf %648 : vector<16x16xf32>
    %650 = math.exp %649 : vector<16x16xf32>
    %cst_89 = arith.constant 1.000000e+00 : f32
    %651 = vector.broadcast %cst_89 : f32 to vector<16x16xf32>
    %652 = arith.addf %651, %650 : vector<16x16xf32>
    %653 = arith.divf %651, %652 : vector<16x16xf32>
    %654 = arith.mulf %648, %653 : vector<16x16xf32>
    %c1_90 = arith.constant 1 : index
    %c1_91 = arith.constant 1 : index
    %c1_92 = arith.constant 1 : index
    %655 = vector.load %arg9[%c1_90, %c1_91, %c1_92] : memref<8x18x18xf32, #tpu.memory_space<vmem>>, vector<1x16x16xf32>
    %656 = vector.shape_cast %655 : vector<1x16x16xf32> to vector<16x16xf32>
    %657 = vector.shape_cast %654 : vector<16x16xf32> to vector<1x16x16xf32>
    tpu.vector_store %arg9[%c1_90, %c1_91, %c1_92], %657 {strides = array<i32>} : memref<8x18x18xf32, #tpu.memory_space<vmem>>, vector<1x16x16xf32>,
    %c2_93 = arith.constant 2 : index
    %658 = memref.load %arg4[%c2_93] : memref<8xf32, #tpu.memory_space<smem>>
    %659 = vector.broadcast %658 : f32 to vector<16x16xf32>
    %660 = arith.addf %613, %659 : vector<16x16xf32>
    %661 = arith.negf %660 : vector<16x16xf32>
    %662 = math.exp %661 : vector<16x16xf32>
    %cst_94 = arith.constant 1.000000e+00 : f32
    %663 = vector.broadcast %cst_94 : f32 to vector<16x16xf32>
    %664 = arith.addf %663, %662 : vector<16x16xf32>
    %665 = arith.divf %663, %664 : vector<16x16xf32>
    %666 = arith.mulf %660, %665 : vector<16x16xf32>
    %c2_95 = arith.constant 2 : index
    %c1_96 = arith.constant 1 : index
    %c1_97 = arith.constant 1 : index
    %667 = vector.load %arg9[%c2_95, %c1_96, %c1_97] : memref<8x18x18xf32, #tpu.memory_space<vmem>>, vector<1x16x16xf32>
    %668 = vector.shape_cast %667 : vector<1x16x16xf32> to vector<16x16xf32>
    %669 = vector.shape_cast %666 : vector<16x16xf32> to vector<1x16x16xf32>
    tpu.vector_store %arg9[%c2_95, %c1_96, %c1_97], %669 {strides = array<i32>} : memref<8x18x18xf32, #tpu.memory_space<vmem>>, vector<1x16x16xf32>,
    %c3_98 = arith.constant 3 : index
    %670 = memref.load %arg4[%c3_98] : memref<8xf32, #tpu.memory_space<smem>>
    %671 = vector.broadcast %670 : f32 to vector<16x16xf32>
    %672 = arith.addf %617, %671 : vector<16x16xf32>
    %673 = arith.negf %672 : vector<16x16xf32>
    %674 = math.exp %673 : vector<16x16xf32>
    %cst_99 = arith.constant 1.000000e+00 : f32
    %675 = vector.broadcast %cst_99 : f32 to vector<16x16xf32>
    %676 = arith.addf %675, %674 : vector<16x16xf32>
    %677 = arith.divf %675, %676 : vector<16x16xf32>
    %678 = arith.mulf %672, %677 : vector<16x16xf32>
    %c3_100 = arith.constant 3 : index
    %c1_101 = arith.constant 1 : index
    %c1_102 = arith.constant 1 : index
    %679 = vector.load %arg9[%c3_100, %c1_101, %c1_102] : memref<8x18x18xf32, #tpu.memory_space<vmem>>, vector<1x16x16xf32>
    %680 = vector.shape_cast %679 : vector<1x16x16xf32> to vector<16x16xf32>
    %681 = vector.shape_cast %678 : vector<16x16xf32> to vector<1x16x16xf32>
    tpu.vector_store %arg9[%c3_100, %c1_101, %c1_102], %681 {strides = array<i32>} : memref<8x18x18xf32, #tpu.memory_space<vmem>>, vector<1x16x16xf32>,
    %c4_103 = arith.constant 4 : index
    %682 = memref.load %arg4[%c4_103] : memref<8xf32, #tpu.memory_space<smem>>
    %683 = vector.broadcast %682 : f32 to vector<16x16xf32>
    %684 = arith.addf %621, %683 : vector<16x16xf32>
    %685 = arith.negf %684 : vector<16x16xf32>
    %686 = math.exp %685 : vector<16x16xf32>
    %cst_104 = arith.constant 1.000000e+00 : f32
    %687 = vector.broadcast %cst_104 : f32 to vector<16x16xf32>
    %688 = arith.addf %687, %686 : vector<16x16xf32>
    %689 = arith.divf %687, %688 : vector<16x16xf32>
    %690 = arith.mulf %684, %689 : vector<16x16xf32>
    %c4_105 = arith.constant 4 : index
    %c1_106 = arith.constant 1 : index
    %c1_107 = arith.constant 1 : index
    %691 = vector.load %arg9[%c4_105, %c1_106, %c1_107] : memref<8x18x18xf32, #tpu.memory_space<vmem>>, vector<1x16x16xf32>
    %692 = vector.shape_cast %691 : vector<1x16x16xf32> to vector<16x16xf32>
    %693 = vector.shape_cast %690 : vector<16x16xf32> to vector<1x16x16xf32>
    tpu.vector_store %arg9[%c4_105, %c1_106, %c1_107], %693 {strides = array<i32>} : memref<8x18x18xf32, #tpu.memory_space<vmem>>, vector<1x16x16xf32>,
    %c5_108 = arith.constant 5 : index
    %694 = memref.load %arg4[%c5_108] : memref<8xf32, #tpu.memory_space<smem>>
    %695 = vector.broadcast %694 : f32 to vector<16x16xf32>
    %696 = arith.addf %625, %695 : vector<16x16xf32>
    %697 = arith.negf %696 : vector<16x16xf32>
    %698 = math.exp %697 : vector<16x16xf32>
    %cst_109 = arith.constant 1.000000e+00 : f32
    %699 = vector.broadcast %cst_109 : f32 to vector<16x16xf32>
    %700 = arith.addf %699, %698 : vector<16x16xf32>
    %701 = arith.divf %699, %700 : vector<16x16xf32>
    %702 = arith.mulf %696, %701 : vector<16x16xf32>
    %c5_110 = arith.constant 5 : index
    %c1_111 = arith.constant 1 : index
    %c1_112 = arith.constant 1 : index
    %703 = vector.load %arg9[%c5_110, %c1_111, %c1_112] : memref<8x18x18xf32, #tpu.memory_space<vmem>>, vector<1x16x16xf32>
    %704 = vector.shape_cast %703 : vector<1x16x16xf32> to vector<16x16xf32>
    %705 = vector.shape_cast %702 : vector<16x16xf32> to vector<1x16x16xf32>
    tpu.vector_store %arg9[%c5_110, %c1_111, %c1_112], %705 {strides = array<i32>} : memref<8x18x18xf32, #tpu.memory_space<vmem>>, vector<1x16x16xf32>,
    %c6_113 = arith.constant 6 : index
    %706 = memref.load %arg4[%c6_113] : memref<8xf32, #tpu.memory_space<smem>>
    %707 = vector.broadcast %706 : f32 to vector<16x16xf32>
    %708 = arith.addf %629, %707 : vector<16x16xf32>
    %709 = arith.negf %708 : vector<16x16xf32>
    %710 = math.exp %709 : vector<16x16xf32>
    %cst_114 = arith.constant 1.000000e+00 : f32
    %711 = vector.broadcast %cst_114 : f32 to vector<16x16xf32>
    %712 = arith.addf %711, %710 : vector<16x16xf32>
    %713 = arith.divf %711, %712 : vector<16x16xf32>
    %714 = arith.mulf %708, %713 : vector<16x16xf32>
    %c6_115 = arith.constant 6 : index
    %c1_116 = arith.constant 1 : index
    %c1_117 = arith.constant 1 : index
    %715 = vector.load %arg9[%c6_115, %c1_116, %c1_117] : memref<8x18x18xf32, #tpu.memory_space<vmem>>, vector<1x16x16xf32>
    %716 = vector.shape_cast %715 : vector<1x16x16xf32> to vector<16x16xf32>
    %717 = vector.shape_cast %714 : vector<16x16xf32> to vector<1x16x16xf32>
    tpu.vector_store %arg9[%c6_115, %c1_116, %c1_117], %717 {strides = array<i32>} : memref<8x18x18xf32, #tpu.memory_space<vmem>>, vector<1x16x16xf32>,
    %c7_118 = arith.constant 7 : index
    %718 = memref.load %arg4[%c7_118] : memref<8xf32, #tpu.memory_space<smem>>
    %719 = vector.broadcast %718 : f32 to vector<16x16xf32>
    %720 = arith.addf %633, %719 : vector<16x16xf32>
    %721 = arith.negf %720 : vector<16x16xf32>
    %722 = math.exp %721 : vector<16x16xf32>
    %cst_119 = arith.constant 1.000000e+00 : f32
    %723 = vector.broadcast %cst_119 : f32 to vector<16x16xf32>
    %724 = arith.addf %723, %722 : vector<16x16xf32>
    %725 = arith.divf %723, %724 : vector<16x16xf32>
    %726 = arith.mulf %720, %725 : vector<16x16xf32>
    %c7_120 = arith.constant 7 : index
    %c1_121 = arith.constant 1 : index
    %c1_122 = arith.constant 1 : index
    %727 = vector.load %arg9[%c7_120, %c1_121, %c1_122] : memref<8x18x18xf32, #tpu.memory_space<vmem>>, vector<1x16x16xf32>
    %728 = vector.shape_cast %727 : vector<1x16x16xf32> to vector<16x16xf32>
    %729 = vector.shape_cast %726 : vector<16x16xf32> to vector<1x16x16xf32>
    tpu.vector_store %arg9[%c7_120, %c1_121, %c1_122], %729 {strides = array<i32>} : memref<8x18x18xf32, #tpu.memory_space<vmem>>, vector<1x16x16xf32>,
    %cst_123 = arith.constant 0.000000e+00 : f32
    %730 = vector.broadcast %cst_123 : f32 to vector<16x16xf32>
    %cst_124 = arith.constant 0.000000e+00 : f32
    %731 = vector.broadcast %cst_124 : f32 to vector<16x16xf32>
    %c0_125 = arith.constant 0 : index
    %c0_126 = arith.constant 0 : index
    %c0_127 = arith.constant 0 : index
    %732 = vector.load %arg9[%c0_125, %c0_126, %c0_127] : memref<8x18x18xf32, #tpu.memory_space<vmem>>, vector<1x16x16xf32>
    %733 = vector.shape_cast %732 : vector<1x16x16xf32> to vector<16x16xf32>
    %c0_128 = arith.constant 0 : index
    %734 = memref.load %arg5[%c0_128] : memref<144xf32, #tpu.memory_space<smem>>
    %735 = vector.broadcast %734 : f32 to vector<16x16xf32>
    %736 = arith.mulf %735, %733 : vector<16x16xf32>
    %737 = arith.addf %730, %736 : vector<16x16xf32>
    %c72_129 = arith.constant 72 : index
    %738 = memref.load %arg5[%c72_129] : memref<144xf32, #tpu.memory_space<smem>>
    %739 = vector.broadcast %738 : f32 to vector<16x16xf32>
    %740 = arith.mulf %739, %733 : vector<16x16xf32>
    %741 = arith.addf %731, %740 : vector<16x16xf32>
    %c0_130 = arith.constant 0 : index
    %c0_131 = arith.constant 0 : index
    %c1_132 = arith.constant 1 : index
    %742 = vector.load %arg9[%c0_130, %c0_131, %c1_132] : memref<8x18x18xf32, #tpu.memory_space<vmem>>, vector<1x16x16xf32>
    %743 = vector.shape_cast %742 : vector<1x16x16xf32> to vector<16x16xf32>
    %c1_133 = arith.constant 1 : index
    %744 = memref.load %arg5[%c1_133] : memref<144xf32, #tpu.memory_space<smem>>
    %745 = vector.broadcast %744 : f32 to vector<16x16xf32>
    %746 = arith.mulf %745, %743 : vector<16x16xf32>
    %747 = arith.addf %737, %746 : vector<16x16xf32>
    %c73_134 = arith.constant 73 : index
    %748 = memref.load %arg5[%c73_134] : memref<144xf32, #tpu.memory_space<smem>>
    %749 = vector.broadcast %748 : f32 to vector<16x16xf32>
    %750 = arith.mulf %749, %743 : vector<16x16xf32>
    %751 = arith.addf %741, %750 : vector<16x16xf32>
    %c0_135 = arith.constant 0 : index
    %c0_136 = arith.constant 0 : index
    %c2_137 = arith.constant 2 : index
    %752 = vector.load %arg9[%c0_135, %c0_136, %c2_137] : memref<8x18x18xf32, #tpu.memory_space<vmem>>, vector<1x16x16xf32>
    %753 = vector.shape_cast %752 : vector<1x16x16xf32> to vector<16x16xf32>
    %c2_138 = arith.constant 2 : index
    %754 = memref.load %arg5[%c2_138] : memref<144xf32, #tpu.memory_space<smem>>
    %755 = vector.broadcast %754 : f32 to vector<16x16xf32>
    %756 = arith.mulf %755, %753 : vector<16x16xf32>
    %757 = arith.addf %747, %756 : vector<16x16xf32>
    %c74_139 = arith.constant 74 : index
    %758 = memref.load %arg5[%c74_139] : memref<144xf32, #tpu.memory_space<smem>>
    %759 = vector.broadcast %758 : f32 to vector<16x16xf32>
    %760 = arith.mulf %759, %753 : vector<16x16xf32>
    %761 = arith.addf %751, %760 : vector<16x16xf32>
    %c0_140 = arith.constant 0 : index
    %c1_141 = arith.constant 1 : index
    %c0_142 = arith.constant 0 : index
    %762 = vector.load %arg9[%c0_140, %c1_141, %c0_142] : memref<8x18x18xf32, #tpu.memory_space<vmem>>, vector<1x16x16xf32>
    %763 = vector.shape_cast %762 : vector<1x16x16xf32> to vector<16x16xf32>
    %c3_143 = arith.constant 3 : index
    %764 = memref.load %arg5[%c3_143] : memref<144xf32, #tpu.memory_space<smem>>
    %765 = vector.broadcast %764 : f32 to vector<16x16xf32>
    %766 = arith.mulf %765, %763 : vector<16x16xf32>
    %767 = arith.addf %757, %766 : vector<16x16xf32>
    %c75_144 = arith.constant 75 : index
    %768 = memref.load %arg5[%c75_144] : memref<144xf32, #tpu.memory_space<smem>>
    %769 = vector.broadcast %768 : f32 to vector<16x16xf32>
    %770 = arith.mulf %769, %763 : vector<16x16xf32>
    %771 = arith.addf %761, %770 : vector<16x16xf32>
    %c0_145 = arith.constant 0 : index
    %c1_146 = arith.constant 1 : index
    %c1_147 = arith.constant 1 : index
    %772 = vector.load %arg9[%c0_145, %c1_146, %c1_147] : memref<8x18x18xf32, #tpu.memory_space<vmem>>, vector<1x16x16xf32>
    %773 = vector.shape_cast %772 : vector<1x16x16xf32> to vector<16x16xf32>
    %c4_148 = arith.constant 4 : index
    %774 = memref.load %arg5[%c4_148] : memref<144xf32, #tpu.memory_space<smem>>
    %775 = vector.broadcast %774 : f32 to vector<16x16xf32>
    %776 = arith.mulf %775, %773 : vector<16x16xf32>
    %777 = arith.addf %767, %776 : vector<16x16xf32>
    %c76_149 = arith.constant 76 : index
    %778 = memref.load %arg5[%c76_149] : memref<144xf32, #tpu.memory_space<smem>>
    %779 = vector.broadcast %778 : f32 to vector<16x16xf32>
    %780 = arith.mulf %779, %773 : vector<16x16xf32>
    %781 = arith.addf %771, %780 : vector<16x16xf32>
    %c0_150 = arith.constant 0 : index
    %c1_151 = arith.constant 1 : index
    %c2_152 = arith.constant 2 : index
    %782 = vector.load %arg9[%c0_150, %c1_151, %c2_152] : memref<8x18x18xf32, #tpu.memory_space<vmem>>, vector<1x16x16xf32>
    %783 = vector.shape_cast %782 : vector<1x16x16xf32> to vector<16x16xf32>
    %c5_153 = arith.constant 5 : index
    %784 = memref.load %arg5[%c5_153] : memref<144xf32, #tpu.memory_space<smem>>
    %785 = vector.broadcast %784 : f32 to vector<16x16xf32>
    %786 = arith.mulf %785, %783 : vector<16x16xf32>
    %787 = arith.addf %777, %786 : vector<16x16xf32>
    %c77_154 = arith.constant 77 : index
    %788 = memref.load %arg5[%c77_154] : memref<144xf32, #tpu.memory_space<smem>>
    %789 = vector.broadcast %788 : f32 to vector<16x16xf32>
    %790 = arith.mulf %789, %783 : vector<16x16xf32>
    %791 = arith.addf %781, %790 : vector<16x16xf32>
    %c0_155 = arith.constant 0 : index
    %c2_156 = arith.constant 2 : index
    %c0_157 = arith.constant 0 : index
    %792 = vector.load %arg9[%c0_155, %c2_156, %c0_157] : memref<8x18x18xf32, #tpu.memory_space<vmem>>, vector<1x16x16xf32>
    %793 = vector.shape_cast %792 : vector<1x16x16xf32> to vector<16x16xf32>
    %c6_158 = arith.constant 6 : index
    %794 = memref.load %arg5[%c6_158] : memref<144xf32, #tpu.memory_space<smem>>
    %795 = vector.broadcast %794 : f32 to vector<16x16xf32>
    %796 = arith.mulf %795, %793 : vector<16x16xf32>
    %797 = arith.addf %787, %796 : vector<16x16xf32>
    %c78_159 = arith.constant 78 : index
    %798 = memref.load %arg5[%c78_159] : memref<144xf32, #tpu.memory_space<smem>>
    %799 = vector.broadcast %798 : f32 to vector<16x16xf32>
    %800 = arith.mulf %799, %793 : vector<16x16xf32>
    %801 = arith.addf %791, %800 : vector<16x16xf32>
    %c0_160 = arith.constant 0 : index
    %c2_161 = arith.constant 2 : index
    %c1_162 = arith.constant 1 : index
    %802 = vector.load %arg9[%c0_160, %c2_161, %c1_162] : memref<8x18x18xf32, #tpu.memory_space<vmem>>, vector<1x16x16xf32>
    %803 = vector.shape_cast %802 : vector<1x16x16xf32> to vector<16x16xf32>
    %c7_163 = arith.constant 7 : index
    %804 = memref.load %arg5[%c7_163] : memref<144xf32, #tpu.memory_space<smem>>
    %805 = vector.broadcast %804 : f32 to vector<16x16xf32>
    %806 = arith.mulf %805, %803 : vector<16x16xf32>
    %807 = arith.addf %797, %806 : vector<16x16xf32>
    %c79_164 = arith.constant 79 : index
    %808 = memref.load %arg5[%c79_164] : memref<144xf32, #tpu.memory_space<smem>>
    %809 = vector.broadcast %808 : f32 to vector<16x16xf32>
    %810 = arith.mulf %809, %803 : vector<16x16xf32>
    %811 = arith.addf %801, %810 : vector<16x16xf32>
    %c0_165 = arith.constant 0 : index
    %c2_166 = arith.constant 2 : index
    %c2_167 = arith.constant 2 : index
    %812 = vector.load %arg9[%c0_165, %c2_166, %c2_167] : memref<8x18x18xf32, #tpu.memory_space<vmem>>, vector<1x16x16xf32>
    %813 = vector.shape_cast %812 : vector<1x16x16xf32> to vector<16x16xf32>
    %c8_168 = arith.constant 8 : index
    %814 = memref.load %arg5[%c8_168] : memref<144xf32, #tpu.memory_space<smem>>
    %815 = vector.broadcast %814 : f32 to vector<16x16xf32>
    %816 = arith.mulf %815, %813 : vector<16x16xf32>
    %817 = arith.addf %807, %816 : vector<16x16xf32>
    %c80_169 = arith.constant 80 : index
    %818 = memref.load %arg5[%c80_169] : memref<144xf32, #tpu.memory_space<smem>>
    %819 = vector.broadcast %818 : f32 to vector<16x16xf32>
    %820 = arith.mulf %819, %813 : vector<16x16xf32>
    %821 = arith.addf %811, %820 : vector<16x16xf32>
    %c1_170 = arith.constant 1 : index
    %c0_171 = arith.constant 0 : index
    %c0_172 = arith.constant 0 : index
    %822 = vector.load %arg9[%c1_170, %c0_171, %c0_172] : memref<8x18x18xf32, #tpu.memory_space<vmem>>, vector<1x16x16xf32>
    %823 = vector.shape_cast %822 : vector<1x16x16xf32> to vector<16x16xf32>
    %c9_173 = arith.constant 9 : index
    %824 = memref.load %arg5[%c9_173] : memref<144xf32, #tpu.memory_space<smem>>
    %825 = vector.broadcast %824 : f32 to vector<16x16xf32>
    %826 = arith.mulf %825, %823 : vector<16x16xf32>
    %827 = arith.addf %817, %826 : vector<16x16xf32>
    %c81_174 = arith.constant 81 : index
    %828 = memref.load %arg5[%c81_174] : memref<144xf32, #tpu.memory_space<smem>>
    %829 = vector.broadcast %828 : f32 to vector<16x16xf32>
    %830 = arith.mulf %829, %823 : vector<16x16xf32>
    %831 = arith.addf %821, %830 : vector<16x16xf32>
    %c1_175 = arith.constant 1 : index
    %c0_176 = arith.constant 0 : index
    %c1_177 = arith.constant 1 : index
    %832 = vector.load %arg9[%c1_175, %c0_176, %c1_177] : memref<8x18x18xf32, #tpu.memory_space<vmem>>, vector<1x16x16xf32>
    %833 = vector.shape_cast %832 : vector<1x16x16xf32> to vector<16x16xf32>
    %c10_178 = arith.constant 10 : index
    %834 = memref.load %arg5[%c10_178] : memref<144xf32, #tpu.memory_space<smem>>
    %835 = vector.broadcast %834 : f32 to vector<16x16xf32>
    %836 = arith.mulf %835, %833 : vector<16x16xf32>
    %837 = arith.addf %827, %836 : vector<16x16xf32>
    %c82_179 = arith.constant 82 : index
    %838 = memref.load %arg5[%c82_179] : memref<144xf32, #tpu.memory_space<smem>>
    %839 = vector.broadcast %838 : f32 to vector<16x16xf32>
    %840 = arith.mulf %839, %833 : vector<16x16xf32>
    %841 = arith.addf %831, %840 : vector<16x16xf32>
    %c1_180 = arith.constant 1 : index
    %c0_181 = arith.constant 0 : index
    %c2_182 = arith.constant 2 : index
    %842 = vector.load %arg9[%c1_180, %c0_181, %c2_182] : memref<8x18x18xf32, #tpu.memory_space<vmem>>, vector<1x16x16xf32>
    %843 = vector.shape_cast %842 : vector<1x16x16xf32> to vector<16x16xf32>
    %c11_183 = arith.constant 11 : index
    %844 = memref.load %arg5[%c11_183] : memref<144xf32, #tpu.memory_space<smem>>
    %845 = vector.broadcast %844 : f32 to vector<16x16xf32>
    %846 = arith.mulf %845, %843 : vector<16x16xf32>
    %847 = arith.addf %837, %846 : vector<16x16xf32>
    %c83_184 = arith.constant 83 : index
    %848 = memref.load %arg5[%c83_184] : memref<144xf32, #tpu.memory_space<smem>>
    %849 = vector.broadcast %848 : f32 to vector<16x16xf32>
    %850 = arith.mulf %849, %843 : vector<16x16xf32>
    %851 = arith.addf %841, %850 : vector<16x16xf32>
    %c1_185 = arith.constant 1 : index
    %c1_186 = arith.constant 1 : index
    %c0_187 = arith.constant 0 : index
    %852 = vector.load %arg9[%c1_185, %c1_186, %c0_187] : memref<8x18x18xf32, #tpu.memory_space<vmem>>, vector<1x16x16xf32>
    %853 = vector.shape_cast %852 : vector<1x16x16xf32> to vector<16x16xf32>
    %c12_188 = arith.constant 12 : index
    %854 = memref.load %arg5[%c12_188] : memref<144xf32, #tpu.memory_space<smem>>
    %855 = vector.broadcast %854 : f32 to vector<16x16xf32>
    %856 = arith.mulf %855, %853 : vector<16x16xf32>
    %857 = arith.addf %847, %856 : vector<16x16xf32>
    %c84_189 = arith.constant 84 : index
    %858 = memref.load %arg5[%c84_189] : memref<144xf32, #tpu.memory_space<smem>>
    %859 = vector.broadcast %858 : f32 to vector<16x16xf32>
    %860 = arith.mulf %859, %853 : vector<16x16xf32>
    %861 = arith.addf %851, %860 : vector<16x16xf32>
    %c1_190 = arith.constant 1 : index
    %c1_191 = arith.constant 1 : index
    %c1_192 = arith.constant 1 : index
    %862 = vector.load %arg9[%c1_190, %c1_191, %c1_192] : memref<8x18x18xf32, #tpu.memory_space<vmem>>, vector<1x16x16xf32>
    %863 = vector.shape_cast %862 : vector<1x16x16xf32> to vector<16x16xf32>
    %c13_193 = arith.constant 13 : index
    %864 = memref.load %arg5[%c13_193] : memref<144xf32, #tpu.memory_space<smem>>
    %865 = vector.broadcast %864 : f32 to vector<16x16xf32>
    %866 = arith.mulf %865, %863 : vector<16x16xf32>
    %867 = arith.addf %857, %866 : vector<16x16xf32>
    %c85_194 = arith.constant 85 : index
    %868 = memref.load %arg5[%c85_194] : memref<144xf32, #tpu.memory_space<smem>>
    %869 = vector.broadcast %868 : f32 to vector<16x16xf32>
    %870 = arith.mulf %869, %863 : vector<16x16xf32>
    %871 = arith.addf %861, %870 : vector<16x16xf32>
    %c1_195 = arith.constant 1 : index
    %c1_196 = arith.constant 1 : index
    %c2_197 = arith.constant 2 : index
    %872 = vector.load %arg9[%c1_195, %c1_196, %c2_197] : memref<8x18x18xf32, #tpu.memory_space<vmem>>, vector<1x16x16xf32>
    %873 = vector.shape_cast %872 : vector<1x16x16xf32> to vector<16x16xf32>
    %c14_198 = arith.constant 14 : index
    %874 = memref.load %arg5[%c14_198] : memref<144xf32, #tpu.memory_space<smem>>
    %875 = vector.broadcast %874 : f32 to vector<16x16xf32>
    %876 = arith.mulf %875, %873 : vector<16x16xf32>
    %877 = arith.addf %867, %876 : vector<16x16xf32>
    %c86_199 = arith.constant 86 : index
    %878 = memref.load %arg5[%c86_199] : memref<144xf32, #tpu.memory_space<smem>>
    %879 = vector.broadcast %878 : f32 to vector<16x16xf32>
    %880 = arith.mulf %879, %873 : vector<16x16xf32>
    %881 = arith.addf %871, %880 : vector<16x16xf32>
    %c1_200 = arith.constant 1 : index
    %c2_201 = arith.constant 2 : index
    %c0_202 = arith.constant 0 : index
    %882 = vector.load %arg9[%c1_200, %c2_201, %c0_202] : memref<8x18x18xf32, #tpu.memory_space<vmem>>, vector<1x16x16xf32>
    %883 = vector.shape_cast %882 : vector<1x16x16xf32> to vector<16x16xf32>
    %c15_203 = arith.constant 15 : index
    %884 = memref.load %arg5[%c15_203] : memref<144xf32, #tpu.memory_space<smem>>
    %885 = vector.broadcast %884 : f32 to vector<16x16xf32>
    %886 = arith.mulf %885, %883 : vector<16x16xf32>
    %887 = arith.addf %877, %886 : vector<16x16xf32>
    %c87_204 = arith.constant 87 : index
    %888 = memref.load %arg5[%c87_204] : memref<144xf32, #tpu.memory_space<smem>>
    %889 = vector.broadcast %888 : f32 to vector<16x16xf32>
    %890 = arith.mulf %889, %883 : vector<16x16xf32>
    %891 = arith.addf %881, %890 : vector<16x16xf32>
    %c1_205 = arith.constant 1 : index
    %c2_206 = arith.constant 2 : index
    %c1_207 = arith.constant 1 : index
    %892 = vector.load %arg9[%c1_205, %c2_206, %c1_207] : memref<8x18x18xf32, #tpu.memory_space<vmem>>, vector<1x16x16xf32>
    %893 = vector.shape_cast %892 : vector<1x16x16xf32> to vector<16x16xf32>
    %c16_208 = arith.constant 16 : index
    %894 = memref.load %arg5[%c16_208] : memref<144xf32, #tpu.memory_space<smem>>
    %895 = vector.broadcast %894 : f32 to vector<16x16xf32>
    %896 = arith.mulf %895, %893 : vector<16x16xf32>
    %897 = arith.addf %887, %896 : vector<16x16xf32>
    %c88_209 = arith.constant 88 : index
    %898 = memref.load %arg5[%c88_209] : memref<144xf32, #tpu.memory_space<smem>>
    %899 = vector.broadcast %898 : f32 to vector<16x16xf32>
    %900 = arith.mulf %899, %893 : vector<16x16xf32>
    %901 = arith.addf %891, %900 : vector<16x16xf32>
    %c1_210 = arith.constant 1 : index
    %c2_211 = arith.constant 2 : index
    %c2_212 = arith.constant 2 : index
    %902 = vector.load %arg9[%c1_210, %c2_211, %c2_212] : memref<8x18x18xf32, #tpu.memory_space<vmem>>, vector<1x16x16xf32>
    %903 = vector.shape_cast %902 : vector<1x16x16xf32> to vector<16x16xf32>
    %c17_213 = arith.constant 17 : index
    %904 = memref.load %arg5[%c17_213] : memref<144xf32, #tpu.memory_space<smem>>
    %905 = vector.broadcast %904 : f32 to vector<16x16xf32>
    %906 = arith.mulf %905, %903 : vector<16x16xf32>
    %907 = arith.addf %897, %906 : vector<16x16xf32>
    %c89_214 = arith.constant 89 : index
    %908 = memref.load %arg5[%c89_214] : memref<144xf32, #tpu.memory_space<smem>>
    %909 = vector.broadcast %908 : f32 to vector<16x16xf32>
    %910 = arith.mulf %909, %903 : vector<16x16xf32>
    %911 = arith.addf %901, %910 : vector<16x16xf32>
    %c2_215 = arith.constant 2 : index
    %c0_216 = arith.constant 0 : index
    %c0_217 = arith.constant 0 : index
    %912 = vector.load %arg9[%c2_215, %c0_216, %c0_217] : memref<8x18x18xf32, #tpu.memory_space<vmem>>, vector<1x16x16xf32>
    %913 = vector.shape_cast %912 : vector<1x16x16xf32> to vector<16x16xf32>
    %c18_218 = arith.constant 18 : index
    %914 = memref.load %arg5[%c18_218] : memref<144xf32, #tpu.memory_space<smem>>
    %915 = vector.broadcast %914 : f32 to vector<16x16xf32>
    %916 = arith.mulf %915, %913 : vector<16x16xf32>
    %917 = arith.addf %907, %916 : vector<16x16xf32>
    %c90_219 = arith.constant 90 : index
    %918 = memref.load %arg5[%c90_219] : memref<144xf32, #tpu.memory_space<smem>>
    %919 = vector.broadcast %918 : f32 to vector<16x16xf32>
    %920 = arith.mulf %919, %913 : vector<16x16xf32>
    %921 = arith.addf %911, %920 : vector<16x16xf32>
    %c2_220 = arith.constant 2 : index
    %c0_221 = arith.constant 0 : index
    %c1_222 = arith.constant 1 : index
    %922 = vector.load %arg9[%c2_220, %c0_221, %c1_222] : memref<8x18x18xf32, #tpu.memory_space<vmem>>, vector<1x16x16xf32>
    %923 = vector.shape_cast %922 : vector<1x16x16xf32> to vector<16x16xf32>
    %c19_223 = arith.constant 19 : index
    %924 = memref.load %arg5[%c19_223] : memref<144xf32, #tpu.memory_space<smem>>
    %925 = vector.broadcast %924 : f32 to vector<16x16xf32>
    %926 = arith.mulf %925, %923 : vector<16x16xf32>
    %927 = arith.addf %917, %926 : vector<16x16xf32>
    %c91_224 = arith.constant 91 : index
    %928 = memref.load %arg5[%c91_224] : memref<144xf32, #tpu.memory_space<smem>>
    %929 = vector.broadcast %928 : f32 to vector<16x16xf32>
    %930 = arith.mulf %929, %923 : vector<16x16xf32>
    %931 = arith.addf %921, %930 : vector<16x16xf32>
    %c2_225 = arith.constant 2 : index
    %c0_226 = arith.constant 0 : index
    %c2_227 = arith.constant 2 : index
    %932 = vector.load %arg9[%c2_225, %c0_226, %c2_227] : memref<8x18x18xf32, #tpu.memory_space<vmem>>, vector<1x16x16xf32>
    %933 = vector.shape_cast %932 : vector<1x16x16xf32> to vector<16x16xf32>
    %c20_228 = arith.constant 20 : index
    %934 = memref.load %arg5[%c20_228] : memref<144xf32, #tpu.memory_space<smem>>
    %935 = vector.broadcast %934 : f32 to vector<16x16xf32>
    %936 = arith.mulf %935, %933 : vector<16x16xf32>
    %937 = arith.addf %927, %936 : vector<16x16xf32>
    %c92_229 = arith.constant 92 : index
    %938 = memref.load %arg5[%c92_229] : memref<144xf32, #tpu.memory_space<smem>>
    %939 = vector.broadcast %938 : f32 to vector<16x16xf32>
    %940 = arith.mulf %939, %933 : vector<16x16xf32>
    %941 = arith.addf %931, %940 : vector<16x16xf32>
    %c2_230 = arith.constant 2 : index
    %c1_231 = arith.constant 1 : index
    %c0_232 = arith.constant 0 : index
    %942 = vector.load %arg9[%c2_230, %c1_231, %c0_232] : memref<8x18x18xf32, #tpu.memory_space<vmem>>, vector<1x16x16xf32>
    %943 = vector.shape_cast %942 : vector<1x16x16xf32> to vector<16x16xf32>
    %c21_233 = arith.constant 21 : index
    %944 = memref.load %arg5[%c21_233] : memref<144xf32, #tpu.memory_space<smem>>
    %945 = vector.broadcast %944 : f32 to vector<16x16xf32>
    %946 = arith.mulf %945, %943 : vector<16x16xf32>
    %947 = arith.addf %937, %946 : vector<16x16xf32>
    %c93_234 = arith.constant 93 : index
    %948 = memref.load %arg5[%c93_234] : memref<144xf32, #tpu.memory_space<smem>>
    %949 = vector.broadcast %948 : f32 to vector<16x16xf32>
    %950 = arith.mulf %949, %943 : vector<16x16xf32>
    %951 = arith.addf %941, %950 : vector<16x16xf32>
    %c2_235 = arith.constant 2 : index
    %c1_236 = arith.constant 1 : index
    %c1_237 = arith.constant 1 : index
    %952 = vector.load %arg9[%c2_235, %c1_236, %c1_237] : memref<8x18x18xf32, #tpu.memory_space<vmem>>, vector<1x16x16xf32>
    %953 = vector.shape_cast %952 : vector<1x16x16xf32> to vector<16x16xf32>
    %c22_238 = arith.constant 22 : index
    %954 = memref.load %arg5[%c22_238] : memref<144xf32, #tpu.memory_space<smem>>
    %955 = vector.broadcast %954 : f32 to vector<16x16xf32>
    %956 = arith.mulf %955, %953 : vector<16x16xf32>
    %957 = arith.addf %947, %956 : vector<16x16xf32>
    %c94_239 = arith.constant 94 : index
    %958 = memref.load %arg5[%c94_239] : memref<144xf32, #tpu.memory_space<smem>>
    %959 = vector.broadcast %958 : f32 to vector<16x16xf32>
    %960 = arith.mulf %959, %953 : vector<16x16xf32>
    %961 = arith.addf %951, %960 : vector<16x16xf32>
    %c2_240 = arith.constant 2 : index
    %c1_241 = arith.constant 1 : index
    %c2_242 = arith.constant 2 : index
    %962 = vector.load %arg9[%c2_240, %c1_241, %c2_242] : memref<8x18x18xf32, #tpu.memory_space<vmem>>, vector<1x16x16xf32>
    %963 = vector.shape_cast %962 : vector<1x16x16xf32> to vector<16x16xf32>
    %c23_243 = arith.constant 23 : index
    %964 = memref.load %arg5[%c23_243] : memref<144xf32, #tpu.memory_space<smem>>
    %965 = vector.broadcast %964 : f32 to vector<16x16xf32>
    %966 = arith.mulf %965, %963 : vector<16x16xf32>
    %967 = arith.addf %957, %966 : vector<16x16xf32>
    %c95_244 = arith.constant 95 : index
    %968 = memref.load %arg5[%c95_244] : memref<144xf32, #tpu.memory_space<smem>>
    %969 = vector.broadcast %968 : f32 to vector<16x16xf32>
    %970 = arith.mulf %969, %963 : vector<16x16xf32>
    %971 = arith.addf %961, %970 : vector<16x16xf32>
    %c2_245 = arith.constant 2 : index
    %c2_246 = arith.constant 2 : index
    %c0_247 = arith.constant 0 : index
    %972 = vector.load %arg9[%c2_245, %c2_246, %c0_247] : memref<8x18x18xf32, #tpu.memory_space<vmem>>, vector<1x16x16xf32>
    %973 = vector.shape_cast %972 : vector<1x16x16xf32> to vector<16x16xf32>
    %c24_248 = arith.constant 24 : index
    %974 = memref.load %arg5[%c24_248] : memref<144xf32, #tpu.memory_space<smem>>
    %975 = vector.broadcast %974 : f32 to vector<16x16xf32>
    %976 = arith.mulf %975, %973 : vector<16x16xf32>
    %977 = arith.addf %967, %976 : vector<16x16xf32>
    %c96_249 = arith.constant 96 : index
    %978 = memref.load %arg5[%c96_249] : memref<144xf32, #tpu.memory_space<smem>>
    %979 = vector.broadcast %978 : f32 to vector<16x16xf32>
    %980 = arith.mulf %979, %973 : vector<16x16xf32>
    %981 = arith.addf %971, %980 : vector<16x16xf32>
    %c2_250 = arith.constant 2 : index
    %c2_251 = arith.constant 2 : index
    %c1_252 = arith.constant 1 : index
    %982 = vector.load %arg9[%c2_250, %c2_251, %c1_252] : memref<8x18x18xf32, #tpu.memory_space<vmem>>, vector<1x16x16xf32>
    %983 = vector.shape_cast %982 : vector<1x16x16xf32> to vector<16x16xf32>
    %c25_253 = arith.constant 25 : index
    %984 = memref.load %arg5[%c25_253] : memref<144xf32, #tpu.memory_space<smem>>
    %985 = vector.broadcast %984 : f32 to vector<16x16xf32>
    %986 = arith.mulf %985, %983 : vector<16x16xf32>
    %987 = arith.addf %977, %986 : vector<16x16xf32>
    %c97_254 = arith.constant 97 : index
    %988 = memref.load %arg5[%c97_254] : memref<144xf32, #tpu.memory_space<smem>>
    %989 = vector.broadcast %988 : f32 to vector<16x16xf32>
    %990 = arith.mulf %989, %983 : vector<16x16xf32>
    %991 = arith.addf %981, %990 : vector<16x16xf32>
    %c2_255 = arith.constant 2 : index
    %c2_256 = arith.constant 2 : index
    %c2_257 = arith.constant 2 : index
    %992 = vector.load %arg9[%c2_255, %c2_256, %c2_257] : memref<8x18x18xf32, #tpu.memory_space<vmem>>, vector<1x16x16xf32>
    %993 = vector.shape_cast %992 : vector<1x16x16xf32> to vector<16x16xf32>
    %c26_258 = arith.constant 26 : index
    %994 = memref.load %arg5[%c26_258] : memref<144xf32, #tpu.memory_space<smem>>
    %995 = vector.broadcast %994 : f32 to vector<16x16xf32>
    %996 = arith.mulf %995, %993 : vector<16x16xf32>
    %997 = arith.addf %987, %996 : vector<16x16xf32>
    %c98_259 = arith.constant 98 : index
    %998 = memref.load %arg5[%c98_259] : memref<144xf32, #tpu.memory_space<smem>>
    %999 = vector.broadcast %998 : f32 to vector<16x16xf32>
    %1000 = arith.mulf %999, %993 : vector<16x16xf32>
    %1001 = arith.addf %991, %1000 : vector<16x16xf32>
    %c3_260 = arith.constant 3 : index
    %c0_261 = arith.constant 0 : index
    %c0_262 = arith.constant 0 : index
    %1002 = vector.load %arg9[%c3_260, %c0_261, %c0_262] : memref<8x18x18xf32, #tpu.memory_space<vmem>>, vector<1x16x16xf32>
    %1003 = vector.shape_cast %1002 : vector<1x16x16xf32> to vector<16x16xf32>
    %c27_263 = arith.constant 27 : index
    %1004 = memref.load %arg5[%c27_263] : memref<144xf32, #tpu.memory_space<smem>>
    %1005 = vector.broadcast %1004 : f32 to vector<16x16xf32>
    %1006 = arith.mulf %1005, %1003 : vector<16x16xf32>
    %1007 = arith.addf %997, %1006 : vector<16x16xf32>
    %c99_264 = arith.constant 99 : index
    %1008 = memref.load %arg5[%c99_264] : memref<144xf32, #tpu.memory_space<smem>>
    %1009 = vector.broadcast %1008 : f32 to vector<16x16xf32>
    %1010 = arith.mulf %1009, %1003 : vector<16x16xf32>
    %1011 = arith.addf %1001, %1010 : vector<16x16xf32>
    %c3_265 = arith.constant 3 : index
    %c0_266 = arith.constant 0 : index
    %c1_267 = arith.constant 1 : index
    %1012 = vector.load %arg9[%c3_265, %c0_266, %c1_267] : memref<8x18x18xf32, #tpu.memory_space<vmem>>, vector<1x16x16xf32>
    %1013 = vector.shape_cast %1012 : vector<1x16x16xf32> to vector<16x16xf32>
    %c28_268 = arith.constant 28 : index
    %1014 = memref.load %arg5[%c28_268] : memref<144xf32, #tpu.memory_space<smem>>
    %1015 = vector.broadcast %1014 : f32 to vector<16x16xf32>
    %1016 = arith.mulf %1015, %1013 : vector<16x16xf32>
    %1017 = arith.addf %1007, %1016 : vector<16x16xf32>
    %c100_269 = arith.constant 100 : index
    %1018 = memref.load %arg5[%c100_269] : memref<144xf32, #tpu.memory_space<smem>>
    %1019 = vector.broadcast %1018 : f32 to vector<16x16xf32>
    %1020 = arith.mulf %1019, %1013 : vector<16x16xf32>
    %1021 = arith.addf %1011, %1020 : vector<16x16xf32>
    %c3_270 = arith.constant 3 : index
    %c0_271 = arith.constant 0 : index
    %c2_272 = arith.constant 2 : index
    %1022 = vector.load %arg9[%c3_270, %c0_271, %c2_272] : memref<8x18x18xf32, #tpu.memory_space<vmem>>, vector<1x16x16xf32>
    %1023 = vector.shape_cast %1022 : vector<1x16x16xf32> to vector<16x16xf32>
    %c29_273 = arith.constant 29 : index
    %1024 = memref.load %arg5[%c29_273] : memref<144xf32, #tpu.memory_space<smem>>
    %1025 = vector.broadcast %1024 : f32 to vector<16x16xf32>
    %1026 = arith.mulf %1025, %1023 : vector<16x16xf32>
    %1027 = arith.addf %1017, %1026 : vector<16x16xf32>
    %c101_274 = arith.constant 101 : index
    %1028 = memref.load %arg5[%c101_274] : memref<144xf32, #tpu.memory_space<smem>>
    %1029 = vector.broadcast %1028 : f32 to vector<16x16xf32>
    %1030 = arith.mulf %1029, %1023 : vector<16x16xf32>
    %1031 = arith.addf %1021, %1030 : vector<16x16xf32>
    %c3_275 = arith.constant 3 : index
    %c1_276 = arith.constant 1 : index
    %c0_277 = arith.constant 0 : index
    %1032 = vector.load %arg9[%c3_275, %c1_276, %c0_277] : memref<8x18x18xf32, #tpu.memory_space<vmem>>, vector<1x16x16xf32>
    %1033 = vector.shape_cast %1032 : vector<1x16x16xf32> to vector<16x16xf32>
    %c30_278 = arith.constant 30 : index
    %1034 = memref.load %arg5[%c30_278] : memref<144xf32, #tpu.memory_space<smem>>
    %1035 = vector.broadcast %1034 : f32 to vector<16x16xf32>
    %1036 = arith.mulf %1035, %1033 : vector<16x16xf32>
    %1037 = arith.addf %1027, %1036 : vector<16x16xf32>
    %c102_279 = arith.constant 102 : index
    %1038 = memref.load %arg5[%c102_279] : memref<144xf32, #tpu.memory_space<smem>>
    %1039 = vector.broadcast %1038 : f32 to vector<16x16xf32>
    %1040 = arith.mulf %1039, %1033 : vector<16x16xf32>
    %1041 = arith.addf %1031, %1040 : vector<16x16xf32>
    %c3_280 = arith.constant 3 : index
    %c1_281 = arith.constant 1 : index
    %c1_282 = arith.constant 1 : index
    %1042 = vector.load %arg9[%c3_280, %c1_281, %c1_282] : memref<8x18x18xf32, #tpu.memory_space<vmem>>, vector<1x16x16xf32>
    %1043 = vector.shape_cast %1042 : vector<1x16x16xf32> to vector<16x16xf32>
    %c31_283 = arith.constant 31 : index
    %1044 = memref.load %arg5[%c31_283] : memref<144xf32, #tpu.memory_space<smem>>
    %1045 = vector.broadcast %1044 : f32 to vector<16x16xf32>
    %1046 = arith.mulf %1045, %1043 : vector<16x16xf32>
    %1047 = arith.addf %1037, %1046 : vector<16x16xf32>
    %c103_284 = arith.constant 103 : index
    %1048 = memref.load %arg5[%c103_284] : memref<144xf32, #tpu.memory_space<smem>>
    %1049 = vector.broadcast %1048 : f32 to vector<16x16xf32>
    %1050 = arith.mulf %1049, %1043 : vector<16x16xf32>
    %1051 = arith.addf %1041, %1050 : vector<16x16xf32>
    %c3_285 = arith.constant 3 : index
    %c1_286 = arith.constant 1 : index
    %c2_287 = arith.constant 2 : index
    %1052 = vector.load %arg9[%c3_285, %c1_286, %c2_287] : memref<8x18x18xf32, #tpu.memory_space<vmem>>, vector<1x16x16xf32>
    %1053 = vector.shape_cast %1052 : vector<1x16x16xf32> to vector<16x16xf32>
    %c32_288 = arith.constant 32 : index
    %1054 = memref.load %arg5[%c32_288] : memref<144xf32, #tpu.memory_space<smem>>
    %1055 = vector.broadcast %1054 : f32 to vector<16x16xf32>
    %1056 = arith.mulf %1055, %1053 : vector<16x16xf32>
    %1057 = arith.addf %1047, %1056 : vector<16x16xf32>
    %c104_289 = arith.constant 104 : index
    %1058 = memref.load %arg5[%c104_289] : memref<144xf32, #tpu.memory_space<smem>>
    %1059 = vector.broadcast %1058 : f32 to vector<16x16xf32>
    %1060 = arith.mulf %1059, %1053 : vector<16x16xf32>
    %1061 = arith.addf %1051, %1060 : vector<16x16xf32>
    %c3_290 = arith.constant 3 : index
    %c2_291 = arith.constant 2 : index
    %c0_292 = arith.constant 0 : index
    %1062 = vector.load %arg9[%c3_290, %c2_291, %c0_292] : memref<8x18x18xf32, #tpu.memory_space<vmem>>, vector<1x16x16xf32>
    %1063 = vector.shape_cast %1062 : vector<1x16x16xf32> to vector<16x16xf32>
    %c33_293 = arith.constant 33 : index
    %1064 = memref.load %arg5[%c33_293] : memref<144xf32, #tpu.memory_space<smem>>
    %1065 = vector.broadcast %1064 : f32 to vector<16x16xf32>
    %1066 = arith.mulf %1065, %1063 : vector<16x16xf32>
    %1067 = arith.addf %1057, %1066 : vector<16x16xf32>
    %c105_294 = arith.constant 105 : index
    %1068 = memref.load %arg5[%c105_294] : memref<144xf32, #tpu.memory_space<smem>>
    %1069 = vector.broadcast %1068 : f32 to vector<16x16xf32>
    %1070 = arith.mulf %1069, %1063 : vector<16x16xf32>
    %1071 = arith.addf %1061, %1070 : vector<16x16xf32>
    %c3_295 = arith.constant 3 : index
    %c2_296 = arith.constant 2 : index
    %c1_297 = arith.constant 1 : index
    %1072 = vector.load %arg9[%c3_295, %c2_296, %c1_297] : memref<8x18x18xf32, #tpu.memory_space<vmem>>, vector<1x16x16xf32>
    %1073 = vector.shape_cast %1072 : vector<1x16x16xf32> to vector<16x16xf32>
    %c34_298 = arith.constant 34 : index
    %1074 = memref.load %arg5[%c34_298] : memref<144xf32, #tpu.memory_space<smem>>
    %1075 = vector.broadcast %1074 : f32 to vector<16x16xf32>
    %1076 = arith.mulf %1075, %1073 : vector<16x16xf32>
    %1077 = arith.addf %1067, %1076 : vector<16x16xf32>
    %c106_299 = arith.constant 106 : index
    %1078 = memref.load %arg5[%c106_299] : memref<144xf32, #tpu.memory_space<smem>>
    %1079 = vector.broadcast %1078 : f32 to vector<16x16xf32>
    %1080 = arith.mulf %1079, %1073 : vector<16x16xf32>
    %1081 = arith.addf %1071, %1080 : vector<16x16xf32>
    %c3_300 = arith.constant 3 : index
    %c2_301 = arith.constant 2 : index
    %c2_302 = arith.constant 2 : index
    %1082 = vector.load %arg9[%c3_300, %c2_301, %c2_302] : memref<8x18x18xf32, #tpu.memory_space<vmem>>, vector<1x16x16xf32>
    %1083 = vector.shape_cast %1082 : vector<1x16x16xf32> to vector<16x16xf32>
    %c35_303 = arith.constant 35 : index
    %1084 = memref.load %arg5[%c35_303] : memref<144xf32, #tpu.memory_space<smem>>
    %1085 = vector.broadcast %1084 : f32 to vector<16x16xf32>
    %1086 = arith.mulf %1085, %1083 : vector<16x16xf32>
    %1087 = arith.addf %1077, %1086 : vector<16x16xf32>
    %c107_304 = arith.constant 107 : index
    %1088 = memref.load %arg5[%c107_304] : memref<144xf32, #tpu.memory_space<smem>>
    %1089 = vector.broadcast %1088 : f32 to vector<16x16xf32>
    %1090 = arith.mulf %1089, %1083 : vector<16x16xf32>
    %1091 = arith.addf %1081, %1090 : vector<16x16xf32>
    %c4_305 = arith.constant 4 : index
    %c0_306 = arith.constant 0 : index
    %c0_307 = arith.constant 0 : index
    %1092 = vector.load %arg9[%c4_305, %c0_306, %c0_307] : memref<8x18x18xf32, #tpu.memory_space<vmem>>, vector<1x16x16xf32>
    %1093 = vector.shape_cast %1092 : vector<1x16x16xf32> to vector<16x16xf32>
    %c36_308 = arith.constant 36 : index
    %1094 = memref.load %arg5[%c36_308] : memref<144xf32, #tpu.memory_space<smem>>
    %1095 = vector.broadcast %1094 : f32 to vector<16x16xf32>
    %1096 = arith.mulf %1095, %1093 : vector<16x16xf32>
    %1097 = arith.addf %1087, %1096 : vector<16x16xf32>
    %c108_309 = arith.constant 108 : index
    %1098 = memref.load %arg5[%c108_309] : memref<144xf32, #tpu.memory_space<smem>>
    %1099 = vector.broadcast %1098 : f32 to vector<16x16xf32>
    %1100 = arith.mulf %1099, %1093 : vector<16x16xf32>
    %1101 = arith.addf %1091, %1100 : vector<16x16xf32>
    %c4_310 = arith.constant 4 : index
    %c0_311 = arith.constant 0 : index
    %c1_312 = arith.constant 1 : index
    %1102 = vector.load %arg9[%c4_310, %c0_311, %c1_312] : memref<8x18x18xf32, #tpu.memory_space<vmem>>, vector<1x16x16xf32>
    %1103 = vector.shape_cast %1102 : vector<1x16x16xf32> to vector<16x16xf32>
    %c37_313 = arith.constant 37 : index
    %1104 = memref.load %arg5[%c37_313] : memref<144xf32, #tpu.memory_space<smem>>
    %1105 = vector.broadcast %1104 : f32 to vector<16x16xf32>
    %1106 = arith.mulf %1105, %1103 : vector<16x16xf32>
    %1107 = arith.addf %1097, %1106 : vector<16x16xf32>
    %c109_314 = arith.constant 109 : index
    %1108 = memref.load %arg5[%c109_314] : memref<144xf32, #tpu.memory_space<smem>>
    %1109 = vector.broadcast %1108 : f32 to vector<16x16xf32>
    %1110 = arith.mulf %1109, %1103 : vector<16x16xf32>
    %1111 = arith.addf %1101, %1110 : vector<16x16xf32>
    %c4_315 = arith.constant 4 : index
    %c0_316 = arith.constant 0 : index
    %c2_317 = arith.constant 2 : index
    %1112 = vector.load %arg9[%c4_315, %c0_316, %c2_317] : memref<8x18x18xf32, #tpu.memory_space<vmem>>, vector<1x16x16xf32>
    %1113 = vector.shape_cast %1112 : vector<1x16x16xf32> to vector<16x16xf32>
    %c38_318 = arith.constant 38 : index
    %1114 = memref.load %arg5[%c38_318] : memref<144xf32, #tpu.memory_space<smem>>
    %1115 = vector.broadcast %1114 : f32 to vector<16x16xf32>
    %1116 = arith.mulf %1115, %1113 : vector<16x16xf32>
    %1117 = arith.addf %1107, %1116 : vector<16x16xf32>
    %c110_319 = arith.constant 110 : index
    %1118 = memref.load %arg5[%c110_319] : memref<144xf32, #tpu.memory_space<smem>>
    %1119 = vector.broadcast %1118 : f32 to vector<16x16xf32>
    %1120 = arith.mulf %1119, %1113 : vector<16x16xf32>
    %1121 = arith.addf %1111, %1120 : vector<16x16xf32>
    %c4_320 = arith.constant 4 : index
    %c1_321 = arith.constant 1 : index
    %c0_322 = arith.constant 0 : index
    %1122 = vector.load %arg9[%c4_320, %c1_321, %c0_322] : memref<8x18x18xf32, #tpu.memory_space<vmem>>, vector<1x16x16xf32>
    %1123 = vector.shape_cast %1122 : vector<1x16x16xf32> to vector<16x16xf32>
    %c39_323 = arith.constant 39 : index
    %1124 = memref.load %arg5[%c39_323] : memref<144xf32, #tpu.memory_space<smem>>
    %1125 = vector.broadcast %1124 : f32 to vector<16x16xf32>
    %1126 = arith.mulf %1125, %1123 : vector<16x16xf32>
    %1127 = arith.addf %1117, %1126 : vector<16x16xf32>
    %c111_324 = arith.constant 111 : index
    %1128 = memref.load %arg5[%c111_324] : memref<144xf32, #tpu.memory_space<smem>>
    %1129 = vector.broadcast %1128 : f32 to vector<16x16xf32>
    %1130 = arith.mulf %1129, %1123 : vector<16x16xf32>
    %1131 = arith.addf %1121, %1130 : vector<16x16xf32>
    %c4_325 = arith.constant 4 : index
    %c1_326 = arith.constant 1 : index
    %c1_327 = arith.constant 1 : index
    %1132 = vector.load %arg9[%c4_325, %c1_326, %c1_327] : memref<8x18x18xf32, #tpu.memory_space<vmem>>, vector<1x16x16xf32>
    %1133 = vector.shape_cast %1132 : vector<1x16x16xf32> to vector<16x16xf32>
    %c40_328 = arith.constant 40 : index
    %1134 = memref.load %arg5[%c40_328] : memref<144xf32, #tpu.memory_space<smem>>
    %1135 = vector.broadcast %1134 : f32 to vector<16x16xf32>
    %1136 = arith.mulf %1135, %1133 : vector<16x16xf32>
    %1137 = arith.addf %1127, %1136 : vector<16x16xf32>
    %c112_329 = arith.constant 112 : index
    %1138 = memref.load %arg5[%c112_329] : memref<144xf32, #tpu.memory_space<smem>>
    %1139 = vector.broadcast %1138 : f32 to vector<16x16xf32>
    %1140 = arith.mulf %1139, %1133 : vector<16x16xf32>
    %1141 = arith.addf %1131, %1140 : vector<16x16xf32>
    %c4_330 = arith.constant 4 : index
    %c1_331 = arith.constant 1 : index
    %c2_332 = arith.constant 2 : index
    %1142 = vector.load %arg9[%c4_330, %c1_331, %c2_332] : memref<8x18x18xf32, #tpu.memory_space<vmem>>, vector<1x16x16xf32>
    %1143 = vector.shape_cast %1142 : vector<1x16x16xf32> to vector<16x16xf32>
    %c41_333 = arith.constant 41 : index
    %1144 = memref.load %arg5[%c41_333] : memref<144xf32, #tpu.memory_space<smem>>
    %1145 = vector.broadcast %1144 : f32 to vector<16x16xf32>
    %1146 = arith.mulf %1145, %1143 : vector<16x16xf32>
    %1147 = arith.addf %1137, %1146 : vector<16x16xf32>
    %c113_334 = arith.constant 113 : index
    %1148 = memref.load %arg5[%c113_334] : memref<144xf32, #tpu.memory_space<smem>>
    %1149 = vector.broadcast %1148 : f32 to vector<16x16xf32>
    %1150 = arith.mulf %1149, %1143 : vector<16x16xf32>
    %1151 = arith.addf %1141, %1150 : vector<16x16xf32>
    %c4_335 = arith.constant 4 : index
    %c2_336 = arith.constant 2 : index
    %c0_337 = arith.constant 0 : index
    %1152 = vector.load %arg9[%c4_335, %c2_336, %c0_337] : memref<8x18x18xf32, #tpu.memory_space<vmem>>, vector<1x16x16xf32>
    %1153 = vector.shape_cast %1152 : vector<1x16x16xf32> to vector<16x16xf32>
    %c42_338 = arith.constant 42 : index
    %1154 = memref.load %arg5[%c42_338] : memref<144xf32, #tpu.memory_space<smem>>
    %1155 = vector.broadcast %1154 : f32 to vector<16x16xf32>
    %1156 = arith.mulf %1155, %1153 : vector<16x16xf32>
    %1157 = arith.addf %1147, %1156 : vector<16x16xf32>
    %c114_339 = arith.constant 114 : index
    %1158 = memref.load %arg5[%c114_339] : memref<144xf32, #tpu.memory_space<smem>>
    %1159 = vector.broadcast %1158 : f32 to vector<16x16xf32>
    %1160 = arith.mulf %1159, %1153 : vector<16x16xf32>
    %1161 = arith.addf %1151, %1160 : vector<16x16xf32>
    %c4_340 = arith.constant 4 : index
    %c2_341 = arith.constant 2 : index
    %c1_342 = arith.constant 1 : index
    %1162 = vector.load %arg9[%c4_340, %c2_341, %c1_342] : memref<8x18x18xf32, #tpu.memory_space<vmem>>, vector<1x16x16xf32>
    %1163 = vector.shape_cast %1162 : vector<1x16x16xf32> to vector<16x16xf32>
    %c43_343 = arith.constant 43 : index
    %1164 = memref.load %arg5[%c43_343] : memref<144xf32, #tpu.memory_space<smem>>
    %1165 = vector.broadcast %1164 : f32 to vector<16x16xf32>
    %1166 = arith.mulf %1165, %1163 : vector<16x16xf32>
    %1167 = arith.addf %1157, %1166 : vector<16x16xf32>
    %c115_344 = arith.constant 115 : index
    %1168 = memref.load %arg5[%c115_344] : memref<144xf32, #tpu.memory_space<smem>>
    %1169 = vector.broadcast %1168 : f32 to vector<16x16xf32>
    %1170 = arith.mulf %1169, %1163 : vector<16x16xf32>
    %1171 = arith.addf %1161, %1170 : vector<16x16xf32>
    %c4_345 = arith.constant 4 : index
    %c2_346 = arith.constant 2 : index
    %c2_347 = arith.constant 2 : index
    %1172 = vector.load %arg9[%c4_345, %c2_346, %c2_347] : memref<8x18x18xf32, #tpu.memory_space<vmem>>, vector<1x16x16xf32>
    %1173 = vector.shape_cast %1172 : vector<1x16x16xf32> to vector<16x16xf32>
    %c44_348 = arith.constant 44 : index
    %1174 = memref.load %arg5[%c44_348] : memref<144xf32, #tpu.memory_space<smem>>
    %1175 = vector.broadcast %1174 : f32 to vector<16x16xf32>
    %1176 = arith.mulf %1175, %1173 : vector<16x16xf32>
    %1177 = arith.addf %1167, %1176 : vector<16x16xf32>
    %c116_349 = arith.constant 116 : index
    %1178 = memref.load %arg5[%c116_349] : memref<144xf32, #tpu.memory_space<smem>>
    %1179 = vector.broadcast %1178 : f32 to vector<16x16xf32>
    %1180 = arith.mulf %1179, %1173 : vector<16x16xf32>
    %1181 = arith.addf %1171, %1180 : vector<16x16xf32>
    %c5_350 = arith.constant 5 : index
    %c0_351 = arith.constant 0 : index
    %c0_352 = arith.constant 0 : index
    %1182 = vector.load %arg9[%c5_350, %c0_351, %c0_352] : memref<8x18x18xf32, #tpu.memory_space<vmem>>, vector<1x16x16xf32>
    %1183 = vector.shape_cast %1182 : vector<1x16x16xf32> to vector<16x16xf32>
    %c45_353 = arith.constant 45 : index
    %1184 = memref.load %arg5[%c45_353] : memref<144xf32, #tpu.memory_space<smem>>
    %1185 = vector.broadcast %1184 : f32 to vector<16x16xf32>
    %1186 = arith.mulf %1185, %1183 : vector<16x16xf32>
    %1187 = arith.addf %1177, %1186 : vector<16x16xf32>
    %c117_354 = arith.constant 117 : index
    %1188 = memref.load %arg5[%c117_354] : memref<144xf32, #tpu.memory_space<smem>>
    %1189 = vector.broadcast %1188 : f32 to vector<16x16xf32>
    %1190 = arith.mulf %1189, %1183 : vector<16x16xf32>
    %1191 = arith.addf %1181, %1190 : vector<16x16xf32>
    %c5_355 = arith.constant 5 : index
    %c0_356 = arith.constant 0 : index
    %c1_357 = arith.constant 1 : index
    %1192 = vector.load %arg9[%c5_355, %c0_356, %c1_357] : memref<8x18x18xf32, #tpu.memory_space<vmem>>, vector<1x16x16xf32>
    %1193 = vector.shape_cast %1192 : vector<1x16x16xf32> to vector<16x16xf32>
    %c46_358 = arith.constant 46 : index
    %1194 = memref.load %arg5[%c46_358] : memref<144xf32, #tpu.memory_space<smem>>
    %1195 = vector.broadcast %1194 : f32 to vector<16x16xf32>
    %1196 = arith.mulf %1195, %1193 : vector<16x16xf32>
    %1197 = arith.addf %1187, %1196 : vector<16x16xf32>
    %c118_359 = arith.constant 118 : index
    %1198 = memref.load %arg5[%c118_359] : memref<144xf32, #tpu.memory_space<smem>>
    %1199 = vector.broadcast %1198 : f32 to vector<16x16xf32>
    %1200 = arith.mulf %1199, %1193 : vector<16x16xf32>
    %1201 = arith.addf %1191, %1200 : vector<16x16xf32>
    %c5_360 = arith.constant 5 : index
    %c0_361 = arith.constant 0 : index
    %c2_362 = arith.constant 2 : index
    %1202 = vector.load %arg9[%c5_360, %c0_361, %c2_362] : memref<8x18x18xf32, #tpu.memory_space<vmem>>, vector<1x16x16xf32>
    %1203 = vector.shape_cast %1202 : vector<1x16x16xf32> to vector<16x16xf32>
    %c47_363 = arith.constant 47 : index
    %1204 = memref.load %arg5[%c47_363] : memref<144xf32, #tpu.memory_space<smem>>
    %1205 = vector.broadcast %1204 : f32 to vector<16x16xf32>
    %1206 = arith.mulf %1205, %1203 : vector<16x16xf32>
    %1207 = arith.addf %1197, %1206 : vector<16x16xf32>
    %c119_364 = arith.constant 119 : index
    %1208 = memref.load %arg5[%c119_364] : memref<144xf32, #tpu.memory_space<smem>>
    %1209 = vector.broadcast %1208 : f32 to vector<16x16xf32>
    %1210 = arith.mulf %1209, %1203 : vector<16x16xf32>
    %1211 = arith.addf %1201, %1210 : vector<16x16xf32>
    %c5_365 = arith.constant 5 : index
    %c1_366 = arith.constant 1 : index
    %c0_367 = arith.constant 0 : index
    %1212 = vector.load %arg9[%c5_365, %c1_366, %c0_367] : memref<8x18x18xf32, #tpu.memory_space<vmem>>, vector<1x16x16xf32>
    %1213 = vector.shape_cast %1212 : vector<1x16x16xf32> to vector<16x16xf32>
    %c48_368 = arith.constant 48 : index
    %1214 = memref.load %arg5[%c48_368] : memref<144xf32, #tpu.memory_space<smem>>
    %1215 = vector.broadcast %1214 : f32 to vector<16x16xf32>
    %1216 = arith.mulf %1215, %1213 : vector<16x16xf32>
    %1217 = arith.addf %1207, %1216 : vector<16x16xf32>
    %c120_369 = arith.constant 120 : index
    %1218 = memref.load %arg5[%c120_369] : memref<144xf32, #tpu.memory_space<smem>>
    %1219 = vector.broadcast %1218 : f32 to vector<16x16xf32>
    %1220 = arith.mulf %1219, %1213 : vector<16x16xf32>
    %1221 = arith.addf %1211, %1220 : vector<16x16xf32>
    %c5_370 = arith.constant 5 : index
    %c1_371 = arith.constant 1 : index
    %c1_372 = arith.constant 1 : index
    %1222 = vector.load %arg9[%c5_370, %c1_371, %c1_372] : memref<8x18x18xf32, #tpu.memory_space<vmem>>, vector<1x16x16xf32>
    %1223 = vector.shape_cast %1222 : vector<1x16x16xf32> to vector<16x16xf32>
    %c49_373 = arith.constant 49 : index
    %1224 = memref.load %arg5[%c49_373] : memref<144xf32, #tpu.memory_space<smem>>
    %1225 = vector.broadcast %1224 : f32 to vector<16x16xf32>
    %1226 = arith.mulf %1225, %1223 : vector<16x16xf32>
    %1227 = arith.addf %1217, %1226 : vector<16x16xf32>
    %c121_374 = arith.constant 121 : index
    %1228 = memref.load %arg5[%c121_374] : memref<144xf32, #tpu.memory_space<smem>>
    %1229 = vector.broadcast %1228 : f32 to vector<16x16xf32>
    %1230 = arith.mulf %1229, %1223 : vector<16x16xf32>
    %1231 = arith.addf %1221, %1230 : vector<16x16xf32>
    %c5_375 = arith.constant 5 : index
    %c1_376 = arith.constant 1 : index
    %c2_377 = arith.constant 2 : index
    %1232 = vector.load %arg9[%c5_375, %c1_376, %c2_377] : memref<8x18x18xf32, #tpu.memory_space<vmem>>, vector<1x16x16xf32>
    %1233 = vector.shape_cast %1232 : vector<1x16x16xf32> to vector<16x16xf32>
    %c50_378 = arith.constant 50 : index
    %1234 = memref.load %arg5[%c50_378] : memref<144xf32, #tpu.memory_space<smem>>
    %1235 = vector.broadcast %1234 : f32 to vector<16x16xf32>
    %1236 = arith.mulf %1235, %1233 : vector<16x16xf32>
    %1237 = arith.addf %1227, %1236 : vector<16x16xf32>
    %c122_379 = arith.constant 122 : index
    %1238 = memref.load %arg5[%c122_379] : memref<144xf32, #tpu.memory_space<smem>>
    %1239 = vector.broadcast %1238 : f32 to vector<16x16xf32>
    %1240 = arith.mulf %1239, %1233 : vector<16x16xf32>
    %1241 = arith.addf %1231, %1240 : vector<16x16xf32>
    %c5_380 = arith.constant 5 : index
    %c2_381 = arith.constant 2 : index
    %c0_382 = arith.constant 0 : index
    %1242 = vector.load %arg9[%c5_380, %c2_381, %c0_382] : memref<8x18x18xf32, #tpu.memory_space<vmem>>, vector<1x16x16xf32>
    %1243 = vector.shape_cast %1242 : vector<1x16x16xf32> to vector<16x16xf32>
    %c51_383 = arith.constant 51 : index
    %1244 = memref.load %arg5[%c51_383] : memref<144xf32, #tpu.memory_space<smem>>
    %1245 = vector.broadcast %1244 : f32 to vector<16x16xf32>
    %1246 = arith.mulf %1245, %1243 : vector<16x16xf32>
    %1247 = arith.addf %1237, %1246 : vector<16x16xf32>
    %c123_384 = arith.constant 123 : index
    %1248 = memref.load %arg5[%c123_384] : memref<144xf32, #tpu.memory_space<smem>>
    %1249 = vector.broadcast %1248 : f32 to vector<16x16xf32>
    %1250 = arith.mulf %1249, %1243 : vector<16x16xf32>
    %1251 = arith.addf %1241, %1250 : vector<16x16xf32>
    %c5_385 = arith.constant 5 : index
    %c2_386 = arith.constant 2 : index
    %c1_387 = arith.constant 1 : index
    %1252 = vector.load %arg9[%c5_385, %c2_386, %c1_387] : memref<8x18x18xf32, #tpu.memory_space<vmem>>, vector<1x16x16xf32>
    %1253 = vector.shape_cast %1252 : vector<1x16x16xf32> to vector<16x16xf32>
    %c52_388 = arith.constant 52 : index
    %1254 = memref.load %arg5[%c52_388] : memref<144xf32, #tpu.memory_space<smem>>
    %1255 = vector.broadcast %1254 : f32 to vector<16x16xf32>
    %1256 = arith.mulf %1255, %1253 : vector<16x16xf32>
    %1257 = arith.addf %1247, %1256 : vector<16x16xf32>
    %c124_389 = arith.constant 124 : index
    %1258 = memref.load %arg5[%c124_389] : memref<144xf32, #tpu.memory_space<smem>>
    %1259 = vector.broadcast %1258 : f32 to vector<16x16xf32>
    %1260 = arith.mulf %1259, %1253 : vector<16x16xf32>
    %1261 = arith.addf %1251, %1260 : vector<16x16xf32>
    %c5_390 = arith.constant 5 : index
    %c2_391 = arith.constant 2 : index
    %c2_392 = arith.constant 2 : index
    %1262 = vector.load %arg9[%c5_390, %c2_391, %c2_392] : memref<8x18x18xf32, #tpu.memory_space<vmem>>, vector<1x16x16xf32>
    %1263 = vector.shape_cast %1262 : vector<1x16x16xf32> to vector<16x16xf32>
    %c53_393 = arith.constant 53 : index
    %1264 = memref.load %arg5[%c53_393] : memref<144xf32, #tpu.memory_space<smem>>
    %1265 = vector.broadcast %1264 : f32 to vector<16x16xf32>
    %1266 = arith.mulf %1265, %1263 : vector<16x16xf32>
    %1267 = arith.addf %1257, %1266 : vector<16x16xf32>
    %c125_394 = arith.constant 125 : index
    %1268 = memref.load %arg5[%c125_394] : memref<144xf32, #tpu.memory_space<smem>>
    %1269 = vector.broadcast %1268 : f32 to vector<16x16xf32>
    %1270 = arith.mulf %1269, %1263 : vector<16x16xf32>
    %1271 = arith.addf %1261, %1270 : vector<16x16xf32>
    %c6_395 = arith.constant 6 : index
    %c0_396 = arith.constant 0 : index
    %c0_397 = arith.constant 0 : index
    %1272 = vector.load %arg9[%c6_395, %c0_396, %c0_397] : memref<8x18x18xf32, #tpu.memory_space<vmem>>, vector<1x16x16xf32>
    %1273 = vector.shape_cast %1272 : vector<1x16x16xf32> to vector<16x16xf32>
    %c54_398 = arith.constant 54 : index
    %1274 = memref.load %arg5[%c54_398] : memref<144xf32, #tpu.memory_space<smem>>
    %1275 = vector.broadcast %1274 : f32 to vector<16x16xf32>
    %1276 = arith.mulf %1275, %1273 : vector<16x16xf32>
    %1277 = arith.addf %1267, %1276 : vector<16x16xf32>
    %c126_399 = arith.constant 126 : index
    %1278 = memref.load %arg5[%c126_399] : memref<144xf32, #tpu.memory_space<smem>>
    %1279 = vector.broadcast %1278 : f32 to vector<16x16xf32>
    %1280 = arith.mulf %1279, %1273 : vector<16x16xf32>
    %1281 = arith.addf %1271, %1280 : vector<16x16xf32>
    %c6_400 = arith.constant 6 : index
    %c0_401 = arith.constant 0 : index
    %c1_402 = arith.constant 1 : index
    %1282 = vector.load %arg9[%c6_400, %c0_401, %c1_402] : memref<8x18x18xf32, #tpu.memory_space<vmem>>, vector<1x16x16xf32>
    %1283 = vector.shape_cast %1282 : vector<1x16x16xf32> to vector<16x16xf32>
    %c55_403 = arith.constant 55 : index
    %1284 = memref.load %arg5[%c55_403] : memref<144xf32, #tpu.memory_space<smem>>
    %1285 = vector.broadcast %1284 : f32 to vector<16x16xf32>
    %1286 = arith.mulf %1285, %1283 : vector<16x16xf32>
    %1287 = arith.addf %1277, %1286 : vector<16x16xf32>
    %c127_404 = arith.constant 127 : index
    %1288 = memref.load %arg5[%c127_404] : memref<144xf32, #tpu.memory_space<smem>>
    %1289 = vector.broadcast %1288 : f32 to vector<16x16xf32>
    %1290 = arith.mulf %1289, %1283 : vector<16x16xf32>
    %1291 = arith.addf %1281, %1290 : vector<16x16xf32>
    %c6_405 = arith.constant 6 : index
    %c0_406 = arith.constant 0 : index
    %c2_407 = arith.constant 2 : index
    %1292 = vector.load %arg9[%c6_405, %c0_406, %c2_407] : memref<8x18x18xf32, #tpu.memory_space<vmem>>, vector<1x16x16xf32>
    %1293 = vector.shape_cast %1292 : vector<1x16x16xf32> to vector<16x16xf32>
    %c56_408 = arith.constant 56 : index
    %1294 = memref.load %arg5[%c56_408] : memref<144xf32, #tpu.memory_space<smem>>
    %1295 = vector.broadcast %1294 : f32 to vector<16x16xf32>
    %1296 = arith.mulf %1295, %1293 : vector<16x16xf32>
    %1297 = arith.addf %1287, %1296 : vector<16x16xf32>
    %c128_409 = arith.constant 128 : index
    %1298 = memref.load %arg5[%c128_409] : memref<144xf32, #tpu.memory_space<smem>>
    %1299 = vector.broadcast %1298 : f32 to vector<16x16xf32>
    %1300 = arith.mulf %1299, %1293 : vector<16x16xf32>
    %1301 = arith.addf %1291, %1300 : vector<16x16xf32>
    %c6_410 = arith.constant 6 : index
    %c1_411 = arith.constant 1 : index
    %c0_412 = arith.constant 0 : index
    %1302 = vector.load %arg9[%c6_410, %c1_411, %c0_412] : memref<8x18x18xf32, #tpu.memory_space<vmem>>, vector<1x16x16xf32>
    %1303 = vector.shape_cast %1302 : vector<1x16x16xf32> to vector<16x16xf32>
    %c57_413 = arith.constant 57 : index
    %1304 = memref.load %arg5[%c57_413] : memref<144xf32, #tpu.memory_space<smem>>
    %1305 = vector.broadcast %1304 : f32 to vector<16x16xf32>
    %1306 = arith.mulf %1305, %1303 : vector<16x16xf32>
    %1307 = arith.addf %1297, %1306 : vector<16x16xf32>
    %c129_414 = arith.constant 129 : index
    %1308 = memref.load %arg5[%c129_414] : memref<144xf32, #tpu.memory_space<smem>>
    %1309 = vector.broadcast %1308 : f32 to vector<16x16xf32>
    %1310 = arith.mulf %1309, %1303 : vector<16x16xf32>
    %1311 = arith.addf %1301, %1310 : vector<16x16xf32>
    %c6_415 = arith.constant 6 : index
    %c1_416 = arith.constant 1 : index
    %c1_417 = arith.constant 1 : index
    %1312 = vector.load %arg9[%c6_415, %c1_416, %c1_417] : memref<8x18x18xf32, #tpu.memory_space<vmem>>, vector<1x16x16xf32>
    %1313 = vector.shape_cast %1312 : vector<1x16x16xf32> to vector<16x16xf32>
    %c58_418 = arith.constant 58 : index
    %1314 = memref.load %arg5[%c58_418] : memref<144xf32, #tpu.memory_space<smem>>
    %1315 = vector.broadcast %1314 : f32 to vector<16x16xf32>
    %1316 = arith.mulf %1315, %1313 : vector<16x16xf32>
    %1317 = arith.addf %1307, %1316 : vector<16x16xf32>
    %c130_419 = arith.constant 130 : index
    %1318 = memref.load %arg5[%c130_419] : memref<144xf32, #tpu.memory_space<smem>>
    %1319 = vector.broadcast %1318 : f32 to vector<16x16xf32>
    %1320 = arith.mulf %1319, %1313 : vector<16x16xf32>
    %1321 = arith.addf %1311, %1320 : vector<16x16xf32>
    %c6_420 = arith.constant 6 : index
    %c1_421 = arith.constant 1 : index
    %c2_422 = arith.constant 2 : index
    %1322 = vector.load %arg9[%c6_420, %c1_421, %c2_422] : memref<8x18x18xf32, #tpu.memory_space<vmem>>, vector<1x16x16xf32>
    %1323 = vector.shape_cast %1322 : vector<1x16x16xf32> to vector<16x16xf32>
    %c59_423 = arith.constant 59 : index
    %1324 = memref.load %arg5[%c59_423] : memref<144xf32, #tpu.memory_space<smem>>
    %1325 = vector.broadcast %1324 : f32 to vector<16x16xf32>
    %1326 = arith.mulf %1325, %1323 : vector<16x16xf32>
    %1327 = arith.addf %1317, %1326 : vector<16x16xf32>
    %c131_424 = arith.constant 131 : index
    %1328 = memref.load %arg5[%c131_424] : memref<144xf32, #tpu.memory_space<smem>>
    %1329 = vector.broadcast %1328 : f32 to vector<16x16xf32>
    %1330 = arith.mulf %1329, %1323 : vector<16x16xf32>
    %1331 = arith.addf %1321, %1330 : vector<16x16xf32>
    %c6_425 = arith.constant 6 : index
    %c2_426 = arith.constant 2 : index
    %c0_427 = arith.constant 0 : index
    %1332 = vector.load %arg9[%c6_425, %c2_426, %c0_427] : memref<8x18x18xf32, #tpu.memory_space<vmem>>, vector<1x16x16xf32>
    %1333 = vector.shape_cast %1332 : vector<1x16x16xf32> to vector<16x16xf32>
    %c60_428 = arith.constant 60 : index
    %1334 = memref.load %arg5[%c60_428] : memref<144xf32, #tpu.memory_space<smem>>
    %1335 = vector.broadcast %1334 : f32 to vector<16x16xf32>
    %1336 = arith.mulf %1335, %1333 : vector<16x16xf32>
    %1337 = arith.addf %1327, %1336 : vector<16x16xf32>
    %c132_429 = arith.constant 132 : index
    %1338 = memref.load %arg5[%c132_429] : memref<144xf32, #tpu.memory_space<smem>>
    %1339 = vector.broadcast %1338 : f32 to vector<16x16xf32>
    %1340 = arith.mulf %1339, %1333 : vector<16x16xf32>
    %1341 = arith.addf %1331, %1340 : vector<16x16xf32>
    %c6_430 = arith.constant 6 : index
    %c2_431 = arith.constant 2 : index
    %c1_432 = arith.constant 1 : index
    %1342 = vector.load %arg9[%c6_430, %c2_431, %c1_432] : memref<8x18x18xf32, #tpu.memory_space<vmem>>, vector<1x16x16xf32>
    %1343 = vector.shape_cast %1342 : vector<1x16x16xf32> to vector<16x16xf32>
    %c61_433 = arith.constant 61 : index
    %1344 = memref.load %arg5[%c61_433] : memref<144xf32, #tpu.memory_space<smem>>
    %1345 = vector.broadcast %1344 : f32 to vector<16x16xf32>
    %1346 = arith.mulf %1345, %1343 : vector<16x16xf32>
    %1347 = arith.addf %1337, %1346 : vector<16x16xf32>
    %c133_434 = arith.constant 133 : index
    %1348 = memref.load %arg5[%c133_434] : memref<144xf32, #tpu.memory_space<smem>>
    %1349 = vector.broadcast %1348 : f32 to vector<16x16xf32>
    %1350 = arith.mulf %1349, %1343 : vector<16x16xf32>
    %1351 = arith.addf %1341, %1350 : vector<16x16xf32>
    %c6_435 = arith.constant 6 : index
    %c2_436 = arith.constant 2 : index
    %c2_437 = arith.constant 2 : index
    %1352 = vector.load %arg9[%c6_435, %c2_436, %c2_437] : memref<8x18x18xf32, #tpu.memory_space<vmem>>, vector<1x16x16xf32>
    %1353 = vector.shape_cast %1352 : vector<1x16x16xf32> to vector<16x16xf32>
    %c62_438 = arith.constant 62 : index
    %1354 = memref.load %arg5[%c62_438] : memref<144xf32, #tpu.memory_space<smem>>
    %1355 = vector.broadcast %1354 : f32 to vector<16x16xf32>
    %1356 = arith.mulf %1355, %1353 : vector<16x16xf32>
    %1357 = arith.addf %1347, %1356 : vector<16x16xf32>
    %c134_439 = arith.constant 134 : index
    %1358 = memref.load %arg5[%c134_439] : memref<144xf32, #tpu.memory_space<smem>>
    %1359 = vector.broadcast %1358 : f32 to vector<16x16xf32>
    %1360 = arith.mulf %1359, %1353 : vector<16x16xf32>
    %1361 = arith.addf %1351, %1360 : vector<16x16xf32>
    %c7_440 = arith.constant 7 : index
    %c0_441 = arith.constant 0 : index
    %c0_442 = arith.constant 0 : index
    %1362 = vector.load %arg9[%c7_440, %c0_441, %c0_442] : memref<8x18x18xf32, #tpu.memory_space<vmem>>, vector<1x16x16xf32>
    %1363 = vector.shape_cast %1362 : vector<1x16x16xf32> to vector<16x16xf32>
    %c63_443 = arith.constant 63 : index
    %1364 = memref.load %arg5[%c63_443] : memref<144xf32, #tpu.memory_space<smem>>
    %1365 = vector.broadcast %1364 : f32 to vector<16x16xf32>
    %1366 = arith.mulf %1365, %1363 : vector<16x16xf32>
    %1367 = arith.addf %1357, %1366 : vector<16x16xf32>
    %c135_444 = arith.constant 135 : index
    %1368 = memref.load %arg5[%c135_444] : memref<144xf32, #tpu.memory_space<smem>>
    %1369 = vector.broadcast %1368 : f32 to vector<16x16xf32>
    %1370 = arith.mulf %1369, %1363 : vector<16x16xf32>
    %1371 = arith.addf %1361, %1370 : vector<16x16xf32>
    %c7_445 = arith.constant 7 : index
    %c0_446 = arith.constant 0 : index
    %c1_447 = arith.constant 1 : index
    %1372 = vector.load %arg9[%c7_445, %c0_446, %c1_447] : memref<8x18x18xf32, #tpu.memory_space<vmem>>, vector<1x16x16xf32>
    %1373 = vector.shape_cast %1372 : vector<1x16x16xf32> to vector<16x16xf32>
    %c64_448 = arith.constant 64 : index
    %1374 = memref.load %arg5[%c64_448] : memref<144xf32, #tpu.memory_space<smem>>
    %1375 = vector.broadcast %1374 : f32 to vector<16x16xf32>
    %1376 = arith.mulf %1375, %1373 : vector<16x16xf32>
    %1377 = arith.addf %1367, %1376 : vector<16x16xf32>
    %c136_449 = arith.constant 136 : index
    %1378 = memref.load %arg5[%c136_449] : memref<144xf32, #tpu.memory_space<smem>>
    %1379 = vector.broadcast %1378 : f32 to vector<16x16xf32>
    %1380 = arith.mulf %1379, %1373 : vector<16x16xf32>
    %1381 = arith.addf %1371, %1380 : vector<16x16xf32>
    %c7_450 = arith.constant 7 : index
    %c0_451 = arith.constant 0 : index
    %c2_452 = arith.constant 2 : index
    %1382 = vector.load %arg9[%c7_450, %c0_451, %c2_452] : memref<8x18x18xf32, #tpu.memory_space<vmem>>, vector<1x16x16xf32>
    %1383 = vector.shape_cast %1382 : vector<1x16x16xf32> to vector<16x16xf32>
    %c65_453 = arith.constant 65 : index
    %1384 = memref.load %arg5[%c65_453] : memref<144xf32, #tpu.memory_space<smem>>
    %1385 = vector.broadcast %1384 : f32 to vector<16x16xf32>
    %1386 = arith.mulf %1385, %1383 : vector<16x16xf32>
    %1387 = arith.addf %1377, %1386 : vector<16x16xf32>
    %c137_454 = arith.constant 137 : index
    %1388 = memref.load %arg5[%c137_454] : memref<144xf32, #tpu.memory_space<smem>>
    %1389 = vector.broadcast %1388 : f32 to vector<16x16xf32>
    %1390 = arith.mulf %1389, %1383 : vector<16x16xf32>
    %1391 = arith.addf %1381, %1390 : vector<16x16xf32>
    %c7_455 = arith.constant 7 : index
    %c1_456 = arith.constant 1 : index
    %c0_457 = arith.constant 0 : index
    %1392 = vector.load %arg9[%c7_455, %c1_456, %c0_457] : memref<8x18x18xf32, #tpu.memory_space<vmem>>, vector<1x16x16xf32>
    %1393 = vector.shape_cast %1392 : vector<1x16x16xf32> to vector<16x16xf32>
    %c66_458 = arith.constant 66 : index
    %1394 = memref.load %arg5[%c66_458] : memref<144xf32, #tpu.memory_space<smem>>
    %1395 = vector.broadcast %1394 : f32 to vector<16x16xf32>
    %1396 = arith.mulf %1395, %1393 : vector<16x16xf32>
    %1397 = arith.addf %1387, %1396 : vector<16x16xf32>
    %c138_459 = arith.constant 138 : index
    %1398 = memref.load %arg5[%c138_459] : memref<144xf32, #tpu.memory_space<smem>>
    %1399 = vector.broadcast %1398 : f32 to vector<16x16xf32>
    %1400 = arith.mulf %1399, %1393 : vector<16x16xf32>
    %1401 = arith.addf %1391, %1400 : vector<16x16xf32>
    %c7_460 = arith.constant 7 : index
    %c1_461 = arith.constant 1 : index
    %c1_462 = arith.constant 1 : index
    %1402 = vector.load %arg9[%c7_460, %c1_461, %c1_462] : memref<8x18x18xf32, #tpu.memory_space<vmem>>, vector<1x16x16xf32>
    %1403 = vector.shape_cast %1402 : vector<1x16x16xf32> to vector<16x16xf32>
    %c67_463 = arith.constant 67 : index
    %1404 = memref.load %arg5[%c67_463] : memref<144xf32, #tpu.memory_space<smem>>
    %1405 = vector.broadcast %1404 : f32 to vector<16x16xf32>
    %1406 = arith.mulf %1405, %1403 : vector<16x16xf32>
    %1407 = arith.addf %1397, %1406 : vector<16x16xf32>
    %c139_464 = arith.constant 139 : index
    %1408 = memref.load %arg5[%c139_464] : memref<144xf32, #tpu.memory_space<smem>>
    %1409 = vector.broadcast %1408 : f32 to vector<16x16xf32>
    %1410 = arith.mulf %1409, %1403 : vector<16x16xf32>
    %1411 = arith.addf %1401, %1410 : vector<16x16xf32>
    %c7_465 = arith.constant 7 : index
    %c1_466 = arith.constant 1 : index
    %c2_467 = arith.constant 2 : index
    %1412 = vector.load %arg9[%c7_465, %c1_466, %c2_467] : memref<8x18x18xf32, #tpu.memory_space<vmem>>, vector<1x16x16xf32>
    %1413 = vector.shape_cast %1412 : vector<1x16x16xf32> to vector<16x16xf32>
    %c68_468 = arith.constant 68 : index
    %1414 = memref.load %arg5[%c68_468] : memref<144xf32, #tpu.memory_space<smem>>
    %1415 = vector.broadcast %1414 : f32 to vector<16x16xf32>
    %1416 = arith.mulf %1415, %1413 : vector<16x16xf32>
    %1417 = arith.addf %1407, %1416 : vector<16x16xf32>
    %c140_469 = arith.constant 140 : index
    %1418 = memref.load %arg5[%c140_469] : memref<144xf32, #tpu.memory_space<smem>>
    %1419 = vector.broadcast %1418 : f32 to vector<16x16xf32>
    %1420 = arith.mulf %1419, %1413 : vector<16x16xf32>
    %1421 = arith.addf %1411, %1420 : vector<16x16xf32>
    %c7_470 = arith.constant 7 : index
    %c2_471 = arith.constant 2 : index
    %c0_472 = arith.constant 0 : index
    %1422 = vector.load %arg9[%c7_470, %c2_471, %c0_472] : memref<8x18x18xf32, #tpu.memory_space<vmem>>, vector<1x16x16xf32>
    %1423 = vector.shape_cast %1422 : vector<1x16x16xf32> to vector<16x16xf32>
    %c69_473 = arith.constant 69 : index
    %1424 = memref.load %arg5[%c69_473] : memref<144xf32, #tpu.memory_space<smem>>
    %1425 = vector.broadcast %1424 : f32 to vector<16x16xf32>
    %1426 = arith.mulf %1425, %1423 : vector<16x16xf32>
    %1427 = arith.addf %1417, %1426 : vector<16x16xf32>
    %c141_474 = arith.constant 141 : index
    %1428 = memref.load %arg5[%c141_474] : memref<144xf32, #tpu.memory_space<smem>>
    %1429 = vector.broadcast %1428 : f32 to vector<16x16xf32>
    %1430 = arith.mulf %1429, %1423 : vector<16x16xf32>
    %1431 = arith.addf %1421, %1430 : vector<16x16xf32>
    %c7_475 = arith.constant 7 : index
    %c2_476 = arith.constant 2 : index
    %c1_477 = arith.constant 1 : index
    %1432 = vector.load %arg9[%c7_475, %c2_476, %c1_477] : memref<8x18x18xf32, #tpu.memory_space<vmem>>, vector<1x16x16xf32>
    %1433 = vector.shape_cast %1432 : vector<1x16x16xf32> to vector<16x16xf32>
    %c70_478 = arith.constant 70 : index
    %1434 = memref.load %arg5[%c70_478] : memref<144xf32, #tpu.memory_space<smem>>
    %1435 = vector.broadcast %1434 : f32 to vector<16x16xf32>
    %1436 = arith.mulf %1435, %1433 : vector<16x16xf32>
    %1437 = arith.addf %1427, %1436 : vector<16x16xf32>
    %c142_479 = arith.constant 142 : index
    %1438 = memref.load %arg5[%c142_479] : memref<144xf32, #tpu.memory_space<smem>>
    %1439 = vector.broadcast %1438 : f32 to vector<16x16xf32>
    %1440 = arith.mulf %1439, %1433 : vector<16x16xf32>
    %1441 = arith.addf %1431, %1440 : vector<16x16xf32>
    %c7_480 = arith.constant 7 : index
    %c2_481 = arith.constant 2 : index
    %c2_482 = arith.constant 2 : index
    %1442 = vector.load %arg9[%c7_480, %c2_481, %c2_482] : memref<8x18x18xf32, #tpu.memory_space<vmem>>, vector<1x16x16xf32>
    %1443 = vector.shape_cast %1442 : vector<1x16x16xf32> to vector<16x16xf32>
    %c71_483 = arith.constant 71 : index
    %1444 = memref.load %arg5[%c71_483] : memref<144xf32, #tpu.memory_space<smem>>
    %1445 = vector.broadcast %1444 : f32 to vector<16x16xf32>
    %1446 = arith.mulf %1445, %1443 : vector<16x16xf32>
    %1447 = arith.addf %1437, %1446 : vector<16x16xf32>
    %c143_484 = arith.constant 143 : index
    %1448 = memref.load %arg5[%c143_484] : memref<144xf32, #tpu.memory_space<smem>>
    %1449 = vector.broadcast %1448 : f32 to vector<16x16xf32>
    %1450 = arith.mulf %1449, %1443 : vector<16x16xf32>
    %1451 = arith.addf %1441, %1450 : vector<16x16xf32>
    %c0_485 = arith.constant 0 : index
    %c0_486 = arith.constant 0 : index
    %c0_487 = arith.constant 0 : index
    %c0_488 = arith.constant 0 : index
    %1452 = vector.load %arg2[%c0_485, %c0_486, %c0_487, %c0_488] : memref<1x2x16x16xf32, #tpu.memory_space<vmem>>, vector<1x1x16x16xf32>
    %1453 = vector.shape_cast %1452 : vector<1x1x16x16xf32> to vector<16x16xf32>
    %c0_489 = arith.constant 0 : index
    %1454 = memref.load %arg6[%c0_489] : memref<2xf32, #tpu.memory_space<smem>>
    %1455 = vector.broadcast %1454 : f32 to vector<16x16xf32>
    %1456 = arith.addf %1447, %1455 : vector<16x16xf32>
    %1457 = arith.addf %1456, %1453 : vector<16x16xf32>
    %1458 = arith.negf %1457 : vector<16x16xf32>
    %1459 = math.exp %1458 : vector<16x16xf32>
    %cst_490 = arith.constant 1.000000e+00 : f32
    %1460 = vector.broadcast %cst_490 : f32 to vector<16x16xf32>
    %1461 = arith.addf %1460, %1459 : vector<16x16xf32>
    %1462 = arith.divf %1460, %1461 : vector<16x16xf32>
    %1463 = arith.mulf %1457, %1462 : vector<16x16xf32>
    %c0_491 = arith.constant 0 : index
    %c2_492 = arith.constant 2 : index
    %c0_493 = arith.constant 0 : index
    %c0_494 = arith.constant 0 : index
    %1464 = vector.load %arg7[%c0_491, %c2_492, %c0_493, %c0_494] : memref<1x4x16x16xf32, #tpu.memory_space<vmem>>, vector<1x1x16x16xf32>
    %1465 = vector.shape_cast %1464 : vector<1x1x16x16xf32> to vector<16x16xf32>
    %1466 = vector.shape_cast %1463 : vector<16x16xf32> to vector<1x1x16x16xf32>
    tpu.vector_store %arg7[%c0_491, %c2_492, %c0_493, %c0_494], %1466 {strides = array<i32>} : memref<1x4x16x16xf32, #tpu.memory_space<vmem>>, vector<1x1x16x16xf32>,
    %c0_495 = arith.constant 0 : index
    %c1_496 = arith.constant 1 : index
    %c0_497 = arith.constant 0 : index
    %c0_498 = arith.constant 0 : index
    %1467 = vector.load %arg2[%c0_495, %c1_496, %c0_497, %c0_498] : memref<1x2x16x16xf32, #tpu.memory_space<vmem>>, vector<1x1x16x16xf32>
    %1468 = vector.shape_cast %1467 : vector<1x1x16x16xf32> to vector<16x16xf32>
    %c1_499 = arith.constant 1 : index
    %1469 = memref.load %arg6[%c1_499] : memref<2xf32, #tpu.memory_space<smem>>
    %1470 = vector.broadcast %1469 : f32 to vector<16x16xf32>
    %1471 = arith.addf %1451, %1470 : vector<16x16xf32>
    %1472 = arith.addf %1471, %1468 : vector<16x16xf32>
    %1473 = arith.negf %1472 : vector<16x16xf32>
    %1474 = math.exp %1473 : vector<16x16xf32>
    %cst_500 = arith.constant 1.000000e+00 : f32
    %1475 = vector.broadcast %cst_500 : f32 to vector<16x16xf32>
    %1476 = arith.addf %1475, %1474 : vector<16x16xf32>
    %1477 = arith.divf %1475, %1476 : vector<16x16xf32>
    %1478 = arith.mulf %1472, %1477 : vector<16x16xf32>
    %c0_501 = arith.constant 0 : index
    %c3_502 = arith.constant 3 : index
    %c0_503 = arith.constant 0 : index
    %c0_504 = arith.constant 0 : index
    %1479 = vector.load %arg7[%c0_501, %c3_502, %c0_503, %c0_504] : memref<1x4x16x16xf32, #tpu.memory_space<vmem>>, vector<1x1x16x16xf32>
    %1480 = vector.shape_cast %1479 : vector<1x1x16x16xf32> to vector<16x16xf32>
    %1481 = vector.shape_cast %1478 : vector<16x16xf32> to vector<1x1x16x16xf32>
    tpu.vector_store %arg7[%c0_501, %c3_502, %c0_503, %c0_504], %1481 {strides = array<i32>} : memref<1x4x16x16xf32, #tpu.memory_space<vmem>>, vector<1x1x16x16xf32>,
    %c0_505 = arith.constant 0 : index
    %c0_506 = arith.constant 0 : index
    %c0_507 = arith.constant 0 : index
    %c0_508 = arith.constant 0 : index
    %1482 = vector.load %arg1[%c0_505, %c0_506, %c0_507, %c0_508] : memref<1x2x16x16xf32, #tpu.memory_space<vmem>>, vector<1x1x16x16xf32>
    %1483 = vector.shape_cast %1482 : vector<1x1x16x16xf32> to vector<16x16xf32>
    %c0_509 = arith.constant 0 : index
    %c0_510 = arith.constant 0 : index
    %c0_511 = arith.constant 0 : index
    %c0_512 = arith.constant 0 : index
    %1484 = vector.load %arg7[%c0_509, %c0_510, %c0_511, %c0_512] : memref<1x4x16x16xf32, #tpu.memory_space<vmem>>, vector<1x1x16x16xf32>
    %1485 = vector.shape_cast %1484 : vector<1x1x16x16xf32> to vector<16x16xf32>
    %1486 = vector.shape_cast %1483 : vector<16x16xf32> to vector<1x1x16x16xf32>
    tpu.vector_store %arg7[%c0_509, %c0_510, %c0_511, %c0_512], %1486 {strides = array<i32>} : memref<1x4x16x16xf32, #tpu.memory_space<vmem>>, vector<1x1x16x16xf32>,
    %c0_513 = arith.constant 0 : index
    %c1_514 = arith.constant 1 : index
    %c0_515 = arith.constant 0 : index
    %c0_516 = arith.constant 0 : index
    %1487 = vector.load %arg1[%c0_513, %c1_514, %c0_515, %c0_516] : memref<1x2x16x16xf32, #tpu.memory_space<vmem>>, vector<1x1x16x16xf32>
    %1488 = vector.shape_cast %1487 : vector<1x1x16x16xf32> to vector<16x16xf32>
    %c0_517 = arith.constant 0 : index
    %c1_518 = arith.constant 1 : index
    %c0_519 = arith.constant 0 : index
    %c0_520 = arith.constant 0 : index
    %1489 = vector.load %arg7[%c0_517, %c1_518, %c0_519, %c0_520] : memref<1x4x16x16xf32, #tpu.memory_space<vmem>>, vector<1x1x16x16xf32>
    %1490 = vector.shape_cast %1489 : vector<1x1x16x16xf32> to vector<16x16xf32>
    %1491 = vector.shape_cast %1488 : vector<16x16xf32> to vector<1x1x16x16xf32>
    tpu.vector_store %arg7[%c0_517, %c1_518, %c0_519, %c0_520], %1491 {strides = array<i32>} : memref<1x4x16x16xf32, #tpu.memory_space<vmem>>, vector<1x1x16x16xf32>,
    return
  }
  func.func @transform_0(%arg0: i32) -> (i32, i32, i32, i32) {
    %c0_i32 = arith.constant 0 : i32
    %c0_i32_0 = arith.constant 0 : i32
    %c0_i32_1 = arith.constant 0 : i32
    %c0_i32_2 = arith.constant 0 : i32
    return %arg0, %c0_i32, %c0_i32_0, %c0_i32_1 : i32, i32, i32, i32
  }
  func.func @transform_1(%arg0: i32) -> (i32, i32, i32, i32) {
    %c0_i32 = arith.constant 0 : i32
    %c0_i32_0 = arith.constant 0 : i32
    %c0_i32_1 = arith.constant 0 : i32
    %c0_i32_2 = arith.constant 0 : i32
    return %arg0, %c0_i32, %c0_i32_0, %c0_i32_1 : i32, i32, i32, i32
  }
  func.func @transform_2(%arg0: i32) -> i32 {
    %c0_i32 = arith.constant 0 : i32
    %c0_i32_0 = arith.constant 0 : i32
    return %c0_i32 : i32
  }
  func.func @transform_3(%arg0: i32) -> i32 {
    %c0_i32 = arith.constant 0 : i32
    %c0_i32_0 = arith.constant 0 : i32
    return %c0_i32 : i32
  }
  func.func @transform_4(%arg0: i32) -> i32 {
    %c0_i32 = arith.constant 0 : i32
    %c0_i32_0 = arith.constant 0 : i32
    return %c0_i32 : i32
  }
  func.func @transform_5(%arg0: i32) -> i32 {
    %c0_i32 = arith.constant 0 : i32
    %c0_i32_0 = arith.constant 0 : i32
    return %c0_i32 : i32
  }
  func.func @transform_6(%arg0: i32) -> (i32, i32, i32, i32) {
    %c0_i32 = arith.constant 0 : i32
    %c0_i32_0 = arith.constant 0 : i32
    %c0_i32_1 = arith.constant 0 : i32
    %c0_i32_2 = arith.constant 0 : i32
    return %arg0, %c0_i32, %c0_i32_0, %c0_i32_1 : i32, i32, i32, i32
  }
}

</mosaic_0001>

<bundles_post_ra>
// kernel: tpu_custom_call.1
= control target key start
LH: loop header
LB: loop body
LE: loop exit
PB: predicated region body
PF: predicated region fallthrough
CT: control target
= control target key end

     0   :  { %s7690_s0 = inlined_call_operand.hbm [shape: f32[2,2,16,16], index: 0, kind: input, shape index: {}]   ;;  %s7691_s1 = inlined_call_operand.hbm [shape: f32[2,2,16,16], index: 1, kind: input, shape index: {}]   ;;  %s7692_s2 = inlined_call_operand.vmem [shape: f32[144], index: 2, kind: input, shape index: {}]   ;;  %s7693_s3 = inlined_call_operand.vmem [shape: f32[8], index: 3, kind: input, shape index: {}]   ;;  %s7694_s4 = inlined_call_operand.vmem [shape: f32[144], index: 4, kind: input, shape index: {}]   ;;  %s7695_s5 = inlined_call_operand.vmem [shape: f32[2], index: 5, kind: input, shape index: {}]   ;;  %s7696_s6 = inlined_call_operand.hbm [shape: f32[2,4,16,16], index: 6, kind: output, shape index: {}]  }
   0x1   :  { %7705 = sst [smem:[#allocation23_spill]] %s7690_s0 }
   0x2   :  { %7706 = sst [smem:[#allocation24_spill]] %s7692_s2 }
   0x3   :  { %7707 = sst [smem:[#allocation25_spill]] %s7693_s3 }
   0x4   :  { %11 = vsyncpa [#allocation5], 0 }
   0x5   :  { %13 = vsyncpa [#allocation5 + $0x1], 0 }
   0x6   :  { %14 = vsyncpa [#allocation9], 0 }
   0x7   :  { %16 = vsyncpa [#allocation9 + $0x1], 0 }
   0x8   :  { %17 = vsyncpa [#allocation7], 0 }
   0x9   :  { %18 = vsyncpa [#allocation12], 0 }
   0xa   :  { %19 = vsyncpa [#allocation15], 0 }
   0xb   :  { %20 = vsyncpa [#allocation6], 0 }
   0xc   :  { %22 = vsyncpa [#allocation6 + $0x1], 0  ;;  %s4977_s21 = smov 0   ;;  %s4979_s22 = smov 0  }
   0xd   :  { %s4981_s23 = smov 0   ;;  %s4983_s24 = smov 0  }
   0xe LB: > { %s4998_s25 = sadd.s32 4294967295, %s4925_s24   ;;  %s4188_s26 = sadd.s32 4294967294, %s4925_s24   ;;  %s4925_s24 = sphi %s4983_s24, %s7734_s24   ;;  %s4921_s23 = sphi %s4981_s23, %s7733_s23   ;;  %s4917_s22 = sphi %s4979_s22, %s7732_s22   ;;  %s4913_s21 = sphi %s4977_s21, %s7731_s21  }
   0xf   : > { %p48_p0 = scmp.ne.s32.totalorder %s4917_s22, %s4913_s21  ;;  %p7697_p1 = scmp.eq.s32.totalorder %s4998_s25, 0 }
  0x10   : > { %p188_p3 = scmp.eq.s32.totalorder %s4188_s26, 1  ;;  %p4189_p5 = scmp.ge.s32.totalorder %s4925_s24, 1 }
  0x11   : > { %p5007_p4 = por %p7697_p1, %p48_p0  ;;  %p195_p7 = scmp.lt.s32.totalorder %s4925_s24, 3 }
  0x12   : > { %p5012_p6 = por %p188_p3, %p48_p0  ;;  %s7710_s3 = sld [smem:[#allocation25_spill]] }
  0x13   : > { %s7708_s27 = scalar_select %p5007_p4, 1, 0 }
  0x14   : > { %s7709_s28 = scalar_select %p5012_p6, 1, 0 }
  0x15   : > { %p5020_p8 = pnand %p4189_p5, %p195_p7  ;;  %s7712_s2 = sld [smem:[#allocation24_spill]] }
  0x16   : > { %s230_s15 = sshll.u32 %s7694_s4, 4  ;;  %s241_s18 = sshll.u32 %s7695_s5, 4  ;;  %s5039_s15 = int_to_ptr.vmem [resolvable:$true] %s230_s15  ;;  %s242_s18 = int_to_ptr.vmem [resolvable:$true] %s241_s18 }
  0x17   : > { %s7711_s8 = scalar_select %p5020_p8, 1, 0 }
  0x18   : > { %s219_s7 = sshll.u32 %s7710_s3, 4  ;;  %p4565_p10 = pneg %p5020_p8  ;;  %s220_s7 = int_to_ptr.vmem [resolvable:$true] %s219_s7 }
  0x19   : > { %s4723_s19 = scalar_lea.vmem %s220_s7, 16  ;;  %p4731_p5 = scmp.lt.s32.totalorder %s220_s7, %s220_s7 }
  0x1a   : > { %p5032_p11 = pnand %p4565_p10, %p7697_p1  ;;  %p4724_p12 = scmp.ne.s32.totalorder %s220_s7, %s4723_s19 }
  0x1b   : > { %s208_s11 = sshll.u32 %s7712_s2, 4  ;;  %p4732_p7 = scmp.lt.s32.totalorder %s4723_s19, %s4723_s19  ;;  %s209_s11 = int_to_ptr.vmem [resolvable:$true] %s208_s11 }
  0x1c   : > { %p4725_p13 = pneg %p5032_p11 }
  0x1d   : > { %p4733_p10 = por %p4732_p7, %p4731_p5 }
  0x1e   : > { %p4726_p0 = pnand %p4725_p13, %p4724_p12 }
  0x20   : > { %p4727_p3 = pneg %p4726_p0 }
  0x22   : > { %p4734_p9 = pnand %p4733_p10, %p4727_p3 }
  0x24   : > { %4737 = shalt.err (!%p4734_p9)
}
  0x25   : > { %s4927_s20 = smov [#allocation11]   ;;  %s4738_s26 = scalar_lea.vmem %s209_s11, 32 }
  0x26   : > { %4571 = dma.vmem_to_smem (!%p5032_p11), %s220_s7, 16, %s4927_s20, [#allocation12]  }
  0x27   : > { %p4739_p1 = scmp.ne.s32.totalorder %s209_s11, %s4738_s26  ;;  %p4746_p4 = scmp.lt.s32.totalorder %s209_s11, %s209_s11 }
  0x28   : > { %p4747_p8 = scmp.lt.s32.totalorder %s4738_s26, %s4738_s26 }
  0x29   : > { %p4741_p2 = pnand %p4739_p1, %p4725_p13 }
  0x2a   : > { %p4748_p12 = por %p4747_p8, %p4746_p4 }
  0x2b   : > { %p4742_p6 = pneg %p4741_p2 }
  0x2d   : > { %p4749_p0 = pnand %p4748_p12, %p4742_p6 }
  0x2f   : > { %4752 = shalt.err (!%p4749_p0)
}
  0x30   : > { %s4928_s29 = smov [#allocation10]   ;;  %s4753_s30 = scalar_lea.vmem %s5039_s15, 32 }
  0x31   : > { %4568 = dma.vmem_to_smem (!%p5032_p11), %s209_s11, 32, %s4928_s29, [#allocation7]  }
  0x32   : > { %p4754_p9 = scmp.ne.s32.totalorder %s5039_s15, %s4753_s30  ;;  %p4761_p2 = scmp.lt.s32.totalorder %s5039_s15, %s5039_s15 }
  0x33   : > { %p4762_p5 = scmp.lt.s32.totalorder %s4753_s30, %s4753_s30 }
  0x34   : > { %p4756_p3 = pnand %p4754_p9, %p4725_p13 }
  0x35   : > { %p4763_p4 = por %p4762_p5, %p4761_p2 }
  0x36   : > { %p4757_p1 = pneg %p4756_p3 }
  0x38   : > { %p4764_p6 = pnand %p4763_p4, %p4757_p1 }
  0x3a   : > { %4767 = shalt.err (!%p4764_p6)
}
  0x3b   : > { %s4929_s7 = smov [#allocation13]   ;;  %s4768_s11 = scalar_lea.vmem %s242_s18, 16 }
  0x3c   : > { %4574 = dma.vmem_to_smem (!%p5032_p11), %s5039_s15, 32, %s4929_s7, [#allocation12]  }
  0x3d   : > { %p4769_p8 = scmp.ne.s32.totalorder %s242_s18, %s4768_s11  ;;  %p4776_p12 = scmp.lt.s32.totalorder %s242_s18, %s242_s18 }
  0x3e   : > { %p4777_p0 = scmp.lt.s32.totalorder %s4768_s11, %s4768_s11 }
  0x3f   : > { %p4771_p7 = pnand %p4769_p8, %p4725_p13 }
  0x40   : > { %p4778_p9 = por %p4777_p0, %p4776_p12 }
  0x41   : > { %p4772_p10 = pneg %p4771_p7 }
  0x43   : > { %p4779_p3 = pnand %p4778_p9, %p4772_p10 }
  0x45   : > { %4782 = shalt.err (!%p4779_p3)
}
  0x46   : > { %s4930_s13 = smov [#allocation14]   ;;  %s5076_s14 = sadd.s32 1, %s4925_s24  }
  0x47   : > { %4577 = dma.vmem_to_smem (!%p5032_p11), %s242_s18, 16, %s4930_s13, [#allocation15]  }
  0x48   : > { %s32_s15 = ssub.s32 %s4925_s24, %s5076_s14  ;;  %s35_s16 = sadd.s32 1, %s4921_s23 }
  0x49   : > { %p33_p13 = scmp.eq.s32.totalorder %s32_s15, 0  ;;  %p42_p1 = scmp.ne.s32.totalorder %s4921_s23, %s4917_s22 }
  0x4a   : > { %p43_p2 = scmp.eq.s32.totalorder %s4925_s24, 0  ;;  %p7714_p4 = scmp.eq.s32.totalorder %s4998_s25, 1 }
  0x4b   : > { %s5085_s12 = scalar_select %p33_p13, %s4921_s23, %s35_s16  }
  0x4c   : > { %p44_p5 = por %p43_p2, %p42_p1  ;;  %p5089_p6 = por %p7714_p4, %p42_p1 }
  0x4d   : > { %p4593_p8 = scmp.lt.s32.totalorder %s4925_s24, 2  ;;  %s5095_s19 = sand.u32 1, %s4921_s23  }
  0x4e   : > { %s7700_s18 = sshll.u32 %s5095_s19, 5  ;;  %s4540_s20 = sshll.u32 %s4925_s24, 9 }
  0x4f   : > { %s7716_s0 = sld [smem:[#allocation23_spill]]  ;;  %s256_s7 = scalar_lea.vmem [#allocation4], %s7700_s18 }
  0x50   : > { %s263_s9 = sshll.u32 %s256_s7, 4  ;;  %p5110_p11 = pnand %p4593_p8, %p44_p5  ;;  %s5108_s9 = int_to_ptr.vmem [resolvable:$true] %s263_s9 }
  0x51   : > { %s253_s11 = scalar_lea.sflag [#allocation5], %s5095_s19 }
  0x52   : > { %p4785_p10 = pneg %p5110_p11 }
  0x55   : > { %s5104_s30 = scalar_lea.hbm %s7716_s0, %s4540_s20  ;;  %s4788_s26 = scalar_lea.hbm %s7716_s0, 1024 }
  0x56   : > { %s4783_s13 = scalar_lea.hbm %s5104_s30, 512  ;;  %p4789_p9 = scmp.lt.u32.totalorder %s5104_s30, %s7716_s0 }
  0x57   : > { %p4784_p7 = scmp.ne.s32.totalorder %s5104_s30, %s4783_s13  ;;  %p4790_p3 = scmp.lt.u32.totalorder %s4788_s26, %s4783_s13 }
  0x58   : > { %p4792_p1 = scmp.lt.u32.totalorder %s4783_s13, %s5104_s30 }
  0x59   : > { %p4786_p12 = pnand %p4785_p10, %p4784_p7  ;;  %p4791_p13 = por %p4790_p3, %p4789_p9 }
  0x5b   : > { %p4787_p0 = pneg %p4786_p12  ;;  %p4793_p2 = por %p4792_p1, %p4791_p13 }
  0x5d   : > { %p4794_p5 = pnand %p4793_p2, %p4787_p0 }
  0x5f   : > { %4797 = shalt.err (!%p4794_p5)
}
  0x60   : > { %s4798_s18 = scalar_lea.vmem %s5108_s9, 512  ;;  %s4931_s15 = smov [#allocation4]  }
  0x61   : > { %p4799_p4 = scmp.ne.s32.totalorder %s5108_s9, %s4798_s18  ;;  %s4803_s16 = sshll.u32 %s4931_s15, 4  ;;  %s4804_s16 = int_to_ptr.vmem [resolvable:$false] %s4803_s16 }
  0x62   : > { %s4805_s29 = scalar_lea.vmem %s4804_s16, 1024  ;;  %p4806_p12 = scmp.lt.s32.totalorder %s5108_s9, %s4804_s16 }
  0x63   : > { %p4801_p8 = pnand %p4799_p4, %p4785_p10  ;;  %p4807_p9 = scmp.lt.s32.totalorder %s4805_s29, %s4798_s18 }
  0x65   : > { %p4802_p7 = pneg %p4801_p8  ;;  %p4808_p3 = por %p4807_p9, %p4806_p12 }
  0x67   : > { %p4809_p13 = pnand %p4808_p3, %p4802_p7 }
  0x69   : > { %4812 = shalt.err (!%p4809_p13)
}
  0x6a   : > { %s4932_s13 = smov 128   ;;  %s4933_s26 = smov 8  }
  0x6b   : > { %4581 = dma.hbm_to_vmem [thread:$0]  (!%p5110_p11), %s5104_s30, 512, %s5108_s9, %s253_s11, %s4932_s13, %s4932_s13, %s4933_s26  }
  0x6c   : > { %s5150_s15 = scalar_lea.hbm %s7691_s1, %s4540_s20  ;;  %s7718_s16 = sshll.u32 %s5095_s19, 5 }
  0x6d   : > { %s277_s29 = scalar_lea.vmem [#allocation8], %s7718_s16  ;;  %s274_s2 = scalar_lea.sflag [#allocation9], %s5095_s19 }
  0x6e   : > { %s284_s0 = sshll.u32 %s277_s29, 4  ;;  %s4813_s3 = scalar_lea.hbm %s5150_s15, 512  ;;  %s5154_s0 = int_to_ptr.vmem [resolvable:$true] %s284_s0 }
  0x6f   : > { %p4814_p0 = scmp.ne.s32.totalorder %s5150_s15, %s4813_s3  ;;  %s4818_s20 = scalar_lea.hbm %s7691_s1, 1024 }
  0x70   : > { %p4819_p5 = scmp.lt.u32.totalorder %s5150_s15, %s7691_s1  ;;  %p4820_p4 = scmp.lt.u32.totalorder %s4818_s20, %s4813_s3 }
  0x71   : > { %p4816_p1 = pnand %p4814_p0, %p4785_p10  ;;  %p4822_p7 = scmp.lt.u32.totalorder %s4813_s3, %s5150_s15 }
  0x72   : > { %p4821_p8 = por %p4820_p4, %p4819_p5 }
  0x73   : > { %p4817_p2 = pneg %p4816_p1 }
  0x74   : > { %p4823_p12 = por %p4822_p7, %p4821_p8 }
  0x76   : > { %p4824_p9 = pnand %p4823_p12, %p4817_p2 }
  0x78   : > { %4827 = shalt.err (!%p4824_p9)
}
  0x79   : > { %s4828_s7 = scalar_lea.vmem %s5154_s0, 512  ;;  %s4934_s16 = smov [#allocation8]  }
  0x7a   : > { %p4829_p3 = scmp.ne.s32.totalorder %s5154_s0, %s4828_s7  ;;  %s4833_s29 = sshll.u32 %s4934_s16, 4  ;;  %s4834_s29 = int_to_ptr.vmem [resolvable:$false] %s4833_s29 }
  0x7b   : > { %s4835_s30 = scalar_lea.vmem %s4834_s29, 1024  ;;  %p4836_p1 = scmp.lt.s32.totalorder %s5154_s0, %s4834_s29 }
  0x7c   : > { %p4831_p13 = pnand %p4829_p3, %p4785_p10  ;;  %p4837_p5 = scmp.lt.s32.totalorder %s4835_s30, %s4828_s7 }
  0x7e   : > { %p4832_p0 = pneg %p4831_p13  ;;  %p4838_p4 = por %p4837_p5, %p4836_p1 }
  0x80   : > { %p4839_p8 = pnand %p4838_p4, %p4832_p0 }
  0x82   : > { %4842 = shalt.err (!%p4839_p8)
}
  0x83   : > { %4584 = dma.hbm_to_vmem [thread:$0]  (!%p5110_p11), %s5150_s15, 512, %s5154_s0, %s274_s2, %s4932_s13, %s4932_s13, %s4933_s26  }
  0x84   : > { %p7719_p10 = scmp.ne.s32.totalorder %s7711_s8, 0 }
  0x85   : > { %s5188_s3 = sand.u32 (!%p7719_p10), 1, %s4917_s22   ;;  %p7720_p2 = scmp.ne.s32.totalorder (!%p7719_p10), %s7708_s27, 0 }
  0x86   : > { %296 = sbr.rel (%p7719_p10) target bundleno = 1455 (0x5af), region = 44  ;;  %s4202_s9 = sshll.u32 (!%p7719_p10), %s5188_s3, 5 }
  0x87   : > { %s299_s20 = scalar_lea.sflag (!%p7719_p10), [#allocation5], %s5188_s3  ;;  %s5192_s10 = scalar_lea.vmem (!%p7719_p10), [#allocation4], %s4202_s9 }
  0x8d   : > { %4888 = dma.done.wait (%p7720_p2), %s299_s20, 512  }
  0x8e   : > { %4890 = vsyncadd (%p7720_p2), %s299_s20, 4294966784  ;;  %s308_s0 = scalar_lea.sflag [#allocation9], %s5188_s3  ;;  %s5199_s2 = scalar_lea.vmem [#allocation8], %s4202_s9 }
  0x8f   : > { %4892 = dma.done.wait (%p7720_p2), %s308_s0, 512  }
  0x90   : > { %4894 = vsyncadd (%p7720_p2), %s308_s0, 4294966784  ;;  %p7721_p11 = scmp.eq.s32.totalorder %s4998_s25, 0 }
  0x92   : > { %4896 = dma.done.wait (%p7721_p11), [#allocation7], 32   ;;  %p7722_p7 = pmov %p7721_p11 }
  0x94   : > { %4898 = vsyncadd (%p7722_p7), [#allocation7], 4294967264  ;;  %p7723_p12 = pmov %p7722_p7 }
  0x95   : > { %p7724_p9 = pmov %p7722_p7 }
  0x96   : > { %4900 = dma.done.wait (%p7723_p12), [#allocation12], 48  }
  0x97   : > { %4902 = vsyncadd (%p7724_p9), [#allocation12], 4294967248  ;;  %p7725_p3 = pmov %p7722_p7 }
  0x99   : > { %4904 = dma.done.wait (%p7725_p3), [#allocation15], 16   ;;  %p7726_p13 = pmov %p7725_p3 }
  0x9b   : > { %4906 = vsyncadd (%p7726_p13), [#allocation15], 4294967280 }
  0x9c   : > { %332 = sfence }
  0x9d   : > { %v370_v0 = vld [vmem:[%s5199_s2] sm:$0xff]  ;;  %vm362_vm0 = vcmask 146432   ;;  %s7701_s27 = smov 1   ;;  %v4936_v1 = vmov 0.0   ;;  %v4209_v2 = vld [vmem:[%s5199_s2 + $0x10] sm:$0xff]  ;;  %vm365_vm1 = vcmask 140288  }
  0x9e   : > { %374 = vrot.lane.b32.xlu0 %v370_v0, %s7701_s27  ;;  %363 = vst.msk [vmem:[#allocation2] sm:$0xff] %vm362_vm0, %v4936_v1  ;;  %364 = vst.msk [vmem:[#allocation2 + $0x8] sm:$0xff] %vm362_vm0, %v4936_v1  ;;  %v371_v3 = vld [vmem:[%s5199_s2 + $0x8] sm:$0xff]  ;;  %388 = vrot.lane.b32.xlu1 %v4209_v2, %s7701_s27  ;;  %v4210_v4 = vld [vmem:[%s5199_s2 + $0x18] sm:$0xff]  ;;  %vm380_vm2 = vcmask 138248   ;;  %s4218_s8 = sld [smem:[#allocation10 + $0x1]] }
  0x9f   : > { %367 = vst.msk [vmem:[#allocation2 + $0x18] sm:$0xff] %vm362_vm0, %v4936_v1  ;;  %368 = vst.msk [vmem:[#allocation2 + $0x20] sm:$0xff] %vm362_vm0, %v4936_v1  ;;  %s4219_s19 = sld [smem:[#allocation10 + $0x13]]  ;;  %s4220_s13 = sld [smem:[#allocation10 + $0x25]]  ;;  %vm3999_vm3 = vcmask 130048  }
  0xa0   : > { %397 = vst.msk [vmem:[#allocation3] sm:$0xff] %vm362_vm0, %v4936_v1  ;;  %398 = vst.msk [vmem:[#allocation3 + $0x8] sm:$0xff] %vm362_vm0, %v4936_v1  ;;  %s4221_s26 = sld [smem:[#allocation10 + $0x37]]  ;;  %s4937_s15 = smov 127  }
  0xa1   : > { %400 = vst.msk [vmem:[#allocation3 + $0x18] sm:$0xff] %vm362_vm0, %v4936_v1  ;;  %401 = vst.msk [vmem:[#allocation3 + $0x20] sm:$0xff] %vm362_vm0, %v4936_v1  ;;  %s4222_s11 = sld [smem:[#allocation10 + $0x49]]  ;;  %s4223_s18 = sld [smem:[#allocation10 + $0x5b]] }
  0xa2   : > { %403 = vst.msk [vmem:[#allocation3 + $0x30] sm:$0xff] %vm362_vm0, %v4936_v1  ;;  %404 = vst.msk [vmem:[#allocation3 + $0x38] sm:$0xff] %vm362_vm0, %v4936_v1  ;;  %376 = vrot.lane.b32.xlu0 %v371_v3, %s7701_s27  ;;  %390 = vrot.lane.b32.xlu1 %v4210_v4, %s7701_s27  ;;  %s4224_s7 = sld [smem:[#allocation10 + $0x6d]]  ;;  %s4225_s16 = sld [smem:[#allocation10 + $0x7f]] }
  0xa3   : > { %406 = vst.msk [vmem:[#allocation3 + $0x48] sm:$0xff] %vm362_vm0, %v4936_v1  ;;  %407 = vst.msk [vmem:[#allocation3 + $0x50] sm:$0xff] %vm362_vm0, %v4936_v1  ;;  %s4226_s29 = sld [smem:[#allocation10 + $0x2]]  ;;  %s4227_s30 = sld [smem:[#allocation10 + $0x14]] }
  0xa4   : > { %409 = vst.msk [vmem:[#allocation3 + $0x60] sm:$0xff] %vm362_vm0, %v4936_v1  ;;  %410 = vst.msk [vmem:[#allocation3 + $0x68] sm:$0xff] %vm362_vm0, %v4936_v1  ;;  %v472_v9 = vstv %s4218_s8  ;;  %s4228_s9 = sld [smem:[#allocation10 + $0x26]]  ;;  %s4229_s20 = sld [smem:[#allocation10 + $0x38]] }
  0xa5   : > { %412 = vst.msk [vmem:[#allocation3 + $0x78] sm:$0xff] %vm362_vm0, %v4936_v1  ;;  %413 = vst.msk [vmem:[#allocation3 + $0x80] sm:$0xff] %vm362_vm0, %v4936_v1  ;;  %v486_v12 = vstv %s4219_s19  ;;  %v500_v16 = vstv %s4220_s13  ;;  %s7703_s0 = smov 126   ;;  %s4230_s8 = sld [smem:[#allocation10 + $0x4a]] }
  0xa6   : > { %415 = vst.msk [vmem:[#allocation3 + $0x90] sm:$0xff] %vm362_vm0, %v4936_v1  ;;  %416 = vst.msk [vmem:[#allocation3 + $0x98] sm:$0xff] %vm362_vm0, %v4936_v1  ;;  %v514_v19 = vstv %s4221_s26  ;;  %s4231_s19 = sld [smem:[#allocation10 + $0x5c]]  ;;  %s4232_s13 = sld [smem:[#allocation10 + $0x6e]] }
  0xa7   : > { %418 = vst.msk [vmem:[#allocation3 + $0xa8] sm:$0xff] %vm362_vm0, %v4936_v1  ;;  %419 = vst.msk [vmem:[#allocation3 + $0xb0] sm:$0xff] %vm362_vm0, %v4936_v1  ;;  %v528_v22 = vstv %s4222_s11  ;;  %v542_v25 = vstv %s4223_s18  ;;  %s4233_s26 = sld [smem:[#allocation10 + $0x80]]  ;;  %s4242_s11 = sld [smem:[#allocation10 + $0x4]] }
  0xa8   : > { %366 = vst.msk [vmem:[#allocation2 + $0x10] sm:$0x3] %vm365_vm1, %v4936_v1  ;;  %369 = vst.msk [vmem:[#allocation2 + $0x28] sm:$0x3] %vm365_vm1, %v4936_v1  ;;  %v556_v28 = vstv %s4224_s7  ;;  %v570_v31 = vstv %s4225_s16  ;;  %s4243_s18 = sld [smem:[#allocation10 + $0x16]]  ;;  %s4244_s7 = sld [smem:[#allocation10 + $0x28]] }
  0xa9   : > { %399 = vst.msk [vmem:[#allocation3 + $0x10] sm:$0x3] %vm365_vm1, %v4936_v1  ;;  %402 = vst.msk [vmem:[#allocation3 + $0x28] sm:$0x3] %vm365_vm1, %v4936_v1  ;;  %v584_v34 = vstv %s4226_s29  ;;  %v598_v37 = vstv %s4227_s30  ;;  %s4245_s16 = sld [smem:[#allocation10 + $0x3a]]  ;;  %s4246_s29 = sld [smem:[#allocation10 + $0x4c]] }
  0xaa   : > { %405 = vst.msk [vmem:[#allocation3 + $0x40] sm:$0x3] %vm365_vm1, %v4936_v1  ;;  %408 = vst.msk [vmem:[#allocation3 + $0x58] sm:$0x3] %vm365_vm1, %v4936_v1  ;;  %v612_v40 = vstv %s4228_s9  ;;  %v626_v43 = vstv %s4229_s20  ;;  %s4247_s30 = sld [smem:[#allocation10 + $0x5e]]  ;;  %s4248_s9 = sld [smem:[#allocation10 + $0x70]] }
  0xab   : > { %411 = vst.msk [vmem:[#allocation3 + $0x70] sm:$0x3] %vm365_vm1, %v4936_v1  ;;  %414 = vst.msk [vmem:[#allocation3 + $0x88] sm:$0x3] %vm365_vm1, %v4936_v1  ;;  %v640_v46 = vstv %s4230_s8  ;;  %s4249_s20 = sld [smem:[#allocation10 + $0x82]]  ;;  %s4250_s8 = sld [smem:[#allocation10 + $0x5]] }
  0xac   : > { %417 = vst.msk [vmem:[#allocation3 + $0xa0] sm:$0x3] %vm365_vm1, %v4936_v1  ;;  %420 = vst.msk [vmem:[#allocation3 + $0xb8] sm:$0x3] %vm365_vm1, %v4936_v1  ;;  %v654_v49 = vstv %s4231_s19  ;;  %v668_v52 = vstv %s4232_s13  ;;  %s4251_s19 = sld [smem:[#allocation10 + $0x17]]  ;;  %s4252_s13 = sld [smem:[#allocation10 + $0x29]] }
  0xad   : > { %v682_v55 = vstv %s4233_s26  ;;  %v746_v59 = vstv %s4242_s11  ;;  %s4253_s26 = sld [smem:[#allocation10 + $0x3b]]  ;;  %s4254_s11 = sld [smem:[#allocation10 + $0x4d]] }
  0xae   : > { %v760_v63 = vstv %s4243_s18  ;;  %v774_v2 = vstv %s4244_s7  ;;  %s4255_s18 = sld [smem:[#allocation10 + $0x5f]]  ;;  %s4256_s7 = sld [smem:[#allocation10 + $0x71]] }
  0xaf   : > { %s5467_s27 = sld [smem:[#allocation10 + $0x15]] }
 0x110   : > { %v375_v5 = vpop.permute.xlu0 %374  ;;  %v389_v6 = vpop.permute.xlu1 %388 }
 0x111   : > { %381 = vst.msk [vmem:[#allocation2 + $0x1] sm:$0xff] %vm380_vm2, %v375_v5  ;;  %395 = vst.msk [vmem:[#allocation2 + $0x19] sm:$0xff] %vm380_vm2, %v389_v6  ;;  %v788_v5 = vstv %s4245_s16  ;;  %s4257_s16 = sld [smem:[#allocation10 + $0x83]] }
 0x114   : > { %v377_v7 = vpop.permute.xlu0 %376  ;;  %v391_v8 = vpop.permute.xlu1 %390 }
 0x115   : > { %382 = vst.msk [vmem:[#allocation2 + $0x9] sm:$0xff] %vm380_vm2, %v377_v7  ;;  %396 = vst.msk [vmem:[#allocation2 + $0x21] sm:$0xff] %vm380_vm2, %v391_v8  ;;  %v802_v8 = vstv %s4246_s29  ;;  %s5375_s29 = sld [smem:[#allocation10 + $0x7]] }
 0x118   : > { %v5249_v10 = vld [vmem:[#allocation2] sm:$0xff] }
 0x119   : > { %v473_v11 = vmul.f32 %v472_v9, %v5249_v10  ;;  %v487_v15 = vmul.f32 %v486_v12, %v5249_v10  ;;  %v501_v18 = vmul.f32 %v500_v16, %v5249_v10  ;;  %v515_v21 = vmul.f32 %v514_v19, %v5249_v10  ;;  %v5313_v58 = vld [vmem:[#allocation2 + $0x1] sm:$0xff] }
 0x11a   : > { %v529_v24 = vmul.f32 %v528_v22, %v5249_v10  ;;  %v543_v27 = vmul.f32 %v542_v25, %v5249_v10  ;;  %v557_v30 = vmul.f32 %v556_v28, %v5249_v10  ;;  %v571_v33 = vmul.f32 %v570_v31, %v5249_v10 }
 0x11b   : > { %477 = vrot.lane.b32.xlu0 %v473_v11, %s4937_s15  ;;  %v585_v36 = vmul.f32 %v584_v34, %v5249_v10  ;;  %v599_v39 = vmul.f32 %v598_v37, %v5249_v10  ;;  %v613_v42 = vmul.f32 %v612_v40, %v5249_v10  ;;  %v627_v45 = vmul.f32 %v626_v43, %v5249_v10 }
 0x11c   : > { %v5253_v13 = vld [vmem:[#allocation2 + $0x8] sm:$0xff]  ;;  %v641_v48 = vmul.f32 %v640_v46, %v5249_v10  ;;  %v655_v51 = vmul.f32 %v654_v49, %v5249_v10  ;;  %v669_v54 = vmul.f32 %v668_v52, %v5249_v10  ;;  %v683_v57 = vmul.f32 %v682_v55, %v5249_v10 }
 0x11d   : > { %v474_v14 = vmul.f32 %v472_v9, %v5253_v13  ;;  %v488_v17 = vmul.f32 %v486_v12, %v5253_v13  ;;  %v502_v20 = vmul.f32 %v500_v16, %v5253_v13  ;;  %v516_v23 = vmul.f32 %v514_v19, %v5253_v13  ;;  %v5319_v62 = vld [vmem:[#allocation2 + $0x9] sm:$0xff] }
 0x11e   : > { %v530_v26 = vmul.f32 %v528_v22, %v5253_v13  ;;  %v544_v29 = vmul.f32 %v542_v25, %v5253_v13  ;;  %v558_v32 = vmul.f32 %v556_v28, %v5253_v13  ;;  %v572_v35 = vmul.f32 %v570_v31, %v5253_v13 }
 0x11f   : > { %479 = vrot.lane.b32.xlu1 %v474_v14, %s4937_s15  ;;  %491 = vrot.lane.b32.xlu0 %v487_v15, %s4937_s15  ;;  %v586_v38 = vmul.f32 %v584_v34, %v5253_v13  ;;  %v600_v41 = vmul.f32 %v598_v37, %v5253_v13  ;;  %v614_v44 = vmul.f32 %v612_v40, %v5253_v13  ;;  %v816_v12 = vstv %s4247_s30  ;;  %s5385_s30 = sld [smem:[#allocation10 + $0x19]] }
 0x120   : > { %v628_v47 = vmul.f32 %v626_v43, %v5253_v13  ;;  %v642_v50 = vmul.f32 %v640_v46, %v5253_v13  ;;  %v656_v53 = vmul.f32 %v654_v49, %v5253_v13  ;;  %v670_v56 = vmul.f32 %v668_v52, %v5253_v13 }
 0x121   : > { %v684_v60 = vmul.f32 %v682_v55, %v5253_v13  ;;  %v747_v61 = vmul.f32 %v746_v59, %v5313_v58  ;;  %v748_v0 = vmul.f32 %v746_v59, %v5319_v62  ;;  %v761_v1 = vmul.f32 %v760_v63, %v5313_v58 }
 0x122   : > { %v762_v3 = vmul.f32 %v760_v63, %v5319_v62  ;;  %v775_v4 = vmul.f32 %v774_v2, %v5313_v58  ;;  %v776_v6 = vmul.f32 %v774_v2, %v5319_v62  ;;  %v789_v7 = vmul.f32 %v788_v5, %v5313_v58 }
 0x123   : > { %493 = vrot.lane.b32.xlu1 %v488_v17, %s4937_s15  ;;  %505 = vrot.lane.b32.xlu0 %v501_v18, %s4937_s15  ;;  %v790_v9 = vmul.f32 %v788_v5, %v5319_v62  ;;  %v803_v11 = vmul.f32 %v802_v8, %v5313_v58  ;;  %v804_v14 = vmul.f32 %v802_v8, %v5319_v62  ;;  %v830_v16 = vstv %s4248_s9  ;;  %s5398_s9 = sld [smem:[#allocation10 + $0x2b]] }
 0x124   : > { %v817_v15 = vmul.f32 %v816_v12, %v5313_v58  ;;  %v818_v17 = vmul.f32 %v816_v12, %v5319_v62  ;;  %v831_v18 = vmul.f32 %v830_v16, %v5313_v58  ;;  %v844_v19 = vstv %s4249_s20  ;;  %s5411_s20 = sld [smem:[#allocation10 + $0x3d]] }
 0x125   : > { %v858_v22 = vstv %s4250_s8  ;;  %v872_v25 = vstv %s4251_s19  ;;  %v886_v28 = vstv %s4252_s13  ;;  %v900_v31 = vstv %s4253_s26  ;;  %s5422_s8 = sld [smem:[#allocation10 + $0x4f]]  ;;  %s5424_s19 = sld [smem:[#allocation10]] }
 0x126   : > { %v914_v34 = vstv %s4254_s11  ;;  %v928_v37 = vstv %s4255_s18  ;;  %v956_v46 = vstv %s4257_s16  ;;  %v1020_v52 = vstv %s5375_s29  ;;  %s5428_s13 = sld [smem:[#allocation10 + $0x12]]  ;;  %s5436_s26 = sld [smem:[#allocation10 + $0x24]] }
 0x127   : > { %507 = vrot.lane.b32.xlu1 %v502_v20, %s4937_s15  ;;  %519 = vrot.lane.b32.xlu0 %v515_v21, %s4937_s15  ;;  %v832_v20 = vmul.f32 %v830_v16, %v5319_v62  ;;  %v845_v21 = vmul.f32 %v844_v19, %v5313_v58  ;;  %v929_v40 = vmul.f32 %v928_v37, %v5313_v58  ;;  %v1034_v59 = vstv %s5385_s30  ;;  %s5439_s11 = sld [smem:[#allocation10 + $0x61]]  ;;  %s5441_s18 = sld [smem:[#allocation10 + $0x36]] }
 0x128   : > { %v958_v55 = vmul.f32 %v956_v46, %v5319_v62  ;;  %s5447_s16 = sld [smem:[#allocation10 + $0x48]]  ;;  %s5449_s29 = sld [smem:[#allocation10 + $0x5a]] }
 0x129   : > { %s5453_s30 = sld [smem:[#allocation10 + $0x6c]] }
 0x12b   : > { %521 = vrot.lane.b32.xlu1 %v516_v23, %s4937_s15  ;;  %533 = vrot.lane.b32.xlu0 %v529_v24, %s4937_s15  ;;  %v846_v23 = vmul.f32 %v844_v19, %v5319_v62  ;;  %v859_v24 = vmul.f32 %v858_v22, %v5313_v58  ;;  %v1076_v12 = vstv %s5422_s8  ;;  %s5483_s8 = sld [smem:[#allocation10 + $0x8]] }
 0x12f   : > { %535 = vrot.lane.b32.xlu1 %v530_v26, %s4937_s15  ;;  %547 = vrot.lane.b32.xlu0 %v543_v27, %s4937_s15  ;;  %v860_v26 = vmul.f32 %v858_v22, %v5319_v62  ;;  %v873_v27 = vmul.f32 %v872_v25, %v5313_v58  ;;  %v436_v22 = vstv %s5436_s26  ;;  %s5507_s26 = sld [smem:[#allocation10 + $0x39]] }
 0x133   : > { %549 = vrot.lane.b32.xlu1 %v544_v29, %s4937_s15  ;;  %561 = vrot.lane.b32.xlu0 %v557_v30, %s4937_s15  ;;  %v874_v29 = vmul.f32 %v872_v25, %v5319_v62  ;;  %v887_v30 = vmul.f32 %v886_v28, %v5313_v58  ;;  %v442_v25 = vstv %s5441_s18  ;;  %s7727_s18 = smov 126  }
 0x137   : > { %563 = vrot.lane.b32.xlu1 %v558_v32, %s4937_s15  ;;  %575 = vrot.lane.b32.xlu0 %v571_v33, %s4937_s15  ;;  %v888_v32 = vmul.f32 %v886_v28, %v5319_v62  ;;  %v901_v33 = vmul.f32 %v900_v31, %v5313_v58  ;;  %v460_v28 = vstv %s5453_s30  ;;  %s5651_s30 = sld [smem:[#allocation10 + $0x86]] }
 0x13b   : > { %577 = vrot.lane.b32.xlu1 %v572_v35, %s4937_s15  ;;  %589 = vrot.lane.b32.xlu0 %v585_v36, %s7703_s0  ;;  %v902_v35 = vmul.f32 %v900_v31, %v5319_v62  ;;  %v915_v36 = vmul.f32 %v914_v34, %v5313_v58 }
 0x13f   : > { %591 = vrot.lane.b32.xlu1 %v586_v38, %s7703_s0  ;;  %603 = vrot.lane.b32.xlu0 %v599_v39, %s7703_s0  ;;  %v916_v39 = vmul.f32 %v914_v34, %v5319_v62 }
 0x143   : > { %605 = vrot.lane.b32.xlu1 %v600_v41, %s7703_s0  ;;  %617 = vrot.lane.b32.xlu0 %v613_v42, %s7703_s0  ;;  %v942_v41 = vstv %s4256_s7  ;;  %s5445_s7 = sld [smem:[#allocation10 + $0x3]] }
 0x144   : > { %v944_v49 = vmul.f32 %v942_v41, %v5319_v62 }
 0x147   : > { %619 = vrot.lane.b32.xlu1 %v614_v44, %s7703_s0  ;;  %631 = vrot.lane.b32.xlu0 %v627_v45, %s7703_s0  ;;  %v930_v44 = vmul.f32 %v928_v37, %v5319_v62  ;;  %v943_v45 = vmul.f32 %v942_v41, %v5313_v58 }
 0x14b   : > { %633 = vrot.lane.b32.xlu1 %v628_v47, %s7703_s0  ;;  %645 = vrot.lane.b32.xlu0 %v641_v48, %s7703_s0 }
 0x14f   : > { %647 = vrot.lane.b32.xlu1 %v642_v50, %s7703_s0  ;;  %659 = vrot.lane.b32.xlu0 %v655_v51, %s7703_s0  ;;  %v957_v50 = vmul.f32 %v956_v46, %v5313_v58  ;;  %v5395_v51 = vld [vmem:[#allocation2 + $0x2] sm:$0xff] }
 0x153   : > { %661 = vrot.lane.b32.xlu1 %v656_v53, %s7703_s0  ;;  %673 = vrot.lane.b32.xlu0 %v669_v54, %s7703_s0 }
 0x157   : > { %675 = vrot.lane.b32.xlu1 %v670_v56, %s7703_s0  ;;  %687 = vrot.lane.b32.xlu0 %v683_v57, %s7703_s0  ;;  %v1021_v56 = vmul.f32 %v1020_v52, %v5395_v51  ;;  %v5408_v57 = vld [vmem:[#allocation2 + $0xa] sm:$0xff] }
 0x158   : > { %v1022_v63 = vmul.f32 %v1020_v52, %v5408_v57  ;;  %v1078_v31 = vmul.f32 %v1076_v12, %v5408_v57 }
 0x15b   : > { %689 = vrot.lane.b32.xlu1 %v684_v60, %s7703_s0  ;;  %751 = vrot.lane.b32.xlu0 %v747_v61, %s4937_s15 }
 0x15f   : > { %753 = vrot.lane.b32.xlu1 %v748_v0, %s4937_s15  ;;  %765 = vrot.lane.b32.xlu0 %v761_v1, %s4937_s15  ;;  %v1035_v0 = vmul.f32 %v1034_v59, %v5395_v51  ;;  %v1048_v1 = vstv %s5398_s9  ;;  %s5459_s9 = sld [smem:[#allocation10 + $0x73]] }
 0x160   : > { %v1049_v5 = vmul.f32 %v1048_v1, %v5395_v51 }
 0x163   : > { %767 = vrot.lane.b32.xlu1 %v762_v3, %s4937_s15  ;;  %779 = vrot.lane.b32.xlu0 %v775_v4, %s4937_s15  ;;  %v1036_v4 = vmul.f32 %v1034_v59, %v5408_v57 }
 0x167   : > { %781 = vrot.lane.b32.xlu1 %v776_v6, %s4937_s15  ;;  %793 = vrot.lane.b32.xlu0 %v789_v7, %s4937_s15  ;;  %v1062_v6 = vstv %s5411_s20  ;;  %s5465_s20 = sld [smem:[#allocation10 + $0x7e]] }
 0x16b   : > { %795 = vrot.lane.b32.xlu1 %v790_v9, %s4937_s15  ;;  %807 = vrot.lane.b32.xlu0 %v803_v11, %s4937_s15  ;;  %v1050_v9 = vmul.f32 %v1048_v1, %v5408_v57  ;;  %v1063_v11 = vmul.f32 %v1062_v6, %v5395_v51 }
 0x16f   : > { %809 = vrot.lane.b32.xlu1 %v804_v14, %s4937_s15  ;;  %821 = vrot.lane.b32.xlu0 %v817_v15, %s4937_s15  ;;  %v424_v14 = vstv %s5424_s19  ;;  %s5486_s19 = sld [smem:[#allocation10 + $0x27]] }
 0x170   : > { %v425_v19 = vmul.f32 %v424_v14, %v5249_v10  ;;  %v426_v34 = vmul.f32 %v424_v14, %v5253_v13 }
 0x173   : > { %823 = vrot.lane.b32.xlu1 %v818_v17, %s4937_s15  ;;  %835 = vrot.lane.b32.xlu0 %v831_v18, %s4937_s15  ;;  %v1064_v17 = vmul.f32 %v1062_v6, %v5408_v57  ;;  %v1077_v18 = vmul.f32 %v1076_v12, %v5395_v51  ;;  %v443_v12 = vmul.f32 %v442_v25, %v5249_v10 }
 0x175   : > { %v710_v1 = vstv %s5486_s19  ;;  %s5610_s19 = sld [smem:[#allocation10 + $0x62]] }
 0x177   : > { %837 = vrot.lane.b32.xlu1 %v832_v20, %s4937_s15  ;;  %849 = vrot.lane.b32.xlu0 %v845_v21, %s4937_s15  ;;  %v430_v20 = vstv %s5428_s13  ;;  %v1090_v21 = vstv %s5439_s11  ;;  %s5504_s13 = sld [smem:[#allocation10 + $0x1a]]  ;;  %s5545_s11 = sld [smem:[#allocation10 + $0x3e]] }
 0x178   : > { %v432_v46 = vmul.f32 %v430_v20, %v5253_v13 }
 0x17b   : > { %851 = vrot.lane.b32.xlu1 %v846_v23, %s4937_s15  ;;  %863 = vrot.lane.b32.xlu0 %v859_v24, %s7703_s0  ;;  %v698_v23 = vstv %s5445_s7  ;;  %s5548_s7 = sld [smem:[#allocation10 + $0x5d]] }
 0x17c   : > { %v699_v37 = vmul.f32 %v698_v23, %v5313_v58 }
 0x17f   : > { %865 = vrot.lane.b32.xlu1 %v860_v26, %s7703_s0  ;;  %877 = vrot.lane.b32.xlu0 %v873_v27, %s7703_s0  ;;  %v448_v26 = vstv %s5447_s16  ;;  %v454_v27 = vstv %s5449_s29  ;;  %s5594_s16 = sld [smem:[#allocation10 + $0x81]]  ;;  %s5632_s29 = sld [smem:[#allocation10 + $0x74]] }
 0x183   : > { %879 = vrot.lane.b32.xlu1 %v874_v29, %s7703_s0  ;;  %891 = vrot.lane.b32.xlu0 %v887_v30, %s7703_s0 }
 0x187   : > { %893 = vrot.lane.b32.xlu1 %v888_v32, %s7703_s0  ;;  %905 = vrot.lane.b32.xlu0 %v901_v33, %s7703_s0  ;;  %v1091_v32 = vmul.f32 %v1090_v21, %v5395_v51  ;;  %v1104_v33 = vstv %s5459_s9  ;;  %s5569_s9 = sld [smem:[#allocation10 + $0x50]] }
 0x18b   : > { %907 = vrot.lane.b32.xlu1 %v902_v35, %s7703_s0  ;;  %919 = vrot.lane.b32.xlu0 %v915_v36, %s7703_s0  ;;  %v431_v35 = vmul.f32 %v430_v20, %v5249_v10 }
 0x18d   : > { %v5371_v38 = vpop.permute.xlu0 %477 }
 0x18e   : > { %v483_v24 = vadd.f32 %v5371_v38, %v425_v19  ;;  %v466_v38 = vstv %s5465_s20  ;;  %s5667_s20 = sld [smem:[#allocation10 + $0xa]] }
 0x18f   : > { %921 = vrot.lane.b32.xlu1 %v916_v39, %s7703_s0  ;;  %933 = vrot.lane.b32.xlu0 %v929_v40, %s7703_s0  ;;  %v704_v39 = vstv %s5467_s27  ;;  %s5523_s27 = sld [smem:[#allocation10 + $0x2c]] }
 0x190   : > { %v706_v20 = vmul.f32 %v704_v39, %v5319_v62 }
 0x191   : > { %v5379_v42 = vpop.permute.xlu1 %479  ;;  %v5381_v43 = vpop.permute.xlu0 %491 }
 0x192   : > { %v484_v40 = vadd.f32 %v5379_v42, %v426_v34  ;;  %v497_v41 = vadd.f32 %v5381_v43, %v431_v35  ;;  %v705_v43 = vmul.f32 %v704_v39, %v5313_v58  ;;  %v449_v34 = vmul.f32 %v448_v26, %v5249_v10 }
 0x193   : > { %935 = vrot.lane.b32.xlu1 %v930_v44, %s7703_s0  ;;  %947 = vrot.lane.b32.xlu0 %v943_v45, %s7703_s0 }
 0x195   : > { %v5389_v47 = vpop.permute.xlu1 %493  ;;  %v5391_v48 = vpop.permute.xlu0 %505 }
 0x197   : > { %949 = vrot.lane.b32.xlu1 %v944_v49, %s7703_s0  ;;  %961 = vrot.lane.b32.xlu0 %v957_v50, %s7703_s0  ;;  %v437_v49 = vmul.f32 %v436_v22, %v5249_v10 }
 0x199   : > { %v5402_v53 = vpop.permute.xlu1 %507  ;;  %v5404_v54 = vpop.permute.xlu0 %519 }
 0x19b   : > { %963 = vrot.lane.b32.xlu1 %v958_v55, %s7703_s0  ;;  %1025 = vrot.lane.b32.xlu0 %v1021_v56, %s4937_s15  ;;  %s5469_s0 = sld [smem:[#allocation10 + $0x85]]  ;;  %v1092_v55 = vmul.f32 %v1090_v21, %v5408_v57  ;;  %v1105_v56 = vmul.f32 %v1104_v33, %v5395_v51  ;;  %v711_v21 = vmul.f32 %v710_v1, %v5313_v58 }
 0x19d   : > { %v5415_v60 = vpop.permute.xlu1 %521  ;;  %v5417_v61 = vpop.permute.xlu0 %533 }
 0x19f   : > { %1027 = vrot.lane.b32.xlu1 %v1022_v63, %s4937_s15  ;;  %1039 = vrot.lane.b32.xlu0 %v1035_v0, %s4937_s15  ;;  %v700_v63 = vmul.f32 %v698_v23, %v5319_v62  ;;  %v1132_v0 = vstv %s5483_s8  ;;  %v716_v23 = vstv %s5507_s26  ;;  %s5572_s8 = sld [smem:[#allocation10 + $0x6f]]  ;;  %s5694_s26 = sld [smem:[#allocation10 + $0x2e]] }
 0x1a1   : > { %v5430_v2 = vpop.permute.xlu1 %535  ;;  %v5432_v3 = vpop.permute.xlu0 %547  ;;  %v1118_v44 = vstv %s5469_s0  ;;  %s5526_s0 = sld [smem:[#allocation10 + $0x4b]] }
 0x1a3   : > { %1041 = vrot.lane.b32.xlu1 %v1036_v4, %s4937_s15  ;;  %1053 = vrot.lane.b32.xlu0 %v1049_v5, %s4937_s15  ;;  %v498_v4 = vadd.f32 %v5389_v47, %v432_v46  ;;  %v511_v5 = vadd.f32 %v5391_v48, %v437_v49  ;;  %v1119_v47 = vmul.f32 %v1118_v44, %v5395_v51 }
 0x1a4   : > { %v539_v49 = vadd.f32 %v5417_v61, %v449_v34 }
 0x1a5   : > { %v5451_v7 = vpop.permute.xlu1 %549  ;;  %v5455_v8 = vpop.permute.xlu0 %561 }
 0x1a7   : > { %1055 = vrot.lane.b32.xlu1 %v1050_v9, %s4937_s15  ;;  %1067 = vrot.lane.b32.xlu0 %v1063_v11, %s4937_s15  ;;  %v438_v11 = vmul.f32 %v436_v22, %v5253_v13  ;;  %v1146_v22 = vstv %s5504_s13  ;;  %v722_v46 = vstv %s5526_s0  ;;  %s5681_s13 = sld [smem:[#allocation10 + $0x1c]]  ;;  %s5718_s0 = sld [smem:[#allocation10 + $0x52]] }
 0x1a9   : > { %v5471_v15 = vpop.permute.xlu1 %563  ;;  %v5473_v16 = vpop.permute.xlu0 %575 }
 0x1ab   : > { %1069 = vrot.lane.b32.xlu1 %v1064_v17, %s4937_s15  ;;  %1081 = vrot.lane.b32.xlu0 %v1077_v18, %s4937_s15  ;;  %v1106_v18 = vmul.f32 %v1104_v33, %v5408_v57  ;;  %v444_v33 = vmul.f32 %v442_v25, %v5253_v13  ;;  %v1160_v25 = vstv %s5523_s27  ;;  %s5707_s27 = sld [smem:[#allocation10 + $0x40]] }
 0x1ad   : > { %v5493_v29 = vpop.permute.xlu1 %577  ;;  %v590_v30 = vpop.permute.xlu0 %589 }
 0x1ae   : > { %v595_v36 = vadd.f32 %v590_v30, %v483_v24  ;;  %v512_v24 = vadd.f32 %v5402_v53, %v438_v11  ;;  %v525_v30 = vadd.f32 %v5404_v54, %v443_v12  ;;  %v1133_v53 = vmul.f32 %v1132_v0, %v5395_v51 }
 0x1af   : > { %1083 = vrot.lane.b32.xlu1 %v1078_v31, %s4937_s15  ;;  %1095 = vrot.lane.b32.xlu0 %v1091_v32, %s4937_s15 }
 0x1b0   : > { %v5512_v45 = vadd.f32 %v699_v37, %v595_v36  ;;  %v1120_v37 = vmul.f32 %v1118_v44, %v5408_v57  ;;  %v526_v44 = vadd.f32 %v5415_v60, %v444_v33  ;;  %v1147_v60 = vmul.f32 %v1146_v22, %v5395_v51 }
 0x1b1   : > { %v592_v50 = vpop.permute.xlu1 %591  ;;  %v604_v52 = vpop.permute.xlu0 %603 }
 0x1b2   : > { %v596_v59 = vadd.f32 %v592_v50, %v484_v40  ;;  %v609_v42 = vadd.f32 %v604_v52, %v497_v41  ;;  %v712_v40 = vmul.f32 %v710_v1, %v5319_v62  ;;  %v717_v41 = vmul.f32 %v716_v23, %v5313_v58 }
 0x1b3   : > { %1097 = vrot.lane.b32.xlu1 %v1092_v55, %s4937_s15  ;;  %1109 = vrot.lane.b32.xlu0 %v1105_v56, %s4937_s15  ;;  %v450_v55 = vmul.f32 %v448_v26, %v5253_v13  ;;  %v455_v56 = vmul.f32 %v454_v27, %v5249_v10  ;;  %v718_v1 = vmul.f32 %v716_v23, %v5319_v62  ;;  %v1174_v26 = vstv %s5545_s11  ;;  %s5729_s11 = sld [smem:[#allocation10 + $0x64]] }
 0x1b4   : > { %v5530_v6 = vadd.f32 %v700_v63, %v596_v59  ;;  %v5532_v9 = vadd.f32 %v705_v43, %v609_v42  ;;  %v1134_v63 = vmul.f32 %v1132_v0, %v5408_v57 }
 0x1b5   : > { %v606_v14 = vpop.permute.xlu1 %605  ;;  %v618_v17 = vpop.permute.xlu0 %617  ;;  %v540_v11 = vadd.f32 %v5430_v2, %v450_v55  ;;  %v553_v0 = vadd.f32 %v5432_v3, %v455_v56  ;;  %v1161_v2 = vmul.f32 %v1160_v25, %v5395_v51 }
 0x1b6   : > { %v610_v19 = vadd.f32 %v606_v14, %v498_v4  ;;  %v623_v48 = vadd.f32 %v618_v17, %v511_v5  ;;  %v723_v4 = vmul.f32 %v722_v46, %v5313_v58  ;;  %v728_v5 = vstv %s5548_s7  ;;  %s5733_s7 = sld [smem:[#allocation10 + $0x6]] }
 0x1b7   : > { %1111 = vrot.lane.b32.xlu1 %v1106_v18, %s4937_s15  ;;  %1123 = vrot.lane.b32.xlu0 %v1119_v47, %s4937_s15  ;;  %v456_v17 = vmul.f32 %v454_v27, %v5253_v13  ;;  %v461_v18 = vmul.f32 %v460_v28, %v5249_v10  ;;  %v729_v23 = vmul.f32 %v728_v5, %v5313_v58  ;;  %v1188_v27 = vstv %s5569_s9  ;;  %s5742_s9 = sld [smem:[#allocation10 + $0x76]] }
 0x1b8   : > { %v5552_v31 = vadd.f32 %v706_v20, %v610_v19  ;;  %v5554_v32 = vadd.f32 %v711_v21, %v623_v48  ;;  %v1148_v48 = vmul.f32 %v1146_v22, %v5408_v57  ;;  %v724_v21 = vmul.f32 %v722_v46, %v5319_v62 }
 0x1b9   : > { %v620_v35 = vpop.permute.xlu1 %619  ;;  %v632_v36 = vpop.permute.xlu0 %631  ;;  %v567_v22 = vadd.f32 %v5455_v8, %v461_v18 }
 0x1ba   : > { %v624_v54 = vadd.f32 %v620_v35, %v512_v24  ;;  %v637_v39 = vadd.f32 %v632_v36, %v525_v30  ;;  %v734_v24 = vstv %s5572_s8  ;;  %v554_v30 = vadd.f32 %v5451_v7, %v456_v17  ;;  %s5746_s8 = sld [smem:[#allocation10 + $0x18]] }
 0x1bb   : > { %1125 = vrot.lane.b32.xlu1 %v1120_v37, %s4937_s15  ;;  %1137 = vrot.lane.b32.xlu0 %v1133_v53, %s7727_s18  ;;  %v462_v35 = vmul.f32 %v460_v28, %v5253_v13  ;;  %v467_v36 = vmul.f32 %v466_v38, %v5249_v10  ;;  %v1175_v7 = vmul.f32 %v1174_v26, %v5395_v51  ;;  %v740_v10 = vstv %s5594_s16  ;;  %s5754_s16 = sld [smem:[#allocation10 + $0x88]] }
 0x1bc   : > { %v5576_v50 = vadd.f32 %v712_v40, %v624_v54  ;;  %v5578_v52 = vadd.f32 %v717_v41, %v637_v39  ;;  %v1162_v54 = vmul.f32 %v1160_v25, %v5408_v57  ;;  %v730_v40 = vmul.f32 %v728_v5, %v5319_v62 }
 0x1bd   : > { %v634_v59 = vpop.permute.xlu1 %633  ;;  %v646_v42 = vpop.permute.xlu0 %645  ;;  %v735_v41 = vmul.f32 %v734_v24, %v5313_v58  ;;  %v568_v28 = vadd.f32 %v5471_v15, %v462_v35  ;;  %v581_v25 = vadd.f32 %v5473_v16, %v467_v36  ;;  %v736_v15 = vmul.f32 %v734_v24, %v5319_v62  ;;  %v5704_v35 = vld [vmem:[#allocation2 + $0x20] sm:$0xff] }
 0x1be   : > { %v638_v61 = vadd.f32 %v634_v59, %v526_v44  ;;  %v651_v43 = vadd.f32 %v646_v42, %v539_v49  ;;  %v468_v49 = vmul.f32 %v466_v38, %v5253_v13  ;;  %v1176_v59 = vmul.f32 %v1174_v26, %v5408_v57 }
 0x1bf   : > { %1139 = vrot.lane.b32.xlu1 %v1134_v63, %s7727_s18  ;;  %1151 = vrot.lane.b32.xlu0 %v1147_v60, %s7727_s18  ;;  %v1189_v42 = vmul.f32 %v1188_v27, %v5395_v51  ;;  %v1202_v63 = vstv %s5610_s19  ;;  %v741_v16 = vmul.f32 %v740_v10, %v5313_v58  ;;  %v1190_v26 = vmul.f32 %v1188_v27, %v5408_v57  ;;  %s5760_s19 = sld [smem:[#allocation10 + $0x2a]] }
 0x1c0   : > { %v5598_v12 = vadd.f32 %v718_v1, %v638_v61  ;;  %v5600_v14 = vadd.f32 %v723_v4, %v651_v43  ;;  %v582_v13 = vadd.f32 %v5493_v29, %v468_v49  ;;  %v1203_v5 = vmul.f32 %v1202_v63, %v5395_v51 }
 0x1c1   : > { %v648_v47 = vpop.permute.xlu1 %647  ;;  %v660_v19 = vpop.permute.xlu0 %659  ;;  %v1216_v58 = vstv %s5632_s29  ;;  %v1308_v36 = vstv %s5681_s13  ;;  %s5768_s29 = sld [smem:[#allocation10 + $0xb]]  ;;  %s5793_s13 = sld [smem:[#allocation10 + $0x4e]] }
 0x1c2   : > { %v652_v3 = vadd.f32 %v648_v47, %v540_v11  ;;  %v665_v20 = vadd.f32 %v660_v19, %v553_v0  ;;  %v742_v0 = vmul.f32 %v740_v10, %v5319_v62  ;;  %v1204_v47 = vmul.f32 %v1202_v63, %v5408_v57 }
 0x1c3   : > { %1153 = vrot.lane.b32.xlu1 %v1148_v48, %s7727_s18  ;;  %1165 = vrot.lane.b32.xlu0 %v1161_v2, %s7727_s18  ;;  %v1217_v19 = vmul.f32 %v1216_v58, %v5395_v51  ;;  %v1230_v48 = vstv %s5651_s30  ;;  %s5775_s30 = sld [smem:[#allocation10 + $0x3c]] }
 0x1c4   : > { %v5620_v33 = vadd.f32 %v724_v21, %v652_v3  ;;  %v5622_v34 = vadd.f32 %v729_v23, %v665_v20  ;;  %v1218_v3 = vmul.f32 %v1216_v58, %v5408_v57  ;;  %v1231_v20 = vmul.f32 %v1230_v48, %v5395_v51  ;;  %v5691_v21 = vld [vmem:[#allocation2 + $0x18] sm:$0xff] }
 0x1c5   : > { %v662_v37 = vpop.permute.xlu1 %661  ;;  %v674_v53 = vpop.permute.xlu0 %673  ;;  %v1294_v23 = vstv %s5667_s20  ;;  %s5786_s20 = sld [smem:[#allocation10 + $0x1d]] }
 0x1c6   : > { %v666_v39 = vadd.f32 %v662_v37, %v554_v30  ;;  %v679_v8 = vadd.f32 %v674_v53, %v567_v22  ;;  %v1232_v30 = vmul.f32 %v1230_v48, %v5408_v57  ;;  %v1295_v22 = vmul.f32 %v1294_v23, %v5691_v21 }
 0x1c7   : > { %1167 = vrot.lane.b32.xlu1 %v1162_v54, %s7727_s18  ;;  %1179 = vrot.lane.b32.xlu0 %v1175_v7, %s7727_s18  ;;  %v1296_v54 = vmul.f32 %v1294_v23, %v5704_v35  ;;  %v1309_v7 = vmul.f32 %v1308_v36, %v5691_v21 }
 0x1c8   : > { %v5641_v46 = vadd.f32 %v730_v40, %v666_v39  ;;  %v5643_v44 = vadd.f32 %v735_v41, %v679_v8  ;;  %v1322_v39 = vstv %s5694_s26  ;;  %v1310_v41 = vmul.f32 %v1308_v36, %v5704_v35  ;;  %s5806_s26 = sld [smem:[#allocation10 + $0x2f]] }
 0x1c9   : > { %v676_v55 = vpop.permute.xlu1 %675  ;;  %v688_v56 = vpop.permute.xlu0 %687  ;;  %v1323_v10 = vmul.f32 %v1322_v39, %v5691_v21 }
 0x1ca   : > { %v680_v60 = vadd.f32 %v676_v55, %v568_v28  ;;  %v693_v61 = vadd.f32 %v688_v56, %v581_v25  ;;  %v1336_v28 = vstv %s5707_s27  ;;  %v1324_v55 = vmul.f32 %v1322_v39, %v5704_v35  ;;  %s5813_s27 = sld [smem:[#allocation10 + $0x60]] }
 0x1cb   : > { %1181 = vrot.lane.b32.xlu1 %v1176_v59, %s7727_s18  ;;  %1193 = vrot.lane.b32.xlu0 %v1189_v42, %s7727_s18  ;;  %v1337_v56 = vmul.f32 %v1336_v28, %v5691_v21  ;;  %v1350_v59 = vstv %s5718_s0  ;;  %s5826_s0 = sld [smem:[#allocation10 + $0x41]] }
 0x1cc   : > { %v5658_v38 = vadd.f32 %v736_v15, %v680_v60  ;;  %v5660_v43 = vadd.f32 %v741_v16, %v693_v61  ;;  %v1338_v60 = vmul.f32 %v1336_v28, %v5704_v35  ;;  %v1351_v61 = vmul.f32 %v1350_v59, %v5691_v21 }
 0x1cd   : > { %v690_v1 = vpop.permute.xlu1 %689  ;;  %v5662_v4 = vpop.permute.xlu0 %751  ;;  %v1364_v15 = vstv %s5729_s11  ;;  %v972_v16 = vstv %s5733_s7  ;;  %s5833_s11 = sld [smem:[#allocation10 + $0x72]]  ;;  %s5846_s7 = sld [smem:[#allocation10 + $0x53]] }
 0x1ce   : > { %v694_v11 = vadd.f32 %v690_v1, %v582_v13  ;;  %v757_v13 = vadd.f32 %v5662_v4, %v5512_v45  ;;  %v1366_v23 = vmul.f32 %v1364_v15, %v5704_v35 }
 0x1cf   : > { %1195 = vrot.lane.b32.xlu1 %v1190_v26, %s7727_s18  ;;  %1207 = vrot.lane.b32.xlu0 %v1203_v5, %s7727_s18  ;;  %v1352_v5 = vmul.f32 %v1350_v59, %v5704_v35  ;;  %v1406_v59 = vstv %s5768_s29  ;;  %s5919_s29 = sld [smem:[#allocation10 + $0xd]] }
 0x1d0   : > { %v5672_v29 = vadd.f32 %v742_v0, %v694_v11  ;;  %v1365_v11 = vmul.f32 %v1364_v15, %v5691_v21  ;;  %v1378_v0 = vstv %s5742_s9  ;;  %s5853_s9 = sld [smem:[#allocation10 + $0x84]] }
 0x1d1   : > { %v5674_v17 = vpop.permute.xlu1 %753  ;;  %v5676_v18 = vpop.permute.xlu0 %765 }
 0x1d2   : > { %v758_v45 = vadd.f32 %v5674_v17, %v5530_v6  ;;  %v771_v4 = vadd.f32 %v5676_v18, %v5532_v9  ;;  %v984_v9 = vstv %s5760_s19  ;;  %s5902_s19 = sld [smem:[#allocation10 + $0x89]] }
 0x1d3   : > { %1209 = vrot.lane.b32.xlu1 %v1204_v47, %s7727_s18  ;;  %1221 = vrot.lane.b32.xlu0 %v1217_v19, %s7727_s18  ;;  %v973_v47 = vmul.f32 %v972_v16, %v5395_v51  ;;  %v978_v19 = vstv %s5746_s8  ;;  %s5866_s8 = sld [smem:[#allocation10 + $0x65]] }
 0x1d4   : > { %v979_v6 = vmul.f32 %v978_v19, %v5395_v51 }
 0x1d5   : > { %v5685_v62 = vpop.permute.xlu1 %767  ;;  %v5687_v2 = vpop.permute.xlu0 %779 }
 0x1d6   : > { %v772_v17 = vadd.f32 %v5685_v62, %v5552_v31  ;;  %v785_v18 = vadd.f32 %v5687_v2, %v5554_v32  ;;  %v980_v62 = vmul.f32 %v978_v19, %v5408_v57  ;;  %v985_v32 = vmul.f32 %v984_v9, %v5395_v51 }
 0x1d7   : > { %1223 = vrot.lane.b32.xlu1 %v1218_v3, %s7727_s18  ;;  %1235 = vrot.lane.b32.xlu0 %v1231_v20, %s7727_s18  ;;  %v990_v2 = vstv %s5775_s30  ;;  %s5933_s30 = sld [smem:[#allocation10 + $0x1f]] }
 0x1d9   : > { %v5698_v27 = vpop.permute.xlu1 %781  ;;  %v5700_v24 = vpop.permute.xlu0 %793 }
 0x1da   : > { %v799_v15 = vadd.f32 %v5700_v24, %v5578_v52  ;;  %v991_v52 = vmul.f32 %v990_v2, %v5395_v51  ;;  %v996_v24 = vstv %s5793_s13  ;;  %s5959_s13 = sld [smem:[#allocation10 + $0x43]] }
 0x1db   : > { %1237 = vrot.lane.b32.xlu1 %v1232_v30, %s7727_s18  ;;  %1299 = vrot.lane.b32.xlu0 %v1295_v22, %s4937_s15  ;;  %v1379_v30 = vmul.f32 %v1378_v0, %v5691_v21  ;;  %v1392_v22 = vstv %s5754_s16  ;;  %s5884_s16 = sld [smem:[#allocation10 + $0x77]] }
 0x1dd   : > { %v5711_v37 = vpop.permute.xlu1 %795  ;;  %v5713_v53 = vpop.permute.xlu0 %807 }
 0x1de   : > { %v800_v19 = vadd.f32 %v5711_v37, %v5598_v12  ;;  %v992_v37 = vmul.f32 %v990_v2, %v5408_v57 }
 0x1df   : > { %1301 = vrot.lane.b32.xlu1 %v1296_v54, %s4937_s15  ;;  %1313 = vrot.lane.b32.xlu0 %v1309_v7, %s4937_s15  ;;  %v974_v7 = vmul.f32 %v972_v16, %v5408_v57 }
 0x1e1   : > { %v5722_v8 = vpop.permute.xlu1 %809  ;;  %v5724_v40 = vpop.permute.xlu0 %821 }
 0x1e3   : > { %1315 = vrot.lane.b32.xlu1 %v1310_v41, %s4937_s15  ;;  %1327 = vrot.lane.b32.xlu0 %v1323_v10, %s4937_s15 }
 0x1e5   : > { %v5735_v25 = vpop.permute.xlu1 %823  ;;  %v5737_v49 = vpop.permute.xlu0 %835 }
 0x1e7   : > { %1329 = vrot.lane.b32.xlu1 %v1324_v55, %s4937_s15  ;;  %1341 = vrot.lane.b32.xlu0 %v1337_v56, %s4937_s15  ;;  %v1380_v55 = vmul.f32 %v1378_v0, %v5704_v35  ;;  %v1393_v56 = vmul.f32 %v1392_v22, %v5691_v21  ;;  %v1420_v0 = vstv %s5786_s20  ;;  %s5946_s20 = sld [smem:[#allocation10 + $0x31]] }
 0x1e9   : > { %v5748_v42 = vpop.permute.xlu1 %837  ;;  %v5750_v63 = vpop.permute.xlu0 %849 }
 0x1eb   : > { %1343 = vrot.lane.b32.xlu1 %v1338_v60, %s4937_s15  ;;  %1355 = vrot.lane.b32.xlu0 %v1351_v61, %s4937_s15  ;;  %v786_v61 = vadd.f32 %v5698_v27, %v5576_v50  ;;  %v986_v27 = vmul.f32 %v984_v9, %v5408_v57 }
 0x1ed   : > { %v5764_v1 = vpop.permute.xlu1 %851  ;;  %v864_v26 = vpop.permute.xlu0 %863 }
 0x1ee   : > { %v869_v58 = vadd.f32 %v864_v26, %v757_v13 }
 0x1ef   : > { %1357 = vrot.lane.b32.xlu1 %v1352_v5, %s4937_s15  ;;  %1369 = vrot.lane.b32.xlu0 %v1365_v11, %s4937_s15  ;;  %v1394_v11 = vmul.f32 %v1392_v22, %v5704_v35  ;;  %v1421_v22 = vmul.f32 %v1420_v0, %v5691_v21 }
 0x1f0   : > { %v5781_v48 = vadd.f32 %v973_v47, %v869_v58  ;;  %v1407_v58 = vmul.f32 %v1406_v59, %v5691_v21 }
 0x1f1   : > { %v866_v3 = vpop.permute.xlu1 %865  ;;  %v878_v20 = vpop.permute.xlu0 %877 }
 0x1f2   : > { %v870_v36 = vadd.f32 %v866_v3, %v758_v45  ;;  %v883_v54 = vadd.f32 %v878_v20, %v771_v4  ;;  %v813_v45 = vadd.f32 %v5713_v53, %v5600_v14  ;;  %v997_v14 = vmul.f32 %v996_v24, %v5395_v51 }
 0x1f3   : > { %1371 = vrot.lane.b32.xlu1 %v1366_v23, %s4937_s15  ;;  %1383 = vrot.lane.b32.xlu0 %v1379_v30, %s4937_s15  ;;  %v1408_v30 = vmul.f32 %v1406_v59, %v5704_v35  ;;  %v1002_v53 = vstv %s5813_s27  ;;  %s5981_s27 = sld [smem:[#allocation10 + $0x67]] }
 0x1f4   : > { %v5799_v39 = vadd.f32 %v974_v7, %v870_v36  ;;  %v5801_v41 = vadd.f32 %v979_v6, %v883_v54  ;;  %v1434_v36 = vstv %s5806_s26  ;;  %v814_v7 = vadd.f32 %v5722_v8, %v5620_v33  ;;  %s5970_s26 = sld [smem:[#allocation10 + $0x55]] }
 0x1f5   : > { %v880_v10 = vpop.permute.xlu1 %879  ;;  %v892_v28 = vpop.permute.xlu0 %891  ;;  %v827_v6 = vadd.f32 %v5724_v40, %v5622_v34  ;;  %v998_v8 = vmul.f32 %v996_v24, %v5408_v57  ;;  %v1003_v34 = vmul.f32 %v1002_v53, %v5395_v51  ;;  %v1008_v40 = vstv %s5833_s11  ;;  %s5994_s11 = sld [smem:[#allocation10 + $0x79]] }
 0x1f6   : > { %v884_v60 = vadd.f32 %v880_v10, %v772_v17  ;;  %v897_v31 = vadd.f32 %v892_v28, %v785_v18  ;;  %v1422_v28 = vmul.f32 %v1420_v0, %v5704_v35  ;;  %v855_v0 = vadd.f32 %v5750_v63, %v5660_v43 }
 0x1f7   : > { %1385 = vrot.lane.b32.xlu1 %v1380_v55, %s4937_s15  ;;  %1397 = vrot.lane.b32.xlu0 %v1393_v56, %s4937_s15  ;;  %v1435_v55 = vmul.f32 %v1434_v36, %v5691_v21  ;;  %v1448_v56 = vstv %s5826_s0  ;;  %s5985_s0 = sld [smem:[#allocation10 + $0x9]] }
 0x1f8   : > { %v5819_v16 = vadd.f32 %v980_v62, %v884_v60  ;;  %v5821_v13 = vadd.f32 %v985_v32, %v897_v31  ;;  %v828_v60 = vadd.f32 %v5735_v25, %v5641_v46  ;;  %v841_v31 = vadd.f32 %v5737_v49, %v5643_v44 }
 0x1f9   : > { %v894_v26 = vpop.permute.xlu1 %893  ;;  %v906_v5 = vpop.permute.xlu0 %905  ;;  %v1004_v46 = vmul.f32 %v1002_v53, %v5408_v57  ;;  %v1009_v44 = vmul.f32 %v1008_v40, %v5395_v51  ;;  %v1014_v25 = vstv %s5853_s9  ;;  %v842_v49 = vadd.f32 %v5748_v42, %v5658_v38  ;;  %s6006_s9 = sld [smem:[#allocation10 + $0x8b]] }
 0x1fa   : > { %v898_v47 = vadd.f32 %v894_v26, %v786_v61  ;;  %v911_v50 = vadd.f32 %v906_v5, %v799_v15  ;;  %v1436_v15 = vmul.f32 %v1434_v36, %v5704_v35  ;;  %v1449_v26 = vmul.f32 %v1448_v56, %v5691_v21 }
 0x1fb   : > { %1399 = vrot.lane.b32.xlu1 %v1394_v11, %s4937_s15  ;;  %1411 = vrot.lane.b32.xlu0 %v1407_v58, %s7727_s18  ;;  %v1462_v5 = vstv %s5846_s7  ;;  %v1450_v24 = vmul.f32 %v1448_v56, %v5704_v35  ;;  %v1010_v38 = vmul.f32 %v1008_v40, %v5408_v57  ;;  %v1015_v43 = vmul.f32 %v1014_v25, %v5395_v51  ;;  %v5943_v56 = vld [vmem:[#allocation2 + $0x19] sm:$0xff]  ;;  %s5998_s7 = sld [smem:[#allocation10 + $0x1b]] }
 0x1fc   : > { %v5839_v4 = vadd.f32 %v986_v27, %v898_v47  ;;  %v5841_v3 = vadd.f32 %v991_v52, %v911_v50  ;;  %v856_v42 = vadd.f32 %v5764_v1, %v5672_v29 }
 0x1fd   : > { %v908_v20 = vpop.permute.xlu1 %907  ;;  %v920_v23 = vpop.permute.xlu0 %919 }
 0x1fe   : > { %v912_v54 = vadd.f32 %v908_v20, %v800_v19  ;;  %v925_v12 = vadd.f32 %v920_v23, %v813_v45  ;;  %v1463_v19 = vmul.f32 %v1462_v5, %v5691_v21  ;;  %v1476_v45 = vstv %s5866_s8  ;;  %s6012_s8 = sld [smem:[#allocation10 + $0x2d]] }
 0x1ff   : > { %1413 = vrot.lane.b32.xlu1 %v1408_v30, %s7727_s18  ;;  %1425 = vrot.lane.b32.xlu0 %v1421_v22, %s7727_s18 }
 0x200   : > { %v5859_v9 = vadd.f32 %v992_v37, %v912_v54  ;;  %v5861_v17 = vadd.f32 %v997_v14, %v925_v12  ;;  %v1464_v54 = vmul.f32 %v1462_v5, %v5704_v35  ;;  %v1477_v12 = vmul.f32 %v1476_v45, %v5691_v21 }
 0x201   : > { %v922_v18 = vpop.permute.xlu1 %921  ;;  %v934_v10 = vpop.permute.xlu0 %933  ;;  %v1490_v37 = vstv %s5884_s16  ;;  %v1016_v14 = vmul.f32 %v1014_v25, %v5408_v57  ;;  %v1596_v5 = vstv %s5946_s20  ;;  %v1610_v25 = vstv %s5959_s13  ;;  %s6020_s16 = sld [smem:[#allocation10 + $0xe]]  ;;  %s6058_s20 = sld [smem:[#allocation10 + $0x32]] }
 0x202   : > { %v926_v59 = vadd.f32 %v922_v18, %v814_v7  ;;  %v939_v33 = vadd.f32 %v934_v10, %v827_v6  ;;  %v1478_v7 = vmul.f32 %v1476_v45, %v5704_v35  ;;  %v1491_v6 = vmul.f32 %v1490_v37, %v5691_v21  ;;  %s6065_s13 = sld [smem:[#allocation10 + $0x63]] }
 0x203   : > { %1427 = vrot.lane.b32.xlu1 %v1422_v28, %s7727_s18  ;;  %1439 = vrot.lane.b32.xlu0 %v1435_v55, %s7727_s18  ;;  %v1504_v18 = vstv %s5902_s19  ;;  %v1492_v28 = vmul.f32 %v1490_v37, %v5704_v35  ;;  %s6027_s19 = sld [smem:[#allocation10 + $0x3f]] }
 0x204   : > { %v5877_v62 = vadd.f32 %v998_v8, %v926_v59  ;;  %v5879_v32 = vadd.f32 %v1003_v34, %v939_v33  ;;  %v1505_v55 = vmul.f32 %v1504_v18, %v5691_v21  ;;  %v1568_v59 = vstv %s5919_s29  ;;  %s6038_s29 = sld [smem:[#allocation10 + $0x20]] }
 0x205   : > { %v936_v2 = vpop.permute.xlu1 %935  ;;  %v948_v61 = vpop.permute.xlu0 %947  ;;  %v1506_v34 = vmul.f32 %v1504_v18, %v5704_v35  ;;  %v1569_v40 = vmul.f32 %v1568_v59, %v5943_v56 }
 0x206   : > { %v940_v11 = vadd.f32 %v936_v2, %v828_v60  ;;  %v953_v58 = vadd.f32 %v948_v61, %v841_v31  ;;  %v5956_v60 = vld [vmem:[#allocation2 + $0x21] sm:$0xff]  ;;  %v1582_v31 = vstv %s5933_s30  ;;  %s6045_s30 = sld [smem:[#allocation10 + $0x51]] }
 0x207   : > { %1441 = vrot.lane.b32.xlu1 %v1436_v15, %s7727_s18  ;;  %1453 = vrot.lane.b32.xlu0 %v1449_v26, %s7727_s18  ;;  %v1570_v15 = vmul.f32 %v1568_v59, %v5956_v60  ;;  %v1583_v26 = vmul.f32 %v1582_v31, %v5943_v56 }
 0x208   : > { %v5895_v47 = vadd.f32 %v1004_v46, %v940_v11  ;;  %v5897_v50 = vadd.f32 %v1009_v44, %v953_v58  ;;  %v1584_v46 = vmul.f32 %v1582_v31, %v5956_v60  ;;  %v1597_v44 = vmul.f32 %v1596_v5, %v5943_v56 }
 0x209   : > { %v950_v27 = vpop.permute.xlu1 %949  ;;  %v962_v52 = vpop.permute.xlu0 %961 }
 0x20a   : > { %v954_v20 = vadd.f32 %v950_v27, %v842_v49  ;;  %v967_v23 = vadd.f32 %v962_v52, %v855_v0  ;;  %v1598_v27 = vmul.f32 %v1596_v5, %v5956_v60  ;;  %v1611_v52 = vmul.f32 %v1610_v25, %v5943_v56 }
 0x20b   : > { %1455 = vrot.lane.b32.xlu1 %v1450_v24, %s7727_s18  ;;  %1467 = vrot.lane.b32.xlu0 %v1463_v19, %s7727_s18  ;;  %v1624_v24 = vstv %s5970_s26  ;;  %s6078_s26 = sld [smem:[#allocation10 + $0x44]] }
 0x20c   : > { %v5910_v63 = vadd.f32 %v1010_v38, %v954_v20  ;;  %v5912_v30 = vadd.f32 %v1015_v43, %v967_v23  ;;  %v1612_v20 = vmul.f32 %v1610_v25, %v5956_v60  ;;  %v1625_v23 = vmul.f32 %v1624_v24, %v5943_v56 }
 0x20d   : > { %v964_v22 = vpop.permute.xlu1 %963  ;;  %v5914_v36 = vpop.permute.xlu0 %1025  ;;  %v1638_v38 = vstv %s5981_s27  ;;  %v1246_v43 = vstv %s5985_s0  ;;  %s6085_s27 = sld [smem:[#allocation10 + $0x75]]  ;;  %s6098_s0 = sld [smem:[#allocation10 + $0x56]] }
 0x20e   : > { %v968_v51 = vadd.f32 %v964_v22, %v856_v42  ;;  %v1031_v42 = vadd.f32 %v5914_v36, %v5781_v48  ;;  %v1640_v59 = vmul.f32 %v1638_v38, %v5956_v60 }
 0x20f   : > { %1469 = vrot.lane.b32.xlu1 %v1464_v54, %s7727_s18  ;;  %1481 = vrot.lane.b32.xlu0 %v1477_v12, %s7727_s18  ;;  %v1626_v12 = vmul.f32 %v1624_v24, %v5956_v60  ;;  %v1680_v24 = vstv %s6020_s16  ;;  %s6171_s16 = sld [smem:[#allocation10 + $0x10]] }
 0x210   : > { %v5924_v29 = vadd.f32 %v1016_v14, %v968_v51  ;;  %v1639_v51 = vmul.f32 %v1638_v38, %v5943_v56  ;;  %v1652_v14 = vstv %s5994_s11  ;;  %s6105_s11 = sld [smem:[#allocation10 + $0x87]] }
 0x211   : > { %v5926_v1 = vpop.permute.xlu1 %1027  ;;  %v5928_v53 = vpop.permute.xlu0 %1039 }
 0x212   : > { %v1032_v48 = vadd.f32 %v5926_v1, %v5799_v39  ;;  %v1045_v36 = vadd.f32 %v5928_v53, %v5801_v41  ;;  %v1258_v41 = vstv %s6012_s8  ;;  %s6154_s8 = sld [smem:[#allocation10 + $0x8c]] }
 0x213   : > { %1483 = vrot.lane.b32.xlu1 %v1478_v7, %s7727_s18  ;;  %1495 = vrot.lane.b32.xlu0 %v1491_v6, %s7727_s18  ;;  %v1247_v7 = vmul.f32 %v1246_v43, %v5691_v21  ;;  %v1252_v6 = vstv %s5998_s7  ;;  %s6118_s7 = sld [smem:[#allocation10 + $0x68]] }
 0x214   : > { %v1253_v39 = vmul.f32 %v1252_v6, %v5691_v21 }
 0x215   : > { %v5937_v57 = vpop.permute.xlu1 %1041  ;;  %v5939_v10 = vpop.permute.xlu0 %1053 }
 0x216   : > { %v1046_v1 = vadd.f32 %v5937_v57, %v5819_v16  ;;  %v1059_v53 = vadd.f32 %v5939_v10, %v5821_v13  ;;  %v1254_v57 = vmul.f32 %v1252_v6, %v5704_v35  ;;  %v1259_v13 = vmul.f32 %v1258_v41, %v5691_v21 }
 0x217   : > { %1497 = vrot.lane.b32.xlu1 %v1492_v28, %s7727_s18  ;;  %1509 = vrot.lane.b32.xlu0 %v1505_v55, %s7727_s18  ;;  %v1264_v10 = vstv %s6027_s19  ;;  %s6185_s19 = sld [smem:[#allocation10 + $0x22]] }
 0x219   : > { %v5950_v33 = vpop.permute.xlu1 %1055  ;;  %v5952_v8 = vpop.permute.xlu0 %1067 }
 0x21a   : > { %v1073_v38 = vadd.f32 %v5952_v8, %v5841_v3  ;;  %v1265_v3 = vmul.f32 %v1264_v10, %v5691_v21  ;;  %v1270_v8 = vstv %s6045_s30  ;;  %s6211_s30 = sld [smem:[#allocation10 + $0x46]] }
 0x21b   : > { %1511 = vrot.lane.b32.xlu1 %v1506_v34, %s7727_s18  ;;  %1573 = vrot.lane.b32.xlu0 %v1569_v40, %s4937_s15  ;;  %v1653_v34 = vmul.f32 %v1652_v14, %v5943_v56  ;;  %v1666_v40 = vstv %s6006_s9  ;;  %s6136_s9 = sld [smem:[#allocation10 + $0x7a]] }
 0x21d   : > { %v5963_v2 = vpop.permute.xlu1 %1069  ;;  %v5965_v61 = vpop.permute.xlu0 %1081 }
 0x21e   : > { %v1074_v6 = vadd.f32 %v5963_v2, %v5859_v9  ;;  %v1266_v2 = vmul.f32 %v1264_v10, %v5704_v35 }
 0x21f   : > { %1575 = vrot.lane.b32.xlu1 %v1570_v15, %s4937_s15  ;;  %1587 = vrot.lane.b32.xlu0 %v1583_v26, %s4937_s15  ;;  %v1248_v26 = vmul.f32 %v1246_v43, %v5704_v35 }
 0x221   : > { %v5974_v11 = vpop.permute.xlu1 %1083  ;;  %v5976_v58 = vpop.permute.xlu0 %1095 }
 0x223   : > { %1589 = vrot.lane.b32.xlu1 %v1584_v46, %s4937_s15  ;;  %1601 = vrot.lane.b32.xlu0 %v1597_v44, %s4937_s15 }
 0x225   : > { %v5987_v49 = vpop.permute.xlu1 %1097  ;;  %v5989_v0 = vpop.permute.xlu0 %1109 }
 0x227   : > { %1603 = vrot.lane.b32.xlu1 %v1598_v27, %s4937_s15  ;;  %1615 = vrot.lane.b32.xlu0 %v1611_v52, %s4937_s15  ;;  %v1654_v27 = vmul.f32 %v1652_v14, %v5956_v60  ;;  %v1667_v52 = vmul.f32 %v1666_v40, %v5943_v56  ;;  %v1694_v14 = vstv %s6038_s29  ;;  %s6198_s29 = sld [smem:[#allocation10 + $0x34]] }
 0x229   : > { %v6000_v19 = vpop.permute.xlu1 %1111  ;;  %v6002_v45 = vpop.permute.xlu0 %1123 }
 0x22b   : > { %1617 = vrot.lane.b32.xlu1 %v1612_v20, %s4937_s15  ;;  %1629 = vrot.lane.b32.xlu0 %v1625_v23, %s4937_s15  ;;  %v1060_v23 = vadd.f32 %v5950_v33, %v5839_v4  ;;  %v1260_v33 = vmul.f32 %v1258_v41, %v5704_v35 }
 0x22d   : > { %v6016_v22 = vpop.permute.xlu1 %1125  ;;  %v1138_v54 = vpop.permute.xlu0 %1137 }
 0x22e   : > { %v1143_v37 = vadd.f32 %v1138_v54, %v1031_v42 }
 0x22f   : > { %1631 = vrot.lane.b32.xlu1 %v1626_v12, %s4937_s15  ;;  %1643 = vrot.lane.b32.xlu0 %v1639_v51, %s4937_s15  ;;  %v1668_v51 = vmul.f32 %v1666_v40, %v5956_v60  ;;  %v1695_v40 = vmul.f32 %v1694_v14, %v5943_v56 }
 0x230   : > { %v6033_v18 = vadd.f32 %v1247_v7, %v1143_v37  ;;  %v1681_v37 = vmul.f32 %v1680_v24, %v5943_v56 }
 0x231   : > { %v1140_v28 = vpop.permute.xlu1 %1139  ;;  %v1152_v55 = vpop.permute.xlu0 %1151 }
 0x232   : > { %v1144_v31 = vadd.f32 %v1140_v28, %v1032_v48  ;;  %v1157_v15 = vadd.f32 %v1152_v55, %v1045_v36  ;;  %v1087_v48 = vadd.f32 %v5965_v61, %v5861_v17  ;;  %v1271_v17 = vmul.f32 %v1270_v8, %v5691_v21 }
 0x233   : > { %1645 = vrot.lane.b32.xlu1 %v1640_v59, %s4937_s15  ;;  %1657 = vrot.lane.b32.xlu0 %v1653_v34, %s4937_s15  ;;  %v1682_v34 = vmul.f32 %v1680_v24, %v5956_v60  ;;  %v1276_v61 = vstv %s6065_s13  ;;  %s6233_s13 = sld [smem:[#allocation10 + $0x6a]] }
 0x234   : > { %v6051_v5 = vadd.f32 %v1248_v26, %v1144_v31  ;;  %v6053_v46 = vadd.f32 %v1253_v39, %v1157_v15  ;;  %v1708_v31 = vstv %s6058_s20  ;;  %v1088_v26 = vadd.f32 %v5974_v11, %v5877_v62  ;;  %s6222_s20 = sld [smem:[#allocation10 + $0x58]] }
 0x235   : > { %v1154_v44 = vpop.permute.xlu1 %1153  ;;  %v1166_v25 = vpop.permute.xlu0 %1165  ;;  %v1101_v39 = vadd.f32 %v5976_v58, %v5879_v32  ;;  %v1272_v11 = vmul.f32 %v1270_v8, %v5704_v35  ;;  %v1277_v32 = vmul.f32 %v1276_v61, %v5691_v21  ;;  %v1282_v58 = vstv %s6085_s27  ;;  %s6246_s27 = sld [smem:[#allocation10 + $0x7c]] }
 0x236   : > { %v1158_v20 = vadd.f32 %v1154_v44, %v1046_v1  ;;  %v1171_v16 = vadd.f32 %v1166_v25, %v1059_v53  ;;  %v1696_v25 = vmul.f32 %v1694_v14, %v5956_v60  ;;  %v1129_v14 = vadd.f32 %v6002_v45, %v5912_v30 }
 0x237   : > { %1659 = vrot.lane.b32.xlu1 %v1654_v27, %s4937_s15  ;;  %1671 = vrot.lane.b32.xlu0 %v1667_v52, %s4937_s15  ;;  %v1709_v27 = vmul.f32 %v1708_v31, %v5943_v56  ;;  %v1722_v52 = vstv %s6078_s26  ;;  %s6237_s26 = sld [smem:[#allocation10 + $0xc]] }
 0x238   : > { %v6071_v43 = vadd.f32 %v1254_v57, %v1158_v20  ;;  %v6073_v42 = vadd.f32 %v1259_v13, %v1171_v16  ;;  %v1102_v20 = vadd.f32 %v5987_v49, %v5895_v47  ;;  %v1115_v16 = vadd.f32 %v5989_v0, %v5897_v50 }
 0x239   : > { %v1168_v54 = vpop.permute.xlu1 %1167  ;;  %v1180_v12 = vpop.permute.xlu0 %1179  ;;  %v1278_v47 = vmul.f32 %v1276_v61, %v5704_v35  ;;  %v1283_v50 = vmul.f32 %v1282_v58, %v5691_v21  ;;  %v1288_v49 = vstv %s6105_s11  ;;  %v1116_v0 = vadd.f32 %v6000_v19, %v5910_v63  ;;  %s6258_s11 = sld [smem:[#allocation10 + $0x8e]] }
 0x23a   : > { %v1172_v7 = vadd.f32 %v1168_v54, %v1060_v23  ;;  %v1185_v4 = vadd.f32 %v1180_v12, %v1073_v38  ;;  %v1710_v38 = vmul.f32 %v1708_v31, %v5956_v60  ;;  %v1723_v54 = vmul.f32 %v1722_v52, %v5943_v56 }
 0x23b   : > { %1673 = vrot.lane.b32.xlu1 %v1668_v51, %s4937_s15  ;;  %1685 = vrot.lane.b32.xlu0 %v1681_v37, %s7727_s18  ;;  %v1736_v12 = vstv %s6098_s0  ;;  %v1724_v8 = vmul.f32 %v1722_v52, %v5956_v60  ;;  %v1284_v63 = vmul.f32 %v1282_v58, %v5704_v35  ;;  %v1289_v30 = vmul.f32 %v1288_v49, %v5691_v21  ;;  %v6195_v52 = vld [vmem:[#allocation2 + $0x1a] sm:$0xff]  ;;  %s6250_s0 = sld [smem:[#allocation10 + $0x1e]] }
 0x23c   : > { %v6091_v36 = vadd.f32 %v1260_v33, %v1172_v7  ;;  %v6093_v28 = vadd.f32 %v1265_v3, %v1185_v4  ;;  %v1130_v19 = vadd.f32 %v6016_v22, %v5924_v29 }
 0x23d   : > { %v1182_v55 = vpop.permute.xlu1 %1181  ;;  %v1194_v59 = vpop.permute.xlu0 %1193 }
 0x23e   : > { %v1186_v15 = vadd.f32 %v1182_v55, %v1074_v6  ;;  %v1199_v9 = vadd.f32 %v1194_v59, %v1087_v48  ;;  %v1737_v6 = vmul.f32 %v1736_v12, %v5943_v56  ;;  %v1750_v48 = vstv %s6118_s7  ;;  %s6264_s7 = sld [smem:[#allocation10 + $0x30]] }
 0x23f   : > { %1687 = vrot.lane.b32.xlu1 %v1682_v34, %s7727_s18  ;;  %1699 = vrot.lane.b32.xlu0 %v1695_v40, %s7727_s18 }
 0x240   : > { %v6111_v41 = vadd.f32 %v1266_v2, %v1186_v15  ;;  %v6113_v1 = vadd.f32 %v1271_v17, %v1199_v9  ;;  %v1738_v15 = vmul.f32 %v1736_v12, %v5956_v60  ;;  %v1751_v9 = vmul.f32 %v1750_v48, %v5943_v56 }
 0x241   : > { %v1196_v53 = vpop.permute.xlu1 %1195  ;;  %v1208_v44 = vpop.permute.xlu0 %1207  ;;  %v1764_v2 = vstv %s6136_s9  ;;  %v1290_v17 = vmul.f32 %v1288_v49, %v5704_v35  ;;  %v1870_v12 = vstv %s6198_s29  ;;  %v1884_v49 = vstv %s6211_s30  ;;  %s6272_s9 = sld [smem:[#allocation10 + $0x11]]  ;;  %s6310_s29 = sld [smem:[#allocation10 + $0x35]] }
 0x242   : > { %v1200_v24 = vadd.f32 %v1196_v53, %v1088_v26  ;;  %v1213_v62 = vadd.f32 %v1208_v44, %v1101_v39  ;;  %v1752_v26 = vmul.f32 %v1750_v48, %v5956_v60  ;;  %v1765_v39 = vmul.f32 %v1764_v2, %v5943_v56  ;;  %s6317_s30 = sld [smem:[#allocation10 + $0x66]] }
 0x243   : > { %1701 = vrot.lane.b32.xlu1 %v1696_v25, %s7727_s18  ;;  %1713 = vrot.lane.b32.xlu0 %v1709_v27, %s7727_s18  ;;  %v1778_v53 = vstv %s6154_s8  ;;  %v1766_v25 = vmul.f32 %v1764_v2, %v5956_v60  ;;  %s6279_s8 = sld [smem:[#allocation10 + $0x42]] }
 0x244   : > { %v6129_v57 = vadd.f32 %v1272_v11, %v1200_v24  ;;  %v6131_v13 = vadd.f32 %v1277_v32, %v1213_v62  ;;  %v1779_v27 = vmul.f32 %v1778_v53, %v5943_v56  ;;  %v1842_v24 = vstv %s6171_s16  ;;  %s6290_s16 = sld [smem:[#allocation10 + $0x23]] }
 0x245   : > { %v1210_v10 = vpop.permute.xlu1 %1209  ;;  %v1222_v23 = vpop.permute.xlu0 %1221  ;;  %v1780_v32 = vmul.f32 %v1778_v53, %v5956_v60  ;;  %v1843_v58 = vmul.f32 %v1842_v24, %v6195_v52 }
 0x246   : > { %v1214_v51 = vadd.f32 %v1210_v10, %v1102_v20  ;;  %v1227_v37 = vadd.f32 %v1222_v23, %v1115_v16  ;;  %v6208_v20 = vld [vmem:[#allocation2 + $0x22] sm:$0xff]  ;;  %v1856_v16 = vstv %s6185_s19  ;;  %s6297_s19 = sld [smem:[#allocation10 + $0x54]] }
 0x247   : > { %1715 = vrot.lane.b32.xlu1 %v1710_v38, %s7727_s18  ;;  %1727 = vrot.lane.b32.xlu0 %v1723_v54, %s7727_s18  ;;  %v1844_v38 = vmul.f32 %v1842_v24, %v6208_v20  ;;  %v1857_v54 = vmul.f32 %v1856_v16, %v6195_v52 }
 0x248   : > { %v6147_v7 = vadd.f32 %v1278_v47, %v1214_v51  ;;  %v6149_v4 = vadd.f32 %v1283_v50, %v1227_v37  ;;  %v1858_v47 = vmul.f32 %v1856_v16, %v6208_v20  ;;  %v1871_v50 = vmul.f32 %v1870_v12, %v6195_v52 }
 0x249   : > { %v1224_v33 = vpop.permute.xlu1 %1223  ;;  %v1236_v3 = vpop.permute.xlu0 %1235 }
 0x24a   : > { %v1228_v55 = vadd.f32 %v1224_v33, %v1116_v0  ;;  %v1241_v59 = vadd.f32 %v1236_v3, %v1129_v14  ;;  %v1872_v33 = vmul.f32 %v1870_v12, %v6208_v20  ;;  %v1885_v3 = vmul.f32 %v1884_v49, %v6195_v52 }
 0x24b   : > { %1729 = vrot.lane.b32.xlu1 %v1724_v8, %s7727_s18  ;;  %1741 = vrot.lane.b32.xlu0 %v1737_v6, %s7727_s18  ;;  %v1898_v8 = vstv %s6222_s20  ;;  %s6330_s20 = sld [smem:[#allocation10 + $0x47]] }
 0x24c   : > { %v6162_v45 = vadd.f32 %v1284_v63, %v1228_v55  ;;  %v6164_v34 = vadd.f32 %v1289_v30, %v1241_v59  ;;  %v1886_v55 = vmul.f32 %v1884_v49, %v6208_v20  ;;  %v1899_v59 = vmul.f32 %v1898_v8, %v6195_v52 }
 0x24d   : > { %v1238_v40 = vpop.permute.xlu1 %1237  ;;  %v6166_v31 = vpop.permute.xlu0 %1299  ;;  %v1912_v63 = vstv %s6233_s13  ;;  %v1520_v30 = vstv %s6237_s26  ;;  %s6337_s13 = sld [smem:[#allocation10 + $0x78]]  ;;  %s6350_s26 = sld [smem:[#allocation10 + $0x59]] }
 0x24e   : > { %v1242_v21 = vadd.f32 %v1238_v40, %v1130_v19  ;;  %v1305_v19 = vadd.f32 %v6166_v31, %v6033_v18  ;;  %v1914_v24 = vmul.f32 %v1912_v63, %v6208_v20 }
 0x24f   : > { %1743 = vrot.lane.b32.xlu1 %v1738_v15, %s7727_s18  ;;  %1755 = vrot.lane.b32.xlu0 %v1751_v9, %s7727_s18  ;;  %v1900_v9 = vmul.f32 %v1898_v8, %v6208_v20  ;;  %v1954_v8 = vstv %s6272_s9  ;;  %s4330_s9 = sld [smem:[#allocation10 + $0xf]] }
 0x250   : > { %v6176_v29 = vadd.f32 %v1290_v17, %v1242_v21  ;;  %v1913_v21 = vmul.f32 %v1912_v63, %v6195_v52  ;;  %v1926_v17 = vstv %s6246_s27  ;;  %s6357_s27 = sld [smem:[#allocation10 + $0x8a]] }
 0x251   : > { %v6178_v22 = vpop.permute.xlu1 %1301  ;;  %v6180_v61 = vpop.permute.xlu0 %1313 }
 0x252   : > { %v1306_v18 = vadd.f32 %v6178_v22, %v6051_v5  ;;  %v1319_v31 = vadd.f32 %v6180_v61, %v6053_v46  ;;  %v1532_v46 = vstv %s6264_s7  ;;  %s6406_s7 = sld [smem:[#allocation10 + $0x8f]] }
 0x253   : > { %1757 = vrot.lane.b32.xlu1 %v1752_v26, %s7727_s18  ;;  %1769 = vrot.lane.b32.xlu0 %v1765_v39, %s7727_s18  ;;  %v1521_v26 = vmul.f32 %v1520_v30, %v5943_v56  ;;  %v1526_v39 = vstv %s6250_s0  ;;  %s6370_s0 = sld [smem:[#allocation10 + $0x6b]] }
 0x254   : > { %v1527_v5 = vmul.f32 %v1526_v39, %v5943_v56 }
 0x255   : > { %v6189_v35 = vpop.permute.xlu1 %1315  ;;  %v6191_v44 = vpop.permute.xlu0 %1327 }
 0x256   : > { %v1320_v22 = vadd.f32 %v6189_v35, %v6071_v43  ;;  %v1333_v61 = vadd.f32 %v6191_v44, %v6073_v42  ;;  %v1528_v35 = vmul.f32 %v1526_v39, %v5956_v60  ;;  %v1533_v42 = vmul.f32 %v1532_v46, %v5943_v56 }
 0x257   : > { %1771 = vrot.lane.b32.xlu1 %v1766_v25, %s7727_s18  ;;  %1783 = vrot.lane.b32.xlu0 %v1779_v27, %s7727_s18  ;;  %v1538_v44 = vstv %s6279_s8  ;;  %s6445_s8 = sld [smem:[#allocation10 + $0x21]] }
 0x259   : > { %v6202_v62 = vpop.permute.xlu1 %1329  ;;  %v6204_v11 = vpop.permute.xlu0 %1341 }
 0x25a   : > { %v1347_v63 = vadd.f32 %v6204_v11, %v6093_v28  ;;  %v1539_v28 = vmul.f32 %v1538_v44, %v5943_v56  ;;  %v1544_v11 = vstv %s6297_s19  ;;  %s6458_s19 = sld [smem:[#allocation10 + $0x45]] }
 0x25b   : > { %1785 = vrot.lane.b32.xlu1 %v1780_v32, %s7727_s18  ;;  %1847 = vrot.lane.b32.xlu0 %v1843_v58, %s4937_s15  ;;  %v1927_v32 = vmul.f32 %v1926_v17, %v6195_v52  ;;  %v1940_v58 = vstv %s6258_s11  ;;  %s6388_s11 = sld [smem:[#allocation10 + $0x7d]] }
 0x25d   : > { %v6215_v10 = vpop.permute.xlu1 %1343  ;;  %v6217_v23 = vpop.permute.xlu0 %1355 }
 0x25e   : > { %v1348_v39 = vadd.f32 %v6215_v10, %v6111_v41  ;;  %v1540_v10 = vmul.f32 %v1538_v44, %v5956_v60 }
 0x25f   : > { %1849 = vrot.lane.b32.xlu1 %v1844_v38, %s4937_s15  ;;  %1861 = vrot.lane.b32.xlu0 %v1857_v54, %s4937_s15  ;;  %v1522_v54 = vmul.f32 %v1520_v30, %v5956_v60 }
 0x261   : > { %v6226_v51 = vpop.permute.xlu1 %1357  ;;  %v6228_v37 = vpop.permute.xlu0 %1369 }
 0x263   : > { %1863 = vrot.lane.b32.xlu1 %v1858_v47, %s4937_s15  ;;  %1875 = vrot.lane.b32.xlu0 %v1871_v50, %s4937_s15 }
 0x265   : > { %v6239_v0 = vpop.permute.xlu1 %1371  ;;  %v6241_v14 = vpop.permute.xlu0 %1383 }
 0x267   : > { %1877 = vrot.lane.b32.xlu1 %v1872_v33, %s4937_s15  ;;  %1889 = vrot.lane.b32.xlu0 %v1885_v3, %s4937_s15  ;;  %v1928_v33 = vmul.f32 %v1926_v17, %v6208_v20  ;;  %v1941_v3 = vmul.f32 %v1940_v58, %v6195_v52  ;;  %v1968_v17 = vstv %s6290_s16  ;;  %s6451_s16 = sld [smem:[#allocation10 + $0x33]] }
 0x269   : > { %v6252_v6 = vpop.permute.xlu1 %1385  ;;  %v6254_v48 = vpop.permute.xlu0 %1397 }
 0x26b   : > { %1891 = vrot.lane.b32.xlu1 %v1886_v55, %s4937_s15  ;;  %1903 = vrot.lane.b32.xlu0 %v1899_v59, %s4937_s15  ;;  %v1334_v59 = vadd.f32 %v6202_v62, %v6091_v36  ;;  %v1534_v62 = vmul.f32 %v1532_v46, %v5956_v60 }
 0x26d   : > { %v6268_v40 = vpop.permute.xlu1 %1399  ;;  %v1412_v15 = vpop.permute.xlu0 %1411 }
 0x26e   : > { %v1417_v2 = vadd.f32 %v1412_v15, %v1305_v19 }
 0x26f   : > { %1905 = vrot.lane.b32.xlu1 %v1900_v9, %s4937_s15  ;;  %1917 = vrot.lane.b32.xlu0 %v1913_v21, %s4937_s15  ;;  %v1942_v21 = vmul.f32 %v1940_v58, %v6208_v20  ;;  %v1969_v58 = vmul.f32 %v1968_v17, %v6195_v52 }
 0x270   : > { %v6285_v53 = vadd.f32 %v1521_v26, %v1417_v2  ;;  %v1955_v2 = vmul.f32 %v1954_v8, %v6195_v52 }
 0x271   : > { %v1414_v25 = vpop.permute.xlu1 %1413  ;;  %v1426_v27 = vpop.permute.xlu0 %1425 }
 0x272   : > { %v1418_v16 = vadd.f32 %v1414_v25, %v1306_v18  ;;  %v1431_v38 = vadd.f32 %v1426_v27, %v1319_v31  ;;  %v1361_v18 = vadd.f32 %v6217_v23, %v6113_v1  ;;  %v1545_v1 = vmul.f32 %v1544_v11, %v5943_v56 }
 0x273   : > { %1919 = vrot.lane.b32.xlu1 %v1914_v24, %s4937_s15  ;;  %1931 = vrot.lane.b32.xlu0 %v1927_v32, %s4937_s15  ;;  %v1956_v32 = vmul.f32 %v1954_v8, %v6208_v20  ;;  %v1550_v23 = vstv %s6317_s30  ;;  %s6478_s30 = sld [smem:[#allocation10 + $0x69]] }
 0x274   : > { %v6303_v12 = vadd.f32 %v1522_v54, %v1418_v16  ;;  %v6305_v47 = vadd.f32 %v1527_v5, %v1431_v38  ;;  %v1982_v16 = vstv %s6310_s29  ;;  %v1362_v54 = vadd.f32 %v6226_v51, %v6129_v57  ;;  %s6467_s29 = sld [smem:[#allocation10 + $0x57]] }
 0x275   : > { %v1428_v50 = vpop.permute.xlu1 %1427  ;;  %v1440_v49 = vpop.permute.xlu0 %1439  ;;  %v1375_v5 = vadd.f32 %v6228_v37, %v6131_v13  ;;  %v1546_v51 = vmul.f32 %v1544_v11, %v5956_v60  ;;  %v1551_v13 = vmul.f32 %v1550_v23, %v5943_v56  ;;  %v1556_v37 = vstv %s6337_s13  ;;  %s6500_s13 = sld [smem:[#allocation10 + $0x8d]] }
 0x276   : > { %v1432_v55 = vadd.f32 %v1428_v50, %v1320_v22  ;;  %v1445_v43 = vadd.f32 %v1440_v49, %v1333_v61  ;;  %v1970_v49 = vmul.f32 %v1968_v17, %v6208_v20  ;;  %v1403_v17 = vadd.f32 %v6254_v48, %v6164_v34 }
 0x277   : > { %1933 = vrot.lane.b32.xlu1 %v1928_v33, %s4937_s15  ;;  %1945 = vrot.lane.b32.xlu0 %v1941_v3, %s4937_s15  ;;  %v1983_v33 = vmul.f32 %v1982_v16, %v6195_v52  ;;  %v1996_v3 = vstv %s6330_s20  ;;  %s6489_s20 = sld [smem:[#allocation10 + $0x7b]] }
 0x278   : > { %v6323_v30 = vadd.f32 %v1528_v35, %v1432_v55  ;;  %v6325_v19 = vadd.f32 %v1533_v42, %v1445_v43  ;;  %v1376_v55 = vadd.f32 %v6239_v0, %v6147_v7  ;;  %v1389_v43 = vadd.f32 %v6241_v14, %v6149_v4 }
 0x279   : > { %v1442_v15 = vpop.permute.xlu1 %1441  ;;  %v1454_v9 = vpop.permute.xlu0 %1453  ;;  %v1552_v7 = vmul.f32 %v1550_v23, %v5956_v60  ;;  %v1557_v4 = vmul.f32 %v1556_v37, %v5943_v56  ;;  %v1562_v0 = vstv %s6357_s27  ;;  %v1390_v14 = vadd.f32 %v6252_v6, %v6162_v45  ;;  %s6555_s27 = sld [smem:[#allocation11 + $0x1]] }
 0x27a   : > { %v1446_v26 = vadd.f32 %v1442_v15, %v1334_v59  ;;  %v1459_v36 = vadd.f32 %v1454_v9, %v1347_v63  ;;  %v1984_v63 = vmul.f32 %v1982_v16, %v6208_v20  ;;  %v1997_v15 = vmul.f32 %v1996_v3, %v6195_v52 }
 0x27b   : > { %1947 = vrot.lane.b32.xlu1 %v1942_v21, %s4937_s15  ;;  %1959 = vrot.lane.b32.xlu0 %v1955_v2, %s7727_s18  ;;  %v2010_v9 = vstv %s6350_s26  ;;  %v1998_v11 = vmul.f32 %v1996_v3, %v6208_v20  ;;  %v1558_v45 = vmul.f32 %v1556_v37, %v5956_v60  ;;  %v1563_v34 = vmul.f32 %v1562_v0, %v5943_v56  ;;  %s2065_s26 = sld [smem:[#allocation11]] }
 0x27c   : > { %v6343_v31 = vadd.f32 %v1534_v62, %v1446_v26  ;;  %v6345_v25 = vadd.f32 %v1539_v28, %v1459_v36  ;;  %v1404_v6 = vadd.f32 %v6268_v40, %v6176_v29  ;;  %v2038_v56 = vstv %s6388_s11  ;;  %s6567_s11 = sld [smem:[#allocation11 + $0x3]] }
 0x27d   : > { %v1456_v27 = vpop.permute.xlu1 %1455  ;;  %v1468_v24 = vpop.permute.xlu0 %1467 }
 0x27e   : > { %v1460_v38 = vadd.f32 %v1456_v27, %v1348_v39  ;;  %v1473_v41 = vadd.f32 %v1468_v24, %v1361_v18  ;;  %v2011_v39 = vmul.f32 %v2010_v9, %v6195_v52  ;;  %v2024_v18 = vstv %s6370_s0  ;;  %s6560_s0 = sld [smem:[#allocation11 + $0x2]] }
 0x27f   : > { %1961 = vrot.lane.b32.xlu1 %v1956_v32, %s7727_s18  ;;  %1973 = vrot.lane.b32.xlu0 %v1969_v58, %s7727_s18 }
 0x280   : > { %v6363_v46 = vadd.f32 %v1540_v10, %v1460_v38  ;;  %v6365_v22 = vadd.f32 %v1545_v1, %v1473_v41  ;;  %v2012_v38 = vmul.f32 %v2010_v9, %v6208_v20  ;;  %v2025_v41 = vmul.f32 %v2024_v18, %v6195_v52 }
 0x281   : > { %v1470_v61 = vpop.permute.xlu1 %1469  ;;  %v1482_v50 = vpop.permute.xlu0 %1481  ;;  %v1564_v1 = vmul.f32 %v1562_v0, %v5956_v60  ;;  %v2040_v60 = vmul.f32 %v2038_v56, %v6208_v20  ;;  %v1800_v0 = vstv %s6445_s8  ;;  %s6599_s8 = sld [smem:[#allocation11 + $0x6]] }
 0x282   : > { %v1474_v8 = vadd.f32 %v1470_v61, %v1362_v54  ;;  %v1487_v57 = vadd.f32 %v1482_v50, %v1375_v5  ;;  %v2026_v54 = vmul.f32 %v2024_v18, %v6208_v20  ;;  %v2039_v5 = vmul.f32 %v2038_v56, %v6195_v52 }
 0x283   : > { %1975 = vrot.lane.b32.xlu1 %v1970_v49, %s7727_s18  ;;  %1987 = vrot.lane.b32.xlu0 %v1983_v33, %s7727_s18  ;;  %v2052_v61 = vstv %s6406_s7  ;;  %v1812_v56 = vstv %s6458_s19  ;;  %s6577_s7 = sld [smem:[#allocation11 + $0x4]]  ;;  %s7728_s19 = smov 1  }
 0x284   : > { %v6381_v35 = vadd.f32 %v1546_v51, %v1474_v8  ;;  %v6383_v42 = vadd.f32 %v1551_v13, %v1487_v57  ;;  %v2053_v33 = vmul.f32 %v2052_v61, %v6195_v52  ;;  %v2054_v57 = vmul.f32 %v2052_v61, %v6208_v20 }
 0x285   : > { %v1484_v44 = vpop.permute.xlu1 %1483  ;;  %v1496_v59 = vpop.permute.xlu0 %1495 }
 0x286   : > { %v1488_v21 = vadd.f32 %v1484_v44, %v1376_v55  ;;  %v1501_v2 = vadd.f32 %v1496_v59, %v1389_v43 }
 0x287   : > { %1989 = vrot.lane.b32.xlu1 %v1984_v63, %s7727_s18  ;;  %2001 = vrot.lane.b32.xlu0 %v1997_v15, %s7727_s18  ;;  %v1794_v15 = vstv %s4330_s9  ;;  %s6590_s9 = sld [smem:[#allocation11 + $0x5]] }
 0x288   : > { %v6399_v26 = vadd.f32 %v1552_v7, %v1488_v21  ;;  %v6401_v36 = vadd.f32 %v1557_v4, %v1501_v2  ;;  %v1795_v4 = vmul.f32 %v1794_v15, %v6195_v52  ;;  %v1796_v18 = vmul.f32 %v1794_v15, %v6208_v20 }
 0x289   : > { %v1498_v62 = vpop.permute.xlu1 %1497  ;;  %v1510_v28 = vpop.permute.xlu0 %1509 }
 0x28a   : > { %v1502_v27 = vadd.f32 %v1498_v62, %v1390_v14  ;;  %v1515_v24 = vadd.f32 %v1510_v28, %v1403_v17 }
 0x28b   : > { %2003 = vrot.lane.b32.xlu1 %v1998_v11, %s7727_s18  ;;  %2015 = vrot.lane.b32.xlu0 %v2011_v39, %s7727_s18 }
 0x28c   : > { %v6414_v48 = vadd.f32 %v1558_v45, %v1502_v27  ;;  %v6416_v32 = vadd.f32 %v1563_v34, %v1515_v24  ;;  %v1801_v27 = vmul.f32 %v1800_v0, %v6195_v52  ;;  %v1806_v24 = vstv %s6451_s16  ;;  %s6611_s16 = sld [smem:[#allocation11 + $0x7]] }
 0x28d   : > { %v1512_v58 = vpop.permute.xlu1 %1511  ;;  %v1574_v16 = vpop.permute.xlu0 %1573 }
 0x28e   : > { %v1516_v10 = vadd.f32 %v1512_v58, %v1404_v6  ;;  %v1579_v9 = vadd.f32 %v1574_v16, %v6285_v53 }
 0x28f   : > { %2017 = vrot.lane.b32.xlu1 %v2012_v38, %s7727_s18  ;;  %2029 = vrot.lane.b32.xlu0 %v2025_v41, %s7727_s18  ;;  %v1802_v41 = vmul.f32 %v1800_v0, %v6208_v20 }
 0x290   : > { %v6424_v29 = vadd.f32 %v1564_v1, %v1516_v10  ;;  %v1807_v10 = vmul.f32 %v1806_v24, %v6195_v52 }
 0x291   : > { %v1576_v40 = vpop.permute.xlu1 %1575  ;;  %v1588_v23 = vpop.permute.xlu0 %1587 }
 0x292   : > { %v1580_v14 = vadd.f32 %v1576_v40, %v6303_v12  ;;  %v1593_v17 = vadd.f32 %v1588_v23, %v6305_v47 }
 0x293   : > { %2031 = vrot.lane.b32.xlu1 %v2026_v54, %s7727_s18  ;;  %2043 = vrot.lane.b32.xlu0 %v2039_v5, %s7727_s18 }
 0x295   : > { %v1590_v50 = vpop.permute.xlu1 %1589  ;;  %v1602_v49 = vpop.permute.xlu0 %1601 }
 0x296   : > { %v1594_v45 = vadd.f32 %v1590_v50, %v6323_v30  ;;  %v1607_v12 = vadd.f32 %v1602_v49, %v6325_v19  ;;  %v1808_v50 = vmul.f32 %v1806_v24, %v6208_v20  ;;  %v1813_v49 = vmul.f32 %v1812_v56, %v6195_v52 }
 0x297   : > { %2045 = vrot.lane.b32.xlu1 %v2040_v60, %s7727_s18  ;;  %2057 = vrot.lane.b32.xlu0 %v2053_v33, %s7727_s18  ;;  %v1818_v60 = vstv %s6467_s29  ;;  %s4378_s29 = sld [smem:[#allocation13 + $0x1]] }
 0x299   : > { %v1604_v3 = vpop.permute.xlu1 %1603  ;;  %v1616_v8 = vpop.permute.xlu0 %1615 }
 0x29a   : > { %v1608_v30 = vadd.f32 %v1604_v3, %v6343_v31  ;;  %v1621_v19 = vadd.f32 %v1616_v8, %v6345_v25 }
 0x29b   : > { %2059 = vrot.lane.b32.xlu1 %v2054_v57, %s7727_s18 }
 0x29d   : > { %v1618_v51 = vpop.permute.xlu1 %1617  ;;  %v1630_v13 = vpop.permute.xlu0 %1629 }
 0x29e   : > { %v1622_v31 = vadd.f32 %v1618_v51, %v6363_v46  ;;  %v1635_v25 = vadd.f32 %v1630_v13, %v6365_v22 }
 0x2a1   : > { %v6437_v37 = vpop.permute.xlu1 %1631  ;;  %v6439_v55 = vpop.permute.xlu0 %1643 }
 0x2a2   : > { %v1636_v46 = vadd.f32 %v6437_v37, %v6381_v35  ;;  %v1649_v22 = vadd.f32 %v6439_v55, %v6383_v42 }
 0x2a5   : > { %v6441_v43 = vpop.permute.xlu1 %1645  ;;  %v6443_v44 = vpop.permute.xlu0 %1657 }
 0x2a6   : > { %v1650_v35 = vadd.f32 %v6441_v43, %v6399_v26  ;;  %v1663_v42 = vadd.f32 %v6443_v44, %v6401_v36 }
 0x2a9   : > { %v6447_v59 = vpop.permute.xlu1 %1659  ;;  %v6449_v63 = vpop.permute.xlu0 %1671 }
 0x2aa   : > { %v1677_v26 = vadd.f32 %v6449_v63, %v6416_v32 }
 0x2ad   : > { %v6454_v21 = vpop.permute.xlu1 %1673  ;;  %v1686_v2 = vpop.permute.xlu0 %1685 }
 0x2ae   : > { %v1691_v7 = vadd.f32 %v1686_v2, %v1579_v9  ;;  %v1814_v2 = vmul.f32 %v1812_v56, %v6208_v20 }
 0x2b0   : > { %v6462_v62 = vadd.f32 %v1795_v4, %v1691_v7  ;;  %v1819_v7 = vmul.f32 %v1818_v60, %v6195_v52  ;;  %v1824_v4 = vstv %s6478_s30  ;;  %s6682_s30 = sld [smem:[#allocation13 + $0x49]] }
 0x2b1   : > { %v1688_v28 = vpop.permute.xlu1 %1687  ;;  %v1700_v11 = vpop.permute.xlu0 %1699 }
 0x2b2   : > { %v1692_v39 = vadd.f32 %v1688_v28, %v1580_v14  ;;  %v1705_v53 = vadd.f32 %v1700_v11, %v1593_v17  ;;  %v1820_v11 = vmul.f32 %v1818_v60, %v6208_v20 }
 0x2b4   : > { %v6471_v34 = vadd.f32 %v1796_v18, %v1692_v39  ;;  %v6473_v47 = vadd.f32 %v1801_v27, %v1705_v53  ;;  %v1825_v39 = vmul.f32 %v1824_v4, %v6195_v52  ;;  %v1830_v53 = vstv %s6489_s20  ;;  %s6686_s20 = sld [smem:[#allocation13 + $0x2]] }
 0x2b5   : > { %v1702_v6 = vpop.permute.xlu1 %1701  ;;  %v1714_v58 = vpop.permute.xlu0 %1713  ;;  %v1832_v56 = vmul.f32 %v1830_v53, %v6208_v20 }
 0x2b6   : > { %v1706_v16 = vadd.f32 %v1702_v6, %v1594_v45  ;;  %v1719_v38 = vadd.f32 %v1714_v58, %v1607_v12  ;;  %v1826_v12 = vmul.f32 %v1824_v4, %v6208_v20  ;;  %v1831_v6 = vmul.f32 %v1830_v53, %v6195_v52 }
 0x2b7   : > { %v1836_v58 = vstv %s6500_s13  ;;  %v2066_v4 = vstv %s2065_s26  ;;  %s6694_s13 = sld [smem:[#allocation13 + $0x4a]]  ;;  %s6704_s26 = sld [smem:[#allocation13 + $0x4]] }
 0x2b8   : > { %v6482_v1 = vadd.f32 %v1802_v41, %v1706_v16  ;;  %v6484_v40 = vadd.f32 %v1807_v10, %v1719_v38  ;;  %v1664_v16 = vadd.f32 %v6447_v59, %v6414_v48 }
 0x2b9   : > { %v1716_v23 = vpop.permute.xlu1 %1715  ;;  %v1728_v54 = vpop.permute.xlu0 %1727 }
 0x2ba   : > { %v1720_v5 = vadd.f32 %v1716_v23, %v1608_v30  ;;  %v1733_v61 = vadd.f32 %v1728_v54, %v1621_v19  ;;  %v1837_v30 = vmul.f32 %v1836_v58, %v6195_v52  ;;  %v1678_v19 = vadd.f32 %v6454_v21, %v6424_v29 }
 0x2bb   : > { %v1838_v54 = vmul.f32 %v1836_v58, %v6208_v20 }
 0x2bc   : > { %v6493_v33 = vadd.f32 %v1808_v50, %v1720_v5  ;;  %v6495_v3 = vadd.f32 %v1813_v49, %v1733_v61 }
 0x2bd   : > { %v1730_v8 = vpop.permute.xlu1 %1729  ;;  %v1742_v57 = vpop.permute.xlu0 %1741 }
 0x2be   : > { %v1734_v15 = vadd.f32 %v1730_v8, %v1622_v31  ;;  %v1747_v9 = vadd.f32 %v1742_v57, %v1635_v25 }
 0x2c0   : > { %v6506_v51 = vadd.f32 %v1814_v2, %v1734_v15  ;;  %v6508_v13 = vadd.f32 %v1819_v7, %v1747_v9 }
 0x2c1   : > { %v1744_v0 = vpop.permute.xlu1 %1743  ;;  %v1756_v14 = vpop.permute.xlu0 %1755 }
 0x2c2   : > { %v1748_v17 = vadd.f32 %v1744_v0, %v1636_v46  ;;  %v1761_v28 = vadd.f32 %v1756_v14, %v1649_v22 }
 0x2c4   : > { %v6517_v37 = vadd.f32 %v1820_v11, %v1748_v17  ;;  %v6519_v55 = vadd.f32 %v1825_v39, %v1761_v28  ;;  %v2094_v11 = vstv %s6555_s27  ;;  %s6712_s27 = sld [smem:[#allocation13 + $0x4c]] }
 0x2c5   : > { %v1758_v18 = vpop.permute.xlu1 %1757  ;;  %v1770_v27 = vpop.permute.xlu0 %1769 }
 0x2c6   : > { %v1762_v24 = vadd.f32 %v1758_v18, %v1650_v35  ;;  %v1775_v45 = vadd.f32 %v1770_v27, %v1663_v42 }
 0x2c8   : > { %v6528_v36 = vadd.f32 %v1826_v12, %v1762_v24  ;;  %v6530_v43 = vadd.f32 %v1831_v6, %v1775_v45  ;;  %v2123_v24 = vstv %s6560_s0  ;;  %s6723_s0 = sld [smem:[#allocation13 + $0x5]] }
 0x2c9   : > { %v1772_v44 = vpop.permute.xlu1 %1771  ;;  %v1784_v38 = vpop.permute.xlu0 %1783 }
 0x2ca   : > { %v1776_v41 = vadd.f32 %v1772_v44, %v1664_v16  ;;  %v1789_v10 = vadd.f32 %v1784_v38, %v1677_v26 }
 0x2cc   : > { %v6536_v23 = vadd.f32 %v1832_v56, %v1776_v41  ;;  %v6538_v48 = vadd.f32 %v1837_v30, %v1789_v10  ;;  %v2152_v41 = vstv %s6567_s11  ;;  %s6732_s11 = sld [smem:[#allocation13 + $0x4d]] }
 0x2cd   : > { %v1786_v32 = vpop.permute.xlu1 %1785  ;;  %v1848_v59 = vpop.permute.xlu0 %1847 }
 0x2ce   : > { %v1790_v63 = vadd.f32 %v1786_v32, %v1678_v19  ;;  %v1853_v2 = vadd.f32 %v1848_v59, %v6462_v62 }
 0x2d0   : > { %v6541_v5 = vadd.f32 %v1838_v54, %v1790_v63 }
 0x2d1   : > { %v1850_v61 = vpop.permute.xlu1 %1849  ;;  %v1862_v50 = vpop.permute.xlu0 %1861 }
 0x2d2   : > { %v1854_v0 = vadd.f32 %v1850_v61, %v6471_v34  ;;  %v1867_v14 = vadd.f32 %v1862_v50, %v6473_v47  ;;  %v2181_v61 = vstv %s6577_s7  ;;  %s4390_s7 = sld [smem:[#allocation13 + $0x7]] }
 0x2d5   : > { %v1864_v49 = vpop.permute.xlu1 %1863  ;;  %v1876_v60 = vpop.permute.xlu0 %1875 }
 0x2d6   : > { %v1868_v42 = vadd.f32 %v1864_v49, %v6482_v1  ;;  %v1881_v18 = vadd.f32 %v1876_v60, %v6484_v40 }
 0x2d9   : > { %v1878_v31 = vpop.permute.xlu1 %1877  ;;  %v1890_v52 = vpop.permute.xlu0 %1889 }
 0x2da   : > { %v1882_v1 = vadd.f32 %v1878_v31, %v6493_v33  ;;  %v1895_v40 = vadd.f32 %v1890_v52, %v6495_v3 }
 0x2dd   : > { %v1892_v25 = vpop.permute.xlu1 %1891  ;;  %v1904_v8 = vpop.permute.xlu0 %1903 }
 0x2de   : > { %v1896_v33 = vadd.f32 %v1892_v25, %v6506_v51  ;;  %v1909_v3 = vadd.f32 %v1904_v8, %v6508_v13 }
 0x2e1   : > { %v6543_v29 = vpop.permute.xlu1 %1905  ;;  %v6545_v21 = vpop.permute.xlu0 %1917 }
 0x2e2   : > { %v1910_v25 = vadd.f32 %v6543_v29, %v6517_v37  ;;  %v2210_v37 = vstv %s6590_s9  ;;  %s4391_s9 = sld [smem:[#allocation13 + $0x4f]] }
 0x2e5   : > { %v6547_v57 = vpop.permute.xlu1 %1919  ;;  %v6549_v15 = vpop.permute.xlu0 %1931 }
 0x2e9   : > { %v6551_v20 = vpop.permute.xlu1 %1933  ;;  %v6553_v9 = vpop.permute.xlu0 %1945 }
 0x2ed   : > { %v6558_v7 = vpop.permute.xlu1 %1947  ;;  %v1960_v46 = vpop.permute.xlu0 %1959 }
 0x2ee   : > { %v1965_v22 = vadd.f32 %v1960_v46, %v1853_v2 }
 0x2f0   : > { %v6564_v17 = vadd.f32 %v2066_v4, %v1965_v22 }
 0x2f1   : > { %v1962_v28 = vpop.permute.xlu1 %1961  ;;  %v1974_v39 = vpop.permute.xlu0 %1973 }
 0x2f2   : > { %v4354_v62 = vmul.f32 -1.442695, %v6564_v17  ;;  %v1966_v53 = vadd.f32 %v1962_v28, %v1854_v0  ;;  %v1979_v35 = vadd.f32 %v1974_v39, %v1867_v14 }
 0x2f4   : > { %4643 = vpow2.f32 %v4354_v62  ;;  %v6572_v34 = vadd.f32 %v2066_v4, %v1966_v53  ;;  %v6574_v27 = vadd.f32 %v2094_v11, %v1979_v35  ;;  %v1923_v4 = vadd.f32 %v6545_v21, %v6519_v55 }
 0x2f5   : > { %v1976_v47 = vpop.permute.xlu1 %1975  ;;  %v1988_v45 = vpop.permute.xlu0 %1987  ;;  %v1937_v21 = vadd.f32 %v6549_v15, %v6530_v43  ;;  %v1938_v43 = vadd.f32 %v6551_v20, %v6536_v23 }
 0x2f6   : > { %v4355_v12 = vmul.f32 -1.442695, %v6572_v34  ;;  %v4357_v6 = vmul.f32 -1.442695, %v6574_v27  ;;  %v1980_v58 = vadd.f32 %v1976_v47, %v1868_v42  ;;  %v1993_v16 = vadd.f32 %v1988_v45, %v1881_v18 }
 0x2f7   : > { %v2239_v47 = vstv %s6599_s8  ;;  %s4392_s8 = sld [smem:[#allocation13 + $0x8]] }
 0x2f8   : > { %4645 = vpow2.f32 %v4355_v12  ;;  %v6583_v26 = vadd.f32 %v2094_v11, %v1980_v58  ;;  %v6585_v44 = vadd.f32 %v2123_v24, %v1993_v16  ;;  %v1924_v11 = vadd.f32 %v6547_v57, %v6528_v36 }
 0x2f9   : > { %4647 = vpow2.f32 %v4357_v6  ;;  %v1990_v38 = vpop.permute.xlu1 %1989  ;;  %v2002_v10 = vpop.permute.xlu0 %2001 }
 0x2fa   : > { %v4358_v56 = vmul.f32 -1.442695, %v6583_v26  ;;  %v4360_v30 = vmul.f32 -1.442695, %v6585_v44  ;;  %v1994_v19 = vadd.f32 %v1990_v38, %v1882_v1  ;;  %v2007_v32 = vadd.f32 %v2002_v10, %v1895_v40 }
 0x2fb   : > { %v1951_v38 = vadd.f32 %v6553_v9, %v6538_v48  ;;  %v2268_v10 = vstv %s6611_s16  ;;  %s4393_s16 = sld [smem:[#allocation13 + $0x50]] }
 0x2fc   : > { %4649 = vpow2.f32 %v4358_v56  ;;  %v6594_v59 = vadd.f32 %v2123_v24, %v1994_v19  ;;  %v6596_v63 = vadd.f32 %v2152_v41, %v2007_v32 }
 0x2fd   : > { %4651 = vpow2.f32 %v4360_v30  ;;  %v2004_v54 = vpop.permute.xlu1 %2003  ;;  %v2016_v50 = vpop.permute.xlu0 %2015 }
 0x2fe   : > { %v4644_v49 = vpop.eup %4643  ;;  %v4361_v60 = vmul.f32 -1.442695, %v6594_v59  ;;  %v4363_v31 = vmul.f32 -1.442695, %v6596_v63  ;;  %v2008_v52 = vadd.f32 %v2004_v54, %v1896_v33  ;;  %v2021_v51 = vadd.f32 %v2016_v50, %v1909_v3 }
 0x2ff   : > { %v2075_v13 = vadd.f32 1.0, %v4644_v49 }
 0x300   : > { %4653 = vpow2.f32 %v4361_v60  ;;  %v6605_v8 = vadd.f32 %v2152_v41, %v2008_v52  ;;  %v6607_v2 = vadd.f32 %v2181_v61, %v2021_v51 }
 0x301   : > { %4655 = vrcp.f32 %v2075_v13  ;;  %v2018_v46 = vpop.permute.xlu1 %2017  ;;  %v2030_v22 = vpop.permute.xlu0 %2029 }
 0x302   : > { %v4646_v0 = vpop.eup %4645  ;;  %4657 = vpow2.f32 %v4363_v31  ;;  %v4364_v14 = vmul.f32 -1.442695, %v6605_v8  ;;  %v2022_v28 = vadd.f32 %v2018_v46, %v1910_v25  ;;  %v4366_v62 = vmul.f32 -1.442695, %v6607_v2 }
 0x303   : > { %v4648_v29 = vpop.eup %4647  ;;  %v2076_v39 = vadd.f32 1.0, %v4646_v0  ;;  %v2035_v55 = vadd.f32 %v2030_v22, %v1923_v4 }
 0x304   : > { %v2103_v53 = vadd.f32 1.0, %v4648_v29  ;;  %4659 = vpow2.f32 %v4364_v14  ;;  %v6620_v35 = vadd.f32 %v2181_v61, %v2022_v28  ;;  %v1952_v61 = vadd.f32 %v6558_v7, %v6541_v5 }
 0x305   : > { %4661 = vrcp.f32 %v2076_v39  ;;  %v6622_v42 = vadd.f32 %v2210_v37, %v2035_v55  ;;  %v2032_v18 = vpop.permute.xlu1 %2031  ;;  %v2044_v24 = vpop.permute.xlu0 %2043 }
 0x306   : > { %v4650_v45 = vpop.eup %4649  ;;  %4663 = vrcp.f32 %v2103_v53  ;;  %v4367_v36 = vmul.f32 -1.442695, %v6620_v35  ;;  %v2036_v57 = vadd.f32 %v2032_v18, %v1924_v11  ;;  %v2049_v12 = vadd.f32 %v2044_v24, %v1937_v21 }
 0x307   : > { %v4652_v6 = vpop.eup %4651  ;;  %v2104_v15 = vadd.f32 1.0, %v4650_v45  ;;  %4665 = vpow2.f32 %v4366_v62  ;;  %v4369_v58 = vmul.f32 -1.442695, %v6622_v42 }
 0x308   : > { %v2132_v16 = vadd.f32 1.0, %v4652_v6  ;;  %4667 = vpow2.f32 %v4367_v36  ;;  %v6629_v1 = vadd.f32 %v2210_v37, %v2036_v57  ;;  %v6631_v40 = vadd.f32 %v2239_v47, %v2049_v12 }
 0x309   : > { %4669 = vrcp.f32 %v2104_v15  ;;  %v2046_v41 = vpop.permute.xlu1 %2045  ;;  %v2058_v56 = vpop.permute.xlu0 %2057 }
 0x30a   : > { %v4654_v30 = vpop.eup %4653  ;;  %4671 = vrcp.f32 %v2132_v16  ;;  %v4370_v23 = vmul.f32 -1.442695, %v6629_v1  ;;  %v4372_v20 = vmul.f32 -1.442695, %v6631_v40  ;;  %v2050_v19 = vadd.f32 %v2046_v41, %v1938_v43 }
 0x30b   : > { %v4656_v32 = vpop.eup %4655  ;;  %v2133_v33 = vadd.f32 1.0, %v4654_v30  ;;  %4673 = vpow2.f32 %v4369_v58  ;;  %v2063_v3 = vadd.f32 %v2058_v56, %v1951_v38 }
 0x30c   : > { %v4658_v54 = vpop.eup %4657  ;;  %v2081_v48 = vmul.f32 %v4656_v32, %v6564_v17  ;;  %4675 = vpow2.f32 %v4370_v23  ;;  %v6641_v9 = vadd.f32 %v2239_v47, %v2050_v19 }
 0x30d   : > { %4677 = vrcp.f32 %v2133_v33  ;;  %v2161_v50 = vadd.f32 1.0, %v4658_v54  ;;  %v6643_v49 = vadd.f32 %v2268_v10, %v2063_v3  ;;  %v2060_v60 = vpop.permute.xlu1 %2059  ;;  %v2311_v3 = vstv %s4378_s29  ;;  %s4397_s29 = sld [smem:[#allocation13 + $0x52]] }
 0x30e   : > { %v4660_v31 = vpop.eup %4659  ;;  %4679 = vpow2.f32 %v4372_v20  ;;  %v4373_v52 = vmul.f32 -1.442695, %v6641_v9  ;;  %v2064_v51 = vadd.f32 %v2060_v60, %v1952_v61  ;;  %2085 = vrot.lane.b32.xlu0 %v2081_v48, %s7728_s19 }
 0x30f   : > { %v4662_v13 = vpop.eup %4661  ;;  %4681 = vrcp.f32 %v2161_v50  ;;  %v2162_v5 = vadd.f32 1.0, %v4660_v31  ;;  %v4375_v7 = vmul.f32 -1.442695, %v6643_v49  ;;  %v2325_v50 = vstv %s6682_s30  ;;  %s4398_s30 = sld [smem:[#allocation13 + $0xb]] }
 0x310   : > { %v4664_v17 = vpop.eup %4663  ;;  %v2082_v25 = vmul.f32 %v4662_v13, %v6572_v34  ;;  %4683 = vpow2.f32 %v4373_v52  ;;  %v6649_v4 = vadd.f32 %v2268_v10, %v2064_v51  ;;  %v2339_v13 = vstv %s6686_s20  ;;  %s4399_s20 = sld [smem:[#allocation13 + $0x53]] }
 0x311   : > { %v4666_v46 = vpop.eup %4665  ;;  %v2109_v22 = vmul.f32 %v4664_v17, %v6574_v27  ;;  %4685 = vrcp.f32 %v2162_v5 }
 0x312   : > { %v4668_v0 = vpop.eup %4667  ;;  %v2190_v14 = vadd.f32 1.0, %v4666_v46  ;;  %4687 = vpow2.f32 %v4375_v7  ;;  %v4376_v28 = vmul.f32 -1.442695, %v6649_v4  ;;  %2087 = vrot.lane.b32.xlu1 %v2082_v25, %s7728_s19 }
 0x313   : > { %v4670_v37 = vpop.eup %4669  ;;  %v2191_v29 = vadd.f32 1.0, %v4668_v0  ;;  %2113 = vrot.lane.b32.xlu0 %v2109_v22, %s7728_s19 }
 0x314   : > { %v4672_v11 = vpop.eup %4671  ;;  %v2110_v34 = vmul.f32 %v4670_v37, %v6583_v26  ;;  %4689 = vrcp.f32 %v2190_v14  ;;  %v2381_v37 = vstv %s6704_s26  ;;  %s4403_s26 = sld [smem:[#allocation13 + $0x55]] }
 0x315   : > { %v4674_v39 = vpop.eup %4673  ;;  %v2138_v62 = vmul.f32 %v4672_v11, %v6585_v44  ;;  %4691 = vrcp.f32 %v2191_v29 }
 0x316   : > { %v4676_v27 = vpop.eup %4675  ;;  %v2219_v55 = vadd.f32 1.0, %v4674_v39  ;;  %4693 = vpow2.f32 %v4376_v28  ;;  %2115 = vrot.lane.b32.xlu1 %v2110_v34, %s7728_s19 }
 0x317   : > { %v4678_v21 = vpop.eup %4677  ;;  %v2220_v53 = vadd.f32 1.0, %v4676_v27  ;;  %2142 = vrot.lane.b32.xlu0 %v2138_v62, %s7728_s19  ;;  %v2395_v62 = vstv %s6712_s27  ;;  %s4404_s27 = sld [smem:[#allocation13 + $0xe]] }
 0x318   : > { %v4680_v18 = vpop.eup %4679  ;;  %v2139_v47 = vmul.f32 %v4678_v21, %v6594_v59  ;;  %4695 = vrcp.f32 %v2219_v55 }
 0x319   : > { %v4682_v24 = vpop.eup %4681  ;;  %4697 = vrcp.f32 %v2220_v53  ;;  %v2248_v26 = vadd.f32 1.0, %v4680_v18 }
 0x31a   : > { %v4684_v45 = vpop.eup %4683  ;;  %v2167_v44 = vmul.f32 %v4682_v24, %v6596_v63  ;;  %2144 = vrot.lane.b32.xlu1 %v2139_v47, %s7728_s19  ;;  %v2409_v47 = vstv %s6723_s0  ;;  %s4405_s0 = sld [smem:[#allocation13 + $0x56]] }
 0x31b   : > { %v4686_v36 = vpop.eup %4685  ;;  %4699 = vrcp.f32 %v2248_v26  ;;  %v2249_v57 = vadd.f32 1.0, %v4684_v45 }
 0x31c   : > { %v4688_v12 = vpop.eup %4687  ;;  %v2168_v6 = vmul.f32 %v4686_v36, %v6605_v8  ;;  %2171 = vrot.lane.b32.xlu0 %v2167_v44, %s7728_s19  ;;  %v2423_v44 = vstv %s6732_s11  ;;  %s4408_s11 = sld [smem:[#allocation13 + $0x10]] }
 0x31d   : > { %4701 = vrcp.f32 %v2249_v57  ;;  %v2277_v43 = vadd.f32 1.0, %v4688_v12 }
 0x31e   : > { %v4690_v59 = vpop.eup %4689  ;;  %2173 = vrot.lane.b32.xlu1 %v2168_v6, %s7728_s19  ;;  %v2451_v6 = vstv %s4390_s7  ;;  %s4409_s7 = sld [smem:[#allocation13 + $0x58]] }
 0x31f   : > { %v4692_v15 = vpop.eup %4691  ;;  %v2196_v58 = vmul.f32 %v4690_v59, %v6607_v2  ;;  %4703 = vrcp.f32 %v2277_v43 }
 0x320   : > { %v4694_v63 = vpop.eup %4693  ;;  %v2197_v16 = vmul.f32 %v4692_v15, %v6620_v35  ;;  %v2465_v15 = vstv %s4391_s9  ;;  %s4410_s9 = sld [smem:[#allocation13 + $0x11]] }
 0x321   : > { %v2278_v38 = vadd.f32 1.0, %v4694_v63  ;;  %2200 = vrot.lane.b32.xlu0 %v2196_v58, %s7728_s19 }
 0x322   : > { %v4696_v41 = vpop.eup %4695  ;;  %2202 = vrot.lane.b32.xlu1 %v2197_v16, %s7728_s19 }
 0x323   : > { %v4698_v8 = vpop.eup %4697  ;;  %v2225_v10 = vmul.f32 %v4696_v41, %v6622_v42  ;;  %4705 = vrcp.f32 %v2278_v38  ;;  %v2479_v38 = vstv %s4392_s8  ;;  %s4411_s8 = sld [smem:[#allocation13 + $0x59]] }
 0x324   : > { %v2226_v56 = vmul.f32 %v4698_v8, %v6629_v1 }
 0x325   : > { %v4700_v30 = vpop.eup %4699  ;;  %2229 = vrot.lane.b32.xlu0 %v2225_v10, %s7728_s19  ;;  %v2493_v10 = vstv %s4393_s16  ;;  %s4414_s16 = sld [smem:[#allocation13 + $0x13]] }
 0x326   : > { %v2254_v2 = vmul.f32 %v4700_v30, %v6631_v40  ;;  %2231 = vrot.lane.b32.xlu1 %v2226_v56, %s7728_s19 }
 0x327   : > { %v4702_v35 = vpop.eup %4701 }
 0x328   : > { %v2255_v23 = vmul.f32 %v4702_v35, %v6641_v9 }
 0x329   : > { %v4704_v20 = vpop.eup %4703  ;;  %2258 = vrot.lane.b32.xlu0 %v2254_v2, %s7728_s19 }
 0x32a   : > { %v2283_v19 = vmul.f32 %v4704_v20, %v6643_v49  ;;  %2260 = vrot.lane.b32.xlu1 %v2255_v23, %s7728_s19 }
 0x32d   : > { %v4706_v42 = vpop.eup %4705  ;;  %2287 = vrot.lane.b32.xlu0 %v2283_v19, %s7728_s19  ;;  %v2535_v19 = vstv %s4397_s29  ;;  %s4416_s29 = sld [smem:[#allocation13 + $0x14]] }
 0x32e   : > { %v2284_v1 = vmul.f32 %v4706_v42, %v6649_v4  ;;  %v2353_v4 = vstv %s6694_s13  ;;  %s4402_s13 = sld [smem:[#allocation13 + $0xd]] }
 0x330   : > { %2289 = vrot.lane.b32.xlu1 %v2284_v1, %s7728_s19  ;;  %s4396_s19 = sld [smem:[#allocation13 + $0xa]] }
 0x336   : > { %v2521_v35 = vstv %s4396_s19  ;;  %s4415_s19 = sld [smem:[#allocation13 + $0x5b]] }
 0x380   : > { %v2086_v40 = vpop.permute.xlu0 %2085 }
 0x381   : > { %2091 = vst.msk [vmem:[#allocation3 + $0x1] sm:$0xff] %vm380_vm2, %v2086_v40 }
 0x384   : > { %v2088_v32 = vpop.permute.xlu1 %2087 }
 0x385   : > { %2092 = vst.msk [vmem:[#allocation3 + $0x9] sm:$0xff] %vm380_vm2, %v2088_v32  ;;  %v2114_v33 = vpop.permute.xlu0 %2113  ;;  %v2549_v32 = vstv %s4398_s30  ;;  %s4417_s30 = sld [smem:[#allocation13 + $0x5c]] }
 0x386   : > { %2120 = vst.msk [vmem:[#allocation3 + $0x19] sm:$0xff] %vm380_vm2, %v2114_v33 }
 0x388   : > { %v6688_v54 = vld [vmem:[#allocation3] sm:$0xff]  ;;  %v2116_v61 = vpop.permute.xlu1 %2115 }
 0x389   : > { %2121 = vst.msk [vmem:[#allocation3 + $0x21] sm:$0xff] %vm380_vm2, %v2116_v61  ;;  %v2143_v48 = vpop.permute.xlu0 %2142  ;;  %v2312_v9 = vmul.f32 %v2311_v3, %v6688_v54  ;;  %v2326_v52 = vmul.f32 %v2325_v50, %v6688_v54  ;;  %v2340_v7 = vmul.f32 %v2339_v13, %v6688_v54  ;;  %v2354_v22 = vmul.f32 %v2353_v4, %v6688_v54  ;;  %v6719_v0 = vld [vmem:[#allocation3 + $0x1] sm:$0xff] }
 0x38a   : > { %2149 = vst.msk [vmem:[#allocation3 + $0x31] sm:$0xff] %vm380_vm2, %v2143_v48  ;;  %v2382_v11 = vmul.f32 %v2381_v37, %v6719_v0  ;;  %v2396_v21 = vmul.f32 %v2395_v62, %v6719_v0  ;;  %v2410_v26 = vmul.f32 %v2409_v47, %v6719_v0  ;;  %v2424_v36 = vmul.f32 %v2423_v44, %v6719_v0 }
 0x38b   : > { %2316 = vrot.lane.b32.xlu0 %v2312_v9, %s4937_s15  ;;  %v2563_v61 = vstv %s4399_s20  ;;  %s4420_s20 = sld [smem:[#allocation13 + $0x16]] }
 0x38c   : > { %v6696_v49 = vld [vmem:[#allocation3 + $0x8] sm:$0xff]  ;;  %v2145_v60 = vpop.permute.xlu1 %2144 }
 0x38d   : > { %2150 = vst.msk [vmem:[#allocation3 + $0x39] sm:$0xff] %vm380_vm2, %v2145_v60  ;;  %v2313_v51 = vmul.f32 %v2311_v3, %v6696_v49  ;;  %v2327_v25 = vmul.f32 %v2325_v50, %v6696_v49  ;;  %v2341_v28 = vmul.f32 %v2339_v13, %v6696_v49  ;;  %v2355_v39 = vmul.f32 %v2353_v4, %v6696_v49  ;;  %v6734_v27 = vld [vmem:[#allocation3 + $0x9] sm:$0xff]  ;;  %v6774_v2 = vld [vmem:[#allocation3 + $0x18] sm:$0xff] }
 0x38e   : > { %v2172_v31 = vpop.permute.xlu0 %2171  ;;  %v2383_v18 = vmul.f32 %v2381_v37, %v6734_v27  ;;  %v2397_v45 = vmul.f32 %v2395_v62, %v6734_v27  ;;  %v6753_v57 = vld [vmem:[#allocation3 + $0x2] sm:$0xff]  ;;  %v2411_v12 = vmul.f32 %v2409_v47, %v6734_v27  ;;  %v2425_v59 = vmul.f32 %v2423_v44, %v6734_v27  ;;  %v6760_v58 = vld [vmem:[#allocation3 + $0xa] sm:$0xff]  ;;  %v6794_v50 = vld [vmem:[#allocation3 + $0x19] sm:$0xff] }
 0x38f   : > { %2178 = vst.msk [vmem:[#allocation3 + $0x49] sm:$0xff] %vm380_vm2, %v2172_v31  ;;  %2330 = vrot.lane.b32.xlu0 %v2326_v52, %s4937_s15  ;;  %2318 = vrot.lane.b32.xlu1 %v2313_v51, %s4937_s15  ;;  %v2452_v43 = vmul.f32 %v2451_v6, %v6753_v57  ;;  %v2466_v63 = vmul.f32 %v2465_v15, %v6753_v57  ;;  %v2591_v60 = vstv %s4402_s13  ;;  %v2605_v51 = vstv %s4403_s26  ;;  %s6850_s13 = sld [smem:[#allocation13 + $0x5e]]  ;;  %s6858_s26 = sld [smem:[#allocation13 + $0x17]] }
 0x390   : > { %v2174_v5 = vpop.permute.xlu1 %2173  ;;  %v2453_v16 = vmul.f32 %v2451_v6, %v6760_v58  ;;  %v2480_v41 = vmul.f32 %v2479_v38, %v6753_v57  ;;  %v2467_v8 = vmul.f32 %v2465_v15, %v6760_v58  ;;  %v2494_v56 = vmul.f32 %v2493_v10, %v6753_v57  ;;  %v6781_v42 = vld [vmem:[#allocation3 + $0x20] sm:$0xff] }
 0x391   : > { %2179 = vst.msk [vmem:[#allocation3 + $0x51] sm:$0xff] %vm380_vm2, %v2174_v5  ;;  %v2481_v30 = vmul.f32 %v2479_v38, %v6760_v58  ;;  %v2522_v23 = vmul.f32 %v2521_v35, %v6774_v2  ;;  %v2495_v20 = vmul.f32 %v2493_v10, %v6760_v58  ;;  %v2536_v1 = vmul.f32 %v2535_v19, %v6774_v2  ;;  %v6801_v13 = vld [vmem:[#allocation3 + $0x21] sm:$0xff] }
 0x392   : > { %v2523_v40 = vmul.f32 %v2521_v35, %v6781_v42  ;;  %v2550_v33 = vmul.f32 %v2549_v32, %v6774_v2  ;;  %v2537_v3 = vmul.f32 %v2535_v19, %v6781_v42  ;;  %v2564_v48 = vmul.f32 %v2563_v61, %v6774_v2 }
 0x393   : > { %v2201_v17 = vpop.permute.xlu0 %2200  ;;  %2344 = vrot.lane.b32.xlu0 %v2340_v7, %s7727_s18  ;;  %2332 = vrot.lane.b32.xlu1 %v2327_v25, %s4937_s15  ;;  %v2551_v9 = vmul.f32 %v2549_v32, %v6781_v42  ;;  %v2592_v31 = vmul.f32 %v2591_v60, %v6794_v50  ;;  %v2565_v52 = vmul.f32 %v2563_v61, %v6781_v42  ;;  %v2661_v37 = vstv %s4408_s11  ;;  %s6869_s11 = sld [smem:[#allocation13 + $0x48]] }
 0x394   : > { %2207 = vst.msk [vmem:[#allocation3 + $0x61] sm:$0xff] %vm380_vm2, %v2201_v17  ;;  %v2203_v46 = vpop.permute.xlu1 %2202  ;;  %v2606_v5 = vmul.f32 %v2605_v51, %v6794_v50  ;;  %v2593_v7 = vmul.f32 %v2591_v60, %v6801_v13  ;;  %v2619_v17 = vstv %s4404_s27  ;;  %v2607_v4 = vmul.f32 %v2605_v51, %v6801_v13  ;;  %s6860_s27 = sld [smem:[#allocation13]]  ;;  %v6874_v19 = vld [vmem:[#allocation3 + $0x39] sm:$0xff] }
 0x395   : > { %2208 = vst.msk [vmem:[#allocation3 + $0x69] sm:$0xff] %vm380_vm2, %v2203_v46  ;;  %v2620_v25 = vmul.f32 %v2619_v17, %v6794_v50  ;;  %v2633_v46 = vstv %s4405_s0  ;;  %v2703_v47 = vstv %s4411_s8  ;;  %v2731_v44 = vstv %s4414_s16  ;;  %s6867_s0 = sld [smem:[#allocation13 + $0x5f]]  ;;  %s6883_s8 = sld [smem:[#allocation13 + $0x4b]] }
 0x396   : > { %v2745_v6 = vstv %s4415_s19  ;;  %s6891_s16 = sld [smem:[#allocation13 + $0x61]]  ;;  %s6904_s19 = sld [smem:[#allocation13 + $0x1a]] }
 0x397   : > { %v2230_v14 = vpop.permute.xlu0 %2229  ;;  %2358 = vrot.lane.b32.xlu0 %v2354_v22, %s7727_s18  ;;  %2346 = vrot.lane.b32.xlu1 %v2341_v28, %s7727_s18  ;;  %v2634_v22 = vmul.f32 %v2633_v46, %v6794_v50  ;;  %v6814_v28 = vld [vmem:[#allocation3 + $0x1a] sm:$0xff] }
 0x398   : > { %2236 = vst.msk [vmem:[#allocation3 + $0x79] sm:$0xff] %vm380_vm2, %v2230_v14  ;;  %v2232_v29 = vpop.permute.xlu1 %2231  ;;  %v2621_v14 = vmul.f32 %v2619_v17, %v6801_v13 }
 0x399   : > { %2237 = vst.msk [vmem:[#allocation3 + $0x81] sm:$0xff] %vm380_vm2, %v2232_v29  ;;  %v2662_v29 = vmul.f32 %v2661_v37, %v6814_v28  ;;  %v2305_v51 = vstv %s6869_s11  ;;  %s6963_s11 = sld [smem:[#allocation13 + $0x9]] }
 0x39b   : > { %v2259_v34 = vpop.permute.xlu0 %2258  ;;  %2386 = vrot.lane.b32.xlu0 %v2382_v11, %s4937_s15  ;;  %2360 = vrot.lane.b32.xlu1 %v2355_v39, %s7727_s18  ;;  %v2635_v11 = vmul.f32 %v2633_v46, %v6801_v13  ;;  %v6821_v39 = vld [vmem:[#allocation3 + $0x22] sm:$0xff]  ;;  %v2306_v46 = vmul.f32 %v2305_v51, %v6688_v54 }
 0x39c   : > { %2265 = vst.msk [vmem:[#allocation3 + $0x91] sm:$0xff] %vm380_vm2, %v2259_v34  ;;  %v2261_v55 = vpop.permute.xlu1 %2260  ;;  %v2675_v34 = vstv %s4409_s7  ;;  %s6871_s7 = sld [smem:[#allocation13 + $0x3]] }
 0x39d   : > { %2266 = vst.msk [vmem:[#allocation3 + $0x99] sm:$0xff] %vm380_vm2, %v2261_v55  ;;  %v2676_v62 = vmul.f32 %v2675_v34, %v6814_v28  ;;  %v2663_v55 = vmul.f32 %v2661_v37, %v6821_v39 }
 0x39f   : > { %v2288_v53 = vpop.permute.xlu0 %2287  ;;  %2400 = vrot.lane.b32.xlu0 %v2396_v21, %s4937_s15  ;;  %2388 = vrot.lane.b32.xlu1 %v2383_v18, %s4937_s15  ;;  %v2689_v21 = vstv %s4410_s9  ;;  %v2677_v18 = vmul.f32 %v2675_v34, %v6821_v39  ;;  %s6878_s9 = sld [smem:[#allocation13 + $0x19]]  ;;  %v2375_v34 = vstv %s6883_s8  ;;  %s6979_s8 = sld [smem:[#allocation13 + $0x67]] }
 0x3a0   : > { %2294 = vst.msk [vmem:[#allocation3 + $0xa9] sm:$0xff] %vm380_vm2, %v2288_v53  ;;  %v2690_v53 = vmul.f32 %v2689_v21, %v6814_v28 }
 0x3a2   : > { %v2290_v24 = vpop.permute.xlu1 %2289 }
 0x3a3   : > { %2295 = vst.msk [vmem:[#allocation3 + $0xb1] sm:$0xff] %vm380_vm2, %v2290_v24  ;;  %2414 = vrot.lane.b32.xlu0 %v2410_v26, %s7727_s18  ;;  %2402 = vrot.lane.b32.xlu1 %v2397_v45, %s4937_s15  ;;  %v2704_v24 = vmul.f32 %v2703_v47, %v6814_v28  ;;  %v2691_v26 = vmul.f32 %v2689_v21, %v6821_v39  ;;  %v6834_v45 = vld [vmem:[#allocation3 + $0x30] sm:$0xff] }
 0x3a7   : > { %2428 = vrot.lane.b32.xlu0 %v2424_v36, %s7727_s18  ;;  %2416 = vrot.lane.b32.xlu1 %v2411_v12, %s7727_s18  ;;  %v2732_v36 = vmul.f32 %v2731_v44, %v6834_v45  ;;  %v2705_v12 = vmul.f32 %v2703_v47, %v6821_v39  ;;  %v2376_v47 = vmul.f32 %v2375_v34, %v6719_v0 }
 0x3ab   : > { %2456 = vrot.lane.b32.xlu0 %v2452_v43, %s4937_s15  ;;  %2430 = vrot.lane.b32.xlu1 %v2425_v59, %s7727_s18  ;;  %v6841_v43 = vld [vmem:[#allocation3 + $0x38] sm:$0xff]  ;;  %v2746_v59 = vmul.f32 %v2745_v6, %v6834_v45 }
 0x3ac   : > { %v2733_v15 = vmul.f32 %v2731_v44, %v6841_v43  ;;  %v2747_v38 = vmul.f32 %v2745_v6, %v6841_v43 }
 0x3af   : > { %2470 = vrot.lane.b32.xlu0 %v2466_v63, %s4937_s15  ;;  %2458 = vrot.lane.b32.xlu1 %v2453_v16, %s4937_s15  ;;  %v2759_v63 = vstv %s4416_s29  ;;  %s6914_s29 = sld [smem:[#allocation13 + $0x62]] }
 0x3b0   : > { %v2760_v16 = vmul.f32 %v2759_v63, %v6834_v45  ;;  %v2761_v10 = vmul.f32 %v2759_v63, %v6841_v43 }
 0x3b3   : > { %2484 = vrot.lane.b32.xlu0 %v2480_v41, %s7727_s18  ;;  %2472 = vrot.lane.b32.xlu1 %v2467_v8, %s4937_s15  ;;  %v2773_v41 = vstv %s4417_s30  ;;  %s6916_s30 = sld [smem:[#allocation13 + $0x6]] }
 0x3b4   : > { %v2774_v8 = vmul.f32 %v2773_v41, %v6834_v45 }
 0x3b7   : > { %2498 = vrot.lane.b32.xlu0 %v2494_v56, %s7727_s18  ;;  %2486 = vrot.lane.b32.xlu1 %v2481_v30, %s7727_s18  ;;  %v6856_v56 = vld [vmem:[#allocation3 + $0x31] sm:$0xff]  ;;  %v2801_v30 = vstv %s4420_s20  ;;  %s6927_s20 = sld [smem:[#allocation13 + $0x1c]] }
 0x3b8   : > { %v2802_v35 = vmul.f32 %v2801_v30, %v6856_v56  ;;  %v2803_v32 = vmul.f32 %v2801_v30, %v6874_v19  ;;  %v2377_v30 = vmul.f32 %v2375_v34, %v6734_v27 }
 0x3bb   : > { %2526 = vrot.lane.b32.xlu0 %v2522_v23, %s4937_s15  ;;  %2500 = vrot.lane.b32.xlu1 %v2495_v20, %s7727_s18  ;;  %v2775_v23 = vmul.f32 %v2773_v41, %v6841_v43  ;;  %v2815_v20 = vstv %s6850_s13  ;;  %s6929_s13 = sld [smem:[#allocation13 + $0x4e]] }
 0x3bf   : > { %2540 = vrot.lane.b32.xlu0 %v2536_v1, %s4937_s15  ;;  %2528 = vrot.lane.b32.xlu1 %v2523_v40, %s4937_s15  ;;  %v2816_v40 = vmul.f32 %v2815_v20, %v6856_v56 }
 0x3c3   : > { %2554 = vrot.lane.b32.xlu0 %v2550_v33, %s7727_s18  ;;  %2542 = vrot.lane.b32.xlu1 %v2537_v3, %s4937_s15  ;;  %v2829_v33 = vstv %s6858_s26  ;;  %v2299_v3 = vstv %s6860_s27  ;;  %s6937_s26 = sld [smem:[#allocation13 + $0x64]]  ;;  %s6948_s27 = sld [smem:[#allocation13 + $0x1d]] }
 0x3c7   : > { %2568 = vrot.lane.b32.xlu0 %v2564_v48, %s7727_s18  ;;  %2556 = vrot.lane.b32.xlu1 %v2551_v9, %s7727_s18  ;;  %v2830_v48 = vmul.f32 %v2829_v33, %v6856_v56  ;;  %v2300_v9 = vmul.f32 %v2299_v3, %v6688_v54 }
 0x3cb   : > { %2596 = vrot.lane.b32.xlu0 %v2592_v31, %s4937_s15  ;;  %2570 = vrot.lane.b32.xlu1 %v2565_v52, %s7727_s18  ;;  %v2817_v31 = vmul.f32 %v2815_v20, %v6874_v19  ;;  %v2843_v52 = vstv %s6867_s0  ;;  %s6957_s0 = sld [smem:[#allocation13 + $0x65]] }
 0x3cc   : > { %v2845_v44 = vmul.f32 %v2843_v52, %v6874_v19 }
 0x3cf   : > { %2610 = vrot.lane.b32.xlu0 %v2606_v5, %s4937_s15  ;;  %2598 = vrot.lane.b32.xlu1 %v2593_v7, %s4937_s15  ;;  %v2369_v5 = vstv %s6871_s7  ;;  %s6969_s7 = sld [smem:[#allocation13 + $0x1f]] }
 0x3d0   : > { %v2371_v6 = vmul.f32 %v2369_v5, %v6734_v27 }
 0x3d3   : > { %2624 = vrot.lane.b32.xlu0 %v2620_v25, %s7727_s18  ;;  %2612 = vrot.lane.b32.xlu1 %v2607_v4, %s4937_s15  ;;  %v2844_v25 = vmul.f32 %v2843_v52, %v6856_v56  ;;  %v2871_v4 = vstv %s6878_s9  ;;  %s6973_s9 = sld [smem:[#allocation13 + $0x51]] }
 0x3d7   : > { %2638 = vrot.lane.b32.xlu0 %v2634_v22, %s7727_s18  ;;  %2626 = vrot.lane.b32.xlu1 %v2621_v14, %s7727_s18  ;;  %v2370_v22 = vmul.f32 %v2369_v5, %v6719_v0  ;;  %v2941_v5 = vstv %s6927_s20  ;;  %s7015_s20 = sld [smem:[#allocation13 + $0x54]] }
 0x3db   : > { %2666 = vrot.lane.b32.xlu0 %v2662_v29, %s4937_s15  ;;  %2640 = vrot.lane.b32.xlu1 %v2635_v11, %s7727_s18  ;;  %v2831_v29 = vmul.f32 %v2829_v33, %v6874_v19  ;;  %v6902_v11 = vld [vmem:[#allocation3 + $0x32] sm:$0xff]  ;;  %v2913_v33 = vstv %s6914_s29  ;;  %s7005_s29 = sld [smem:[#allocation13 + $0xc]] }
 0x3df   : > { %2680 = vrot.lane.b32.xlu0 %v2676_v62, %s4937_s15  ;;  %2668 = vrot.lane.b32.xlu1 %v2663_v55, %s4937_s15  ;;  %v2301_v62 = vmul.f32 %v2299_v3, %v6696_v49  ;;  %v2439_v3 = vstv %s6916_s30  ;;  %s7011_s30 = sld [smem:[#allocation13 + $0x22]] }
 0x3e3   : > { %2694 = vrot.lane.b32.xlu0 %v2690_v53, %s7727_s18  ;;  %2682 = vrot.lane.b32.xlu1 %v2677_v18, %s4937_s15  ;;  %v2872_v18 = vmul.f32 %v2871_v4, %v6902_v11 }
 0x3e7   : > { %2708 = vrot.lane.b32.xlu0 %v2704_v24, %s7727_s18  ;;  %2696 = vrot.lane.b32.xlu1 %v2691_v26, %s7727_s18 }
 0x3eb   : > { %2736 = vrot.lane.b32.xlu0 %v2732_v36, %s4937_s15  ;;  %2710 = vrot.lane.b32.xlu1 %v2705_v12, %s7727_s18  ;;  %v2885_v36 = vstv %s6891_s16  ;;  %v2307_v12 = vmul.f32 %v2305_v51, %v6696_v49  ;;  %v6945_v51 = vld [vmem:[#allocation3 + $0x48] sm:$0xff]  ;;  %s6990_s16 = sld [smem:[#allocation13 + $0x20]] }
 0x3ec   : > { %v2886_v41 = vmul.f32 %v2885_v36, %v6902_v11 }
 0x3ef   : > { %2750 = vrot.lane.b32.xlu0 %v2746_v59, %s4937_s15  ;;  %2738 = vrot.lane.b32.xlu1 %v2733_v15, %s4937_s15  ;;  %v6921_v15 = vld [vmem:[#allocation3 + $0x3a] sm:$0xff] }
 0x3f0   : > { %v2873_v49 = vmul.f32 %v2871_v4, %v6921_v15  ;;  %v2915_v34 = vmul.f32 %v2913_v33, %v6921_v15 }
 0x3f3   : > { %2764 = vrot.lane.b32.xlu0 %v2760_v16, %s7727_s18  ;;  %2752 = vrot.lane.b32.xlu1 %v2747_v38, %s4937_s15 }
 0x3f7   : > { %2778 = vrot.lane.b32.xlu0 %v2774_v8, %s7727_s18  ;;  %2766 = vrot.lane.b32.xlu1 %v2761_v10, %s7727_s18  ;;  %v2899_v10 = vstv %s6904_s19  ;;  %s6999_s19 = sld [smem:[#allocation13 + $0x68]] }
 0x3f8   : > { %v2901_v52 = vmul.f32 %v2899_v10, %v6921_v15 }
 0x3fb   : > { %2806 = vrot.lane.b32.xlu0 %v2802_v35, %s4937_s15  ;;  %2780 = vrot.lane.b32.xlu1 %v2775_v23, %s7727_s18 }
 0x3fd   : > { %v2317_v1 = vpop.permute.xlu0 %2316 }
 0x3fe   : > { %v2322_v7 = vadd.f32 %v2317_v1, %v2300_v9  ;;  %v2900_v1 = vmul.f32 %v2899_v10, %v6902_v11  ;;  %v2440_v9 = vmul.f32 %v2439_v3, %v6753_v57 }
 0x3ff   : > { %2820 = vrot.lane.b32.xlu0 %v2816_v40, %s4937_s15  ;;  %2808 = vrot.lane.b32.xlu1 %v2803_v32, %s4937_s15  ;;  %v2887_v32 = vmul.f32 %v2885_v36, %v6921_v15  ;;  %v2969_v36 = vstv %s6948_s27  ;;  %s7041_s27 = sld [smem:[#allocation13 + $0x6b]] }
 0x401   : > { %v2331_v61 = vpop.permute.xlu0 %2330  ;;  %v2319_v60 = vpop.permute.xlu1 %2318 }
 0x402   : > { %v2336_v55 = vadd.f32 %v2331_v61, %v2306_v46  ;;  %v2323_v54 = vadd.f32 %v2319_v60, %v2301_v62  ;;  %v2955_v62 = vstv %s6937_s26  ;;  %s7032_s26 = sld [smem:[#allocation13 + $0x23]] }
 0x403   : > { %2834 = vrot.lane.b32.xlu0 %v2830_v48, %s7727_s18  ;;  %2822 = vrot.lane.b32.xlu1 %v2817_v31, %s4937_s15  ;;  %v2914_v48 = vmul.f32 %v2913_v33, %v6902_v11 }
 0x405   : > { %v2345_v17 = vpop.permute.xlu0 %2344  ;;  %v2333_v14 = vpop.permute.xlu1 %2332 }
 0x406   : > { %v2350_v37 = vadd.f32 %v2345_v17, %v2322_v7  ;;  %v2337_v63 = vadd.f32 %v2333_v14, %v2307_v12  ;;  %v2445_v7 = vstv %s6929_s13  ;;  %s7021_s13 = sld [smem:[#allocation13 + $0x6a]] }
 0x407   : > { %2848 = vrot.lane.b32.xlu0 %v2844_v25, %s7727_s18  ;;  %2836 = vrot.lane.b32.xlu1 %v2831_v29, %s7727_s18  ;;  %v2446_v14 = vmul.f32 %v2445_v7, %v6753_v57  ;;  %v2447_v12 = vmul.f32 %v2445_v7, %v6760_v58 }
 0x408   : > { %v2372_v21 = vadd.f32 %v2370_v22, %v2350_v37  ;;  %v2942_v22 = vmul.f32 %v2941_v5, %v6945_v51 }
 0x409   : > { %v2359_v53 = vpop.permute.xlu0 %2358  ;;  %v2347_v24 = vpop.permute.xlu1 %2346 }
 0x40a   : > { %v2364_v26 = vadd.f32 %v2359_v53, %v2336_v55  ;;  %v2351_v59 = vadd.f32 %v2347_v24, %v2323_v54  ;;  %v2441_v55 = vmul.f32 %v2439_v3, %v6760_v58  ;;  %v6961_v54 = vld [vmem:[#allocation3 + $0x50] sm:$0xff]  ;;  %v2956_v24 = vmul.f32 %v2955_v62, %v6945_v51 }
 0x40b   : > { %2876 = vrot.lane.b32.xlu0 %v2872_v18, %s4937_s15  ;;  %2850 = vrot.lane.b32.xlu1 %v2845_v44, %s7727_s18  ;;  %v2943_v44 = vmul.f32 %v2941_v5, %v6961_v54  ;;  %v2509_v58 = vstv %s6963_s11  ;;  %v3025_v5 = vstv %s6979_s8  ;;  %s7053_s11 = sld [smem:[#allocation13 + $0x25]]  ;;  %s7074_s8 = sld [smem:[#allocation13 + $0x26]] }
 0x40c   : > { %v2378_v0 = vadd.f32 %v2376_v47, %v2364_v26  ;;  %v2373_v16 = vadd.f32 %v2371_v6, %v2351_v59 }
 0x40d   : > { %v2387_v38 = vpop.permute.xlu0 %2386  ;;  %v2361_v8 = vpop.permute.xlu1 %2360 }
 0x40e   : > { %v2365_v35 = vadd.f32 %v2361_v8, %v2337_v63  ;;  %v2392_v27 = vadd.f32 %v2387_v38, %v2372_v21  ;;  %v2970_v63 = vmul.f32 %v2969_v36, %v6945_v51  ;;  %v2957_v38 = vmul.f32 %v2955_v62, %v6961_v54 }
 0x40f   : > { %2890 = vrot.lane.b32.xlu0 %v2886_v41, %s4937_s15  ;;  %2878 = vrot.lane.b32.xlu1 %v2873_v49, %s4937_s15  ;;  %v2983_v41 = vstv %s6957_s0  ;;  %s7047_s0 = sld [smem:[#allocation13 + $0xf]] }
 0x410   : > { %v2379_v23 = vadd.f32 %v2377_v30, %v2365_v35  ;;  %v2984_v10 = vmul.f32 %v2983_v41, %v6945_v51  ;;  %v2510_v35 = vmul.f32 %v2509_v58, %v6774_v2 }
 0x411   : > { %v2401_v20 = vpop.permute.xlu0 %2400  ;;  %v2389_v40 = vpop.permute.xlu1 %2388 }
 0x412   : > { %v2406_v17 = vadd.f32 %v2401_v20, %v2378_v0  ;;  %v2393_v4 = vadd.f32 %v2389_v40, %v2373_v16  ;;  %v2971_v20 = vmul.f32 %v2969_v36, %v6961_v54  ;;  %v3011_v40 = vstv %s6969_s7  ;;  %s7057_s7 = sld [smem:[#allocation13 + $0x57]] }
 0x413   : > { %2904 = vrot.lane.b32.xlu0 %v2900_v1, %s7727_s18  ;;  %2892 = vrot.lane.b32.xlu1 %v2887_v32, %s4937_s15  ;;  %v6987_v1 = vld [vmem:[#allocation3 + $0x49] sm:$0xff]  ;;  %v2515_v32 = vstv %s6973_s9  ;;  %s7063_s9 = sld [smem:[#allocation13 + $0x6d]] }
 0x415   : > { %v2415_v61 = vpop.permute.xlu0 %2414  ;;  %v2403_v60 = vpop.permute.xlu1 %2402 }
 0x416   : > { %v2420_v31 = vadd.f32 %v2415_v61, %v2392_v27  ;;  %v2407_v57 = vadd.f32 %v2403_v60, %v2379_v23  ;;  %v2516_v60 = vmul.f32 %v2515_v32, %v6774_v2 }
 0x417   : > { %2918 = vrot.lane.b32.xlu0 %v2914_v48, %s7727_s18  ;;  %2906 = vrot.lane.b32.xlu1 %v2901_v52, %s7727_s18  ;;  %v3012_v48 = vmul.f32 %v3011_v40, %v6987_v1  ;;  %v2985_v52 = vmul.f32 %v2983_v41, %v6961_v54 }
 0x418   : > { %v2442_v25 = vadd.f32 %v2440_v9, %v2420_v31 }
 0x419   : > { %v2429_v46 = vpop.permute.xlu0 %2428  ;;  %v2417_v37 = vpop.permute.xlu1 %2416 }
 0x41a   : > { %v2434_v29 = vadd.f32 %v2429_v46, %v2406_v17  ;;  %v2421_v21 = vadd.f32 %v2417_v37, %v2393_v4  ;;  %v2511_v17 = vmul.f32 %v2509_v58, %v6781_v42 }
 0x41b   : > { %2946 = vrot.lane.b32.xlu0 %v2942_v22, %s4937_s15  ;;  %2920 = vrot.lane.b32.xlu1 %v2915_v34, %s7727_s18  ;;  %v3039_v34 = vstv %s6990_s16  ;;  %s7083_s16 = sld [smem:[#allocation13 + $0x6e]] }
 0x41c   : > { %v2448_v53 = vadd.f32 %v2446_v14, %v2434_v29  ;;  %v2443_v18 = vadd.f32 %v2441_v55, %v2421_v21  ;;  %v3026_v14 = vmul.f32 %v3025_v5, %v6987_v1  ;;  %v2517_v55 = vmul.f32 %v2515_v32, %v6781_v42 }
 0x41d   : > { %v2457_v47 = vpop.permute.xlu0 %2456  ;;  %v2431_v26 = vpop.permute.xlu1 %2430  ;;  %v2579_v42 = vstv %s7005_s29  ;;  %s7095_s29 = sld [smem:[#allocation13 + $0x28]] }
 0x41e   : > { %v2435_v6 = vadd.f32 %v2431_v26, %v2407_v57  ;;  %v2462_v8 = vadd.f32 %v2457_v47, %v2442_v25  ;;  %v7003_v25 = vld [vmem:[#allocation3 + $0x51] sm:$0xff]  ;;  %v3040_v57 = vmul.f32 %v3039_v34, %v6987_v1  ;;  %v2581_v32 = vmul.f32 %v2579_v42, %v6801_v13 }
 0x41f   : > { %2960 = vrot.lane.b32.xlu0 %v2956_v24, %s4937_s15  ;;  %2948 = vrot.lane.b32.xlu1 %v2943_v44, %s4937_s15  ;;  %v3013_v29 = vmul.f32 %v3011_v40, %v7003_v25  ;;  %v3027_v47 = vmul.f32 %v3025_v5, %v7003_v25  ;;  %v3053_v24 = vstv %s6999_s19  ;;  %v3095_v40 = vstv %s7021_s13  ;;  %s7089_s19 = sld [smem:[#allocation13 + $0x12]]  ;;  %s7116_s13 = sld [smem:[#allocation13 + $0x29]] }
 0x420   : > { %v2449_v59 = vadd.f32 %v2447_v12, %v2435_v6  ;;  %v3054_v36 = vmul.f32 %v3053_v24, %v6987_v1  ;;  %v2580_v6 = vmul.f32 %v2579_v42, %v6794_v50 }
 0x421   : > { %v2471_v0 = vpop.permute.xlu0 %2470  ;;  %v2459_v16 = vpop.permute.xlu1 %2458 }
 0x422   : > { %v2476_v33 = vadd.f32 %v2471_v0, %v2448_v53  ;;  %v2463_v27 = vadd.f32 %v2459_v16, %v2443_v18  ;;  %v3041_v0 = vmul.f32 %v3039_v34, %v7003_v25  ;;  %v3081_v16 = vstv %s7011_s30  ;;  %s7099_s30 = sld [smem:[#allocation13 + $0x5a]] }
 0x423   : > { %2974 = vrot.lane.b32.xlu0 %v2970_v63, %s7727_s18  ;;  %2962 = vrot.lane.b32.xlu1 %v2957_v38, %s4937_s15  ;;  %v7029_v63 = vld [vmem:[#allocation3 + $0x4a] sm:$0xff]  ;;  %v2585_v38 = vstv %s7015_s20  ;;  %s7105_s20 = sld [smem:[#allocation13 + $0x70]] }
 0x424   : > { %v2587_v5 = vmul.f32 %v2585_v38, %v6801_v13  ;;  %v2649_v13 = vstv %s7047_s0  ;;  %s7137_s0 = sld [smem:[#allocation13 + $0x2b]] }
 0x425   : > { %v2485_v49 = vpop.permute.xlu0 %2484  ;;  %v2473_v30 = vpop.permute.xlu1 %2472 }
 0x426   : > { %v2490_v23 = vadd.f32 %v2485_v49, %v2462_v8  ;;  %v2477_v2 = vadd.f32 %v2473_v30, %v2449_v59 }
 0x427   : > { %2988 = vrot.lane.b32.xlu0 %v2984_v10, %s7727_s18  ;;  %2976 = vrot.lane.b32.xlu1 %v2971_v20, %s7727_s18  ;;  %v3082_v10 = vmul.f32 %v3081_v16, %v7029_v63  ;;  %v3055_v20 = vmul.f32 %v3053_v24, %v7003_v25 }
 0x428   : > { %v2512_v3 = vadd.f32 %v2510_v35, %v2490_v23  ;;  %v2586_v35 = vmul.f32 %v2585_v38, %v6794_v50  ;;  %v2651_v38 = vmul.f32 %v2649_v13, %v6821_v39 }
 0x429   : > { %v2499_v61 = vpop.permute.xlu0 %2498  ;;  %v2487_v9 = vpop.permute.xlu1 %2486 }
 0x42a   : > { %v2504_v31 = vadd.f32 %v2499_v61, %v2476_v33  ;;  %v2491_v7 = vadd.f32 %v2487_v9, %v2463_v27  ;;  %v3096_v9 = vmul.f32 %v3095_v40, %v7029_v63 }
 0x42b   : > { %3016 = vrot.lane.b32.xlu0 %v3012_v48, %s4937_s15  ;;  %2990 = vrot.lane.b32.xlu1 %v2985_v52, %s7727_s18  ;;  %v3109_v52 = vstv %s7032_s26  ;;  %s7125_s26 = sld [smem:[#allocation13 + $0x71]] }
 0x42c   : > { %v2518_v4 = vadd.f32 %v2516_v60, %v2504_v31  ;;  %v2513_v46 = vadd.f32 %v2511_v17, %v2491_v7 }
 0x42d   : > { %v2527_v22 = vpop.permute.xlu0 %2526  ;;  %v2501_v37 = vpop.permute.xlu1 %2500 }
 0x42e   : > { %v2505_v62 = vadd.f32 %v2501_v37, %v2477_v2  ;;  %v2532_v26 = vadd.f32 %v2527_v22, %v2512_v3  ;;  %v7045_v3 = vld [vmem:[#allocation3 + $0x52] sm:$0xff]  ;;  %v3110_v2 = vmul.f32 %v3109_v52, %v7029_v63 }
 0x42f   : > { %3030 = vrot.lane.b32.xlu0 %v3026_v14, %s4937_s15  ;;  %3018 = vrot.lane.b32.xlu1 %v3013_v29, %s4937_s15  ;;  %v3083_v31 = vmul.f32 %v3081_v16, %v7045_v3  ;;  %v3097_v22 = vmul.f32 %v3095_v40, %v7045_v3  ;;  %v3123_v14 = vstv %s7041_s27  ;;  %v3165_v16 = vstv %s7063_s9  ;;  %s7131_s27 = sld [smem:[#allocation13 + $0x15]]  ;;  %s7158_s9 = sld [smem:[#allocation13 + $0x2c]] }
 0x430   : > { %v2519_v21 = vadd.f32 %v2517_v55, %v2505_v62  ;;  %v3124_v34 = vmul.f32 %v3123_v14, %v7029_v63  ;;  %v2650_v55 = vmul.f32 %v2649_v13, %v6814_v28 }
 0x431   : > { %v2541_v53 = vpop.permute.xlu0 %2540  ;;  %v2529_v18 = vpop.permute.xlu1 %2528 }
 0x432   : > { %v2546_v41 = vadd.f32 %v2541_v53, %v2518_v4  ;;  %v2533_v8 = vadd.f32 %v2529_v18, %v2513_v46  ;;  %v3111_v53 = vmul.f32 %v3109_v52, %v7045_v3  ;;  %v3151_v18 = vstv %s7053_s11  ;;  %s7141_s11 = sld [smem:[#allocation13 + $0x5d]] }
 0x433   : > { %3044 = vrot.lane.b32.xlu0 %v3040_v57, %s7727_s18  ;;  %3032 = vrot.lane.b32.xlu1 %v3027_v47, %s4937_s15  ;;  %v7071_v57 = vld [vmem:[#allocation3 + $0x60] sm:$0xff]  ;;  %v2655_v47 = vstv %s7057_s7  ;;  %s7147_s7 = sld [smem:[#allocation13 + $0x73]] }
 0x434   : > { %v2657_v40 = vmul.f32 %v2655_v47, %v6821_v39  ;;  %v2719_v39 = vstv %s7089_s19  ;;  %s7179_s19 = sld [smem:[#allocation13 + $0x2e]] }
 0x435   : > { %v2555_v44 = vpop.permute.xlu0 %2554  ;;  %v2543_v12 = vpop.permute.xlu1 %2542 }
 0x436   : > { %v2560_v59 = vadd.f32 %v2555_v44, %v2532_v26  ;;  %v2547_v50 = vadd.f32 %v2543_v12, %v2519_v21 }
 0x437   : > { %3058 = vrot.lane.b32.xlu0 %v3054_v36, %s7727_s18  ;;  %3046 = vrot.lane.b32.xlu1 %v3041_v0, %s7727_s18  ;;  %v3152_v36 = vmul.f32 %v3151_v18, %v7071_v57  ;;  %v3125_v0 = vmul.f32 %v3123_v14, %v7045_v3 }
 0x438   : > { %v2582_v58 = vadd.f32 %v2580_v6, %v2560_v59  ;;  %v2656_v6 = vmul.f32 %v2655_v47, %v6814_v28 }
 0x439   : > { %v2569_v49 = vpop.permute.xlu0 %2568  ;;  %v2557_v30 = vpop.permute.xlu1 %2556 }
 0x43a   : > { %v2574_v23 = vadd.f32 %v2569_v49, %v2546_v41  ;;  %v2561_v33 = vadd.f32 %v2557_v30, %v2533_v8  ;;  %v3166_v30 = vmul.f32 %v3165_v16, %v7071_v57 }
 0x43b   : > { %3086 = vrot.lane.b32.xlu0 %v3082_v10, %s4937_s15  ;;  %3060 = vrot.lane.b32.xlu1 %v3055_v20, %s7727_s18  ;;  %v3179_v20 = vstv %s7074_s8  ;;  %s7167_s8 = sld [smem:[#allocation13 + $0x74]] }
 0x43c   : > { %v2588_v27 = vadd.f32 %v2586_v35, %v2574_v23  ;;  %v2583_v61 = vadd.f32 %v2581_v32, %v2561_v33 }
 0x43d   : > { %v2597_v48 = vpop.permute.xlu0 %2596  ;;  %v2571_v60 = vpop.permute.xlu1 %2570 }
 0x43e   : > { %v2575_v7 = vadd.f32 %v2571_v60, %v2547_v50  ;;  %v2602_v37 = vadd.f32 %v2597_v48, %v2582_v58  ;;  %v7087_v58 = vld [vmem:[#allocation3 + $0x68] sm:$0xff]  ;;  %v3180_v50 = vmul.f32 %v3179_v20, %v7071_v57 }
 0x43f   : > { %3100 = vrot.lane.b32.xlu0 %v3096_v9, %s4937_s15  ;;  %3088 = vrot.lane.b32.xlu1 %v3083_v31, %s4937_s15  ;;  %v3153_v23 = vmul.f32 %v3151_v18, %v7087_v58  ;;  %v3167_v48 = vmul.f32 %v3165_v16, %v7087_v58  ;;  %v3193_v9 = vstv %s7083_s16  ;;  %v3235_v18 = vstv %s7105_s20  ;;  %s7173_s16 = sld [smem:[#allocation13 + $0x18]]  ;;  %s7200_s20 = sld [smem:[#allocation13 + $0x2f]] }
 0x440   : > { %v2589_v17 = vadd.f32 %v2587_v5, %v2575_v7  ;;  %v3194_v52 = vmul.f32 %v3193_v9, %v7071_v57  ;;  %v2720_v7 = vmul.f32 %v2719_v39, %v6834_v45 }
 0x441   : > { %v2611_v4 = vpop.permute.xlu0 %2610  ;;  %v2599_v46 = vpop.permute.xlu1 %2598 }
 0x442   : > { %v2616_v24 = vadd.f32 %v2611_v4, %v2588_v27  ;;  %v2603_v26 = vadd.f32 %v2599_v46, %v2583_v61  ;;  %v3181_v4 = vmul.f32 %v3179_v20, %v7087_v58  ;;  %v3221_v46 = vstv %s7095_s29  ;;  %s7183_s29 = sld [smem:[#allocation13 + $0x60]] }
 0x443   : > { %3114 = vrot.lane.b32.xlu0 %v3110_v2, %s7727_s18  ;;  %3102 = vrot.lane.b32.xlu1 %v3097_v22, %s4937_s15  ;;  %v7113_v2 = vld [vmem:[#allocation3 + $0x61] sm:$0xff]  ;;  %v2725_v22 = vstv %s7099_s30  ;;  %s7189_s30 = sld [smem:[#allocation13 + $0x76]] }
 0x445   : > { %v2625_v29 = vpop.permute.xlu0 %2624  ;;  %v2613_v62 = vpop.permute.xlu1 %2612 }
 0x446   : > { %v2630_v21 = vadd.f32 %v2625_v29, %v2602_v37  ;;  %v2617_v28 = vadd.f32 %v2613_v62, %v2589_v17 }
 0x447   : > { %3128 = vrot.lane.b32.xlu0 %v3124_v34, %s7727_s18  ;;  %3116 = vrot.lane.b32.xlu1 %v3111_v53, %s7727_s18  ;;  %v3222_v34 = vmul.f32 %v3221_v46, %v7113_v2  ;;  %v3195_v53 = vmul.f32 %v3193_v9, %v7087_v58 }
 0x448   : > { %v2652_v42 = vadd.f32 %v2650_v55, %v2630_v21  ;;  %v2726_v55 = vmul.f32 %v2725_v22, %v6834_v45 }
 0x449   : > { %v2639_v44 = vpop.permute.xlu0 %2638  ;;  %v2627_v12 = vpop.permute.xlu1 %2626 }
 0x44a   : > { %v2644_v59 = vadd.f32 %v2639_v44, %v2616_v24  ;;  %v2631_v41 = vadd.f32 %v2627_v12, %v2603_v26  ;;  %v2721_v24 = vmul.f32 %v2719_v39, %v6841_v43  ;;  %v3236_v12 = vmul.f32 %v3235_v18, %v7113_v2 }
 0x44b   : > { %3156 = vrot.lane.b32.xlu0 %v3152_v36, %s4937_s15  ;;  %3130 = vrot.lane.b32.xlu1 %v3125_v0, %s7727_s18  ;;  %v3249_v0 = vstv %s7116_s13  ;;  %s7209_s13 = sld [smem:[#allocation13 + $0x77]] }
 0x44c   : > { %v2658_v8 = vadd.f32 %v2656_v6, %v2644_v59  ;;  %v2653_v49 = vadd.f32 %v2651_v38, %v2631_v41  ;;  %v2727_v38 = vmul.f32 %v2725_v22, %v6841_v43  ;;  %v2789_v43 = vstv %s7131_s27  ;;  %s7221_s27 = sld [smem:[#allocation13 + $0x31]] }
 0x44d   : > { %v2667_v10 = vpop.permute.xlu0 %2666  ;;  %v2641_v35 = vpop.permute.xlu1 %2640  ;;  %v2791_v22 = vmul.f32 %v2789_v43, %v6874_v19 }
 0x44e   : > { %v2645_v32 = vadd.f32 %v2641_v35, %v2617_v28  ;;  %v2672_v60 = vadd.f32 %v2667_v10, %v2652_v42  ;;  %v7129_v42 = vld [vmem:[#allocation3 + $0x69] sm:$0xff]  ;;  %v3250_v28 = vmul.f32 %v3249_v0, %v7113_v2 }
 0x44f   : > { %3170 = vrot.lane.b32.xlu0 %v3166_v30, %s4937_s15  ;;  %3158 = vrot.lane.b32.xlu1 %v3153_v23, %s4937_s15  ;;  %v3223_v59 = vmul.f32 %v3221_v46, %v7129_v42  ;;  %v3237_v10 = vmul.f32 %v3235_v18, %v7129_v42  ;;  %v3263_v30 = vstv %s7125_s26  ;;  %v3305_v46 = vstv %s7147_s7  ;;  %s7215_s26 = sld [smem:[#allocation13 + $0x1b]]  ;;  %s7242_s7 = sld [smem:[#allocation13 + $0x32]] }
 0x450   : > { %v2659_v33 = vadd.f32 %v2657_v40, %v2645_v32  ;;  %v3264_v20 = vmul.f32 %v3263_v30, %v7113_v2  ;;  %v2790_v32 = vmul.f32 %v2789_v43, %v6856_v56 }
 0x451   : > { %v2681_v27 = vpop.permute.xlu0 %2680  ;;  %v2669_v61 = vpop.permute.xlu1 %2668 }
 0x452   : > { %v2686_v14 = vadd.f32 %v2681_v27, %v2658_v8  ;;  %v2673_v37 = vadd.f32 %v2669_v61, %v2653_v49  ;;  %v3251_v27 = vmul.f32 %v3249_v0, %v7129_v42  ;;  %v3291_v61 = vstv %s7137_s0  ;;  %s7225_s0 = sld [smem:[#allocation13 + $0x63]] }
 0x453   : > { %3184 = vrot.lane.b32.xlu0 %v3180_v50, %s7727_s18  ;;  %3172 = vrot.lane.b32.xlu1 %v3167_v48, %s4937_s15  ;;  %v7155_v50 = vld [vmem:[#allocation3 + $0x62] sm:$0xff]  ;;  %v2795_v48 = vstv %s7141_s11  ;;  %s7231_s11 = sld [smem:[#allocation13 + $0x79]] }
 0x454   : > { %v2797_v18 = vmul.f32 %v2795_v48, %v6874_v19  ;;  %v2859_v19 = vstv %s7173_s16  ;;  %s7263_s16 = sld [smem:[#allocation13 + $0x34]] }
 0x455   : > { %v2695_v31 = vpop.permute.xlu0 %2694  ;;  %v2683_v5 = vpop.permute.xlu1 %2682 }
 0x456   : > { %v2700_v17 = vadd.f32 %v2695_v31, %v2672_v60  ;;  %v2687_v45 = vadd.f32 %v2683_v5, %v2659_v33 }
 0x457   : > { %3198 = vrot.lane.b32.xlu0 %v3194_v52, %s7727_s18  ;;  %3186 = vrot.lane.b32.xlu1 %v3181_v4, %s7727_s18  ;;  %v3292_v52 = vmul.f32 %v3291_v61, %v7155_v50  ;;  %v3265_v4 = vmul.f32 %v3263_v30, %v7129_v42 }
 0x458   : > { %v2722_v13 = vadd.f32 %v2720_v7, %v2700_v17  ;;  %v2796_v7 = vmul.f32 %v2795_v48, %v6856_v56  ;;  %v2861_v48 = vmul.f32 %v2859_v19, %v6921_v15 }
 0x459   : > { %v2709_v29 = vpop.permute.xlu0 %2708  ;;  %v2697_v62 = vpop.permute.xlu1 %2696 }
 0x45a   : > { %v2714_v21 = vadd.f32 %v2709_v29, %v2686_v14  ;;  %v2701_v47 = vadd.f32 %v2697_v62, %v2673_v37  ;;  %v3306_v62 = vmul.f32 %v3305_v46, %v7155_v50 }
 0x45b   : > { %3226 = vrot.lane.b32.xlu0 %v3222_v34, %s4937_s15  ;;  %3200 = vrot.lane.b32.xlu1 %v3195_v53, %s7727_s18  ;;  %v3319_v53 = vstv %s7158_s9  ;;  %s7251_s9 = sld [smem:[#allocation13 + $0x7a]] }
 0x45c   : > { %v2728_v26 = vadd.f32 %v2726_v55, %v2714_v21  ;;  %v2723_v44 = vadd.f32 %v2721_v24, %v2701_v47 }
 0x45d   : > { %v2737_v36 = vpop.permute.xlu0 %2736  ;;  %v2711_v6 = vpop.permute.xlu1 %2710 }
 0x45e   : > { %v2715_v16 = vadd.f32 %v2711_v6, %v2687_v45  ;;  %v2742_v35 = vadd.f32 %v2737_v36, %v2722_v13  ;;  %v7171_v13 = vld [vmem:[#allocation3 + $0x6a] sm:$0xff]  ;;  %v3320_v45 = vmul.f32 %v3319_v53, %v7155_v50 }
 0x45f   : > { %3240 = vrot.lane.b32.xlu0 %v3236_v12, %s4937_s15  ;;  %3228 = vrot.lane.b32.xlu1 %v3223_v59, %s4937_s15  ;;  %v3293_v21 = vmul.f32 %v3291_v61, %v7171_v13  ;;  %v3307_v36 = vmul.f32 %v3305_v46, %v7171_v13  ;;  %v3333_v12 = vstv %s7167_s8  ;;  %v3375_v61 = vstv %s7189_s30  ;;  %s7257_s8 = sld [smem:[#allocation13 + $0x1e]]  ;;  %s7284_s30 = sld [smem:[#allocation13 + $0x35]] }
 0x460   : > { %v2729_v41 = vadd.f32 %v2727_v38, %v2715_v16  ;;  %v3334_v0 = vmul.f32 %v3333_v12, %v7155_v50  ;;  %v2860_v38 = vmul.f32 %v2859_v19, %v6902_v11 }
 0x461   : > { %v2751_v8 = vpop.permute.xlu0 %2750  ;;  %v2739_v49 = vpop.permute.xlu1 %2738 }
 0x462   : > { %v2756_v9 = vadd.f32 %v2751_v8, %v2728_v26  ;;  %v2743_v60 = vadd.f32 %v2739_v49, %v2723_v44  ;;  %v3321_v8 = vmul.f32 %v3319_v53, %v7171_v13  ;;  %v3361_v49 = vstv %s7179_s19  ;;  %s7267_s19 = sld [smem:[#allocation13 + $0x66]] }
 0x463   : > { %3254 = vrot.lane.b32.xlu0 %v3250_v28, %s7727_s18  ;;  %3242 = vrot.lane.b32.xlu1 %v3237_v10, %s4937_s15  ;;  %v7197_v28 = vld [vmem:[#allocation3 + $0x78] sm:$0xff]  ;;  %v2865_v10 = vstv %s7183_s29  ;;  %s7273_s29 = sld [smem:[#allocation13 + $0x7c]] }
 0x464   : > { %v2867_v46 = vmul.f32 %v2865_v10, %v6921_v15  ;;  %v2929_v15 = vstv %s7215_s26  ;;  %s7305_s26 = sld [smem:[#allocation13 + $0x37]] }
 0x465   : > { %v2765_v23 = vpop.permute.xlu0 %2764  ;;  %v2753_v40 = vpop.permute.xlu1 %2752 }
 0x466   : > { %v2770_v33 = vadd.f32 %v2765_v23, %v2742_v35  ;;  %v2757_v56 = vadd.f32 %v2753_v40, %v2729_v41 }
 0x467   : > { %3268 = vrot.lane.b32.xlu0 %v3264_v20, %s7727_s18  ;;  %3256 = vrot.lane.b32.xlu1 %v3251_v27, %s7727_s18  ;;  %v3362_v20 = vmul.f32 %v3361_v49, %v7197_v28  ;;  %v3335_v27 = vmul.f32 %v3333_v12, %v7171_v13 }
 0x468   : > { %v2792_v39 = vadd.f32 %v2790_v32, %v2770_v33  ;;  %v2866_v32 = vmul.f32 %v2865_v10, %v6902_v11 }
 0x469   : > { %v2779_v31 = vpop.permute.xlu0 %2778  ;;  %v2767_v5 = vpop.permute.xlu1 %2766 }
 0x46a   : > { %v2784_v17 = vadd.f32 %v2779_v31, %v2756_v9  ;;  %v2771_v14 = vadd.f32 %v2767_v5, %v2743_v60  ;;  %v3376_v5 = vmul.f32 %v3375_v61, %v7197_v28 }
 0x46b   : > { %3296 = vrot.lane.b32.xlu0 %v3292_v52, %s4937_s15  ;;  %3270 = vrot.lane.b32.xlu1 %v3265_v4, %s7727_s18  ;;  %v3389_v4 = vstv %s7200_s20  ;;  %s7293_s20 = sld [smem:[#allocation13 + $0x7d]] }
 0x46c   : > { %v2798_v37 = vadd.f32 %v2796_v7, %v2784_v17  ;;  %v2793_v29 = vadd.f32 %v2791_v22, %v2771_v14 }
 0x46d   : > { %v2807_v34 = vpop.permute.xlu0 %2806  ;;  %v2781_v55 = vpop.permute.xlu1 %2780 }
 0x46e   : > { %v2785_v47 = vadd.f32 %v2781_v55, %v2757_v56  ;;  %v2812_v6 = vadd.f32 %v2807_v34, %v2792_v39  ;;  %v7213_v39 = vld [vmem:[#allocation3 + $0x80] sm:$0xff]  ;;  %v3390_v56 = vmul.f32 %v3389_v4, %v7197_v28 }
 0x46f   : > { %3310 = vrot.lane.b32.xlu0 %v3306_v62, %s4937_s15  ;;  %3298 = vrot.lane.b32.xlu1 %v3293_v21, %s4937_s15  ;;  %v3363_v17 = vmul.f32 %v3361_v49, %v7213_v39  ;;  %v3377_v34 = vmul.f32 %v3375_v61, %v7213_v39  ;;  %v3403_v62 = vstv %s7209_s13  ;;  %v3445_v49 = vstv %s7231_s11  ;;  %s7299_s13 = sld [smem:[#allocation13 + $0x21]]  ;;  %s7326_s11 = sld [smem:[#allocation13 + $0x38]] }
 0x470   : > { %v2799_v24 = vadd.f32 %v2797_v18, %v2785_v47  ;;  %v3404_v53 = vmul.f32 %v3403_v62, %v7197_v28  ;;  %v2930_v47 = vmul.f32 %v2929_v15, %v6945_v51 }
 0x471   : > { %v2821_v26 = vpop.permute.xlu0 %2820  ;;  %v2809_v44 = vpop.permute.xlu1 %2808 }
 0x472   : > { %v2826_v30 = vadd.f32 %v2821_v26, %v2798_v37  ;;  %v2813_v35 = vadd.f32 %v2809_v44, %v2793_v29  ;;  %v3391_v26 = vmul.f32 %v3389_v4, %v7213_v39  ;;  %v3431_v44 = vstv %s7221_s27  ;;  %s7309_s27 = sld [smem:[#allocation13 + $0x69]] }
 0x473   : > { %3324 = vrot.lane.b32.xlu0 %v3320_v45, %s7727_s18  ;;  %3312 = vrot.lane.b32.xlu1 %v3307_v36, %s4937_s15  ;;  %v7239_v45 = vld [vmem:[#allocation3 + $0x79] sm:$0xff]  ;;  %v2935_v36 = vstv %s7225_s0  ;;  %s7315_s0 = sld [smem:[#allocation13 + $0x7f]] }
 0x475   : > { %v2835_v59 = vpop.permute.xlu0 %2834  ;;  %v2823_v16 = vpop.permute.xlu1 %2822 }
 0x476   : > { %v2840_v41 = vadd.f32 %v2835_v59, %v2812_v6  ;;  %v2827_v11 = vadd.f32 %v2823_v16, %v2799_v24 }
 0x477   : > { %3338 = vrot.lane.b32.xlu0 %v3334_v0, %s7727_s18  ;;  %3326 = vrot.lane.b32.xlu1 %v3321_v8, %s7727_s18  ;;  %v3432_v0 = vmul.f32 %v3431_v44, %v7239_v45  ;;  %v3405_v8 = vmul.f32 %v3403_v62, %v7213_v39 }
 0x478   : > { %v2862_v43 = vadd.f32 %v2860_v38, %v2840_v41  ;;  %v2936_v38 = vmul.f32 %v2935_v36, %v6945_v51 }
 0x479   : > { %v2849_v23 = vpop.permute.xlu0 %2848  ;;  %v2837_v40 = vpop.permute.xlu1 %2836 }
 0x47a   : > { %v2854_v33 = vadd.f32 %v2849_v23, %v2826_v30  ;;  %v2841_v9 = vadd.f32 %v2837_v40, %v2813_v35  ;;  %v2931_v30 = vmul.f32 %v2929_v15, %v6961_v54  ;;  %v3446_v40 = vmul.f32 %v3445_v49, %v7239_v45 }
 0x47b   : > { %3366 = vrot.lane.b32.xlu0 %v3362_v20, %s4937_s15  ;;  %3340 = vrot.lane.b32.xlu1 %v3335_v27, %s7727_s18  ;;  %v3459_v27 = vstv %s7242_s7  ;;  %s7335_s7 = sld [smem:[#allocation13 + $0x80]] }
 0x47c   : > { %v2868_v60 = vadd.f32 %v2866_v32, %v2854_v33  ;;  %v2863_v31 = vadd.f32 %v2861_v48, %v2841_v9  ;;  %v2937_v48 = vmul.f32 %v2935_v36, %v6961_v54  ;;  %v2999_v54 = vstv %s7257_s8  ;;  %s7347_s8 = sld [smem:[#allocation13 + $0x3a]] }
 0x47d   : > { %v2877_v52 = vpop.permute.xlu0 %2876  ;;  %v2851_v7 = vpop.permute.xlu1 %2850 }
 0x47e   : > { %v2855_v22 = vadd.f32 %v2851_v7, %v2827_v11  ;;  %v2882_v55 = vadd.f32 %v2877_v52, %v2862_v43  ;;  %v7255_v43 = vld [vmem:[#allocation3 + $0x81] sm:$0xff]  ;;  %v3460_v11 = vmul.f32 %v3459_v27, %v7239_v45 }
 0x47f   : > { %3380 = vrot.lane.b32.xlu0 %v3376_v5, %s4937_s15  ;;  %3368 = vrot.lane.b32.xlu1 %v3363_v17, %s4937_s15  ;;  %v3433_v33 = vmul.f32 %v3431_v44, %v7255_v43  ;;  %v3447_v52 = vmul.f32 %v3445_v49, %v7255_v43  ;;  %v3473_v5 = vstv %s7251_s9  ;;  %s7341_s9 = sld [smem:[#allocation13 + $0x24]] }
 0x480   : > { %v2869_v14 = vadd.f32 %v2867_v46, %v2855_v22  ;;  %v3474_v4 = vmul.f32 %v3473_v5, %v7239_v45 }
 0x481   : > { %v2891_v37 = vpop.permute.xlu0 %2890  ;;  %v2879_v29 = vpop.permute.xlu1 %2878 }
 0x482   : > { %v2896_v12 = vadd.f32 %v2891_v37, %v2868_v60  ;;  %v2883_v6 = vadd.f32 %v2879_v29, %v2863_v31  ;;  %v7280_v37 = vld [vmem:[#allocation3 + $0x7a] sm:$0xff]  ;;  %v3000_v29 = vmul.f32 %v2999_v54, %v6987_v1 }
 0x483   : > { %3394 = vrot.lane.b32.xlu0 %v3390_v56, %s7727_s18  ;;  %3382 = vrot.lane.b32.xlu1 %v3377_v34, %s4937_s15  ;;  %v3501_v56 = vstv %s7263_s16  ;;  %v3005_v34 = vstv %s7267_s19  ;;  %s7351_s16 = sld [smem:[#allocation13 + $0x6c]]  ;;  %s7357_s19 = sld [smem:[#allocation13 + $0x82]] }
 0x484   : > { %v3006_v44 = vmul.f32 %v3005_v34, %v6987_v1 }
 0x485   : > { %v2905_v21 = vpop.permute.xlu0 %2904  ;;  %v2893_v18 = vpop.permute.xlu1 %2892 }
 0x486   : > { %v2910_v24 = vadd.f32 %v2905_v21, %v2882_v55  ;;  %v2897_v51 = vadd.f32 %v2893_v18, %v2869_v14  ;;  %v3461_v14 = vmul.f32 %v3459_v27, %v7255_v43 }
 0x487   : > { %3408 = vrot.lane.b32.xlu0 %v3404_v53, %s7727_s18  ;;  %3396 = vrot.lane.b32.xlu1 %v3391_v26, %s7727_s18  ;;  %v3502_v53 = vmul.f32 %v3501_v56, %v7280_v37  ;;  %v3515_v26 = vstv %s7273_s29  ;;  %s7368_s29 = sld [smem:[#allocation13 + $0x3b]] }
 0x488   : > { %v2932_v19 = vadd.f32 %v2930_v47, %v2910_v24  ;;  %v3475_v24 = vmul.f32 %v3473_v5, %v7255_v43 }
 0x489   : > { %v2919_v59 = vpop.permute.xlu0 %2918  ;;  %v2907_v16 = vpop.permute.xlu1 %2906 }
 0x48a   : > { %v2924_v41 = vadd.f32 %v2919_v59, %v2896_v12  ;;  %v2911_v10 = vadd.f32 %v2907_v16, %v2883_v6  ;;  %v7296_v12 = vld [vmem:[#allocation3 + $0x82] sm:$0xff]  ;;  %v3516_v16 = vmul.f32 %v3515_v26, %v7280_v37 }
 0x48b   : > { %3436 = vrot.lane.b32.xlu0 %v3432_v0, %s4937_s15  ;;  %3410 = vrot.lane.b32.xlu1 %v3405_v8, %s7727_s18  ;;  %v3529_v8 = vstv %s7284_s30  ;;  %s7377_s30 = sld [smem:[#allocation13 + $0x83]] }
 0x48c   : > { %v2938_v35 = vadd.f32 %v2936_v38, %v2924_v41  ;;  %v2933_v23 = vadd.f32 %v2931_v30, %v2911_v10  ;;  %v3503_v41 = vmul.f32 %v3501_v56, %v7296_v12  ;;  %v3007_v10 = vmul.f32 %v3005_v34, %v7003_v25 }
 0x48d   : > { %v2947_v20 = vpop.permute.xlu0 %2946  ;;  %v2921_v32 = vpop.permute.xlu1 %2920  ;;  %v3585_v56 = vstv %s7315_s0  ;;  %s7410_s0 = sld [smem:[#allocation13 + $0x3e]] }
 0x48e   : > { %v2925_v61 = vadd.f32 %v2921_v32, %v2897_v51  ;;  %v2952_v7 = vadd.f32 %v2947_v20, %v2932_v19  ;;  %v3001_v19 = vmul.f32 %v2999_v54, %v7003_v25  ;;  %v3517_v20 = vmul.f32 %v3515_v26, %v7296_v12 }
 0x48f   : > { %3450 = vrot.lane.b32.xlu0 %v3446_v40, %s4937_s15  ;;  %3438 = vrot.lane.b32.xlu1 %v3433_v33, %s4937_s15  ;;  %v3543_v40 = vstv %s7293_s20  ;;  %v3069_v32 = vstv %s7299_s13  ;;  %s7383_s20 = sld [smem:[#allocation13 + $0x27]]  ;;  %s7389_s13 = sld [smem:[#allocation13 + $0x3d]] }
 0x490   : > { %v2939_v9 = vadd.f32 %v2937_v48, %v2925_v61  ;;  %v3544_v27 = vmul.f32 %v3543_v40, %v7280_v37  ;;  %v3599_v26 = vstv %s7326_s11  ;;  %s7419_s11 = sld [smem:[#allocation13 + $0x86]] }
 0x491   : > { %v2961_v60 = vpop.permute.xlu0 %2960  ;;  %v2949_v31 = vpop.permute.xlu1 %2948 }
 0x492   : > { %v2966_v62 = vadd.f32 %v2961_v60, %v2938_v35  ;;  %v2953_v55 = vadd.f32 %v2949_v31, %v2933_v23  ;;  %v3530_v35 = vmul.f32 %v3529_v8, %v7280_v37  ;;  %v7322_v60 = vld [vmem:[#allocation3 + $0x90] sm:$0xff]  ;;  %v3070_v31 = vmul.f32 %v3069_v32, %v7029_v63 }
 0x493   : > { %3464 = vrot.lane.b32.xlu0 %v3460_v11, %s7727_s18  ;;  %3452 = vrot.lane.b32.xlu1 %v3447_v52, %s4937_s15  ;;  %v3571_v11 = vstv %s7305_s26  ;;  %v3075_v52 = vstv %s7309_s27  ;;  %s7393_s26 = sld [smem:[#allocation13 + $0x6f]]  ;;  %s7399_s27 = sld [smem:[#allocation13 + $0x85]] }
 0x495   : > { %v2975_v17 = vpop.permute.xlu0 %2974  ;;  %v2963_v46 = vpop.permute.xlu1 %2962 }
 0x496   : > { %v2980_v22 = vadd.f32 %v2975_v17, %v2952_v7  ;;  %v2967_v59 = vadd.f32 %v2963_v46, %v2939_v9  ;;  %v3531_v9 = vmul.f32 %v3529_v8, %v7296_v12 }
 0x497   : > { %3478 = vrot.lane.b32.xlu0 %v3474_v4, %s7727_s18  ;;  %3466 = vrot.lane.b32.xlu1 %v3461_v14, %s7727_s18  ;;  %v3572_v4 = vmul.f32 %v3571_v11, %v7322_v60  ;;  %v3545_v14 = vmul.f32 %v3543_v40, %v7296_v12 }
 0x498   : > { %v3002_v15 = vadd.f32 %v3000_v29, %v2980_v22  ;;  %v3076_v29 = vmul.f32 %v3075_v52, %v7029_v63 }
 0x499   : > { %v2989_v21 = vpop.permute.xlu0 %2988  ;;  %v2977_v18 = vpop.permute.xlu1 %2976 }
 0x49a   : > { %v2994_v47 = vadd.f32 %v2989_v21, %v2966_v62  ;;  %v2981_v36 = vadd.f32 %v2977_v18, %v2953_v55  ;;  %v7338_v62 = vld [vmem:[#allocation3 + $0x98] sm:$0xff]  ;;  %v3586_v18 = vmul.f32 %v3585_v56, %v7322_v60 }
 0x49b   : > { %3506 = vrot.lane.b32.xlu0 %v3502_v53, %s4937_s15  ;;  %3480 = vrot.lane.b32.xlu1 %v3475_v24, %s7727_s18  ;;  %v3573_v24 = vmul.f32 %v3571_v11, %v7338_v62  ;;  %v3655_v11 = vstv %s7357_s19  ;;  %s7452_s19 = sld [smem:[#allocation13 + $0x41]] }
 0x49c   : > { %v3008_v6 = vadd.f32 %v3006_v44, %v2994_v47  ;;  %v3003_v1 = vadd.f32 %v3001_v19, %v2981_v36  ;;  %v3077_v36 = vmul.f32 %v3075_v52, %v7045_v3 }
 0x49d   : > { %v3017_v0 = vpop.permute.xlu0 %3016  ;;  %v2991_v38 = vpop.permute.xlu1 %2990 }
 0x49e   : > { %v2995_v49 = vadd.f32 %v2991_v38, %v2967_v59  ;;  %v3022_v25 = vadd.f32 %v3017_v0, %v3002_v15  ;;  %v3071_v15 = vmul.f32 %v3069_v32, %v7045_v3  ;;  %v3139_v38 = vstv %s7341_s9  ;;  %s7431_s9 = sld [smem:[#allocation13 + $0x40]] }
 0x49f   : > { %3520 = vrot.lane.b32.xlu0 %v3516_v16, %s4937_s15  ;;  %3508 = vrot.lane.b32.xlu1 %v3503_v41, %s4937_s15  ;;  %v3587_v16 = vmul.f32 %v3585_v56, %v7338_v62 }
 0x4a0   : > { %v3009_v51 = vadd.f32 %v3007_v10, %v2995_v49 }
 0x4a1   : > { %v3031_v30 = vpop.permute.xlu0 %3030  ;;  %v3019_v23 = vpop.permute.xlu1 %3018 }
 0x4a2   : > { %v3036_v5 = vadd.f32 %v3031_v30, %v3008_v6  ;;  %v3023_v7 = vadd.f32 %v3019_v23, %v3003_v1  ;;  %v3600_v6 = vmul.f32 %v3599_v26, %v7322_v60  ;;  %v3613_v1 = vstv %s7335_s7  ;;  %s7425_s7 = sld [smem:[#allocation13 + $0x2a]] }
 0x4a3   : > { %3534 = vrot.lane.b32.xlu0 %v3530_v35, %s7727_s18  ;;  %3522 = vrot.lane.b32.xlu1 %v3517_v20, %s4937_s15  ;;  %v3614_v8 = vmul.f32 %v3613_v1, %v7322_v60  ;;  %v3601_v30 = vmul.f32 %v3599_v26, %v7338_v62  ;;  %v7364_v35 = vld [vmem:[#allocation3 + $0x91] sm:$0xff]  ;;  %v3140_v23 = vmul.f32 %v3139_v38, %v7071_v57  ;;  %v3145_v20 = vstv %s7351_s16  ;;  %s7441_s16 = sld [smem:[#allocation13 + $0x88]] }
 0x4a5   : > { %v3045_v33 = vpop.permute.xlu0 %3044  ;;  %v3033_v61 = vpop.permute.xlu1 %3032 }
 0x4a6   : > { %v3050_v48 = vadd.f32 %v3045_v33, %v3022_v25  ;;  %v3037_v21 = vadd.f32 %v3033_v61, %v3009_v51  ;;  %v3641_v51 = vstv %s7347_s8  ;;  %s7435_s8 = sld [smem:[#allocation13 + $0x72]] }
 0x4a7   : > { %3548 = vrot.lane.b32.xlu0 %v3544_v27, %s7727_s18  ;;  %3536 = vrot.lane.b32.xlu1 %v3531_v9, %s7727_s18  ;;  %v3642_v27 = vmul.f32 %v3641_v51, %v7364_v35  ;;  %v3615_v9 = vmul.f32 %v3613_v1, %v7338_v62 }
 0x4a8   : > { %v3072_v54 = vadd.f32 %v3070_v31, %v3050_v48  ;;  %v3146_v31 = vmul.f32 %v3145_v20, %v7071_v57 }
 0x4a9   : > { %v3059_v17 = vpop.permute.xlu0 %3058  ;;  %v3047_v46 = vpop.permute.xlu1 %3046 }
 0x4aa   : > { %v3064_v22 = vadd.f32 %v3059_v17, %v3036_v5  ;;  %v3051_v34 = vadd.f32 %v3047_v46, %v3023_v7  ;;  %v7380_v5 = vld [vmem:[#allocation3 + $0x99] sm:$0xff]  ;;  %v3656_v46 = vmul.f32 %v3655_v11, %v7364_v35 }
 0x4ab   : > { %3576 = vrot.lane.b32.xlu0 %v3572_v4, %s4937_s15  ;;  %3550 = vrot.lane.b32.xlu1 %v3545_v14, %s7727_s18  ;;  %v3643_v56 = vmul.f32 %v3641_v51, %v7380_v5 }
 0x4ac   : > { %v3078_v55 = vadd.f32 %v3076_v29, %v3064_v22  ;;  %v3073_v63 = vadd.f32 %v3071_v15, %v3051_v34  ;;  %v3669_v29 = vstv %s7368_s29  ;;  %v3147_v15 = vmul.f32 %v3145_v20, %v7087_v58  ;;  %s7461_s29 = sld [smem:[#allocation13 + $0x89]] }
 0x4ad   : > { %v3087_v53 = vpop.permute.xlu0 %3086  ;;  %v3061_v47 = vpop.permute.xlu1 %3060 }
 0x4ae   : > { %v3065_v44 = vadd.f32 %v3061_v47, %v3037_v21  ;;  %v3092_v3 = vadd.f32 %v3087_v53, %v3072_v54  ;;  %v3141_v54 = vmul.f32 %v3139_v38, %v7087_v58  ;;  %v3670_v21 = vmul.f32 %v3669_v29, %v7364_v35 }
 0x4af   : > { %3590 = vrot.lane.b32.xlu0 %v3586_v18, %s4937_s15  ;;  %3578 = vrot.lane.b32.xlu1 %v3573_v24, %s4937_s15  ;;  %v3657_v47 = vmul.f32 %v3655_v11, %v7380_v5  ;;  %v3683_v24 = vstv %s7377_s30  ;;  %v3209_v58 = vstv %s7383_s20  ;;  %s7467_s30 = sld [smem:[#allocation13 + $0x2d]]  ;;  %s7473_s20 = sld [smem:[#allocation13 + $0x43]] }
 0x4b0   : > { %v3079_v59 = vadd.f32 %v3077_v36, %v3065_v44  ;;  %v3684_v36 = vmul.f32 %v3683_v24, %v7364_v35  ;;  %v3210_v1 = vmul.f32 %v3209_v58, %v7113_v2  ;;  %v3685_v51 = vmul.f32 %v3683_v24, %v7380_v5 }
 0x4b1   : > { %v3101_v19 = vpop.permute.xlu0 %3100  ;;  %v3089_v0 = vpop.permute.xlu1 %3088  ;;  %v3285_v24 = vstv %s7435_s8  ;;  %s7525_s8 = sld [smem:[#allocation13 + $0x8e]] }
 0x4b2   : > { %v3106_v40 = vadd.f32 %v3101_v19, %v3078_v55  ;;  %v3093_v25 = vadd.f32 %v3089_v0, %v3073_v63  ;;  %v7406_v0 = vld [vmem:[#allocation3 + $0x92] sm:$0xff] }
 0x4b3   : > { %3604 = vrot.lane.b32.xlu0 %v3600_v6, %s7727_s18  ;;  %3592 = vrot.lane.b32.xlu1 %v3587_v16, %s4937_s15  ;;  %v3711_v16 = vstv %s7389_s13  ;;  %s7477_s13 = sld [smem:[#allocation13 + $0x75]] }
 0x4b5   : > { %v3115_v41 = vpop.permute.xlu0 %3114  ;;  %v3103_v49 = vpop.permute.xlu1 %3102 }
 0x4b6   : > { %v3120_v10 = vadd.f32 %v3115_v41, %v3092_v3  ;;  %v3107_v17 = vadd.f32 %v3103_v49, %v3079_v59  ;;  %v3671_v59 = vmul.f32 %v3669_v29, %v7380_v5  ;;  %v3215_v3 = vstv %s7393_s26  ;;  %s7483_s26 = sld [smem:[#allocation13 + $0x8b]] }
 0x4b7   : > { %3618 = vrot.lane.b32.xlu0 %v3614_v8, %s7727_s18  ;;  %3606 = vrot.lane.b32.xlu1 %v3601_v30, %s7727_s18  ;;  %v3712_v49 = vmul.f32 %v3711_v16, %v7406_v0  ;;  %v3216_v20 = vmul.f32 %v3215_v3, %v7113_v2 }
 0x4b8   : > { %v3142_v32 = vadd.f32 %v3140_v23, %v3120_v10  ;;  %v3725_v23 = vstv %s7399_s27  ;;  %s7494_s27 = sld [smem:[#allocation13 + $0x44]] }
 0x4b9   : > { %v3129_v33 = vpop.permute.xlu0 %3128  ;;  %v3117_v61 = vpop.permute.xlu1 %3116 }
 0x4ba   : > { %v3134_v48 = vadd.f32 %v3129_v33, %v3106_v40  ;;  %v3121_v52 = vadd.f32 %v3117_v61, %v3093_v25  ;;  %v3211_v25 = vmul.f32 %v3209_v58, %v7129_v42  ;;  %v3726_v61 = vmul.f32 %v3725_v23, %v7406_v0 }
 0x4bb   : > { %3646 = vrot.lane.b32.xlu0 %v3642_v27, %s4937_s15  ;;  %3620 = vrot.lane.b32.xlu1 %v3615_v9, %s7727_s18 }
 0x4bc   : > { %v3148_v7 = vadd.f32 %v3146_v31, %v3134_v48  ;;  %v3143_v57 = vadd.f32 %v3141_v54, %v3121_v52  ;;  %v3739_v31 = vstv %s7410_s0  ;;  %v3217_v54 = vmul.f32 %v3215_v3, %v7129_v42  ;;  %s7503_s0 = sld [smem:[#allocation13 + $0x8c]] }
 0x4bd   : > { %v3157_v4 = vpop.permute.xlu0 %3156  ;;  %v3131_v22 = vpop.permute.xlu1 %3130  ;;  %v3279_v42 = vstv %s7425_s7  ;;  %s7515_s7 = sld [smem:[#allocation13 + $0x46]] }
 0x4be   : > { %v3162_v14 = vadd.f32 %v3157_v4, %v3142_v32  ;;  %v3135_v34 = vadd.f32 %v3131_v22, %v3107_v17  ;;  %v7422_v32 = vld [vmem:[#allocation3 + $0x9a] sm:$0xff]  ;;  %v3740_v17 = vmul.f32 %v3739_v31, %v7406_v0  ;;  %v3281_v3 = vmul.f32 %v3279_v42, %v7171_v13 }
 0x4bf   : > { %3660 = vrot.lane.b32.xlu0 %v3656_v46, %s4937_s15  ;;  %3648 = vrot.lane.b32.xlu1 %v3643_v56, %s4937_s15  ;;  %v3713_v11 = vmul.f32 %v3711_v16, %v7422_v32  ;;  %v3727_v22 = vmul.f32 %v3725_v23, %v7422_v32  ;;  %v3286_v16 = vmul.f32 %v3285_v24, %v7155_v50  ;;  %v3809_v23 = vstv %s7452_s19  ;;  %s7545_s19 = sld [smem:[#allocation13 + $0x8f]] }
 0x4c0   : > { %v3149_v53 = vadd.f32 %v3147_v15, %v3135_v34 }
 0x4c1   : > { %v3171_v55 = vpop.permute.xlu0 %3170  ;;  %v3159_v18 = vpop.permute.xlu1 %3158 }
 0x4c2   : > { %v3176_v63 = vadd.f32 %v3171_v55, %v3148_v7  ;;  %v3163_v26 = vadd.f32 %v3159_v18, %v3143_v57  ;;  %v3781_v18 = vstv %s7431_s9  ;;  %s7519_s9 = sld [smem:[#allocation13 + $0x78]] }
 0x4c3   : > { %3674 = vrot.lane.b32.xlu0 %v3670_v21, %s7727_s18  ;;  %3662 = vrot.lane.b32.xlu1 %v3657_v47, %s4937_s15  ;;  %v3741_v21 = vmul.f32 %v3739_v31, %v7422_v32 }
 0x4c5   : > { %v3185_v44 = vpop.permute.xlu0 %3184  ;;  %v3173_v19 = vpop.permute.xlu1 %3172 }
 0x4c6   : > { %v3190_v6 = vadd.f32 %v3185_v44, %v3162_v14  ;;  %v3177_v38 = vadd.f32 %v3173_v19, %v3149_v53  ;;  %v3753_v14 = vstv %s7419_s11  ;;  %v7448_v53 = vld [vmem:[#allocation3 + $0xa8] sm:$0xff]  ;;  %s7509_s11 = sld [smem:[#allocation13 + $0x30]] }
 0x4c7   : > { %3688 = vrot.lane.b32.xlu0 %v3684_v36, %s7727_s18  ;;  %3676 = vrot.lane.b32.xlu1 %v3671_v59, %s7727_s18  ;;  %v3754_v34 = vmul.f32 %v3753_v14, %v7406_v0  ;;  %v3782_v44 = vmul.f32 %v3781_v18, %v7448_v53  ;;  %v3795_v59 = vstv %s7441_s16  ;;  %s7536_s16 = sld [smem:[#allocation13 + $0x47]] }
 0x4c8   : > { %v3212_v41 = vadd.f32 %v3210_v1, %v3190_v6  ;;  %v3755_v6 = vmul.f32 %v3753_v14, %v7422_v32  ;;  %v3355_v14 = vstv %s7477_s13  ;;  %s4208_s13 = sshll.u32 %s5188_s3, 6 }
 0x4c9   : > { %v3199_v8 = vpop.permute.xlu0 %3198  ;;  %v3187_v10 = vpop.permute.xlu1 %3186 }
 0x4ca   : > { %v3204_v30 = vadd.f32 %v3199_v8, %v3176_v63  ;;  %v3191_v40 = vadd.f32 %v3187_v10, %v3163_v26  ;;  %v3280_v63 = vmul.f32 %v3279_v42, %v7155_v50 }
 0x4cb   : > { %3716 = vrot.lane.b32.xlu0 %v3712_v49, %s4937_s15  ;;  %3690 = vrot.lane.b32.xlu1 %v3685_v51, %s7727_s18  ;;  %v3796_v49 = vmul.f32 %v3795_v59, %v7448_v53 }
 0x4cc   : > { %v3218_v33 = vadd.f32 %v3216_v20, %v3204_v30  ;;  %v3213_v48 = vadd.f32 %v3211_v25, %v3191_v40  ;;  %v3287_v40 = vmul.f32 %v3285_v24, %v7171_v13  ;;  %v3349_v13 = vstv %s7467_s30  ;;  %s7559_s30 = sld [smem:[#allocation13 + $0x7b]] }
 0x4cd   : > { %v3227_v27 = vpop.permute.xlu0 %3226  ;;  %v3201_v9 = vpop.permute.xlu1 %3200  ;;  %v3351_v24 = vmul.f32 %v3349_v13, %v7213_v39 }
 0x4ce   : > { %v3232_v2 = vadd.f32 %v3227_v27, %v3212_v41  ;;  %v3205_v52 = vadd.f32 %v3201_v9, %v3177_v38  ;;  %v7464_v38 = vld [vmem:[#allocation3 + $0xb0] sm:$0xff] }
 0x4cf   : > { %3730 = vrot.lane.b32.xlu0 %v3726_v61, %s4937_s15  ;;  %3718 = vrot.lane.b32.xlu1 %v3713_v11, %s4937_s15  ;;  %v3783_v51 = vmul.f32 %v3781_v18, %v7464_v38  ;;  %v3797_v9 = vmul.f32 %v3795_v59, %v7464_v38  ;;  %v3356_v18 = vmul.f32 %v3355_v14, %v7197_v28  ;;  %v3879_v59 = vstv %s7494_s27  ;;  %s7591_s27 = scalar_lea.vmem [#allocation16], %s4208_s13 }
 0x4d0   : > { %v3219_v4 = vadd.f32 %v3217_v54, %v3205_v52 }
 0x4d1   : > { %v3241_v7 = vpop.permute.xlu0 %3240  ;;  %v3229_v46 = vpop.permute.xlu1 %3228 }
 0x4d2   : > { %v3246_v57 = vadd.f32 %v3241_v7, %v3218_v33  ;;  %v3233_v56 = vadd.f32 %v3229_v46, %v3213_v48  ;;  %v3810_v33 = vmul.f32 %v3809_v23, %v7448_v53  ;;  %v3851_v46 = vstv %s7473_s20  ;;  %s4485_s20 = sld [smem:[#allocation13 + $0x7e]] }
 0x4d3   : > { %3744 = vrot.lane.b32.xlu0 %v3740_v17, %s7727_s18  ;;  %3732 = vrot.lane.b32.xlu1 %v3727_v22, %s4937_s15  ;;  %v3811_v17 = vmul.f32 %v3809_v23, %v7464_v38 }
 0x4d5   : > { %v3255_v29 = vpop.permute.xlu0 %3254  ;;  %v3243_v15 = vpop.permute.xlu1 %3242 }
 0x4d6   : > { %v3260_v55 = vadd.f32 %v3255_v29, %v3232_v2  ;;  %v3247_v47 = vadd.f32 %v3243_v15, %v3219_v4  ;;  %v3823_v2 = vstv %s7461_s29  ;;  %v7490_v4 = vld [vmem:[#allocation3 + $0xa9] sm:$0xff]  ;;  %s7551_s29 = sld [smem:[#allocation13 + $0x33]] }
 0x4d7   : > { %3758 = vrot.lane.b32.xlu0 %v3754_v34, %s7727_s18  ;;  %3746 = vrot.lane.b32.xlu1 %v3741_v21, %s7727_s18  ;;  %v3824_v52 = vmul.f32 %v3823_v2, %v7448_v53  ;;  %v3852_v29 = vmul.f32 %v3851_v46, %v7490_v4  ;;  %v3865_v21 = vstv %s7483_s26  ;;  %s7586_s26 = sld [smem:[#allocation13 + $0x81]] }
 0x4d8   : > { %v3282_v26 = vadd.f32 %v3280_v63, %v3260_v55  ;;  %v3825_v55 = vmul.f32 %v3823_v2, %v7464_v38  ;;  %v3425_v2 = vstv %s7519_s9  ;;  %s4508_s9 = sld [smem:[#allocation13 + $0x42]] }
 0x4d9   : > { %v3269_v58 = vpop.permute.xlu0 %3268  ;;  %v3257_v36 = vpop.permute.xlu1 %3256 }
 0x4da   : > { %v3274_v19 = vadd.f32 %v3269_v58, %v3246_v57  ;;  %v3261_v1 = vadd.f32 %v3257_v36, %v3233_v56  ;;  %v3350_v57 = vmul.f32 %v3349_v13, %v7197_v28 }
 0x4db   : > { %3786 = vrot.lane.b32.xlu0 %v3782_v44, %s4937_s15  ;;  %3760 = vrot.lane.b32.xlu1 %v3755_v6, %s7727_s18  ;;  %v3866_v44 = vmul.f32 %v3865_v21, %v7490_v4 }
 0x4dc   : > { %v3288_v41 = vadd.f32 %v3286_v16, %v3274_v19  ;;  %v3283_v10 = vadd.f32 %v3281_v3, %v3261_v1  ;;  %v3357_v1 = vmul.f32 %v3355_v14, %v7213_v39  ;;  %v3419_v39 = vstv %s7509_s11  ;;  %s4502_s11 = sld [smem:[#allocation13 + $0x3f]] }
 0x4dd   : > { %v3297_v8 = vpop.permute.xlu0 %3296  ;;  %v3271_v30 = vpop.permute.xlu1 %3270  ;;  %v3421_v14 = vmul.f32 %v3419_v39, %v7255_v43 }
 0x4de   : > { %v3302_v50 = vadd.f32 %v3297_v8, %v3282_v26  ;;  %v3275_v20 = vadd.f32 %v3271_v30, %v3247_v47  ;;  %v7506_v47 = vld [vmem:[#allocation3 + $0xb1] sm:$0xff] }
 0x4df   : > { %3800 = vrot.lane.b32.xlu0 %v3796_v49, %s4937_s15  ;;  %3788 = vrot.lane.b32.xlu1 %v3783_v51, %s4937_s15  ;;  %v3853_v6 = vmul.f32 %v3851_v46, %v7506_v47  ;;  %v3867_v30 = vmul.f32 %v3865_v21, %v7506_v47  ;;  %v3426_v46 = vmul.f32 %v3425_v2, %v7239_v45  ;;  %v3949_v21 = vstv %s7536_s16  ;;  %s4514_s16 = sld [smem:[#allocation13 + $0x45]] }
 0x4e0   : > { %v3289_v27 = vadd.f32 %v3287_v40, %v3275_v20 }
 0x4e1   : > { %v3311_v25 = vpop.permute.xlu0 %3310  ;;  %v3299_v61 = vpop.permute.xlu1 %3298 }
 0x4e2   : > { %v3316_v48 = vadd.f32 %v3311_v25, %v3288_v41  ;;  %v3303_v11 = vadd.f32 %v3299_v61, %v3283_v10  ;;  %v3880_v41 = vmul.f32 %v3879_v59, %v7490_v4  ;;  %v3921_v61 = vstv %s7515_s7  ;;  %s4503_s7 = sld [smem:[#allocation13 + $0x87]] }
 0x4e3   : > { %3814 = vrot.lane.b32.xlu0 %v3810_v33, %s7727_s18  ;;  %3802 = vrot.lane.b32.xlu1 %v3797_v9, %s4937_s15  ;;  %v3881_v33 = vmul.f32 %v3879_v59, %v7506_v47  ;;  %v3489_v59 = vstv %s7551_s29  ;;  %s3978_s29 = sld [smem:[#allocation14]] }
 0x4e5   : > { %v3325_v31 = vpop.permute.xlu0 %3324  ;;  %v3313_v54 = vpop.permute.xlu1 %3312 }
 0x4e6   : > { %v3330_v7 = vadd.f32 %v3325_v31, %v3302_v50  ;;  %v3317_v22 = vadd.f32 %v3313_v54, %v3289_v27  ;;  %v3893_v50 = vstv %s7503_s0  ;;  %v7532_v27 = vld [vmem:[#allocation3 + $0xaa] sm:$0xff]  ;;  %s4497_s0 = sld [smem:[#allocation13 + $0x84]] }
 0x4e7   : > { %3828 = vrot.lane.b32.xlu0 %v3824_v52, %s7727_s18  ;;  %3816 = vrot.lane.b32.xlu1 %v3811_v17, %s7727_s18  ;;  %v3894_v20 = vmul.f32 %v3893_v50, %v7490_v4  ;;  %v3922_v31 = vmul.f32 %v3921_v61, %v7532_v27  ;;  %v3935_v17 = vstv %s7525_s8  ;;  %s4509_s8 = sld [smem:[#allocation13 + $0x8a]] }
 0x4e8   : > { %v3352_v56 = vadd.f32 %v3350_v57, %v3330_v7  ;;  %v3895_v7 = vmul.f32 %v3893_v50, %v7506_v47 }
 0x4e9   : > { %v3339_v42 = vpop.permute.xlu0 %3338  ;;  %v3327_v34 = vpop.permute.xlu1 %3326 }
 0x4ea   : > { %v3344_v15 = vadd.f32 %v3339_v42, %v3316_v48  ;;  %v3331_v63 = vadd.f32 %v3327_v34, %v3303_v11  ;;  %v3420_v48 = vmul.f32 %v3419_v39, %v7239_v45 }
 0x4eb   : > { %3856 = vrot.lane.b32.xlu0 %v3852_v29, %s4937_s15  ;;  %3830 = vrot.lane.b32.xlu1 %v3825_v55, %s7727_s18  ;;  %v3936_v29 = vmul.f32 %v3935_v17, %v7532_v27 }
 0x4ec   : > { %v3358_v26 = vadd.f32 %v3356_v18, %v3344_v15  ;;  %v3353_v36 = vadd.f32 %v3351_v24, %v3331_v63  ;;  %v3427_v63 = vmul.f32 %v3425_v2, %v7255_v43 }
 0x4ed   : > { %v3367_v58 = vpop.permute.xlu0 %3366  ;;  %v3341_v19 = vpop.permute.xlu1 %3340 }
 0x4ee   : > { %v3372_v28 = vadd.f32 %v3367_v58, %v3352_v56  ;;  %v3345_v16 = vadd.f32 %v3341_v19, %v3317_v22  ;;  %v7548_v22 = vld [vmem:[#allocation3 + $0xb2] sm:$0xff] }
 0x4ef   : > { %3870 = vrot.lane.b32.xlu0 %v3866_v44, %s4937_s15  ;;  %3858 = vrot.lane.b32.xlu1 %v3853_v6, %s4937_s15  ;;  %v3923_v55 = vmul.f32 %v3921_v61, %v7548_v22  ;;  %v3937_v19 = vmul.f32 %v3935_v17, %v7548_v22 }
 0x4f0   : > { %v3359_v8 = vadd.f32 %v3357_v1, %v3345_v16 }
 0x4f1   : > { %v3381_v3 = vpop.permute.xlu0 %3380  ;;  %v3369_v49 = vpop.permute.xlu1 %3368 }
 0x4f2   : > { %v3386_v10 = vadd.f32 %v3381_v3, %v3358_v26  ;;  %v3373_v51 = vadd.f32 %v3369_v49, %v3353_v36  ;;  %v3950_v26 = vmul.f32 %v3949_v21, %v7532_v27 }
 0x4f3   : > { %3884 = vrot.lane.b32.xlu0 %v3880_v41, %s7727_s18  ;;  %3872 = vrot.lane.b32.xlu1 %v3867_v30, %s4937_s15  ;;  %v3951_v41 = vmul.f32 %v3949_v21, %v7548_v22 }
 0x4f5   : > { %v3395_v23 = vpop.permute.xlu0 %3394  ;;  %v3383_v40 = vpop.permute.xlu1 %3382 }
 0x4f6   : > { %v3400_v25 = vadd.f32 %v3395_v23, %v3372_v28  ;;  %v3387_v9 = vadd.f32 %v3383_v40, %v3359_v8  ;;  %v3963_v28 = vstv %s7545_s19  ;;  %v3490_v8 = vmul.f32 %v3489_v59, %v7280_v37  ;;  %s4515_s19 = sld [smem:[#allocation13 + $0x8d]] }
 0x4f7   : > { %3898 = vrot.lane.b32.xlu0 %v3894_v20, %s7727_s18  ;;  %3886 = vrot.lane.b32.xlu1 %v3881_v33, %s7727_s18  ;;  %v3964_v16 = vmul.f32 %v3963_v28, %v7532_v27  ;;  %v3965_v23 = vmul.f32 %v3963_v28, %v7548_v22  ;;  %v4027_v28 = vld [vmem:[%s5192_s10] sm:$0xff] }
 0x4f8   : > { %v3422_v11 = vadd.f32 %v3420_v48, %v3400_v25  ;;  %v3491_v25 = vmul.f32 %v3489_v59, %v7296_v12  ;;  %v4531_v59 = vld [vmem:[%s5192_s10 + $0x10] sm:$0xff]  ;;  %4029 = vst.msk [vmem:[%s7591_s27] sm:$0xff] %vm3999_vm3, %v4027_v28 }
 0x4f9   : > { %v3409_v13 = vpop.permute.xlu0 %3408  ;;  %v3397_v52 = vpop.permute.xlu1 %3396  ;;  %4533 = vst.msk [vmem:[%s7591_s27 + $0x10] sm:$0xff] %vm3999_vm3, %v4531_v59 }
 0x4fa   : > { %v3414_v54 = vadd.f32 %v3409_v13, %v3386_v10  ;;  %v3401_v57 = vadd.f32 %v3397_v52, %v3373_v51  ;;  %v3495_v10 = vstv %s7559_s30  ;;  %s7624_s30 = sld [smem:[#allocation14 + $0x1]] }
 0x4fb   : > { %3926 = vrot.lane.b32.xlu0 %v3922_v31, %s4937_s15  ;;  %3900 = vrot.lane.b32.xlu1 %v3895_v7, %s7727_s18  ;;  %v3496_v20 = vmul.f32 %v3495_v10, %v7280_v37  ;;  %v3497_v13 = vmul.f32 %v3495_v10, %v7296_v12  ;;  %v3635_v10 = vstv %s7586_s26 }
 0x4fc   : > { %v3428_v56 = vadd.f32 %v3426_v46, %v3414_v54  ;;  %v3423_v34 = vadd.f32 %v3421_v14, %v3401_v57 }
 0x4fd   : > { %v3437_v42 = vpop.permute.xlu0 %3436  ;;  %v3411_v45 = vpop.permute.xlu1 %3410 }
 0x4fe   : > { %v3442_v15 = vadd.f32 %v3437_v42, %v3422_v11  ;;  %v3415_v18 = vadd.f32 %v3411_v45, %v3387_v9 }
 0x4ff   : > { %3940 = vrot.lane.b32.xlu0 %v3936_v29, %s4937_s15  ;;  %3928 = vrot.lane.b32.xlu1 %v3923_v55, %s4937_s15  ;;  %v3565_v29 = vstv %s4485_s20 }
 0x500   : > { %v3429_v58 = vadd.f32 %v3427_v63, %v3415_v18  ;;  %v3566_v12 = vmul.f32 %v3565_v29, %v7322_v60 }
 0x501   : > { %v3451_v24 = vpop.permute.xlu0 %3450  ;;  %v3439_v44 = vpop.permute.xlu1 %3438 }
 0x502   : > { %v3456_v36 = vadd.f32 %v3451_v24, %v3428_v56  ;;  %v3443_v6 = vadd.f32 %v3439_v44, %v3423_v34 }
 0x503   : > { %3954 = vrot.lane.b32.xlu0 %v3950_v26, %s7727_s18  ;;  %3942 = vrot.lane.b32.xlu1 %v3937_v19, %s4937_s15  ;;  %s4484_s15 = sld [smem:[#allocation13 + $0x36]] }
 0x505   : > { %v3465_v43 = vpop.permute.xlu0 %3464  ;;  %v3453_v1 = vpop.permute.xlu1 %3452 }
 0x506   : > { %v3470_v3 = vadd.f32 %v3465_v43, %v3442_v15  ;;  %v3457_v49 = vadd.f32 %v3453_v1, %v3429_v58 }
 0x507   : > { %3968 = vrot.lane.b32.xlu0 %v3964_v16, %s7727_s18  ;;  %3956 = vrot.lane.b32.xlu1 %v3951_v41, %s7727_s18 }
 0x508   : > { %v3492_v30 = vadd.f32 %v3490_v8, %v3470_v3 }
 0x509   : > { %v3479_v50 = vpop.permute.xlu0 %3478  ;;  %v3467_v51 = vpop.permute.xlu1 %3466  ;;  %v3559_v17 = vstv %s4484_s15  ;;  %s4051_s15 = sshll.u32 %s7591_s27, 4  ;;  %s7644_s15 = int_to_ptr.vmem [resolvable:$true] %s4051_s15 }
 0x50a   : > { %v3484_v39 = vadd.f32 %v3479_v50, %v3456_v36  ;;  %v3471_v40 = vadd.f32 %v3467_v51, %v3443_v6  ;;  %v3560_v56 = vmul.f32 %v3559_v17, %v7322_v60  ;;  %v3561_v18 = vmul.f32 %v3559_v17, %v7338_v62  ;;  %v4028_v6 = vld [vmem:[%s5192_s10 + $0x8] sm:$0xff]  ;;  %s4843_s26 = scalar_lea.vmem %s7644_s15, 1024 }
 0x50b   : > { %3970 = vrot.lane.b32.xlu1 %v3965_v23, %s7727_s18  ;;  %s7582_s18 = sld [smem:[#allocation13 + $0x39]]  ;;  %v3567_v36 = vmul.f32 %v3565_v29, %v7338_v62  ;;  %4030 = vst.msk [vmem:[%s7591_s27 + $0x8] sm:$0xff] %vm3999_vm3, %v4028_v6  ;;  %v4532_v62 = vld [vmem:[%s5192_s10 + $0x18] sm:$0xff]  ;;  %s4496_s10 = sld [smem:[#allocation13 + $0x3c]]  ;;  %v3769_v6 = vstv %s4502_s11 }
 0x50c   : > { %v3498_v33 = vadd.f32 %v3496_v20, %v3484_v39  ;;  %v3493_v48 = vadd.f32 %v3491_v25, %v3471_v40  ;;  %4534 = vst.msk [vmem:[%s7591_s27 + $0x18] sm:$0xff] %vm3999_vm3, %v4532_v62  ;;  %v3636_v40 = vmul.f32 %v3635_v10, %v7364_v35  ;;  %p4844_p0 = scmp.ne.s32.totalorder %s7644_s15, %s4843_s26 }
 0x50d   : > { %v3507_v61 = vpop.permute.xlu0 %3506  ;;  %v3481_v9 = vpop.permute.xlu1 %3480 }
 0x50e   : > { %v3512_v2 = vadd.f32 %v3507_v61, %v3492_v30  ;;  %v3485_v11 = vadd.f32 %v3481_v9, %v3457_v49  ;;  %p4845_p1 = pnand %p4844_p0, %p5089_p6 }
 0x510   : > { %v3499_v52 = vadd.f32 %v3497_v13, %v3485_v11  ;;  %p4846_p5 = pneg %p4845_p1 }
 0x511   : > { %v3521_v31 = vpop.permute.xlu0 %3520  ;;  %v3509_v54 = vpop.permute.xlu1 %3508  ;;  %v3629_v16 = vstv %s7582_s18 }
 0x512   : > { %v3526_v7 = vadd.f32 %v3521_v31, %v3498_v33  ;;  %v3513_v37 = vadd.f32 %v3509_v54, %v3493_v48  ;;  %v3630_v49 = vmul.f32 %v3629_v16, %v7364_v35  ;;  %v3631_v33 = vmul.f32 %v3629_v16, %v7380_v5 }
 0x513   : > { %v3637_v31 = vmul.f32 %v3635_v10, %v7380_v5  ;;  %v3770_v16 = vmul.f32 %v3769_v6, %v7448_v53 }
 0x515   : > { %v3535_v46 = vpop.permute.xlu0 %3534  ;;  %v3523_v57 = vpop.permute.xlu1 %3522 }
 0x516   : > { %v3540_v14 = vadd.f32 %v3535_v46, %v3512_v2  ;;  %v3527_v42 = vadd.f32 %v3523_v57, %v3499_v52 }
 0x518   : > { %v3562_v34 = vadd.f32 %v3560_v56, %v3540_v14  ;;  %v3705_v56 = vstv %s4497_s0 }
 0x519   : > { %v3549_v45 = vpop.permute.xlu0 %3548  ;;  %v3537_v15 = vpop.permute.xlu1 %3536  ;;  %v3706_v5 = vmul.f32 %v3705_v56, %v7406_v0 }
 0x51a   : > { %v3554_v55 = vadd.f32 %v3549_v45, %v3526_v7  ;;  %v3541_v21 = vadd.f32 %v3537_v15, %v3513_v37  ;;  %v3699_v37 = vstv %s4496_s10  ;;  %s4939_s10 = smov [#allocation16]  }
 0x51b   : > { %v3700_v14 = vmul.f32 %v3699_v37, %v7406_v0  ;;  %s4847_s0 = sshll.u32 %s4939_s10, 4  ;;  %s4848_s0 = int_to_ptr.vmem [resolvable:$false] %s4847_s0 }
 0x51c   : > { %v3568_v63 = vadd.f32 %v3566_v12, %v3554_v55  ;;  %v3563_v26 = vadd.f32 %v3561_v18, %v3541_v21  ;;  %v3701_v21 = vmul.f32 %v3699_v37, %v7422_v32  ;;  %s4849_s11 = scalar_lea.vmem %s4848_s0, 2048  ;;  %p4850_p4 = scmp.lt.s32.totalorder %s7644_s15, %s4848_s0 }
 0x51d   : > { %v3577_v24 = vpop.permute.xlu0 %3576  ;;  %v3551_v58 = vpop.permute.xlu1 %3550  ;;  %p4851_p8 = scmp.lt.s32.totalorder %s4849_s11, %s4843_s26 }
 0x51e   : > { %v3555_v44 = vadd.f32 %v3551_v58, %v3527_v42  ;;  %v3582_v1 = vadd.f32 %v3577_v24, %v3562_v34 }
 0x51f   : > { %p4852_p10 = por %p4851_p8, %p4850_p4 }
 0x520   : > { %v3569_v19 = vadd.f32 %v3567_v36, %v3555_v44  ;;  %v3707_v36 = vmul.f32 %v3705_v56, %v7422_v32 }
 0x521   : > { %v3591_v60 = vpop.permute.xlu0 %3590  ;;  %v3579_v43 = vpop.permute.xlu1 %3578  ;;  %p4853_p2 = pnand %p4852_p10, %p4846_p5 }
 0x522   : > { %v3596_v30 = vadd.f32 %v3591_v60, %v3568_v63  ;;  %v3583_v51 = vadd.f32 %v3579_v43, %v3563_v26 }
 0x525   : > { %v3605_v3 = vpop.permute.xlu0 %3604  ;;  %v3593_v41 = vpop.permute.xlu1 %3592 }
 0x526   : > { %v3610_v8 = vadd.f32 %v3605_v3, %v3582_v1  ;;  %v3597_v48 = vadd.f32 %v3593_v41, %v3569_v19  ;;  %v3775_v1 = vstv %s4503_s7 }
 0x527   : > { %v3776_v32 = vmul.f32 %v3775_v1, %v7448_v53 }
 0x528   : > { %v3632_v50 = vadd.f32 %v3630_v49, %v3610_v8 }
 0x529   : > { %v3619_v39 = vpop.permute.xlu0 %3618  ;;  %v3607_v23 = vpop.permute.xlu1 %3606 }
 0x52a   : > { %v3624_v20 = vadd.f32 %v3619_v39, %v3596_v30  ;;  %v3611_v25 = vadd.f32 %v3607_v23, %v3583_v51  ;;  %v3771_v51 = vmul.f32 %v3769_v6, %v7464_v38 }
 0x52c   : > { %v3638_v61 = vadd.f32 %v3636_v40, %v3624_v20  ;;  %v3633_v2 = vadd.f32 %v3631_v33, %v3611_v25 }
 0x52d   : > { %v3647_v9 = vpop.permute.xlu0 %3646  ;;  %v3621_v11 = vpop.permute.xlu1 %3620 }
 0x52e   : > { %v3625_v13 = vadd.f32 %v3621_v11, %v3597_v48  ;;  %v3652_v17 = vadd.f32 %v3647_v9, %v3632_v50  ;;  %v3839_v11 = vstv %s4508_s9 }
 0x530   : > { %v3639_v54 = vadd.f32 %v3637_v31, %v3625_v13 }
 0x531   : > { %v3661_v52 = vpop.permute.xlu0 %3660  ;;  %v3649_v7 = vpop.permute.xlu1 %3648 }
 0x532   : > { %v3666_v42 = vadd.f32 %v3661_v52, %v3638_v61  ;;  %v3653_v34 = vadd.f32 %v3649_v7, %v3633_v2  ;;  %v3777_v61 = vmul.f32 %v3775_v1, %v7464_v38  ;;  %v3845_v7 = vstv %s4509_s8 }
 0x533   : > { %v3846_v38 = vmul.f32 %v3845_v7, %v7490_v4 }
 0x535   : > { %v3675_v46 = vpop.permute.xlu0 %3674  ;;  %v3663_v35 = vpop.permute.xlu1 %3662 }
 0x536   : > { %v3680_v57 = vadd.f32 %v3675_v46, %v3652_v17  ;;  %v3667_v63 = vadd.f32 %v3663_v35, %v3639_v54  ;;  %v3840_v54 = vmul.f32 %v3839_v11, %v7490_v4 }
 0x538   : > { %v3702_v29 = vadd.f32 %v3700_v14, %v3680_v57 }
 0x539   : > { %v3689_v45 = vpop.permute.xlu0 %3688  ;;  %v3677_v15 = vpop.permute.xlu1 %3676 }
 0x53a   : > { %v3694_v55 = vadd.f32 %v3689_v45, %v3666_v42  ;;  %v3681_v12 = vadd.f32 %v3677_v15, %v3653_v34  ;;  %v3841_v42 = vmul.f32 %v3839_v11, %v7506_v47 }
 0x53c   : > { %v3708_v18 = vadd.f32 %v3706_v5, %v3694_v55  ;;  %v3703_v26 = vadd.f32 %v3701_v21, %v3681_v12  ;;  %v3847_v12 = vmul.f32 %v3845_v7, %v7506_v47 }
 0x53d   : > { %v3717_v24 = vpop.permute.xlu0 %3716  ;;  %v3691_v58 = vpop.permute.xlu1 %3690 }
 0x53e   : > { %v3695_v44 = vadd.f32 %v3691_v58, %v3667_v63  ;;  %v3722_v59 = vadd.f32 %v3717_v24, %v3702_v29  ;;  %v3909_v24 = vstv %s4514_s16 }
 0x540   : > { %v3709_v19 = vadd.f32 %v3707_v36, %v3695_v44  ;;  %v3910_v36 = vmul.f32 %v3909_v24, %v7532_v27 }
 0x541   : > { %v3731_v60 = vpop.permute.xlu0 %3730  ;;  %v3719_v28 = vpop.permute.xlu1 %3718 }
 0x542   : > { %v3736_v3 = vadd.f32 %v3731_v60, %v3708_v18  ;;  %v3723_v8 = vadd.f32 %v3719_v28, %v3703_v26  ;;  %v3915_v60 = vstv %s4515_s19 }
 0x543   : > { %v3916_v47 = vmul.f32 %v3915_v60, %v7532_v27 }
 0x545   : > { %v3745_v43 = vpop.permute.xlu0 %3744  ;;  %v3733_v0 = vpop.permute.xlu1 %3732 }
 0x546   : > { %v3750_v62 = vadd.f32 %v3745_v43, %v3722_v59  ;;  %v3737_v23 = vadd.f32 %v3733_v0, %v3709_v19 }
 0x548   : > { %v3772_v41 = vadd.f32 %v3770_v16, %v3750_v62  ;;  %v3911_v16 = vmul.f32 %v3909_v24, %v7548_v22 }
 0x549   : > { %v3759_v49 = vpop.permute.xlu0 %3758  ;;  %v3747_v10 = vpop.permute.xlu1 %3746 }
 0x54a   : > { %v3764_v30 = vadd.f32 %v3759_v49, %v3736_v3  ;;  %v3751_v50 = vadd.f32 %v3747_v10, %v3723_v8 }
 0x54c   : > { %v3778_v39 = vadd.f32 %v3776_v32, %v3764_v30  ;;  %v3773_v40 = vadd.f32 %v3771_v51, %v3751_v50  ;;  %v3917_v30 = vmul.f32 %v3915_v60, %v7548_v22 }
 0x54d   : > { %v3787_v20 = vpop.permute.xlu0 %3786  ;;  %v3761_v25 = vpop.permute.xlu1 %3760 }
 0x54e   : > { %v3765_v33 = vadd.f32 %v3761_v25, %v3737_v23  ;;  %v3792_v13 = vadd.f32 %v3787_v20, %v3772_v41  ;;  %v3976_v25 = vld [vmem:[%s5199_s2] sm:$0xff] }
 0x550   : > { %v3779_v9 = vadd.f32 %v3777_v61, %v3765_v33 }
 0x551   : > { %v3801_v48 = vpop.permute.xlu0 %3800  ;;  %v3789_v2 = vpop.permute.xlu1 %3788 }
 0x552   : > { %v3806_v37 = vadd.f32 %v3801_v48, %v3778_v39  ;;  %v3793_v46 = vadd.f32 %v3789_v2, %v3773_v40  ;;  %v3979_v39 = vstv %s3978_s29 }
 0x555   : > { %v3815_v31 = vpop.permute.xlu0 %3814  ;;  %v3803_v53 = vpop.permute.xlu1 %3802 }
 0x556   : > { %v3820_v52 = vadd.f32 %v3815_v31, %v3792_v13  ;;  %v3807_v34 = vadd.f32 %v3803_v53, %v3779_v9  ;;  %v4005_v9 = vstv %s7624_s30  ;;  %v4524_v53 = vld [vmem:[%s5199_s2 + $0x10] sm:$0xff] }
 0x558   : > { %v3842_v17 = vadd.f32 %v3840_v54, %v3820_v52  ;;  %v3977_v54 = vld [vmem:[%s5199_s2 + $0x8] sm:$0xff] }
 0x559   : > { %v3829_v35 = vpop.permute.xlu0 %3828  ;;  %v3817_v57 = vpop.permute.xlu1 %3816 }
 0x55a   : > { %v3834_v14 = vadd.f32 %v3829_v35, %v3806_v37  ;;  %v3821_v56 = vadd.f32 %v3817_v57, %v3793_v46 }
 0x55c   : > { %v3848_v29 = vadd.f32 %v3846_v38, %v3834_v14  ;;  %v3843_v15 = vadd.f32 %v3841_v42, %v3821_v56  ;;  %v4525_v56 = vld [vmem:[%s5199_s2 + $0x18] sm:$0xff]  ;;  %s4542_s2 = sshll.u32 %s4998_s25, 10  ;;  %s4038_s25 = scalar_lea.sflag [#allocation6], %s5188_s3 }
 0x55d   : > { %v3857_v45 = vpop.permute.xlu0 %3856  ;;  %v3831_v55 = vpop.permute.xlu1 %3830  ;;  %s7642_s13 = scalar_lea.hbm %s7696_s6, %s4542_s2 }
 0x55e   : > { %v3835_v5 = vadd.f32 %v3831_v55, %v3807_v34  ;;  %v3862_v26 = vadd.f32 %v3857_v45, %v3842_v17 }
 0x560   : > { %v3849_v18 = vadd.f32 %v3847_v12, %v3835_v5 }
 0x561   : > { %v3871_v21 = vpop.permute.xlu0 %3870  ;;  %v3859_v63 = vpop.permute.xlu1 %3858 }
 0x562   : > { %v3876_v19 = vadd.f32 %v3871_v21, %v3848_v29  ;;  %v3863_v6 = vadd.f32 %v3859_v63, %v3843_v15 }
 0x565   : > { %v3885_v58 = vpop.permute.xlu0 %3884  ;;  %v3873_v4 = vpop.permute.xlu1 %3872 }
 0x566   : > { %v3890_v44 = vadd.f32 %v3885_v58, %v3862_v26  ;;  %v3877_v3 = vadd.f32 %v3873_v4, %v3849_v18 }
 0x568   : > { %v3912_v28 = vadd.f32 %v3910_v36, %v3890_v44 }
 0x569   : > { %v3899_v59 = vpop.permute.xlu0 %3898  ;;  %v3887_v43 = vpop.permute.xlu1 %3886 }
 0x56a   : > { %v3904_v0 = vadd.f32 %v3899_v59, %v3876_v19  ;;  %v3891_v62 = vadd.f32 %v3887_v43, %v3863_v6 }
 0x56c   : > { %v3918_v1 = vadd.f32 %v3916_v47, %v3904_v0  ;;  %v3913_v8 = vadd.f32 %v3911_v16, %v3891_v62 }
 0x56d   : > { %v3927_v41 = vpop.permute.xlu0 %3926  ;;  %v3901_v49 = vpop.permute.xlu1 %3900 }
 0x56e   : > { %v3905_v10 = vadd.f32 %v3901_v49, %v3877_v3  ;;  %v3932_v27 = vadd.f32 %v3927_v41, %v3912_v28 }
 0x570   : > { %v3919_v50 = vadd.f32 %v3917_v30, %v3905_v10 }
 0x571   : > { %v3941_v32 = vpop.permute.xlu0 %3940  ;;  %v3929_v51 = vpop.permute.xlu1 %3928 }
 0x572   : > { %v3946_v33 = vadd.f32 %v3941_v32, %v3918_v1  ;;  %v3933_v48 = vadd.f32 %v3929_v51, %v3913_v8 }
 0x575   : > { %v3955_v23 = vpop.permute.xlu0 %3954  ;;  %v3943_v20 = vpop.permute.xlu1 %3942 }
 0x576   : > { %v3960_v40 = vadd.f32 %v3955_v23, %v3932_v27  ;;  %v3947_v37 = vadd.f32 %v3943_v20, %v3919_v50 }
 0x578   : > { %v3980_v61 = vadd.f32 %v3979_v39, %v3960_v40 }
 0x579   : > { %v3969_v2 = vpop.permute.xlu0 %3968  ;;  %v3957_v11 = vpop.permute.xlu1 %3956 }
 0x57a   : > { %v3982_v22 = vadd.f32 %v3980_v61, %v3976_v25  ;;  %v3974_v13 = vadd.f32 %v3969_v2, %v3946_v33  ;;  %v3961_v31 = vadd.f32 %v3957_v11, %v3933_v48 }
 0x57c   : > { %v4520_v52 = vmul.f32 -1.442695, %v3982_v22  ;;  %v4006_v7 = vadd.f32 %v4005_v9, %v3974_v13  ;;  %v3981_v17 = vadd.f32 %v3979_v39, %v3961_v31 }
 0x57d   : > { %v3971_v35 = vpop.permute.xlu1 %3970 }
 0x57e   : > { %4707 = vpow2.f32 %v4520_v52  ;;  %v4008_v46 = vadd.f32 %v4524_v53, %v4006_v7  ;;  %v3983_v57 = vadd.f32 %v3981_v17, %v3977_v54  ;;  %v3975_v14 = vadd.f32 %v3971_v35, %v3947_v37 }
 0x580   : > { %v4527_v38 = vmul.f32 -1.442695, %v4008_v46  ;;  %v4521_v42 = vmul.f32 -1.442695, %v3983_v57  ;;  %v4007_v29 = vadd.f32 %v4005_v9, %v3975_v14 }
 0x582   : > { %4709 = vpow2.f32 %v4527_v38  ;;  %v4009_v34 = vadd.f32 %v4525_v56, %v4007_v29 }
 0x583   : > { %4711 = vpow2.f32 %v4521_v42 }
 0x584   : > { %v4528_v45 = vmul.f32 -1.442695, %v4009_v34 }
 0x586   : > { %4713 = vpow2.f32 %v4528_v45 }
 0x588   : > { %v4708_v15 = vpop.eup %4707 }
 0x589   : > { %v3990_v55 = vadd.f32 1.0, %v4708_v15 }
 0x58b   : > { %4715 = vrcp.f32 %v3990_v55 }
 0x58c   : > { %v4710_v5 = vpop.eup %4709 }
 0x58d   : > { %v4712_v12 = vpop.eup %4711  ;;  %v4016_v21 = vadd.f32 1.0, %v4710_v5 }
 0x58e   : > { %v3991_v18 = vadd.f32 1.0, %v4712_v12 }
 0x58f   : > { %4717 = vrcp.f32 %v4016_v21 }
 0x590   : > { %4719 = vrcp.f32 %v3991_v18  ;;  %v4714_v63 = vpop.eup %4713 }
 0x591   : > { %v4017_v24 = vadd.f32 1.0, %v4714_v63 }
 0x593   : > { %4721 = vrcp.f32 %v4017_v24 }
 0x595   : > { %v4716_v26 = vpop.eup %4715 }
 0x596   : > { %v3996_v58 = vmul.f32 %v4716_v26, %v3982_v22 }
 0x598   : > { %4522 = vst.msk [vmem:[%s7591_s27 + $0x20] sm:$0xff] %vm3999_vm3, %v3996_v58 }
 0x599   : > { %v4718_v4 = vpop.eup %4717 }
 0x59a   : > { %v4720_v44 = vpop.eup %4719  ;;  %v4022_v36 = vmul.f32 %v4718_v4, %v4008_v46 }
 0x59b   : > { %v3997_v60 = vmul.f32 %v4720_v44, %v3983_v57 }
 0x59c   : > { %4529 = vst.msk [vmem:[%s7591_s27 + $0x30] sm:$0xff] %vm3999_vm3, %v4022_v36 }
 0x59d   : > { %4523 = vst.msk [vmem:[%s7591_s27 + $0x28] sm:$0xff] %vm3999_vm3, %v3997_v60  ;;  %v4722_v19 = vpop.eup %4721 }
 0x59e   : > { %v4023_v28 = vmul.f32 %v4722_v19, %v4009_v34 }
 0x5a0   : > { %4530 = vst.msk [vmem:[%s7591_s27 + $0x38] sm:$0xff] %vm3999_vm3, %v4023_v28 }
 0x5a1   : > { %4856 = shalt.err (!%p4853_p2)
}
 0x5a2   : > { %s4857_s27 = scalar_lea.hbm %s7642_s13, 1024  ;;  %s4861_s8 = scalar_lea.hbm %s7696_s6, 2048 }
 0x5a3   : > { %p4858_p11 = scmp.ne.s32.totalorder %s7642_s13, %s4857_s27  ;;  %p4862_p9 = scmp.lt.u32.totalorder %s7642_s13, %s7696_s6 }
 0x5a4   : > { %p4863_p3 = scmp.lt.u32.totalorder %s4861_s8, %s4857_s27  ;;  %p4865_p0 = scmp.lt.u32.totalorder %s4857_s27, %s7642_s13 }
 0x5a5   : > { %p4859_p7 = pnand %p4858_p11, %p5089_p6 }
 0x5a6   : > { %p4864_p13 = por %p4863_p3, %p4862_p9 }
 0x5a7   : > { %p4860_p12 = pneg %p4859_p7 }
 0x5a8   : > { %p4866_p1 = por %p4865_p0, %p4864_p13 }
 0x5aa   : > { %p4867_p5 = pnand %p4866_p1, %p4860_p12 }
 0x5ac   : > { %4870 = shalt.err (!%p4867_p5)
}
 0x5ad   : > { %s4940_s29 = smov 128   ;;  %s4941_s30 = smov 8  }
 0x5ae   : > { %4563 = dma.vmem_to_hbm [thread:$0]  (%p5089_p6), %s7644_s15, 1024, %s7642_s13, %s4038_s25, %s4940_s29, %s4940_s29, %s4941_s30  }
 0x5af PF: > { %s4066_s2 = sand.u32 1, %s4913_s21   ;;  %p7729_p4 = scmp.ne.s32.totalorder %s7709_s28, 0 }
 0x5b0   : > { %p7730_p8 = scmp.ge.s32.totalorder %s4925_s24, 2  ;;  %s4067_s20 = scalar_lea.sflag [#allocation6], %s4066_s2 }
 0x5b2   : > { %p4586_p10 = pnand %p7730_p8, %p7729_p4 }
 0x5b4   : > { %4908 = dma.done.wait (!%p4586_p10), %s4067_s20, 1024  }
 0x5b5   : > { %4910 = vsyncadd (!%p4586_p10), %s4067_s20, 4294966272  ;;  %p25_p2 = scmp.ge.s32.totalorder %s5076_s14, 4   ;;  %s7731_s21 = smov %s4917_s22 }
 0x5b6   : > { %s7732_s22 = smov %s4921_s23  ;;  %s7733_s23 = smov %s5085_s12 }
 0x5b7   : > { %s7734_s24 = smov %s5076_s14  ;;  %27 = sbr.rel (!%p25_p2) target bundleno = 14 (0xe), region = 132 }
 0x5be   :  { %4072 = vsyncpa [#allocation5], 1 }
 0x5bf   :  { %4074 = vsyncpa [#allocation5 + $0x1], 1 }
 0x5c0   :  { %4075 = vsyncpa [#allocation9], 1 }
 0x5c1   :  { %4077 = vsyncpa [#allocation9 + $0x1], 1 }
 0x5c2   :  { %4078 = vsyncpa [#allocation6], 1 }
 0x5c3   :  { %4080 = vsyncpa [#allocation6 + $0x1], 1 }
 0x5c4   :  { %4081 = vsyncpa [#allocation7], 1 }
 0x5c5   :  { %4083 = vsyncpa [#allocation7 + $0x1], 1 }
 0x5c6   :  { %4084 = vsyncpa [#allocation12], 1 }
 0x5c7   :  { %4085 = vsyncpa [#allocation15], 1 }

</bundles_post_ra>
